<compile_context>
chip_gen: v7x
topology: tpu7x:2x2x1
jax: 0.10.0
libtpu: 0.0.40
codegen_flags: <defaults>
</compile_context>

<pallas_src>
import jax
import jax.numpy as jnp
from jax.experimental import pallas as pl
from jax.experimental.pallas import tpu as pltpu


# Explicit scoped-VMEM budget, safe on v5e/v6e/v7x.  Row tiles are capped at
# 512-2048 rows per the measured HBM-roofline data; v7x (64 MiB physical VMEM)
# should use roughly half the v6e tile if K grows large.
VMEM_LIMIT = 32 * 1024 * 1024
ROW_TILE_CAP = 1024


def _row_tile(m, cap=ROW_TILE_CAP):
    """Largest tile <= cap that divides m and is a multiple of 8 (fallback: m)."""
    t = min(m, cap)
    while t > 8 and (m % t or t % 8):
        t -= 8
    return t if (t > 0 and m % t == 0) else m


# ----------------------------------------------------------------------------
# Kernel 1: ConvTranspose2d(k=2, s=2) as a row-tiled matmul + bias
# ----------------------------------------------------------------------------
def _matmul_bias_kernel(x_ref, w_ref, b_ref, o_ref):
    o_ref[...] = (
        jnp.dot(x_ref[...], w_ref[...], preferred_element_type=jnp.float32)
        + b_ref[...]
    )


def _convt_matmul(x2d, w2d, b2d):
    m, k = x2d.shape
    c4 = w2d.shape[1]
    tile = _row_tile(m)
    return pl.pallas_call(
        _matmul_bias_kernel,
        out_shape=jax.ShapeDtypeStruct((m, c4), jnp.float32),
        grid=(m // tile,),
        in_specs=[
            pl.BlockSpec((tile, k), lambda i: (i, 0)),
            pl.BlockSpec((k, c4), lambda i: (0, 0)),
            pl.BlockSpec((1, c4), lambda i: (0, 0)),
        ],
        out_specs=pl.BlockSpec((tile, c4), lambda i: (i, 0)),
        compiler_params=pltpu.CompilerParams(
            dimension_semantics=("parallel",),
            vmem_limit_bytes=VMEM_LIMIT,
        ),
        cost_estimate=pl.CostEstimate(
            flops=2 * m * k * c4,
            transcendentals=0,
            bytes_accessed=4 * (m * k + k * c4 + m * c4),
        ),
    )(x2d, w2d, b2d)


# ----------------------------------------------------------------------------
# Kernel 2: conv1 on implicit concat([enc, up]) + bias, with masked BN1 stats
# accumulated across the batch grid axis (resident (1, C) accumulators).
# ----------------------------------------------------------------------------
def _conv1_stats(enc_pf, up_pf, w_enc, w_up, bias, mask, H, W):
    n = enc_pf.shape[0]
    c = w_enc.shape[2]
    wp = W + 2
    rows = (H + 2) * wp
    L = rows - 2 * (wp + 1)          # rows of the padded plane actually computed

    def kernel(enc_ref, up_ref, we_ref, wu_ref, b_ref, m_ref,
               y_ref, sum_ref, ssq_ref):
        acc = jnp.zeros((L, c), jnp.float32)
        for t in range(9):           # 3x3 taps: row offset dy*(W+2)+dx in flat coords
            dy, dx = divmod(t, 3)
            a = dy * wp + dx
            acc = acc + jnp.dot(enc_ref[0, a:a + L, :], we_ref[t],
                                preferred_element_type=jnp.float32)
            acc = acc + jnp.dot(up_ref[0, a:a + L, :], wu_ref[t],
                                preferred_element_type=jnp.float32)
        acc = acc + b_ref[...]
        y_ref[...] = jnp.zeros_like(y_ref)             # defined values in the pad ring
        y_ref[0, wp + 1:wp + 1 + L, :] = acc
        msk = m_ref[wp + 1:wp + 1 + L, :]              # 1.0 only at real output pixels

        @pl.when(pl.program_id(0) == 0)
        def _():
            sum_ref[...] = jnp.zeros_like(sum_ref)
            ssq_ref[...] = jnp.zeros_like(ssq_ref)

        sum_ref[...] += jnp.sum(msk * acc, axis=0, keepdims=True)
        ssq_ref[...] += jnp.sum(msk * acc * acc, axis=0, keepdims=True)

    return pl.pallas_call(
        kernel,
        out_shape=(
            jax.ShapeDtypeStruct((n, rows, c), jnp.float32),
            jax.ShapeDtypeStruct((1, c), jnp.float32),
            jax.ShapeDtypeStruct((1, c), jnp.float32),
        ),
        grid=(n,),
        in_specs=[
            pl.BlockSpec((1, rows, c), lambda i: (i, 0, 0)),
            pl.BlockSpec((1, rows, c), lambda i: (i, 0, 0)),
            pl.BlockSpec((9, c, c), lambda i: (0, 0, 0)),
            pl.BlockSpec((9, c, c), lambda i: (0, 0, 0)),
            pl.BlockSpec((1, c), lambda i: (0, 0)),
            pl.BlockSpec((rows, 1), lambda i: (0, 0)),
        ],
        out_specs=(
            pl.BlockSpec((1, rows, c), lambda i: (i, 0, 0)),
            pl.BlockSpec((1, c), lambda i: (0, 0)),
            pl.BlockSpec((1, c), lambda i: (0, 0)),
        ),
        compiler_params=pltpu.CompilerParams(
            dimension_semantics=("arbitrary",),        # stats are resident accumulators
            vmem_limit_bytes=VMEM_LIMIT,
        ),
        cost_estimate=pl.CostEstimate(
            flops=2 * n * L * 9 * (2 * c) * c,
            transcendentals=0,
            bytes_accessed=4 * (3 * n * rows * c + 18 * c * c),
        ),
    )(enc_pf, up_pf, w_enc, w_up, bias, mask)


# ----------------------------------------------------------------------------
# Kernel 3: BN1(train)+ReLU fused on the input, then conv2 + bias, with masked
# BN2 stats accumulated across the batch grid axis.
# ----------------------------------------------------------------------------
def _conv2_fused_bn_stats(y1, w_taps, bias, mask, mean1, scale1, shift1, H, W):
    n = y1.shape[0]
    c = w_taps.shape[2]
    wp = W + 2
    rows = (H + 2) * wp
    L = rows - 2 * (wp + 1)

    def kernel(y1_ref, w_ref, b_ref, m_ref, mu_ref, sc_ref, sh_ref,
               y2_ref, sum_ref, ssq_ref, xbuf_ref):
        # BN1 + ReLU applied in-register; mask re-zeroes the 1-px conv pad ring
        # (the ring must be zero *after* ReLU to match F.pad-before-conv semantics).
        x = (y1_ref[0] - mu_ref[...]) * sc_ref[...] + sh_ref[...]
        xbuf_ref[...] = jnp.maximum(x, 0.0) * m_ref[...]

        acc = jnp.zeros((L, c), jnp.float32)
        for t in range(9):
            dy, dx = divmod(t, 3)
            a = dy * wp + dx
            acc = acc + jnp.dot(xbuf_ref[a:a + L, :], w_ref[t],
                                preferred_element_type=jnp.float32)
        acc = acc + b_ref[...]
        y2_ref[...] = jnp.zeros_like(y2_ref)
        y2_ref[0, wp + 1:wp + 1 + L, :] = acc
        msk = m_ref[wp + 1:wp + 1 + L, :]

        @pl.when(pl.program_id(0) == 0)
        def _():
            sum_ref[...] = jnp.zeros_like(sum_ref)
            ssq_ref[...] = jnp.zeros_like(ssq_ref)

        sum_ref[...] += jnp.sum(msk * acc, axis=0, keepdims=True)
        ssq_ref[...] += jnp.sum(msk * acc * acc, axis=0, keepdims=True)

    return pl.pallas_call(
        kernel,
        out_shape=(
            jax.ShapeDtypeStruct((n, rows, c), jnp.float32),
            jax.ShapeDtypeStruct((1, c), jnp.float32),
            jax.ShapeDtypeStruct((1, c), jnp.float32),
        ),
        grid=(n,),
        in_specs=[
            pl.BlockSpec((1, rows, c), lambda i: (i, 0, 0)),
            pl.BlockSpec((9, c, c), lambda i: (0, 0, 0)),
            pl.BlockSpec((1, c), lambda i: (0, 0)),
            pl.BlockSpec((rows, 1), lambda i: (0, 0)),
            pl.BlockSpec((1, c), lambda i: (0, 0)),
            pl.BlockSpec((1, c), lambda i: (0, 0)),
            pl.BlockSpec((1, c), lambda i: (0, 0)),
        ],
        out_specs=(
            pl.BlockSpec((1, rows, c), lambda i: (i, 0, 0)),
            pl.BlockSpec((1, c), lambda i: (0, 0)),
            pl.BlockSpec((1, c), lambda i: (0, 0)),
        ),
        scratch_shapes=[pltpu.VMEM((rows, c), jnp.float32)],
        compiler_params=pltpu.CompilerParams(
            dimension_semantics=("arbitrary",),
            vmem_limit_bytes=VMEM_LIMIT,
        ),
        cost_estimate=pl.CostEstimate(
            flops=2 * n * L * 9 * c * c,
            transcendentals=0,
            bytes_accessed=4 * (2 * n * rows * c + 9 * c * c),
        ),
    )(y1, w_taps, bias, mask, mean1, scale1, shift1)


# ----------------------------------------------------------------------------
# Kernel 4: final BN2 + ReLU, row-tiled elementwise
# ----------------------------------------------------------------------------
def _bn_relu_kernel(x_ref, mean_ref, scale_ref, shift_ref, o_ref):
    o_ref[...] = jnp.maximum(
        (x_ref[...] - mean_ref[...]) * scale_ref[...] + shift_ref[...], 0.0)


def _bn_relu(x2d, mean, scale, shift):
    m, c = x2d.shape
    tile = _row_tile(m)
    return pl.pallas_call(
        _bn_relu_kernel,
        out_shape=jax.ShapeDtypeStruct((m, c), jnp.float32),
        grid=(m // tile,),
        in_specs=[
            pl.BlockSpec((tile, c), lambda i: (i, 0)),
            pl.BlockSpec((1, c), lambda i: (0, 0)),
            pl.BlockSpec((1, c), lambda i: (0, 0)),
            pl.BlockSpec((1, c), lambda i: (0, 0)),
        ],
        out_specs=pl.BlockSpec((tile, c), lambda i: (i, 0)),
        compiler_params=pltpu.CompilerParams(
            dimension_semantics=("parallel",),
            vmem_limit_bytes=VMEM_LIMIT,
        ),
    )(x2d, mean, scale, shift)


# ----------------------------------------------------------------------------
# JAX glue (layout only: transpose / pad / flatten / tap-weight reorder)
# ----------------------------------------------------------------------------
def _conv_taps(w_oihw):
    """(Cout, Cin, 3, 3) -> (9, Cin, Cout), tap-major (dy, dx)."""
    co, ci, kh, kw = w_oihw.shape
    return jnp.transpose(w_oihw, (2, 3, 1, 0)).reshape(kh * kw, ci, co)


def _bn_fold(s, q, count, gamma):
    """Fold accumulated sum / sum^2 into BN mean and gamma * rsqrt(var + eps)."""
    mean = s / count
    var = q / count - mean * mean            # biased variance (PyTorch train mode)
    scale = gamma.reshape(1, -1) * jax.lax.rsqrt(var + 1e-5)
    return mean, scale


@jax.jit
def up_block_forward(x_nchw, enc_nchw, params):
    wt, bt, w1, b1, g1, be1, w2, b2, g2, be2 = params
    n, cin, h, w = x_nchw.shape
    cout = wt.shape[1]
    enc_h, enc_w = enc_nchw.shape[2], enc_nchw.shape[3]
    hp, wp = enc_h + 2, enc_w + 2

    # --- ConvTranspose2d(k=2, s=2): row-tiled matmul; 2x2 interleave is XLA glue ---
    x_rows = jnp.transpose(x_nchw, (0, 2, 3, 1)).reshape(n * h * w, cin)
    wt_flat = jnp.transpose(wt, (0, 2, 3, 1)).reshape(cin, 4 * cout)   # cols = (a,b,o)
    bt_flat = jnp.tile(bt.reshape(1, cout), (1, 4))
    up = _convt_matmul(x_rows, wt_flat, bt_flat)                        # (n*h*w, 4*cout)
    up = up.reshape(n, h, w, 2, 2, cout)
    up = jnp.transpose(up, (0, 1, 3, 2, 4, 5)).reshape(n, 2 * h, 2 * w, cout)

    # --- center-pad to encoder size + 1-px conv halo, in a single pad ---
    diff_y = enc_h - up.shape[1]
    diff_x = enc_w - up.shape[2]
    up_pf = jnp.pad(
        up,
        ((0, 0),
         (diff_y // 2 + 1, diff_y - diff_y // 2 + 1),
         (diff_x // 2 + 1, diff_x - diff_x // 2 + 1),
         (0, 0))).reshape(n, hp * wp, cout)
    enc_pf = jnp.pad(jnp.transpose(enc_nchw, (0, 2, 3, 1)),
                     ((0, 0), (1, 1), (1, 1), (0, 0))).reshape(n, hp * wp, cout)

    # interior mask: 1 at real output pixels, 0 in the 1-px conv pad ring
    mask = jnp.zeros((hp, wp, 1), jnp.float32)
    mask = mask.at[1:enc_h + 1, 1:enc_w + 1, :].set(1.0).reshape(hp * wp, 1)

    # --- conv1 over the implicit concat([enc, up]) + BN1 batch stats ---
    w1_enc = _conv_taps(w1[:, :cout])
    w1_up = _conv_taps(w1[:, cout:])
    y1, s1, q1 = _conv1_stats(enc_pf, up_pf, w1_enc, w1_up,
                              b1.reshape(1, -1), mask, enc_h, enc_w)
    count = n * enc_h * enc_w
    mean1, scale1 = _bn_fold(s1, q1, count, g1)

    # --- BN1+ReLU fused into conv2 + BN2 batch stats ---
    y2, s2, q2 = _conv2_fused_bn_stats(y1, _conv_taps(w2), b2.reshape(1, -1),
                                       mask, mean1, scale1, be1.reshape(1, -1),
                                       enc_h, enc_w)
    mean2, scale2 = _bn_fold(s2, q2, count, g2)

    # --- final BN2 + ReLU (row-tiled elementwise), then drop the pad ring ---
    y3 = _bn_relu(y2.reshape(n * hp * wp, cout), mean2, scale2, be2.reshape(1, -1))
    y3 = y3.reshape(n, hp, wp, cout)[:, 1:enc_h + 1, 1:enc_w + 1, :]
    return jnp.transpose(y3, (0, 3, 1, 2))                              # back to NCHW


# ----------------------------------------------------------------------------
# Pure-JAX reference (mirrors the PyTorch forward) for verification
# ----------------------------------------------------------------------------
def reference_forward(x, enc, params):
    wt, bt, w1, b1, g1, be1, w2, b2, g2, be2 = params
    N, Cin, h, w = x.shape
    Cout = wt.shape[1]
    up = jnp.einsum("ncij,coab->noiajb", x, wt,
                    precision=jax.lax.Precision.HIGHEST)
    up = up.reshape(N, Cout, 2 * h, 2 * w) + bt[None, :, None, None]
    diffY = enc.shape[2] - up.shape[2]
    diffX = enc.shape[3] - up.shape[3]
    up = jnp.pad(up, ((0, 0), (0, 0),
                      (diffY // 2, diffY - diffY // 2),
                      (diffX // 2, diffX - diffX // 2)))
    y = jnp.concatenate([enc, up], axis=1)

    def conv_bn_relu(t, wgt, bias, gamma, beta):
        t = jax.lax.conv_general_dilated(
            t, wgt, (1, 1), ((1, 1), (1, 1)),
            dimension_numbers=("NCHW", "OIHW", "NCHW"),
            precision=jax.lax.Precision.HIGHEST) + bias[None, :, None, None]
        mean = jnp.mean(t, axis=(0, 2, 3), keepdims=True)
        var = jnp.mean((t - mean) ** 2, axis=(0, 2, 3), keepdims=True)
        t = (t - mean) * jax.lax.rsqrt(var + 1e-5)
        t = t * gamma[None, :, None, None] + beta[None, :, None, None]
        return jnp.maximum(t, 0.0)

    y = conv_bn_relu(y, w1, b1, g1, be1)
    y = conv_bn_relu(y, w2, b2, g2, be2)
    return y


# ----------------------------------------------------------------------------
def make_params(key, in_ch, out_ch):
    ks = jax.random.split(key, 8)
    wt = 0.1 * jax.random.normal(ks[0], (in_ch, out_ch, 2, 2), jnp.float32)
    bt = 0.1 * jax.random.normal(ks[1], (out_ch,), jnp.float32)
    w1 = 0.1 * jax.random.normal(ks[2], (out_ch, in_ch, 3, 3), jnp.float32)
    b1 = 0.1 * jax.random.normal(ks[3], (out_ch,), jnp.float32)
    g1 = 1.0 + 0.1 * jax.random.normal(ks[4], (out_ch,), jnp.float32)
    be1 = 0.1 * jax.random.normal(ks[5], (out_ch,), jnp.float32)
    w2 = 0.1 * jax.random.normal(ks[6], (out_ch, out_ch, 3, 3), jnp.float32)
    b2 = 0.1 * jax.random.normal(ks[7], (out_ch,), jnp.float32)
    g2 = jnp.ones((out_ch,), jnp.float32)
    be2 = jnp.zeros((out_ch,), jnp.float32)
    return (wt, bt, w1, b1, g1, be1, w2, b2, g2, be2)


if __name__ == "__main__":
    in_ch, out_ch = 8, 4
    n, h, w = 2, 8, 8                # decoder input spatial
    H, W = 2 * h, 2 * w              # encoder skip spatial (16 x 16)

    key = jax.random.PRNGKey(0)
    kx, ke, kp = jax.random.split(key, 3)
    x = jax.random.normal(kx, (n, in_ch, h, w), jnp.float32)          # NCHW
    enc_feat = jax.random.normal(ke, (n, out_ch, H, W), jnp.float32)  # NCHW
    params = make_params(kp, in_ch, out_ch)

    out = jax.block_until_ready(up_block_forward(x, enc_feat, params))
    ref = jax.block_until_ready(reference_forward(x, enc_feat, params))

    assert out.shape == (n, out_ch, H, W), out.shape
    err = float(jnp.max(jnp.abs(out - ref)))
    assert jnp.allclose(out, ref, atol=2e-3, rtol=2e-3), err
    print("KERNEL_OK")
</pallas_src>

<mosaic_0001>
module attributes {stable_mosaic.version = 11 : i64} {
  func.func @_matmul_bias_kernel(%arg0: i32, %arg1: memref<128x8xf32, #tpu.memory_space<vmem>>, %arg2: memref<8x16xf32, #tpu.memory_space<vmem>>, %arg3: memref<1x16xf32, #tpu.memory_space<vmem>>, %arg4: memref<128x16xf32, #tpu.memory_space<vmem>>) attributes {dimension_semantics = [#tpu.dimension_semantics<parallel>], iteration_bounds = array<i64: 1>, scalar_prefetch = 0 : i64, scratch_operands = 0 : i64, tpu.core_type = #tpu.core_type<tc>, window_params = [{transform_indices = @transform_0, window_bounds = array<i64: 128, 8>}, {pipeline_mode = #tpu.pipeline_mode<synchronous>, transform_indices = @transform_1, window_bounds = array<i64: 8, 16>}, {pipeline_mode = #tpu.pipeline_mode<synchronous>, transform_indices = @transform_2, window_bounds = array<i64: 1, 16>}, {transform_indices = @transform_3, window_bounds = array<i64: 128, 16>}]} {
    %c0 = arith.constant 0 : index
    %c0_0 = arith.constant 0 : index
    %0 = vector.load %arg1[%c0, %c0_0] : memref<128x8xf32, #tpu.memory_space<vmem>>, vector<128x8xf32>
    %c0_1 = arith.constant 0 : index
    %c0_2 = arith.constant 0 : index
    %1 = vector.load %arg2[%c0_1, %c0_2] : memref<8x16xf32, #tpu.memory_space<vmem>>, vector<8x16xf32>
    %cst = arith.constant dense<0.000000e+00> : vector<128x16xf32>
    %2 = tpu.matmul %0, %1, %cst {dimension_numbers = #tpu.dot_dimension_numbers<[1], [0], [0], [1], [0, 0, 1, 1], [], []>} : vector<128x8xf32>, vector<8x16xf32>, vector<128x16xf32> -> vector<128x16xf32>
    %c0_3 = arith.constant 0 : index
    %c0_4 = arith.constant 0 : index
    %3 = vector.load %arg3[%c0_3, %c0_4] : memref<1x16xf32, #tpu.memory_space<vmem>>, vector<1x16xf32>
    %4 = vector.broadcast %3 : vector<1x16xf32> to vector<128x16xf32>
    %5 = arith.addf %2, %4 : vector<128x16xf32>
    %c0_5 = arith.constant 0 : index
    %c0_6 = arith.constant 0 : index
    %6 = vector.load %arg4[%c0_5, %c0_6] : memref<128x16xf32, #tpu.memory_space<vmem>>, vector<128x16xf32>
    tpu.vector_store %arg4[%c0_5, %c0_6], %5 {strides = array<i32>} : memref<128x16xf32, #tpu.memory_space<vmem>>, vector<128x16xf32>,
    return
  }
  func.func @transform_0(%arg0: i32) -> (i32, i32) {
    %c0_i32 = arith.constant 0 : i32
    %c0_i32_0 = arith.constant 0 : i32
    return %arg0, %c0_i32 : i32, i32
  }
  func.func @transform_1(%arg0: i32) -> (i32, i32) {
    %c0_i32 = arith.constant 0 : i32
    %c0_i32_0 = arith.constant 0 : i32
    %c0_i32_1 = arith.constant 0 : i32
    return %c0_i32, %c0_i32_0 : i32, i32
  }
  func.func @transform_2(%arg0: i32) -> (i32, i32) {
    %c0_i32 = arith.constant 0 : i32
    %c0_i32_0 = arith.constant 0 : i32
    %c0_i32_1 = arith.constant 0 : i32
    return %c0_i32, %c0_i32_0 : i32, i32
  }
  func.func @transform_3(%arg0: i32) -> (i32, i32) {
    %c0_i32 = arith.constant 0 : i32
    %c0_i32_0 = arith.constant 0 : i32
    return %arg0, %c0_i32 : i32, i32
  }
}

module attributes {stable_mosaic.version = 11 : i64} {
  func.func @_bn_relu_kernel(%arg0: i32, %arg1: memref<648x4xf32, #tpu.memory_space<vmem>>, %arg2: memref<1x4xf32, #tpu.memory_space<vmem>>, %arg3: memref<1x4xf32, #tpu.memory_space<vmem>>, %arg4: memref<1x4xf32, #tpu.memory_space<vmem>>, %arg5: memref<648x4xf32, #tpu.memory_space<vmem>>) attributes {dimension_semantics = [#tpu.dimension_semantics<parallel>], iteration_bounds = array<i64: 1>, scalar_prefetch = 0 : i64, scratch_operands = 0 : i64, tpu.core_type = #tpu.core_type<tc>, window_params = [{transform_indices = @transform_0, window_bounds = array<i64: 648, 4>}, {pipeline_mode = #tpu.pipeline_mode<synchronous>, transform_indices = @transform_1, window_bounds = array<i64: 1, 4>}, {pipeline_mode = #tpu.pipeline_mode<synchronous>, transform_indices = @transform_2, window_bounds = array<i64: 1, 4>}, {pipeline_mode = #tpu.pipeline_mode<synchronous>, transform_indices = @transform_3, window_bounds = array<i64: 1, 4>}, {transform_indices = @transform_4, window_bounds = array<i64: 648, 4>}]} {
    %c0 = arith.constant 0 : index
    %c0_0 = arith.constant 0 : index
    %0 = vector.load %arg1[%c0, %c0_0] : memref<648x4xf32, #tpu.memory_space<vmem>>, vector<648x4xf32>
    %c0_1 = arith.constant 0 : index
    %c0_2 = arith.constant 0 : index
    %1 = vector.load %arg2[%c0_1, %c0_2] : memref<1x4xf32, #tpu.memory_space<vmem>>, vector<1x4xf32>
    %2 = vector.broadcast %1 : vector<1x4xf32> to vector<648x4xf32>
    %3 = arith.subf %0, %2 : vector<648x4xf32>
    %c0_3 = arith.constant 0 : index
    %c0_4 = arith.constant 0 : index
    %4 = vector.load %arg3[%c0_3, %c0_4] : memref<1x4xf32, #tpu.memory_space<vmem>>, vector<1x4xf32>
    %5 = vector.broadcast %4 : vector<1x4xf32> to vector<648x4xf32>
    %6 = arith.mulf %3, %5 : vector<648x4xf32>
    %c0_5 = arith.constant 0 : index
    %c0_6 = arith.constant 0 : index
    %7 = vector.load %arg4[%c0_5, %c0_6] : memref<1x4xf32, #tpu.memory_space<vmem>>, vector<1x4xf32>
    %8 = vector.broadcast %7 : vector<1x4xf32> to vector<648x4xf32>
    %9 = arith.addf %6, %8 : vector<648x4xf32>
    %cst = arith.constant 0.000000e+00 : f32
    %10 = vector.broadcast %cst : f32 to vector<648x4xf32>
    %11 = arith.maximumf %9, %10 : vector<648x4xf32>
    %c0_7 = arith.constant 0 : index
    %c0_8 = arith.constant 0 : index
    %12 = vector.load %arg5[%c0_7, %c0_8] : memref<648x4xf32, #tpu.memory_space<vmem>>, vector<648x4xf32>
    tpu.vector_store %arg5[%c0_7, %c0_8], %11 {strides = array<i32>} : memref<648x4xf32, #tpu.memory_space<vmem>>, vector<648x4xf32>,
    return
  }
  func.func @transform_0(%arg0: i32) -> (i32, i32) {
    %c0_i32 = arith.constant 0 : i32
    %c0_i32_0 = arith.constant 0 : i32
    return %arg0, %c0_i32 : i32, i32
  }
  func.func @transform_1(%arg0: i32) -> (i32, i32) {
    %c0_i32 = arith.constant 0 : i32
    %c0_i32_0 = arith.constant 0 : i32
    %c0_i32_1 = arith.constant 0 : i32
    return %c0_i32, %c0_i32_0 : i32, i32
  }
  func.func @transform_2(%arg0: i32) -> (i32, i32) {
    %c0_i32 = arith.constant 0 : i32
    %c0_i32_0 = arith.constant 0 : i32
    %c0_i32_1 = arith.constant 0 : i32
    return %c0_i32, %c0_i32_0 : i32, i32
  }
  func.func @transform_3(%arg0: i32) -> (i32, i32) {
    %c0_i32 = arith.constant 0 : i32
    %c0_i32_0 = arith.constant 0 : i32
    %c0_i32_1 = arith.constant 0 : i32
    return %c0_i32, %c0_i32_0 : i32, i32
  }
  func.func @transform_4(%arg0: i32) -> (i32, i32) {
    %c0_i32 = arith.constant 0 : i32
    %c0_i32_0 = arith.constant 0 : i32
    return %arg0, %c0_i32 : i32, i32
  }
}

module attributes {stable_mosaic.version = 11 : i64} {
  func.func @kernel(%arg0: i32, %arg1: memref<1x324x4xf32, #tpu.memory_space<vmem>>, %arg2: memref<1x324x4xf32, #tpu.memory_space<vmem>>, %arg3: memref<9x4x4xf32, #tpu.memory_space<vmem>>, %arg4: memref<9x4x4xf32, #tpu.memory_space<vmem>>, %arg5: memref<1x4xf32, #tpu.memory_space<vmem>>, %arg6: memref<324x1xf32, #tpu.memory_space<vmem>>, %arg7: memref<1x324x4xf32, #tpu.memory_space<vmem>>, %arg8: memref<1x4xf32, #tpu.memory_space<vmem>>, %arg9: memref<1x4xf32, #tpu.memory_space<vmem>>) attributes {dimension_semantics = [#tpu.dimension_semantics<arbitrary>], iteration_bounds = array<i64: 2>, scalar_prefetch = 0 : i64, scratch_operands = 0 : i64, tpu.core_type = #tpu.core_type<tc>, window_params = [{transform_indices = @transform_0, window_bounds = array<i64: 1, 324, 4>}, {transform_indices = @transform_1, window_bounds = array<i64: 1, 324, 4>}, {pipeline_mode = #tpu.pipeline_mode<synchronous>, transform_indices = @transform_2, window_bounds = array<i64: 9, 4, 4>}, {pipeline_mode = #tpu.pipeline_mode<synchronous>, transform_indices = @transform_3, window_bounds = array<i64: 9, 4, 4>}, {pipeline_mode = #tpu.pipeline_mode<synchronous>, transform_indices = @transform_4, window_bounds = array<i64: 1, 4>}, {pipeline_mode = #tpu.pipeline_mode<synchronous>, transform_indices = @transform_5, window_bounds = array<i64: 324, 1>}, {transform_indices = @transform_6, window_bounds = array<i64: 1, 324, 4>}, {pipeline_mode = #tpu.pipeline_mode<synchronous>, transform_indices = @transform_7, window_bounds = array<i64: 1, 4>}, {pipeline_mode = #tpu.pipeline_mode<synchronous>, transform_indices = @transform_8, window_bounds = array<i64: 1, 4>}]} {
    %cst = arith.constant 0.000000e+00 : f32
    %0 = vector.broadcast %cst : f32 to vector<286x4xf32>
    %c0 = arith.constant 0 : index
    %c0_0 = arith.constant 0 : index
    %c0_1 = arith.constant 0 : index
    %1 = vector.load %arg1[%c0, %c0_0, %c0_1] : memref<1x324x4xf32, #tpu.memory_space<vmem>>, vector<1x286x4xf32>
    %2 = vector.shape_cast %1 : vector<1x286x4xf32> to vector<286x4xf32>
    %c0_2 = arith.constant 0 : index
    %c0_3 = arith.constant 0 : index
    %c0_4 = arith.constant 0 : index
    %3 = vector.load %arg3[%c0_2, %c0_3, %c0_4] : memref<9x4x4xf32, #tpu.memory_space<vmem>>, vector<1x4x4xf32>
    %4 = vector.shape_cast %3 : vector<1x4x4xf32> to vector<4x4xf32>
    %cst_5 = arith.constant dense<0.000000e+00> : vector<286x4xf32>
    %5 = tpu.matmul %2, %4, %cst_5 {dimension_numbers = #tpu.dot_dimension_numbers<[1], [0], [0], [1], [0, 0, 1, 1], [], []>} : vector<286x4xf32>, vector<4x4xf32>, vector<286x4xf32> -> vector<286x4xf32>
    %6 = arith.addf %0, %5 : vector<286x4xf32>
    %c0_6 = arith.constant 0 : index
    %c0_7 = arith.constant 0 : index
    %c0_8 = arith.constant 0 : index
    %7 = vector.load %arg2[%c0_6, %c0_7, %c0_8] : memref<1x324x4xf32, #tpu.memory_space<vmem>>, vector<1x286x4xf32>
    %8 = vector.shape_cast %7 : vector<1x286x4xf32> to vector<286x4xf32>
    %c0_9 = arith.constant 0 : index
    %c0_10 = arith.constant 0 : index
    %c0_11 = arith.constant 0 : index
    %9 = vector.load %arg4[%c0_9, %c0_10, %c0_11] : memref<9x4x4xf32, #tpu.memory_space<vmem>>, vector<1x4x4xf32>
    %10 = vector.shape_cast %9 : vector<1x4x4xf32> to vector<4x4xf32>
    %cst_12 = arith.constant dense<0.000000e+00> : vector<286x4xf32>
    %11 = tpu.matmul %8, %10, %cst_12 {dimension_numbers = #tpu.dot_dimension_numbers<[1], [0], [0], [1], [0, 0, 1, 1], [], []>} : vector<286x4xf32>, vector<4x4xf32>, vector<286x4xf32> -> vector<286x4xf32>
    %12 = arith.addf %6, %11 : vector<286x4xf32>
    %c0_13 = arith.constant 0 : index
    %c1 = arith.constant 1 : index
    %c0_14 = arith.constant 0 : index
    %13 = vector.load %arg1[%c0_13, %c1, %c0_14] : memref<1x324x4xf32, #tpu.memory_space<vmem>>, vector<1x286x4xf32>
    %14 = vector.shape_cast %13 : vector<1x286x4xf32> to vector<286x4xf32>
    %c1_15 = arith.constant 1 : index
    %c0_16 = arith.constant 0 : index
    %c0_17 = arith.constant 0 : index
    %15 = vector.load %arg3[%c1_15, %c0_16, %c0_17] : memref<9x4x4xf32, #tpu.memory_space<vmem>>, vector<1x4x4xf32>
    %16 = vector.shape_cast %15 : vector<1x4x4xf32> to vector<4x4xf32>
    %cst_18 = arith.constant dense<0.000000e+00> : vector<286x4xf32>
    %17 = tpu.matmul %14, %16, %cst_18 {dimension_numbers = #tpu.dot_dimension_numbers<[1], [0], [0], [1], [0, 0, 1, 1], [], []>} : vector<286x4xf32>, vector<4x4xf32>, vector<286x4xf32> -> vector<286x4xf32>
    %18 = arith.addf %12, %17 : vector<286x4xf32>
    %c0_19 = arith.constant 0 : index
    %c1_20 = arith.constant 1 : index
    %c0_21 = arith.constant 0 : index
    %19 = vector.load %arg2[%c0_19, %c1_20, %c0_21] : memref<1x324x4xf32, #tpu.memory_space<vmem>>, vector<1x286x4xf32>
    %20 = vector.shape_cast %19 : vector<1x286x4xf32> to vector<286x4xf32>
    %c1_22 = arith.constant 1 : index
    %c0_23 = arith.constant 0 : index
    %c0_24 = arith.constant 0 : index
    %21 = vector.load %arg4[%c1_22, %c0_23, %c0_24] : memref<9x4x4xf32, #tpu.memory_space<vmem>>, vector<1x4x4xf32>
    %22 = vector.shape_cast %21 : vector<1x4x4xf32> to vector<4x4xf32>
    %cst_25 = arith.constant dense<0.000000e+00> : vector<286x4xf32>
    %23 = tpu.matmul %20, %22, %cst_25 {dimension_numbers = #tpu.dot_dimension_numbers<[1], [0], [0], [1], [0, 0, 1, 1], [], []>} : vector<286x4xf32>, vector<4x4xf32>, vector<286x4xf32> -> vector<286x4xf32>
    %24 = arith.addf %18, %23 : vector<286x4xf32>
    %c0_26 = arith.constant 0 : index
    %c2 = arith.constant 2 : index
    %c0_27 = arith.constant 0 : index
    %25 = vector.load %arg1[%c0_26, %c2, %c0_27] : memref<1x324x4xf32, #tpu.memory_space<vmem>>, vector<1x286x4xf32>
    %26 = vector.shape_cast %25 : vector<1x286x4xf32> to vector<286x4xf32>
    %c2_28 = arith.constant 2 : index
    %c0_29 = arith.constant 0 : index
    %c0_30 = arith.constant 0 : index
    %27 = vector.load %arg3[%c2_28, %c0_29, %c0_30] : memref<9x4x4xf32, #tpu.memory_space<vmem>>, vector<1x4x4xf32>
    %28 = vector.shape_cast %27 : vector<1x4x4xf32> to vector<4x4xf32>
    %cst_31 = arith.constant dense<0.000000e+00> : vector<286x4xf32>
    %29 = tpu.matmul %26, %28, %cst_31 {dimension_numbers = #tpu.dot_dimension_numbers<[1], [0], [0], [1], [0, 0, 1, 1], [], []>} : vector<286x4xf32>, vector<4x4xf32>, vector<286x4xf32> -> vector<286x4xf32>
    %30 = arith.addf %24, %29 : vector<286x4xf32>
    %c0_32 = arith.constant 0 : index
    %c2_33 = arith.constant 2 : index
    %c0_34 = arith.constant 0 : index
    %31 = vector.load %arg2[%c0_32, %c2_33, %c0_34] : memref<1x324x4xf32, #tpu.memory_space<vmem>>, vector<1x286x4xf32>
    %32 = vector.shape_cast %31 : vector<1x286x4xf32> to vector<286x4xf32>
    %c2_35 = arith.constant 2 : index
    %c0_36 = arith.constant 0 : index
    %c0_37 = arith.constant 0 : index
    %33 = vector.load %arg4[%c2_35, %c0_36, %c0_37] : memref<9x4x4xf32, #tpu.memory_space<vmem>>, vector<1x4x4xf32>
    %34 = vector.shape_cast %33 : vector<1x4x4xf32> to vector<4x4xf32>
    %cst_38 = arith.constant dense<0.000000e+00> : vector<286x4xf32>
    %35 = tpu.matmul %32, %34, %cst_38 {dimension_numbers = #tpu.dot_dimension_numbers<[1], [0], [0], [1], [0, 0, 1, 1], [], []>} : vector<286x4xf32>, vector<4x4xf32>, vector<286x4xf32> -> vector<286x4xf32>
    %36 = arith.addf %30, %35 : vector<286x4xf32>
    %c0_39 = arith.constant 0 : index
    %c18 = arith.constant 18 : index
    %c0_40 = arith.constant 0 : index
    %37 = vector.load %arg1[%c0_39, %c18, %c0_40] : memref<1x324x4xf32, #tpu.memory_space<vmem>>, vector<1x286x4xf32>
    %38 = vector.shape_cast %37 : vector<1x286x4xf32> to vector<286x4xf32>
    %c3 = arith.constant 3 : index
    %c0_41 = arith.constant 0 : index
    %c0_42 = arith.constant 0 : index
    %39 = vector.load %arg3[%c3, %c0_41, %c0_42] : memref<9x4x4xf32, #tpu.memory_space<vmem>>, vector<1x4x4xf32>
    %40 = vector.shape_cast %39 : vector<1x4x4xf32> to vector<4x4xf32>
    %cst_43 = arith.constant dense<0.000000e+00> : vector<286x4xf32>
    %41 = tpu.matmul %38, %40, %cst_43 {dimension_numbers = #tpu.dot_dimension_numbers<[1], [0], [0], [1], [0, 0, 1, 1], [], []>} : vector<286x4xf32>, vector<4x4xf32>, vector<286x4xf32> -> vector<286x4xf32>
    %42 = arith.addf %36, %41 : vector<286x4xf32>
    %c0_44 = arith.constant 0 : index
    %c18_45 = arith.constant 18 : index
    %c0_46 = arith.constant 0 : index
    %43 = vector.load %arg2[%c0_44, %c18_45, %c0_46] : memref<1x324x4xf32, #tpu.memory_space<vmem>>, vector<1x286x4xf32>
    %44 = vector.shape_cast %43 : vector<1x286x4xf32> to vector<286x4xf32>
    %c3_47 = arith.constant 3 : index
    %c0_48 = arith.constant 0 : index
    %c0_49 = arith.constant 0 : index
    %45 = vector.load %arg4[%c3_47, %c0_48, %c0_49] : memref<9x4x4xf32, #tpu.memory_space<vmem>>, vector<1x4x4xf32>
    %46 = vector.shape_cast %45 : vector<1x4x4xf32> to vector<4x4xf32>
    %cst_50 = arith.constant dense<0.000000e+00> : vector<286x4xf32>
    %47 = tpu.matmul %44, %46, %cst_50 {dimension_numbers = #tpu.dot_dimension_numbers<[1], [0], [0], [1], [0, 0, 1, 1], [], []>} : vector<286x4xf32>, vector<4x4xf32>, vector<286x4xf32> -> vector<286x4xf32>
    %48 = arith.addf %42, %47 : vector<286x4xf32>
    %c0_51 = arith.constant 0 : index
    %c19 = arith.constant 19 : index
    %c0_52 = arith.constant 0 : index
    %49 = vector.load %arg1[%c0_51, %c19, %c0_52] : memref<1x324x4xf32, #tpu.memory_space<vmem>>, vector<1x286x4xf32>
    %50 = vector.shape_cast %49 : vector<1x286x4xf32> to vector<286x4xf32>
    %c4 = arith.constant 4 : index
    %c0_53 = arith.constant 0 : index
    %c0_54 = arith.constant 0 : index
    %51 = vector.load %arg3[%c4, %c0_53, %c0_54] : memref<9x4x4xf32, #tpu.memory_space<vmem>>, vector<1x4x4xf32>
    %52 = vector.shape_cast %51 : vector<1x4x4xf32> to vector<4x4xf32>
    %cst_55 = arith.constant dense<0.000000e+00> : vector<286x4xf32>
    %53 = tpu.matmul %50, %52, %cst_55 {dimension_numbers = #tpu.dot_dimension_numbers<[1], [0], [0], [1], [0, 0, 1, 1], [], []>} : vector<286x4xf32>, vector<4x4xf32>, vector<286x4xf32> -> vector<286x4xf32>
    %54 = arith.addf %48, %53 : vector<286x4xf32>
    %c0_56 = arith.constant 0 : index
    %c19_57 = arith.constant 19 : index
    %c0_58 = arith.constant 0 : index
    %55 = vector.load %arg2[%c0_56, %c19_57, %c0_58] : memref<1x324x4xf32, #tpu.memory_space<vmem>>, vector<1x286x4xf32>
    %56 = vector.shape_cast %55 : vector<1x286x4xf32> to vector<286x4xf32>
    %c4_59 = arith.constant 4 : index
    %c0_60 = arith.constant 0 : index
    %c0_61 = arith.constant 0 : index
    %57 = vector.load %arg4[%c4_59, %c0_60, %c0_61] : memref<9x4x4xf32, #tpu.memory_space<vmem>>, vector<1x4x4xf32>
    %58 = vector.shape_cast %57 : vector<1x4x4xf32> to vector<4x4xf32>
    %cst_62 = arith.constant dense<0.000000e+00> : vector<286x4xf32>
    %59 = tpu.matmul %56, %58, %cst_62 {dimension_numbers = #tpu.dot_dimension_numbers<[1], [0], [0], [1], [0, 0, 1, 1], [], []>} : vector<286x4xf32>, vector<4x4xf32>, vector<286x4xf32> -> vector<286x4xf32>
    %60 = arith.addf %54, %59 : vector<286x4xf32>
    %c0_63 = arith.constant 0 : index
    %c20 = arith.constant 20 : index
    %c0_64 = arith.constant 0 : index
    %61 = vector.load %arg1[%c0_63, %c20, %c0_64] : memref<1x324x4xf32, #tpu.memory_space<vmem>>, vector<1x286x4xf32>
    %62 = vector.shape_cast %61 : vector<1x286x4xf32> to vector<286x4xf32>
    %c5 = arith.constant 5 : index
    %c0_65 = arith.constant 0 : index
    %c0_66 = arith.constant 0 : index
    %63 = vector.load %arg3[%c5, %c0_65, %c0_66] : memref<9x4x4xf32, #tpu.memory_space<vmem>>, vector<1x4x4xf32>
    %64 = vector.shape_cast %63 : vector<1x4x4xf32> to vector<4x4xf32>
    %cst_67 = arith.constant dense<0.000000e+00> : vector<286x4xf32>
    %65 = tpu.matmul %62, %64, %cst_67 {dimension_numbers = #tpu.dot_dimension_numbers<[1], [0], [0], [1], [0, 0, 1, 1], [], []>} : vector<286x4xf32>, vector<4x4xf32>, vector<286x4xf32> -> vector<286x4xf32>
    %66 = arith.addf %60, %65 : vector<286x4xf32>
    %c0_68 = arith.constant 0 : index
    %c20_69 = arith.constant 20 : index
    %c0_70 = arith.constant 0 : index
    %67 = vector.load %arg2[%c0_68, %c20_69, %c0_70] : memref<1x324x4xf32, #tpu.memory_space<vmem>>, vector<1x286x4xf32>
    %68 = vector.shape_cast %67 : vector<1x286x4xf32> to vector<286x4xf32>
    %c5_71 = arith.constant 5 : index
    %c0_72 = arith.constant 0 : index
    %c0_73 = arith.constant 0 : index
    %69 = vector.load %arg4[%c5_71, %c0_72, %c0_73] : memref<9x4x4xf32, #tpu.memory_space<vmem>>, vector<1x4x4xf32>
    %70 = vector.shape_cast %69 : vector<1x4x4xf32> to vector<4x4xf32>
    %cst_74 = arith.constant dense<0.000000e+00> : vector<286x4xf32>
    %71 = tpu.matmul %68, %70, %cst_74 {dimension_numbers = #tpu.dot_dimension_numbers<[1], [0], [0], [1], [0, 0, 1, 1], [], []>} : vector<286x4xf32>, vector<4x4xf32>, vector<286x4xf32> -> vector<286x4xf32>
    %72 = arith.addf %66, %71 : vector<286x4xf32>
    %c0_75 = arith.constant 0 : index
    %c36 = arith.constant 36 : index
    %c0_76 = arith.constant 0 : index
    %73 = vector.load %arg1[%c0_75, %c36, %c0_76] : memref<1x324x4xf32, #tpu.memory_space<vmem>>, vector<1x286x4xf32>
    %74 = vector.shape_cast %73 : vector<1x286x4xf32> to vector<286x4xf32>
    %c6 = arith.constant 6 : index
    %c0_77 = arith.constant 0 : index
    %c0_78 = arith.constant 0 : index
    %75 = vector.load %arg3[%c6, %c0_77, %c0_78] : memref<9x4x4xf32, #tpu.memory_space<vmem>>, vector<1x4x4xf32>
    %76 = vector.shape_cast %75 : vector<1x4x4xf32> to vector<4x4xf32>
    %cst_79 = arith.constant dense<0.000000e+00> : vector<286x4xf32>
    %77 = tpu.matmul %74, %76, %cst_79 {dimension_numbers = #tpu.dot_dimension_numbers<[1], [0], [0], [1], [0, 0, 1, 1], [], []>} : vector<286x4xf32>, vector<4x4xf32>, vector<286x4xf32> -> vector<286x4xf32>
    %78 = arith.addf %72, %77 : vector<286x4xf32>
    %c0_80 = arith.constant 0 : index
    %c36_81 = arith.constant 36 : index
    %c0_82 = arith.constant 0 : index
    %79 = vector.load %arg2[%c0_80, %c36_81, %c0_82] : memref<1x324x4xf32, #tpu.memory_space<vmem>>, vector<1x286x4xf32>
    %80 = vector.shape_cast %79 : vector<1x286x4xf32> to vector<286x4xf32>
    %c6_83 = arith.constant 6 : index
    %c0_84 = arith.constant 0 : index
    %c0_85 = arith.constant 0 : index
    %81 = vector.load %arg4[%c6_83, %c0_84, %c0_85] : memref<9x4x4xf32, #tpu.memory_space<vmem>>, vector<1x4x4xf32>
    %82 = vector.shape_cast %81 : vector<1x4x4xf32> to vector<4x4xf32>
    %cst_86 = arith.constant dense<0.000000e+00> : vector<286x4xf32>
    %83 = tpu.matmul %80, %82, %cst_86 {dimension_numbers = #tpu.dot_dimension_numbers<[1], [0], [0], [1], [0, 0, 1, 1], [], []>} : vector<286x4xf32>, vector<4x4xf32>, vector<286x4xf32> -> vector<286x4xf32>
    %84 = arith.addf %78, %83 : vector<286x4xf32>
    %c0_87 = arith.constant 0 : index
    %c37 = arith.constant 37 : index
    %c0_88 = arith.constant 0 : index
    %85 = vector.load %arg1[%c0_87, %c37, %c0_88] : memref<1x324x4xf32, #tpu.memory_space<vmem>>, vector<1x286x4xf32>
    %86 = vector.shape_cast %85 : vector<1x286x4xf32> to vector<286x4xf32>
    %c7 = arith.constant 7 : index
    %c0_89 = arith.constant 0 : index
    %c0_90 = arith.constant 0 : index
    %87 = vector.load %arg3[%c7, %c0_89, %c0_90] : memref<9x4x4xf32, #tpu.memory_space<vmem>>, vector<1x4x4xf32>
    %88 = vector.shape_cast %87 : vector<1x4x4xf32> to vector<4x4xf32>
    %cst_91 = arith.constant dense<0.000000e+00> : vector<286x4xf32>
    %89 = tpu.matmul %86, %88, %cst_91 {dimension_numbers = #tpu.dot_dimension_numbers<[1], [0], [0], [1], [0, 0, 1, 1], [], []>} : vector<286x4xf32>, vector<4x4xf32>, vector<286x4xf32> -> vector<286x4xf32>
    %90 = arith.addf %84, %89 : vector<286x4xf32>
    %c0_92 = arith.constant 0 : index
    %c37_93 = arith.constant 37 : index
    %c0_94 = arith.constant 0 : index
    %91 = vector.load %arg2[%c0_92, %c37_93, %c0_94] : memref<1x324x4xf32, #tpu.memory_space<vmem>>, vector<1x286x4xf32>
    %92 = vector.shape_cast %91 : vector<1x286x4xf32> to vector<286x4xf32>
    %c7_95 = arith.constant 7 : index
    %c0_96 = arith.constant 0 : index
    %c0_97 = arith.constant 0 : index
    %93 = vector.load %arg4[%c7_95, %c0_96, %c0_97] : memref<9x4x4xf32, #tpu.memory_space<vmem>>, vector<1x4x4xf32>
    %94 = vector.shape_cast %93 : vector<1x4x4xf32> to vector<4x4xf32>
    %cst_98 = arith.constant dense<0.000000e+00> : vector<286x4xf32>
    %95 = tpu.matmul %92, %94, %cst_98 {dimension_numbers = #tpu.dot_dimension_numbers<[1], [0], [0], [1], [0, 0, 1, 1], [], []>} : vector<286x4xf32>, vector<4x4xf32>, vector<286x4xf32> -> vector<286x4xf32>
    %96 = arith.addf %90, %95 : vector<286x4xf32>
    %c0_99 = arith.constant 0 : index
    %c38 = arith.constant 38 : index
    %c0_100 = arith.constant 0 : index
    %97 = vector.load %arg1[%c0_99, %c38, %c0_100] : memref<1x324x4xf32, #tpu.memory_space<vmem>>, vector<1x286x4xf32>
    %98 = vector.shape_cast %97 : vector<1x286x4xf32> to vector<286x4xf32>
    %c8 = arith.constant 8 : index
    %c0_101 = arith.constant 0 : index
    %c0_102 = arith.constant 0 : index
    %99 = vector.load %arg3[%c8, %c0_101, %c0_102] : memref<9x4x4xf32, #tpu.memory_space<vmem>>, vector<1x4x4xf32>
    %100 = vector.shape_cast %99 : vector<1x4x4xf32> to vector<4x4xf32>
    %cst_103 = arith.constant dense<0.000000e+00> : vector<286x4xf32>
    %101 = tpu.matmul %98, %100, %cst_103 {dimension_numbers = #tpu.dot_dimension_numbers<[1], [0], [0], [1], [0, 0, 1, 1], [], []>} : vector<286x4xf32>, vector<4x4xf32>, vector<286x4xf32> -> vector<286x4xf32>
    %102 = arith.addf %96, %101 : vector<286x4xf32>
    %c0_104 = arith.constant 0 : index
    %c38_105 = arith.constant 38 : index
    %c0_106 = arith.constant 0 : index
    %103 = vector.load %arg2[%c0_104, %c38_105, %c0_106] : memref<1x324x4xf32, #tpu.memory_space<vmem>>, vector<1x286x4xf32>
    %104 = vector.shape_cast %103 : vector<1x286x4xf32> to vector<286x4xf32>
    %c8_107 = arith.constant 8 : index
    %c0_108 = arith.constant 0 : index
    %c0_109 = arith.constant 0 : index
    %105 = vector.load %arg4[%c8_107, %c0_108, %c0_109] : memref<9x4x4xf32, #tpu.memory_space<vmem>>, vector<1x4x4xf32>
    %106 = vector.shape_cast %105 : vector<1x4x4xf32> to vector<4x4xf32>
    %cst_110 = arith.constant dense<0.000000e+00> : vector<286x4xf32>
    %107 = tpu.matmul %104, %106, %cst_110 {dimension_numbers = #tpu.dot_dimension_numbers<[1], [0], [0], [1], [0, 0, 1, 1], [], []>} : vector<286x4xf32>, vector<4x4xf32>, vector<286x4xf32> -> vector<286x4xf32>
    %108 = arith.addf %102, %107 : vector<286x4xf32>
    %c0_111 = arith.constant 0 : index
    %c0_112 = arith.constant 0 : index
    %109 = vector.load %arg5[%c0_111, %c0_112] : memref<1x4xf32, #tpu.memory_space<vmem>>, vector<1x4xf32>
    %110 = vector.broadcast %109 : vector<1x4xf32> to vector<286x4xf32>
    %111 = arith.addf %108, %110 : vector<286x4xf32>
    %cst_113 = arith.constant 0.000000e+00 : f32
    %112 = vector.broadcast %cst_113 : f32 to vector<1x324x4xf32>
    %c0_114 = arith.constant 0 : index
    %c0_115 = arith.constant 0 : index
    %c0_116 = arith.constant 0 : index
    %113 = vector.load %arg7[%c0_114, %c0_115, %c0_116] : memref<1x324x4xf32, #tpu.memory_space<vmem>>, vector<1x324x4xf32>
    tpu.vector_store %arg7[%c0_114, %c0_115, %c0_116], %112 {strides = array<i32>} : memref<1x324x4xf32, #tpu.memory_space<vmem>>, vector<1x324x4xf32>,
    %c0_117 = arith.constant 0 : index
    %c19_118 = arith.constant 19 : index
    %c0_119 = arith.constant 0 : index
    %114 = vector.load %arg7[%c0_117, %c19_118, %c0_119] : memref<1x324x4xf32, #tpu.memory_space<vmem>>, vector<1x286x4xf32>
    %115 = vector.shape_cast %114 : vector<1x286x4xf32> to vector<286x4xf32>
    %116 = vector.shape_cast %111 : vector<286x4xf32> to vector<1x286x4xf32>
    tpu.vector_store %arg7[%c0_117, %c19_118, %c0_119], %116 {strides = array<i32>} : memref<1x324x4xf32, #tpu.memory_space<vmem>>, vector<1x286x4xf32>,
    %c19_120 = arith.constant 19 : index
    %c0_121 = arith.constant 0 : index
    %117 = vector.load %arg6[%c19_120, %c0_121] : memref<324x1xf32, #tpu.memory_space<vmem>>, vector<286x1xf32>
    %c0_i32 = arith.constant 0 : i32
    %118 = arith.cmpi eq, %arg0, %c0_i32 : i32
    %119 = arith.extui %118 : i1 to i32
    %c0_i32_122 = arith.constant 0 : i32
    %120 = arith.cmpi ne, %119, %c0_i32_122 : i32
    scf.if %120 {
      %cst_133 = arith.constant 0.000000e+00 : f32
      %136 = vector.broadcast %cst_133 : f32 to vector<1x4xf32>
      %c0_134 = arith.constant 0 : index
      %c0_135 = arith.constant 0 : index
      %137 = vector.load %arg8[%c0_134, %c0_135] : memref<1x4xf32, #tpu.memory_space<vmem>>, vector<1x4xf32>
      tpu.vector_store %arg8[%c0_134, %c0_135], %136 {strides = array<i32>} : memref<1x4xf32, #tpu.memory_space<vmem>>, vector<1x4xf32>,
      %cst_136 = arith.constant 0.000000e+00 : f32
      %138 = vector.broadcast %cst_136 : f32 to vector<1x4xf32>
      %c0_137 = arith.constant 0 : index
      %c0_138 = arith.constant 0 : index
      %139 = vector.load %arg9[%c0_137, %c0_138] : memref<1x4xf32, #tpu.memory_space<vmem>>, vector<1x4xf32>
      tpu.vector_store %arg9[%c0_137, %c0_138], %138 {strides = array<i32>} : memref<1x4xf32, #tpu.memory_space<vmem>>, vector<1x4xf32>,
    } else {
    }
    %c0_123 = arith.constant 0 : index
    %c0_124 = arith.constant 0 : index
    %121 = vector.load %arg8[%c0_123, %c0_124] : memref<1x4xf32, #tpu.memory_space<vmem>>, vector<1x4xf32>
    %122 = vector.broadcast %117 : vector<286x1xf32> to vector<286x4xf32>
    %123 = arith.mulf %122, %111 : vector<286x4xf32>
    %cst_125 = arith.constant dense<0.000000e+00> : vector<4xf32>
    %124 = vector.multi_reduction <add>, %123, %cst_125 [0] : vector<286x4xf32> to vector<4xf32>
    %125 = vector.shape_cast %124 : vector<4xf32> to vector<1x4xf32>
    %126 = arith.addf %121, %125 : vector<1x4xf32>
    %c0_126 = arith.constant 0 : index
    %c0_127 = arith.constant 0 : index
    %127 = vector.load %arg8[%c0_126, %c0_127] : memref<1x4xf32, #tpu.memory_space<vmem>>, vector<1x4xf32>
    tpu.vector_store %arg8[%c0_126, %c0_127], %126 {strides = array<i32>} : memref<1x4xf32, #tpu.memory_space<vmem>>, vector<1x4xf32>,
    %c0_128 = arith.constant 0 : index
    %c0_129 = arith.constant 0 : index
    %128 = vector.load %arg9[%c0_128, %c0_129] : memref<1x4xf32, #tpu.memory_space<vmem>>, vector<1x4xf32>
    %129 = vector.broadcast %117 : vector<286x1xf32> to vector<286x4xf32>
    %130 = arith.mulf %129, %111 : vector<286x4xf32>
    %131 = arith.mulf %130, %111 : vector<286x4xf32>
    %cst_130 = arith.constant dense<0.000000e+00> : vector<4xf32>
    %132 = vector.multi_reduction <add>, %131, %cst_130 [0] : vector<286x4xf32> to vector<4xf32>
    %133 = vector.shape_cast %132 : vector<4xf32> to vector<1x4xf32>
    %134 = arith.addf %128, %133 : vector<1x4xf32>
    %c0_131 = arith.constant 0 : index
    %c0_132 = arith.constant 0 : index
    %135 = vector.load %arg9[%c0_131, %c0_132] : memref<1x4xf32, #tpu.memory_space<vmem>>, vector<1x4xf32>
    tpu.vector_store %arg9[%c0_131, %c0_132], %134 {strides = array<i32>} : memref<1x4xf32, #tpu.memory_space<vmem>>, vector<1x4xf32>,
    return
  }
  func.func @transform_0(%arg0: i32) -> (i32, i32, i32) {
    %c0_i32 = arith.constant 0 : i32
    %c0_i32_0 = arith.constant 0 : i32
    %c0_i32_1 = arith.constant 0 : i32
    return %arg0, %c0_i32, %c0_i32_0 : i32, i32, i32
  }
  func.func @transform_1(%arg0: i32) -> (i32, i32, i32) {
    %c0_i32 = arith.constant 0 : i32
    %c0_i32_0 = arith.constant 0 : i32
    %c0_i32_1 = arith.constant 0 : i32
    return %arg0, %c0_i32, %c0_i32_0 : i32, i32, i32
  }
  func.func @transform_2(%arg0: i32) -> (i32, i32, i32) {
    %c0_i32 = arith.constant 0 : i32
    %c0_i32_0 = arith.constant 0 : i32
    %c0_i32_1 = arith.constant 0 : i32
    %c0_i32_2 = arith.constant 0 : i32
    return %c0_i32, %c0_i32_0, %c0_i32_1 : i32, i32, i32
  }
  func.func @transform_3(%arg0: i32) -> (i32, i32, i32) {
    %c0_i32 = arith.constant 0 : i32
    %c0_i32_0 = arith.constant 0 : i32
    %c0_i32_1 = arith.constant 0 : i32
    %c0_i32_2 = arith.constant 0 : i32
    return %c0_i32, %c0_i32_0, %c0_i32_1 : i32, i32, i32
  }
  func.func @transform_4(%arg0: i32) -> (i32, i32) {
    %c0_i32 = arith.constant 0 : i32
    %c0_i32_0 = arith.constant 0 : i32
    %c0_i32_1 = arith.constant 0 : i32
    return %c0_i32, %c0_i32_0 : i32, i32
  }
  func.func @transform_5(%arg0: i32) -> (i32, i32) {
    %c0_i32 = arith.constant 0 : i32
    %c0_i32_0 = arith.constant 0 : i32
    %c0_i32_1 = arith.constant 0 : i32
    return %c0_i32, %c0_i32_0 : i32, i32
  }
  func.func @transform_6(%arg0: i32) -> (i32, i32, i32) {
    %c0_i32 = arith.constant 0 : i32
    %c0_i32_0 = arith.constant 0 : i32
    %c0_i32_1 = arith.constant 0 : i32
    return %arg0, %c0_i32, %c0_i32_0 : i32, i32, i32
  }
  func.func @transform_7(%arg0: i32) -> (i32, i32) {
    %c0_i32 = arith.constant 0 : i32
    %c0_i32_0 = arith.constant 0 : i32
    %c0_i32_1 = arith.constant 0 : i32
    return %c0_i32, %c0_i32_0 : i32, i32
  }
  func.func @transform_8(%arg0: i32) -> (i32, i32) {
    %c0_i32 = arith.constant 0 : i32
    %c0_i32_0 = arith.constant 0 : i32
    %c0_i32_1 = arith.constant 0 : i32
    return %c0_i32, %c0_i32_0 : i32, i32
  }
}

module attributes {stable_mosaic.version = 11 : i64} {
  func.func @kernel(%arg0: i32, %arg1: memref<1x324x4xf32, #tpu.memory_space<vmem>>, %arg2: memref<9x4x4xf32, #tpu.memory_space<vmem>>, %arg3: memref<1x4xf32, #tpu.memory_space<vmem>>, %arg4: memref<324x1xf32, #tpu.memory_space<vmem>>, %arg5: memref<1x4xf32, #tpu.memory_space<vmem>>, %arg6: memref<1x4xf32, #tpu.memory_space<vmem>>, %arg7: memref<1x4xf32, #tpu.memory_space<vmem>>, %arg8: memref<1x324x4xf32, #tpu.memory_space<vmem>>, %arg9: memref<1x4xf32, #tpu.memory_space<vmem>>, %arg10: memref<1x4xf32, #tpu.memory_space<vmem>>, %arg11: memref<324x4xf32, #tpu.memory_space<vmem>>) attributes {dimension_semantics = [#tpu.dimension_semantics<arbitrary>], iteration_bounds = array<i64: 2>, scalar_prefetch = 0 : i64, scratch_operands = 1 : i64, tpu.core_type = #tpu.core_type<tc>, window_params = [{transform_indices = @transform_0, window_bounds = array<i64: 1, 324, 4>}, {pipeline_mode = #tpu.pipeline_mode<synchronous>, transform_indices = @transform_1, window_bounds = array<i64: 9, 4, 4>}, {pipeline_mode = #tpu.pipeline_mode<synchronous>, transform_indices = @transform_2, window_bounds = array<i64: 1, 4>}, {pipeline_mode = #tpu.pipeline_mode<synchronous>, transform_indices = @transform_3, window_bounds = array<i64: 324, 1>}, {pipeline_mode = #tpu.pipeline_mode<synchronous>, transform_indices = @transform_4, window_bounds = array<i64: 1, 4>}, {pipeline_mode = #tpu.pipeline_mode<synchronous>, transform_indices = @transform_5, window_bounds = array<i64: 1, 4>}, {pipeline_mode = #tpu.pipeline_mode<synchronous>, transform_indices = @transform_6, window_bounds = array<i64: 1, 4>}, {transform_indices = @transform_7, window_bounds = array<i64: 1, 324, 4>}, {pipeline_mode = #tpu.pipeline_mode<synchronous>, transform_indices = @transform_8, window_bounds = array<i64: 1, 4>}, {pipeline_mode = #tpu.pipeline_mode<synchronous>, transform_indices = @transform_9, window_bounds = array<i64: 1, 4>}]} {
    %c0 = arith.constant 0 : index
    %c0_0 = arith.constant 0 : index
    %c0_1 = arith.constant 0 : index
    %0 = vector.load %arg1[%c0, %c0_0, %c0_1] : memref<1x324x4xf32, #tpu.memory_space<vmem>>, vector<1x324x4xf32>
    %1 = vector.shape_cast %0 : vector<1x324x4xf32> to vector<324x4xf32>
    %c0_2 = arith.constant 0 : index
    %c0_3 = arith.constant 0 : index
    %2 = vector.load %arg5[%c0_2, %c0_3] : memref<1x4xf32, #tpu.memory_space<vmem>>, vector<1x4xf32>
    %3 = vector.broadcast %2 : vector<1x4xf32> to vector<324x4xf32>
    %4 = arith.subf %1, %3 : vector<324x4xf32>
    %c0_4 = arith.constant 0 : index
    %c0_5 = arith.constant 0 : index
    %5 = vector.load %arg6[%c0_4, %c0_5] : memref<1x4xf32, #tpu.memory_space<vmem>>, vector<1x4xf32>
    %6 = vector.broadcast %5 : vector<1x4xf32> to vector<324x4xf32>
    %7 = arith.mulf %4, %6 : vector<324x4xf32>
    %c0_6 = arith.constant 0 : index
    %c0_7 = arith.constant 0 : index
    %8 = vector.load %arg7[%c0_6, %c0_7] : memref<1x4xf32, #tpu.memory_space<vmem>>, vector<1x4xf32>
    %9 = vector.broadcast %8 : vector<1x4xf32> to vector<324x4xf32>
    %10 = arith.addf %7, %9 : vector<324x4xf32>
    %cst = arith.constant 0.000000e+00 : f32
    %11 = vector.broadcast %cst : f32 to vector<324x4xf32>
    %12 = arith.maximumf %10, %11 : vector<324x4xf32>
    %c0_8 = arith.constant 0 : index
    %c0_9 = arith.constant 0 : index
    %13 = vector.load %arg4[%c0_8, %c0_9] : memref<324x1xf32, #tpu.memory_space<vmem>>, vector<324x1xf32>
    %14 = vector.broadcast %13 : vector<324x1xf32> to vector<324x4xf32>
    %15 = arith.mulf %12, %14 : vector<324x4xf32>
    %c0_10 = arith.constant 0 : index
    %c0_11 = arith.constant 0 : index
    %16 = vector.load %arg11[%c0_10, %c0_11] : memref<324x4xf32, #tpu.memory_space<vmem>>, vector<324x4xf32>
    tpu.vector_store %arg11[%c0_10, %c0_11], %15 {strides = array<i32>} : memref<324x4xf32, #tpu.memory_space<vmem>>, vector<324x4xf32>,
    %cst_12 = arith.constant 0.000000e+00 : f32
    %17 = vector.broadcast %cst_12 : f32 to vector<286x4xf32>
    %c0_13 = arith.constant 0 : index
    %c0_14 = arith.constant 0 : index
    %18 = vector.load %arg11[%c0_13, %c0_14] : memref<324x4xf32, #tpu.memory_space<vmem>>, vector<286x4xf32>
    %c0_15 = arith.constant 0 : index
    %c0_16 = arith.constant 0 : index
    %c0_17 = arith.constant 0 : index
    %19 = vector.load %arg2[%c0_15, %c0_16, %c0_17] : memref<9x4x4xf32, #tpu.memory_space<vmem>>, vector<1x4x4xf32>
    %20 = vector.shape_cast %19 : vector<1x4x4xf32> to vector<4x4xf32>
    %cst_18 = arith.constant dense<0.000000e+00> : vector<286x4xf32>
    %21 = tpu.matmul %18, %20, %cst_18 {dimension_numbers = #tpu.dot_dimension_numbers<[1], [0], [0], [1], [0, 0, 1, 1], [], []>} : vector<286x4xf32>, vector<4x4xf32>, vector<286x4xf32> -> vector<286x4xf32>
    %22 = arith.addf %17, %21 : vector<286x4xf32>
    %c1 = arith.constant 1 : index
    %c0_19 = arith.constant 0 : index
    %23 = vector.load %arg11[%c1, %c0_19] : memref<324x4xf32, #tpu.memory_space<vmem>>, vector<286x4xf32>
    %c1_20 = arith.constant 1 : index
    %c0_21 = arith.constant 0 : index
    %c0_22 = arith.constant 0 : index
    %24 = vector.load %arg2[%c1_20, %c0_21, %c0_22] : memref<9x4x4xf32, #tpu.memory_space<vmem>>, vector<1x4x4xf32>
    %25 = vector.shape_cast %24 : vector<1x4x4xf32> to vector<4x4xf32>
    %cst_23 = arith.constant dense<0.000000e+00> : vector<286x4xf32>
    %26 = tpu.matmul %23, %25, %cst_23 {dimension_numbers = #tpu.dot_dimension_numbers<[1], [0], [0], [1], [0, 0, 1, 1], [], []>} : vector<286x4xf32>, vector<4x4xf32>, vector<286x4xf32> -> vector<286x4xf32>
    %27 = arith.addf %22, %26 : vector<286x4xf32>
    %c2 = arith.constant 2 : index
    %c0_24 = arith.constant 0 : index
    %28 = vector.load %arg11[%c2, %c0_24] : memref<324x4xf32, #tpu.memory_space<vmem>>, vector<286x4xf32>
    %c2_25 = arith.constant 2 : index
    %c0_26 = arith.constant 0 : index
    %c0_27 = arith.constant 0 : index
    %29 = vector.load %arg2[%c2_25, %c0_26, %c0_27] : memref<9x4x4xf32, #tpu.memory_space<vmem>>, vector<1x4x4xf32>
    %30 = vector.shape_cast %29 : vector<1x4x4xf32> to vector<4x4xf32>
    %cst_28 = arith.constant dense<0.000000e+00> : vector<286x4xf32>
    %31 = tpu.matmul %28, %30, %cst_28 {dimension_numbers = #tpu.dot_dimension_numbers<[1], [0], [0], [1], [0, 0, 1, 1], [], []>} : vector<286x4xf32>, vector<4x4xf32>, vector<286x4xf32> -> vector<286x4xf32>
    %32 = arith.addf %27, %31 : vector<286x4xf32>
    %c18 = arith.constant 18 : index
    %c0_29 = arith.constant 0 : index
    %33 = vector.load %arg11[%c18, %c0_29] : memref<324x4xf32, #tpu.memory_space<vmem>>, vector<286x4xf32>
    %c3 = arith.constant 3 : index
    %c0_30 = arith.constant 0 : index
    %c0_31 = arith.constant 0 : index
    %34 = vector.load %arg2[%c3, %c0_30, %c0_31] : memref<9x4x4xf32, #tpu.memory_space<vmem>>, vector<1x4x4xf32>
    %35 = vector.shape_cast %34 : vector<1x4x4xf32> to vector<4x4xf32>
    %cst_32 = arith.constant dense<0.000000e+00> : vector<286x4xf32>
    %36 = tpu.matmul %33, %35, %cst_32 {dimension_numbers = #tpu.dot_dimension_numbers<[1], [0], [0], [1], [0, 0, 1, 1], [], []>} : vector<286x4xf32>, vector<4x4xf32>, vector<286x4xf32> -> vector<286x4xf32>
    %37 = arith.addf %32, %36 : vector<286x4xf32>
    %c19 = arith.constant 19 : index
    %c0_33 = arith.constant 0 : index
    %38 = vector.load %arg11[%c19, %c0_33] : memref<324x4xf32, #tpu.memory_space<vmem>>, vector<286x4xf32>
    %c4 = arith.constant 4 : index
    %c0_34 = arith.constant 0 : index
    %c0_35 = arith.constant 0 : index
    %39 = vector.load %arg2[%c4, %c0_34, %c0_35] : memref<9x4x4xf32, #tpu.memory_space<vmem>>, vector<1x4x4xf32>
    %40 = vector.shape_cast %39 : vector<1x4x4xf32> to vector<4x4xf32>
    %cst_36 = arith.constant dense<0.000000e+00> : vector<286x4xf32>
    %41 = tpu.matmul %38, %40, %cst_36 {dimension_numbers = #tpu.dot_dimension_numbers<[1], [0], [0], [1], [0, 0, 1, 1], [], []>} : vector<286x4xf32>, vector<4x4xf32>, vector<286x4xf32> -> vector<286x4xf32>
    %42 = arith.addf %37, %41 : vector<286x4xf32>
    %c20 = arith.constant 20 : index
    %c0_37 = arith.constant 0 : index
    %43 = vector.load %arg11[%c20, %c0_37] : memref<324x4xf32, #tpu.memory_space<vmem>>, vector<286x4xf32>
    %c5 = arith.constant 5 : index
    %c0_38 = arith.constant 0 : index
    %c0_39 = arith.constant 0 : index
    %44 = vector.load %arg2[%c5, %c0_38, %c0_39] : memref<9x4x4xf32, #tpu.memory_space<vmem>>, vector<1x4x4xf32>
    %45 = vector.shape_cast %44 : vector<1x4x4xf32> to vector<4x4xf32>
    %cst_40 = arith.constant dense<0.000000e+00> : vector<286x4xf32>
    %46 = tpu.matmul %43, %45, %cst_40 {dimension_numbers = #tpu.dot_dimension_numbers<[1], [0], [0], [1], [0, 0, 1, 1], [], []>} : vector<286x4xf32>, vector<4x4xf32>, vector<286x4xf32> -> vector<286x4xf32>
    %47 = arith.addf %42, %46 : vector<286x4xf32>
    %c36 = arith.constant 36 : index
    %c0_41 = arith.constant 0 : index
    %48 = vector.load %arg11[%c36, %c0_41] : memref<324x4xf32, #tpu.memory_space<vmem>>, vector<286x4xf32>
    %c6 = arith.constant 6 : index
    %c0_42 = arith.constant 0 : index
    %c0_43 = arith.constant 0 : index
    %49 = vector.load %arg2[%c6, %c0_42, %c0_43] : memref<9x4x4xf32, #tpu.memory_space<vmem>>, vector<1x4x4xf32>
    %50 = vector.shape_cast %49 : vector<1x4x4xf32> to vector<4x4xf32>
    %cst_44 = arith.constant dense<0.000000e+00> : vector<286x4xf32>
    %51 = tpu.matmul %48, %50, %cst_44 {dimension_numbers = #tpu.dot_dimension_numbers<[1], [0], [0], [1], [0, 0, 1, 1], [], []>} : vector<286x4xf32>, vector<4x4xf32>, vector<286x4xf32> -> vector<286x4xf32>
    %52 = arith.addf %47, %51 : vector<286x4xf32>
    %c37 = arith.constant 37 : index
    %c0_45 = arith.constant 0 : index
    %53 = vector.load %arg11[%c37, %c0_45] : memref<324x4xf32, #tpu.memory_space<vmem>>, vector<286x4xf32>
    %c7 = arith.constant 7 : index
    %c0_46 = arith.constant 0 : index
    %c0_47 = arith.constant 0 : index
    %54 = vector.load %arg2[%c7, %c0_46, %c0_47] : memref<9x4x4xf32, #tpu.memory_space<vmem>>, vector<1x4x4xf32>
    %55 = vector.shape_cast %54 : vector<1x4x4xf32> to vector<4x4xf32>
    %cst_48 = arith.constant dense<0.000000e+00> : vector<286x4xf32>
    %56 = tpu.matmul %53, %55, %cst_48 {dimension_numbers = #tpu.dot_dimension_numbers<[1], [0], [0], [1], [0, 0, 1, 1], [], []>} : vector<286x4xf32>, vector<4x4xf32>, vector<286x4xf32> -> vector<286x4xf32>
    %57 = arith.addf %52, %56 : vector<286x4xf32>
    %c38 = arith.constant 38 : index
    %c0_49 = arith.constant 0 : index
    %58 = vector.load %arg11[%c38, %c0_49] : memref<324x4xf32, #tpu.memory_space<vmem>>, vector<286x4xf32>
    %c8 = arith.constant 8 : index
    %c0_50 = arith.constant 0 : index
    %c0_51 = arith.constant 0 : index
    %59 = vector.load %arg2[%c8, %c0_50, %c0_51] : memref<9x4x4xf32, #tpu.memory_space<vmem>>, vector<1x4x4xf32>
    %60 = vector.shape_cast %59 : vector<1x4x4xf32> to vector<4x4xf32>
    %cst_52 = arith.constant dense<0.000000e+00> : vector<286x4xf32>
    %61 = tpu.matmul %58, %60, %cst_52 {dimension_numbers = #tpu.dot_dimension_numbers<[1], [0], [0], [1], [0, 0, 1, 1], [], []>} : vector<286x4xf32>, vector<4x4xf32>, vector<286x4xf32> -> vector<286x4xf32>
    %62 = arith.addf %57, %61 : vector<286x4xf32>
    %c0_53 = arith.constant 0 : index
    %c0_54 = arith.constant 0 : index
    %63 = vector.load %arg3[%c0_53, %c0_54] : memref<1x4xf32, #tpu.memory_space<vmem>>, vector<1x4xf32>
    %64 = vector.broadcast %63 : vector<1x4xf32> to vector<286x4xf32>
    %65 = arith.addf %62, %64 : vector<286x4xf32>
    %cst_55 = arith.constant 0.000000e+00 : f32
    %66 = vector.broadcast %cst_55 : f32 to vector<1x324x4xf32>
    %c0_56 = arith.constant 0 : index
    %c0_57 = arith.constant 0 : index
    %c0_58 = arith.constant 0 : index
    %67 = vector.load %arg8[%c0_56, %c0_57, %c0_58] : memref<1x324x4xf32, #tpu.memory_space<vmem>>, vector<1x324x4xf32>
    tpu.vector_store %arg8[%c0_56, %c0_57, %c0_58], %66 {strides = array<i32>} : memref<1x324x4xf32, #tpu.memory_space<vmem>>, vector<1x324x4xf32>,
    %c0_59 = arith.constant 0 : index
    %c19_60 = arith.constant 19 : index
    %c0_61 = arith.constant 0 : index
    %68 = vector.load %arg8[%c0_59, %c19_60, %c0_61] : memref<1x324x4xf32, #tpu.memory_space<vmem>>, vector<1x286x4xf32>
    %69 = vector.shape_cast %68 : vector<1x286x4xf32> to vector<286x4xf32>
    %70 = vector.shape_cast %65 : vector<286x4xf32> to vector<1x286x4xf32>
    tpu.vector_store %arg8[%c0_59, %c19_60, %c0_61], %70 {strides = array<i32>} : memref<1x324x4xf32, #tpu.memory_space<vmem>>, vector<1x286x4xf32>,
    %c19_62 = arith.constant 19 : index
    %c0_63 = arith.constant 0 : index
    %71 = vector.load %arg4[%c19_62, %c0_63] : memref<324x1xf32, #tpu.memory_space<vmem>>, vector<286x1xf32>
    %c0_i32 = arith.constant 0 : i32
    %72 = arith.cmpi eq, %arg0, %c0_i32 : i32
    %73 = arith.extui %72 : i1 to i32
    %c0_i32_64 = arith.constant 0 : i32
    %74 = arith.cmpi ne, %73, %c0_i32_64 : i32
    scf.if %74 {
      %cst_75 = arith.constant 0.000000e+00 : f32
      %90 = vector.broadcast %cst_75 : f32 to vector<1x4xf32>
      %c0_76 = arith.constant 0 : index
      %c0_77 = arith.constant 0 : index
      %91 = vector.load %arg9[%c0_76, %c0_77] : memref<1x4xf32, #tpu.memory_space<vmem>>, vector<1x4xf32>
      tpu.vector_store %arg9[%c0_76, %c0_77], %90 {strides = array<i32>} : memref<1x4xf32, #tpu.memory_space<vmem>>, vector<1x4xf32>,
      %cst_78 = arith.constant 0.000000e+00 : f32
      %92 = vector.broadcast %cst_78 : f32 to vector<1x4xf32>
      %c0_79 = arith.constant 0 : index
      %c0_80 = arith.constant 0 : index
      %93 = vector.load %arg10[%c0_79, %c0_80] : memref<1x4xf32, #tpu.memory_space<vmem>>, vector<1x4xf32>
      tpu.vector_store %arg10[%c0_79, %c0_80], %92 {strides = array<i32>} : memref<1x4xf32, #tpu.memory_space<vmem>>, vector<1x4xf32>,
    } else {
    }
    %c0_65 = arith.constant 0 : index
    %c0_66 = arith.constant 0 : index
    %75 = vector.load %arg9[%c0_65, %c0_66] : memref<1x4xf32, #tpu.memory_space<vmem>>, vector<1x4xf32>
    %76 = vector.broadcast %71 : vector<286x1xf32> to vector<286x4xf32>
    %77 = arith.mulf %76, %65 : vector<286x4xf32>
    %cst_67 = arith.constant dense<0.000000e+00> : vector<4xf32>
    %78 = vector.multi_reduction <add>, %77, %cst_67 [0] : vector<286x4xf32> to vector<4xf32>
    %79 = vector.shape_cast %78 : vector<4xf32> to vector<1x4xf32>
    %80 = arith.addf %75, %79 : vector<1x4xf32>
    %c0_68 = arith.constant 0 : index
    %c0_69 = arith.constant 0 : index
    %81 = vector.load %arg9[%c0_68, %c0_69] : memref<1x4xf32, #tpu.memory_space<vmem>>, vector<1x4xf32>
    tpu.vector_store %arg9[%c0_68, %c0_69], %80 {strides = array<i32>} : memref<1x4xf32, #tpu.memory_space<vmem>>, vector<1x4xf32>,
    %c0_70 = arith.constant 0 : index
    %c0_71 = arith.constant 0 : index
    %82 = vector.load %arg10[%c0_70, %c0_71] : memref<1x4xf32, #tpu.memory_space<vmem>>, vector<1x4xf32>
    %83 = vector.broadcast %71 : vector<286x1xf32> to vector<286x4xf32>
    %84 = arith.mulf %83, %65 : vector<286x4xf32>
    %85 = arith.mulf %84, %65 : vector<286x4xf32>
    %cst_72 = arith.constant dense<0.000000e+00> : vector<4xf32>
    %86 = vector.multi_reduction <add>, %85, %cst_72 [0] : vector<286x4xf32> to vector<4xf32>
    %87 = vector.shape_cast %86 : vector<4xf32> to vector<1x4xf32>
    %88 = arith.addf %82, %87 : vector<1x4xf32>
    %c0_73 = arith.constant 0 : index
    %c0_74 = arith.constant 0 : index
    %89 = vector.load %arg10[%c0_73, %c0_74] : memref<1x4xf32, #tpu.memory_space<vmem>>, vector<1x4xf32>
    tpu.vector_store %arg10[%c0_73, %c0_74], %88 {strides = array<i32>} : memref<1x4xf32, #tpu.memory_space<vmem>>, vector<1x4xf32>,
    return
  }
  func.func @transform_0(%arg0: i32) -> (i32, i32, i32) {
    %c0_i32 = arith.constant 0 : i32
    %c0_i32_0 = arith.constant 0 : i32
    %c0_i32_1 = arith.constant 0 : i32
    return %arg0, %c0_i32, %c0_i32_0 : i32, i32, i32
  }
  func.func @transform_1(%arg0: i32) -> (i32, i32, i32) {
    %c0_i32 = arith.constant 0 : i32
    %c0_i32_0 = arith.constant 0 : i32
    %c0_i32_1 = arith.constant 0 : i32
    %c0_i32_2 = arith.constant 0 : i32
    return %c0_i32, %c0_i32_0, %c0_i32_1 : i32, i32, i32
  }
  func.func @transform_2(%arg0: i32) -> (i32, i32) {
    %c0_i32 = arith.constant 0 : i32
    %c0_i32_0 = arith.constant 0 : i32
    %c0_i32_1 = arith.constant 0 : i32
    return %c0_i32, %c0_i32_0 : i32, i32
  }
  func.func @transform_3(%arg0: i32) -> (i32, i32) {
    %c0_i32 = arith.constant 0 : i32
    %c0_i32_0 = arith.constant 0 : i32
    %c0_i32_1 = arith.constant 0 : i32
    return %c0_i32, %c0_i32_0 : i32, i32
  }
  func.func @transform_4(%arg0: i32) -> (i32, i32) {
    %c0_i32 = arith.constant 0 : i32
    %c0_i32_0 = arith.constant 0 : i32
    %c0_i32_1 = arith.constant 0 : i32
    return %c0_i32, %c0_i32_0 : i32, i32
  }
  func.func @transform_5(%arg0: i32) -> (i32, i32) {
    %c0_i32 = arith.constant 0 : i32
    %c0_i32_0 = arith.constant 0 : i32
    %c0_i32_1 = arith.constant 0 : i32
    return %c0_i32, %c0_i32_0 : i32, i32
  }
  func.func @transform_6(%arg0: i32) -> (i32, i32) {
    %c0_i32 = arith.constant 0 : i32
    %c0_i32_0 = arith.constant 0 : i32
    %c0_i32_1 = arith.constant 0 : i32
    return %c0_i32, %c0_i32_0 : i32, i32
  }
  func.func @transform_7(%arg0: i32) -> (i32, i32, i32) {
    %c0_i32 = arith.constant 0 : i32
    %c0_i32_0 = arith.constant 0 : i32
    %c0_i32_1 = arith.constant 0 : i32
    return %arg0, %c0_i32, %c0_i32_0 : i32, i32, i32
  }
  func.func @transform_8(%arg0: i32) -> (i32, i32) {
    %c0_i32 = arith.constant 0 : i32
    %c0_i32_0 = arith.constant 0 : i32
    %c0_i32_1 = arith.constant 0 : i32
    return %c0_i32, %c0_i32_0 : i32, i32
  }
  func.func @transform_9(%arg0: i32) -> (i32, i32) {
    %c0_i32 = arith.constant 0 : i32
    %c0_i32_0 = arith.constant 0 : i32
    %c0_i32_1 = arith.constant 0 : i32
    return %c0_i32, %c0_i32_0 : i32, i32
  }
}

</mosaic_0001>

<bundles_post_ra>
// kernel: up_block_forward.4
= control target key start
LH: loop header
LB: loop body
LE: loop exit
PB: predicated region body
PF: predicated region fallthrough
CT: control target
= control target key end

     0   :  { %vm38_vm0 = vcmask 64512   ;;  %vm232_vm1 = vcmask 130048   ;;  %s469_s1 = inlined_call_operand.vmem [shape: f32[8,16], index: 1, kind: input, shape index: {}]   ;;  %s470_s0 = inlined_call_operand.vmem [shape: f32[128,8], index: 0, kind: input, shape index: {}]   ;;  %s471_s2 = inlined_call_operand.vmem [shape: f32[1,16], index: 2, kind: input, shape index: {}]   ;;  %s472_s3 = inlined_call_operand.vmem [shape: f32[128,16], index: 3, kind: output, shape index: {}]  }
   0x1   :  { %v30_v0 = vld [vmem:[%s469_s1] sm:$0xff]  ;;  %v15_v3 = vld [vmem:[%s470_s0 + $0x8] sm:$0xff]  ;;  %v16_v5 = vld [vmem:[%s470_s0 + $0x10] sm:$0xff] }
   0x2   :  { %v14_v1 = vld [vmem:[%s470_s0] sm:$0xff]  ;;  %287 = vmatprep.subr.mxu0 %v30_v0  ;;  %313 = vmatprep.subr.mxu1 %v30_v0  ;;  %v23_v4 = vld [vmem:[%s470_s0 + $0x48] sm:$0xff]  ;;  %v24_v6 = vld [vmem:[%s470_s0 + $0x50] sm:$0xff] }
   0x3   :  { %v22_v2 = vld [vmem:[%s470_s0 + $0x40] sm:$0xff]  ;;  %288 = vmatpush3.msra.mxu0 %v30_v0  ;;  %314 = vmatpush3.msra.mxu1 %v30_v0  ;;  %v17_v7 = vld [vmem:[%s470_s0 + $0x18] sm:$0xff]  ;;  %v19_v11 = vld [vmem:[%s470_s0 + $0x28] sm:$0xff] }
   0x4   :  { %289 = vmatprep.mubr.msk.f32.mxu0 %vm38_vm0, %v14_v1  ;;  %301 = vmatprep.mubr.msk.f32.mxu1 %vm38_vm0, %v22_v2  ;;  %v25_v8 = vld [vmem:[%s470_s0 + $0x58] sm:$0xff]  ;;  %v18_v9 = vld [vmem:[%s470_s0 + $0x20] sm:$0xff]  ;;  %v27_v12 = vld [vmem:[%s470_s0 + $0x68] sm:$0xff] }
   0x5   :  { %290 = vmatmul.mubr.msk.f32.vlgmr.msra.gmra.mrb[0].mxu0 %vm38_vm0, %v15_v3  ;;  %302 = vmatmul.mubr.msk.f32.vlgmr.msra.gmra.mrb[0].mxu1 %vm38_vm0, %v23_v4  ;;  %v26_v10 = vld [vmem:[%s470_s0 + $0x60] sm:$0xff]  ;;  %v20_v13 = vld [vmem:[%s470_s0 + $0x30] sm:$0xff]  ;;  %v21_v15 = vld [vmem:[%s470_s0 + $0x38] sm:$0xff] }
   0x6   :  { %292 = vmatprep.mubr.msk.f32.mxu0 %vm38_vm0, %v16_v5  ;;  %304 = vmatprep.mubr.msk.f32.mxu1 %vm38_vm0, %v24_v6  ;;  %v28_v14 = vld [vmem:[%s470_s0 + $0x70] sm:$0xff]  ;;  %v29_v16 = vld [vmem:[%s470_s0 + $0x78] sm:$0xff]  ;;  %v253_v17 = vld [vmem:[%s471_s2] ss:$0 sm:$0xff] }
   0x9   :  { %293 = vmatmul.mubr.msk.f32.gmra.mrb[2].mxu0 %vm38_vm0, %v17_v7  ;;  %305 = vmatmul.mubr.msk.f32.gmra.mrb[2].mxu1 %vm38_vm0, %v25_v8 }
   0xa   :  { %295 = vmatprep.mubr.msk.f32.mxu0 %vm38_vm0, %v18_v9  ;;  %307 = vmatprep.mubr.msk.f32.mxu1 %vm38_vm0, %v26_v10 }
   0xd   :  { %296 = vmatmul.mubr.msk.f32.gmra.mrb[4].mxu0 %vm38_vm0, %v19_v11  ;;  %308 = vmatmul.mubr.msk.f32.gmra.mrb[4].mxu1 %vm38_vm0, %v27_v12 }
   0xe   :  { %298 = vmatprep.mubr.msk.f32.mxu0 %vm38_vm0, %v20_v13  ;;  %310 = vmatprep.mubr.msk.f32.mxu1 %vm38_vm0, %v28_v14 }
  0x11   :  { %299 = vmatmul.mubr.msk.f32.gmra.mrb[6].mxu0 %vm38_vm0, %v21_v15  ;;  %311 = vmatmul.mubr.msk.f32.gmra.mrb[6].mxu1 %vm38_vm0, %v29_v16 }
  0xd8   :  { %v291_v18 = vpop.f32.mrb[0].mxu0  ;;  %v303_v19 = vpop.f32.mrb[0].mxu1 }
  0xd9   :  { %v159_v20 = vadd.f32 %v291_v18, %v253_v17  ;;  %v199_v21 = vadd.f32 %v303_v19, %v253_v17  ;;  %v153_v22 = vpop.f32.mrb[1].mxu0  ;;  %v193_v23 = vpop.f32.mrb[1].mxu1 }
  0xda   :  { %v154_v24 = vadd.f32 %v253_v17, %v153_v22  ;;  %v194_v25 = vadd.f32 %v253_v17, %v193_v23 }
  0xdb   :  { %234 = vst.msk [vmem:[%s472_s3 + $0x8] sm:$0xff] %vm232_vm1, %v159_v20  ;;  %242 = vst.msk [vmem:[%s472_s3 + $0x48] sm:$0xff] %vm232_vm1, %v199_v21 }
  0xdc   :  { %233 = vst.msk [vmem:[%s472_s3] sm:$0xff] %vm232_vm1, %v154_v24  ;;  %241 = vst.msk [vmem:[%s472_s3 + $0x40] sm:$0xff] %vm232_vm1, %v194_v25  ;;  %v294_v26 = vpop.f32.mrb[2].mxu0  ;;  %v306_v27 = vpop.f32.mrb[2].mxu1 }
  0xdd   :  { %v169_v28 = vadd.f32 %v294_v26, %v253_v17  ;;  %v209_v29 = vadd.f32 %v306_v27, %v253_v17  ;;  %v163_v30 = vpop.f32.mrb[3].mxu0  ;;  %v203_v31 = vpop.f32.mrb[3].mxu1 }
  0xde   :  { %v164_v32 = vadd.f32 %v253_v17, %v163_v30  ;;  %v204_v33 = vadd.f32 %v253_v17, %v203_v31 }
  0xdf   :  { %236 = vst.msk [vmem:[%s472_s3 + $0x18] sm:$0xff] %vm232_vm1, %v169_v28  ;;  %244 = vst.msk [vmem:[%s472_s3 + $0x58] sm:$0xff] %vm232_vm1, %v209_v29 }
  0xe0   :  { %235 = vst.msk [vmem:[%s472_s3 + $0x10] sm:$0xff] %vm232_vm1, %v164_v32  ;;  %243 = vst.msk [vmem:[%s472_s3 + $0x50] sm:$0xff] %vm232_vm1, %v204_v33  ;;  %v297_v34 = vpop.f32.mrb[4].mxu0  ;;  %v309_v35 = vpop.f32.mrb[4].mxu1 }
  0xe1   :  { %v179_v36 = vadd.f32 %v297_v34, %v253_v17  ;;  %v219_v37 = vadd.f32 %v309_v35, %v253_v17  ;;  %v173_v38 = vpop.f32.mrb[5].mxu0  ;;  %v213_v39 = vpop.f32.mrb[5].mxu1 }
  0xe2   :  { %v174_v40 = vadd.f32 %v253_v17, %v173_v38  ;;  %v214_v41 = vadd.f32 %v253_v17, %v213_v39 }
  0xe3   :  { %238 = vst.msk [vmem:[%s472_s3 + $0x28] sm:$0xff] %vm232_vm1, %v179_v36  ;;  %246 = vst.msk [vmem:[%s472_s3 + $0x68] sm:$0xff] %vm232_vm1, %v219_v37 }
  0xe4   :  { %237 = vst.msk [vmem:[%s472_s3 + $0x20] sm:$0xff] %vm232_vm1, %v174_v40  ;;  %245 = vst.msk [vmem:[%s472_s3 + $0x60] sm:$0xff] %vm232_vm1, %v214_v41  ;;  %v300_v42 = vpop.f32.mrb[6].mxu0  ;;  %v312_v43 = vpop.f32.mrb[6].mxu1 }
  0xe5   :  { %v189_v44 = vadd.f32 %v300_v42, %v253_v17  ;;  %v229_v45 = vadd.f32 %v312_v43, %v253_v17  ;;  %v183_v46 = vpop.f32.mrb[7].mxu0  ;;  %v223_v47 = vpop.f32.mrb[7].mxu1 }
  0xe6   :  { %v184_v48 = vadd.f32 %v253_v17, %v183_v46  ;;  %v224_v49 = vadd.f32 %v253_v17, %v223_v47 }
  0xe7   :  { %240 = vst.msk [vmem:[%s472_s3 + $0x38] sm:$0xff] %vm232_vm1, %v189_v44  ;;  %248 = vst.msk [vmem:[%s472_s3 + $0x78] sm:$0xff] %vm232_vm1, %v229_v45 }
  0xe8   :  { %239 = vst.msk [vmem:[%s472_s3 + $0x30] sm:$0xff] %vm232_vm1, %v184_v48  ;;  %247 = vst.msk [vmem:[%s472_s3 + $0x70] sm:$0xff] %vm232_vm1, %v224_v49 }

// kernel: up_block_forward.7
= control target key start
LH: loop header
LB: loop body
LE: loop exit
PB: predicated region body
PF: predicated region fallthrough
CT: control target
= control target key end

     0   :  { %vm443_vm0 = vcmask 31744   ;;  %s1382_s0 = inlined_call_operand.vmem [shape: f32[648,4], index: 0, kind: input, shape index: {}]   ;;  %s1383_s1 = inlined_call_operand.vmem [shape: f32[1,4], index: 1, kind: input, shape index: {}]   ;;  %s1384_s2 = inlined_call_operand.vmem [shape: f32[1,4], index: 2, kind: input, shape index: {}]   ;;  %s1385_s3 = inlined_call_operand.vmem [shape: f32[1,4], index: 3, kind: input, shape index: {}]   ;;  %s1386_s4 = inlined_call_operand.vmem [shape: f32[648,4], index: 4, kind: output, shape index: {}]  }
   0x1   :  { %v17_v0 = vld [vmem:[%s1382_s0] sm:$0xff]  ;;  %v18_v5 = vld [vmem:[%s1382_s0 + $0x8] sm:$0xff]  ;;  %v19_v6 = vld [vmem:[%s1382_s0 + $0x10] sm:$0xff] }
   0x2   :  { %v563_v1 = vld [vmem:[%s1383_s1] ss:$0 sm:$0xff]  ;;  %v20_v9 = vld [vmem:[%s1382_s0 + $0x18] sm:$0xff]  ;;  %v22_v11 = vld [vmem:[%s1382_s0 + $0x28] sm:$0xff] }
   0x3   :  { %v568_v2 = vld [vmem:[%s1384_s2] ss:$0 sm:$0xff]  ;;  %v105_v3 = vsub.f32 %v17_v0, %v563_v1  ;;  %v106_v7 = vsub.f32 %v18_v5, %v563_v1  ;;  %v107_v8 = vsub.f32 %v19_v6, %v563_v1  ;;  %v108_v13 = vsub.f32 %v20_v9, %v563_v1  ;;  %v23_v16 = vld [vmem:[%s1382_s0 + $0x30] sm:$0xff]  ;;  %v24_v17 = vld [vmem:[%s1382_s0 + $0x38] sm:$0xff] }
   0x4   :  { %v574_v4 = vld [vmem:[%s1385_s3] ss:$0 sm:$0xff]  ;;  %v110_v15 = vsub.f32 %v22_v11, %v563_v1  ;;  %v111_v20 = vsub.f32 %v23_v16, %v563_v1  ;;  %v112_v21 = vsub.f32 %v24_v17, %v563_v1  ;;  %v26_v35 = vld [vmem:[%s1382_s0 + $0x48] sm:$0xff]  ;;  %v27_v36 = vld [vmem:[%s1382_s0 + $0x50] sm:$0xff] }
   0x5   :  { %v21_v10 = vld [vmem:[%s1382_s0 + $0x20] sm:$0xff]  ;;  %v193_v12 = vmul.f32 %v568_v2, %v105_v3  ;;  %v194_v18 = vmul.f32 %v568_v2, %v106_v7  ;;  %v195_v19 = vmul.f32 %v568_v2, %v107_v8  ;;  %v196_v23 = vmul.f32 %v568_v2, %v108_v13  ;;  %v28_v41 = vld [vmem:[%s1382_s0 + $0x58] sm:$0xff]  ;;  %v30_v43 = vld [vmem:[%s1382_s0 + $0x68] sm:$0xff] }
   0x6   :  { %v109_v14 = vsub.f32 %v21_v10, %v563_v1  ;;  %v198_v25 = vmul.f32 %v568_v2, %v110_v15  ;;  %v199_v28 = vmul.f32 %v568_v2, %v111_v20  ;;  %v200_v29 = vmul.f32 %v568_v2, %v112_v21  ;;  %v25_v30 = vld [vmem:[%s1382_s0 + $0x40] sm:$0xff]  ;;  %v31_v48 = vld [vmem:[%s1382_s0 + $0x70] sm:$0xff]  ;;  %v32_v49 = vld [vmem:[%s1382_s0 + $0x78] sm:$0xff] }
   0x7   :  { %v281_v22 = vadd.f32 %v574_v4, %v193_v12  ;;  %v282_v26 = vadd.f32 %v574_v4, %v194_v18  ;;  %v283_v27 = vadd.f32 %v574_v4, %v195_v19  ;;  %v284_v32 = vadd.f32 %v574_v4, %v196_v23  ;;  %v29_v42 = vld [vmem:[%s1382_s0 + $0x60] sm:$0xff]  ;;  %v35_v15 = vld [vmem:[%s1382_s0 + $0x90] sm:$0xff]  ;;  %v36_v20 = vld [vmem:[%s1382_s0 + $0x98] sm:$0xff] }
   0x8   :  { %v197_v24 = vmul.f32 %v568_v2, %v109_v14  ;;  %v286_v34 = vadd.f32 %v574_v4, %v198_v25  ;;  %v287_v39 = vadd.f32 %v574_v4, %v199_v28  ;;  %v288_v40 = vadd.f32 %v574_v4, %v200_v29  ;;  %v33_v9 = vld [vmem:[%s1382_s0 + $0x80] sm:$0xff]  ;;  %v34_v14 = vld [vmem:[%s1382_s0 + $0x88] sm:$0xff]  ;;  %v40_v28 = vld [vmem:[%s1382_s0 + $0xb8] sm:$0xff] }
   0x9   :  { %v362_v31 = vmax.f32 %v281_v22, 0.0  ;;  %v363_v37 = vmax.f32 %v282_v26, 0.0  ;;  %v364_v38 = vmax.f32 %v283_v27, 0.0  ;;  %v365_v44 = vmax.f32 %v284_v32, 0.0  ;;  %v37_v21 = vld [vmem:[%s1382_s0 + $0xa0] sm:$0xff]  ;;  %v38_v22 = vld [vmem:[%s1382_s0 + $0xa8] sm:$0xff] }
   0xa   :  { %v285_v33 = vadd.f32 %v574_v4, %v197_v24  ;;  %v367_v46 = vmax.f32 %v286_v34, 0.0  ;;  %v113_v47 = vsub.f32 %v25_v30, %v563_v1  ;;  %v368_v50 = vmax.f32 %v287_v39, 0.0  ;;  %v39_v27 = vld [vmem:[%s1382_s0 + $0xb0] sm:$0xff] }
   0xb   :  { %444 = vst.msk [vmem:[%s1386_s4] sm:$0xff] %vm443_vm0, %v362_v31  ;;  %445 = vst.msk [vmem:[%s1386_s4 + $0x8] sm:$0xff] %vm443_vm0, %v363_v37  ;;  %v369_v51 = vmax.f32 %v288_v40, 0.0  ;;  %v114_v52 = vsub.f32 %v26_v35, %v563_v1  ;;  %v115_v53 = vsub.f32 %v27_v36, %v563_v1  ;;  %v116_v55 = vsub.f32 %v28_v41, %v563_v1 }
   0xc   :  { %v366_v45 = vmax.f32 %v285_v33, 0.0  ;;  %446 = vst.msk [vmem:[%s1386_s4 + $0x10] sm:$0xff] %vm443_vm0, %v364_v38  ;;  %447 = vst.msk [vmem:[%s1386_s4 + $0x18] sm:$0xff] %vm443_vm0, %v365_v44  ;;  %v201_v54 = vmul.f32 %v568_v2, %v113_v47  ;;  %v117_v56 = vsub.f32 %v29_v42, %v563_v1  ;;  %v118_v57 = vsub.f32 %v30_v43, %v563_v1 }
   0xd   :  { %449 = vst.msk [vmem:[%s1386_s4 + $0x28] sm:$0xff] %vm443_vm0, %v367_v46  ;;  %450 = vst.msk [vmem:[%s1386_s4 + $0x30] sm:$0xff] %vm443_vm0, %v368_v50  ;;  %v202_v58 = vmul.f32 %v568_v2, %v114_v52  ;;  %v203_v59 = vmul.f32 %v568_v2, %v115_v53  ;;  %v119_v60 = vsub.f32 %v31_v48, %v563_v1 }
   0xe   :  { %448 = vst.msk [vmem:[%s1386_s4 + $0x20] sm:$0xff] %vm443_vm0, %v366_v45  ;;  %451 = vst.msk [vmem:[%s1386_s4 + $0x38] sm:$0xff] %vm443_vm0, %v369_v51  ;;  %v120_v61 = vsub.f32 %v32_v49, %v563_v1  ;;  %v289_v62 = vadd.f32 %v574_v4, %v201_v54  ;;  %v204_v63 = vmul.f32 %v568_v2, %v116_v55  ;;  %v41_v49 = vld [vmem:[%s1382_s0 + $0xc0] sm:$0xff]  ;;  %v42_v54 = vld [vmem:[%s1382_s0 + $0xc8] sm:$0xff] }
   0xf   :  { %v205_v0 = vmul.f32 %v568_v2, %v117_v56  ;;  %v206_v3 = vmul.f32 %v568_v2, %v118_v57  ;;  %v290_v5 = vadd.f32 %v574_v4, %v202_v58  ;;  %v291_v6 = vadd.f32 %v574_v4, %v203_v59  ;;  %v43_v55 = vld [vmem:[%s1382_s0 + $0xd0] sm:$0xff] }
  0x10   :  { %v207_v7 = vmul.f32 %v568_v2, %v119_v60  ;;  %v208_v8 = vmul.f32 %v568_v2, %v120_v61  ;;  %v370_v10 = vmax.f32 %v289_v62, 0.0  ;;  %v292_v11 = vadd.f32 %v574_v4, %v204_v63  ;;  %v44_v60 = vld [vmem:[%s1382_s0 + $0xd8] sm:$0xff]  ;;  %v45_v61 = vld [vmem:[%s1382_s0 + $0xe0] sm:$0xff]  ;;  %v46_v62 = vld [vmem:[%s1382_s0 + $0xe8] sm:$0xff] }
  0x11   :  { %v293_v12 = vadd.f32 %v574_v4, %v205_v0  ;;  %v294_v13 = vadd.f32 %v574_v4, %v206_v3  ;;  %v371_v16 = vmax.f32 %v290_v5, 0.0  ;;  %v372_v17 = vmax.f32 %v291_v6, 0.0  ;;  %v47_v6 = vld [vmem:[%s1382_s0 + $0xf0] sm:$0xff] }
  0x12   :  { %v295_v18 = vadd.f32 %v574_v4, %v207_v7  ;;  %v296_v19 = vadd.f32 %v574_v4, %v208_v8  ;;  %452 = vst.msk [vmem:[%s1386_s4 + $0x40] sm:$0xff] %vm443_vm0, %v370_v10  ;;  %v373_v23 = vmax.f32 %v292_v11, 0.0  ;;  %v121_v26 = vsub.f32 %v33_v9, %v563_v1  ;;  %v48_v7 = vld [vmem:[%s1382_s0 + $0xf8] sm:$0xff] }
  0x13   :  { %v374_v24 = vmax.f32 %v293_v12, 0.0  ;;  %v375_v25 = vmax.f32 %v294_v13, 0.0  ;;  %453 = vst.msk [vmem:[%s1386_s4 + $0x48] sm:$0xff] %vm443_vm0, %v371_v16  ;;  %454 = vst.msk [vmem:[%s1386_s4 + $0x50] sm:$0xff] %vm443_vm0, %v372_v17  ;;  %v122_v31 = vsub.f32 %v34_v14, %v563_v1  ;;  %v123_v32 = vsub.f32 %v35_v15, %v563_v1 }
  0x14   :  { %v376_v29 = vmax.f32 %v295_v18, 0.0  ;;  %v377_v30 = vmax.f32 %v296_v19, 0.0  ;;  %455 = vst.msk [vmem:[%s1386_s4 + $0x58] sm:$0xff] %vm443_vm0, %v373_v23  ;;  %v209_v33 = vmul.f32 %v568_v2, %v121_v26  ;;  %v124_v34 = vsub.f32 %v36_v20, %v563_v1 }
  0x15   :  { %456 = vst.msk [vmem:[%s1386_s4 + $0x60] sm:$0xff] %vm443_vm0, %v374_v24  ;;  %457 = vst.msk [vmem:[%s1386_s4 + $0x68] sm:$0xff] %vm443_vm0, %v375_v25  ;;  %v125_v35 = vsub.f32 %v37_v21, %v563_v1  ;;  %v126_v36 = vsub.f32 %v38_v22, %v563_v1  ;;  %v210_v37 = vmul.f32 %v568_v2, %v122_v31 }
  0x16   :  { %458 = vst.msk [vmem:[%s1386_s4 + $0x70] sm:$0xff] %vm443_vm0, %v376_v29  ;;  %459 = vst.msk [vmem:[%s1386_s4 + $0x78] sm:$0xff] %vm443_vm0, %v377_v30  ;;  %v211_v38 = vmul.f32 %v568_v2, %v123_v32  ;;  %v127_v39 = vsub.f32 %v39_v27, %v563_v1  ;;  %v128_v40 = vsub.f32 %v40_v28, %v563_v1  ;;  %v49_v28 = vld [vmem:[%s1382_s0 + $0x100] sm:$0xff] }
  0x17   :  { %v297_v41 = vadd.f32 %v574_v4, %v209_v33  ;;  %v212_v42 = vmul.f32 %v568_v2, %v124_v34  ;;  %v213_v43 = vmul.f32 %v568_v2, %v125_v35  ;;  %v214_v44 = vmul.f32 %v568_v2, %v126_v36  ;;  %v50_v33 = vld [vmem:[%s1382_s0 + $0x108] sm:$0xff]  ;;  %v51_v34 = vld [vmem:[%s1382_s0 + $0x110] sm:$0xff] }
  0x18   :  { %v298_v45 = vadd.f32 %v574_v4, %v210_v37  ;;  %v299_v46 = vadd.f32 %v574_v4, %v211_v38  ;;  %v215_v47 = vmul.f32 %v568_v2, %v127_v39  ;;  %v216_v48 = vmul.f32 %v568_v2, %v128_v40  ;;  %v52_v39 = vld [vmem:[%s1382_s0 + $0x118] sm:$0xff]  ;;  %v53_v40 = vld [vmem:[%s1382_s0 + $0x120] sm:$0xff] }
  0x19   :  { %v378_v50 = vmax.f32 %v297_v41, 0.0  ;;  %v300_v51 = vadd.f32 %v574_v4, %v212_v42  ;;  %v301_v52 = vadd.f32 %v574_v4, %v213_v43  ;;  %v302_v53 = vadd.f32 %v574_v4, %v214_v44  ;;  %v54_v41 = vld [vmem:[%s1382_s0 + $0x128] sm:$0xff] }
  0x1a   :  { %v379_v56 = vmax.f32 %v298_v45, 0.0  ;;  %v380_v57 = vmax.f32 %v299_v46, 0.0  ;;  %v303_v58 = vadd.f32 %v574_v4, %v215_v47  ;;  %v304_v59 = vadd.f32 %v574_v4, %v216_v48  ;;  %v55_v46 = vld [vmem:[%s1382_s0 + $0x130] sm:$0xff]  ;;  %v56_v47 = vld [vmem:[%s1382_s0 + $0x138] sm:$0xff] }
  0x1b   :  { %460 = vst.msk [vmem:[%s1386_s4 + $0x80] sm:$0xff] %vm443_vm0, %v378_v50  ;;  %v381_v63 = vmax.f32 %v300_v51, 0.0  ;;  %v382_v0 = vmax.f32 %v301_v52, 0.0  ;;  %v383_v3 = vmax.f32 %v302_v53, 0.0  ;;  %v129_v5 = vsub.f32 %v41_v49, %v563_v1 }
  0x1c   :  { %461 = vst.msk [vmem:[%s1386_s4 + $0x88] sm:$0xff] %vm443_vm0, %v379_v56  ;;  %462 = vst.msk [vmem:[%s1386_s4 + $0x90] sm:$0xff] %vm443_vm0, %v380_v57  ;;  %v384_v8 = vmax.f32 %v303_v58, 0.0  ;;  %v385_v9 = vmax.f32 %v304_v59, 0.0  ;;  %v130_v10 = vsub.f32 %v42_v54, %v563_v1  ;;  %v131_v11 = vsub.f32 %v43_v55, %v563_v1 }
  0x1d   :  { %463 = vst.msk [vmem:[%s1386_s4 + $0x98] sm:$0xff] %vm443_vm0, %v381_v63  ;;  %464 = vst.msk [vmem:[%s1386_s4 + $0xa0] sm:$0xff] %vm443_vm0, %v382_v0  ;;  %v217_v12 = vmul.f32 %v568_v2, %v129_v5  ;;  %v132_v13 = vsub.f32 %v44_v60, %v563_v1  ;;  %v133_v14 = vsub.f32 %v45_v61, %v563_v1 }
  0x1e   :  { %465 = vst.msk [vmem:[%s1386_s4 + $0xa8] sm:$0xff] %vm443_vm0, %v383_v3  ;;  %v134_v15 = vsub.f32 %v46_v62, %v563_v1  ;;  %466 = vst.msk [vmem:[%s1386_s4 + $0xb0] sm:$0xff] %vm443_vm0, %v384_v8  ;;  %v218_v16 = vmul.f32 %v568_v2, %v130_v10  ;;  %v219_v17 = vmul.f32 %v568_v2, %v131_v11 }
  0x1f   :  { %467 = vst.msk [vmem:[%s1386_s4 + $0xb8] sm:$0xff] %vm443_vm0, %v385_v9  ;;  %v135_v18 = vsub.f32 %v47_v6, %v563_v1  ;;  %v136_v19 = vsub.f32 %v48_v7, %v563_v1  ;;  %v305_v20 = vadd.f32 %v574_v4, %v217_v12  ;;  %v220_v21 = vmul.f32 %v568_v2, %v132_v13  ;;  %v57_v7 = vld [vmem:[%s1382_s0 + $0x140] sm:$0xff]  ;;  %v58_v12 = vld [vmem:[%s1382_s0 + $0x148] sm:$0xff]  ;;  %v59_v13 = vld [vmem:[%s1382_s0 + $0x150] sm:$0xff] }
  0x20   :  { %v221_v22 = vmul.f32 %v568_v2, %v133_v14  ;;  %v222_v23 = vmul.f32 %v568_v2, %v134_v15  ;;  %v306_v24 = vadd.f32 %v574_v4, %v218_v16  ;;  %v307_v25 = vadd.f32 %v574_v4, %v219_v17 }
  0x21   :  { %v223_v26 = vmul.f32 %v568_v2, %v135_v18  ;;  %v224_v27 = vmul.f32 %v568_v2, %v136_v19  ;;  %v386_v29 = vmax.f32 %v305_v20, 0.0  ;;  %v308_v30 = vadd.f32 %v574_v4, %v220_v21  ;;  %v60_v18 = vld [vmem:[%s1382_s0 + $0x158] sm:$0xff]  ;;  %v61_v19 = vld [vmem:[%s1382_s0 + $0x160] sm:$0xff]  ;;  %v62_v20 = vld [vmem:[%s1382_s0 + $0x168] sm:$0xff] }
  0x22   :  { %v309_v31 = vadd.f32 %v574_v4, %v221_v22  ;;  %v310_v32 = vadd.f32 %v574_v4, %v222_v23  ;;  %v387_v35 = vmax.f32 %v306_v24, 0.0  ;;  %v388_v36 = vmax.f32 %v307_v25, 0.0  ;;  %v63_v25 = vld [vmem:[%s1382_s0 + $0x170] sm:$0xff] }
  0x23   :  { %v311_v37 = vadd.f32 %v574_v4, %v223_v26  ;;  %v312_v38 = vadd.f32 %v574_v4, %v224_v27  ;;  %468 = vst.msk [vmem:[%s1386_s4 + $0xc0] sm:$0xff] %vm443_vm0, %v386_v29  ;;  %v389_v42 = vmax.f32 %v308_v30, 0.0  ;;  %v137_v45 = vsub.f32 %v49_v28, %v563_v1  ;;  %v64_v26 = vld [vmem:[%s1382_s0 + $0x178] sm:$0xff] }
  0x24   :  { %v390_v43 = vmax.f32 %v309_v31, 0.0  ;;  %v391_v44 = vmax.f32 %v310_v32, 0.0  ;;  %469 = vst.msk [vmem:[%s1386_s4 + $0xc8] sm:$0xff] %vm443_vm0, %v387_v35  ;;  %470 = vst.msk [vmem:[%s1386_s4 + $0xd0] sm:$0xff] %vm443_vm0, %v388_v36  ;;  %v138_v50 = vsub.f32 %v50_v33, %v563_v1  ;;  %v139_v51 = vsub.f32 %v51_v34, %v563_v1 }
  0x25   :  { %v392_v48 = vmax.f32 %v311_v37, 0.0  ;;  %v393_v49 = vmax.f32 %v312_v38, 0.0  ;;  %471 = vst.msk [vmem:[%s1386_s4 + $0xd8] sm:$0xff] %vm443_vm0, %v389_v42  ;;  %v225_v52 = vmul.f32 %v568_v2, %v137_v45  ;;  %v140_v53 = vsub.f32 %v52_v39, %v563_v1 }
  0x26   :  { %472 = vst.msk [vmem:[%s1386_s4 + $0xe0] sm:$0xff] %vm443_vm0, %v390_v43  ;;  %473 = vst.msk [vmem:[%s1386_s4 + $0xe8] sm:$0xff] %vm443_vm0, %v391_v44  ;;  %v141_v54 = vsub.f32 %v53_v40, %v563_v1  ;;  %v142_v55 = vsub.f32 %v54_v41, %v563_v1  ;;  %v226_v56 = vmul.f32 %v568_v2, %v138_v50 }
  0x27   :  { %474 = vst.msk [vmem:[%s1386_s4 + $0xf0] sm:$0xff] %vm443_vm0, %v392_v48  ;;  %475 = vst.msk [vmem:[%s1386_s4 + $0xf8] sm:$0xff] %vm443_vm0, %v393_v49  ;;  %v227_v57 = vmul.f32 %v568_v2, %v139_v51  ;;  %v143_v58 = vsub.f32 %v55_v46, %v563_v1  ;;  %v144_v59 = vsub.f32 %v56_v47, %v563_v1  ;;  %v65_v47 = vld [vmem:[%s1382_s0 + $0x180] sm:$0xff] }
  0x28   :  { %v313_v60 = vadd.f32 %v574_v4, %v225_v52  ;;  %v228_v61 = vmul.f32 %v568_v2, %v140_v53  ;;  %v229_v62 = vmul.f32 %v568_v2, %v141_v54  ;;  %v230_v63 = vmul.f32 %v568_v2, %v142_v55  ;;  %v66_v52 = vld [vmem:[%s1382_s0 + $0x188] sm:$0xff]  ;;  %v67_v53 = vld [vmem:[%s1382_s0 + $0x190] sm:$0xff] }
  0x29   :  { %v314_v0 = vadd.f32 %v574_v4, %v226_v56  ;;  %v315_v3 = vadd.f32 %v574_v4, %v227_v57  ;;  %v231_v5 = vmul.f32 %v568_v2, %v143_v58  ;;  %v232_v6 = vmul.f32 %v568_v2, %v144_v59  ;;  %v68_v58 = vld [vmem:[%s1382_s0 + $0x198] sm:$0xff]  ;;  %v69_v59 = vld [vmem:[%s1382_s0 + $0x1a0] sm:$0xff] }
  0x2a   :  { %v394_v8 = vmax.f32 %v313_v60, 0.0  ;;  %v316_v9 = vadd.f32 %v574_v4, %v228_v61  ;;  %v317_v10 = vadd.f32 %v574_v4, %v229_v62  ;;  %v318_v11 = vadd.f32 %v574_v4, %v230_v63  ;;  %v70_v60 = vld [vmem:[%s1382_s0 + $0x1a8] sm:$0xff] }
  0x2b   :  { %v395_v14 = vmax.f32 %v314_v0, 0.0  ;;  %v396_v15 = vmax.f32 %v315_v3, 0.0  ;;  %v319_v16 = vadd.f32 %v574_v4, %v231_v5  ;;  %v320_v17 = vadd.f32 %v574_v4, %v232_v6  ;;  %v71_v3 = vld [vmem:[%s1382_s0 + $0x1b0] sm:$0xff]  ;;  %v72_v5 = vld [vmem:[%s1382_s0 + $0x1b8] sm:$0xff] }
  0x2c   :  { %476 = vst.msk [vmem:[%s1386_s4 + $0x100] sm:$0xff] %vm443_vm0, %v394_v8  ;;  %v397_v21 = vmax.f32 %v316_v9, 0.0  ;;  %v398_v22 = vmax.f32 %v317_v10, 0.0  ;;  %v399_v23 = vmax.f32 %v318_v11, 0.0  ;;  %v145_v24 = vsub.f32 %v57_v7, %v563_v1 }
  0x2d   :  { %477 = vst.msk [vmem:[%s1386_s4 + $0x108] sm:$0xff] %vm443_vm0, %v395_v14  ;;  %478 = vst.msk [vmem:[%s1386_s4 + $0x110] sm:$0xff] %vm443_vm0, %v396_v15  ;;  %v400_v27 = vmax.f32 %v319_v16, 0.0  ;;  %v401_v28 = vmax.f32 %v320_v17, 0.0  ;;  %v146_v29 = vsub.f32 %v58_v12, %v563_v1  ;;  %v147_v30 = vsub.f32 %v59_v13, %v563_v1 }
  0x2e   :  { %479 = vst.msk [vmem:[%s1386_s4 + $0x118] sm:$0xff] %vm443_vm0, %v397_v21  ;;  %480 = vst.msk [vmem:[%s1386_s4 + $0x120] sm:$0xff] %vm443_vm0, %v398_v22  ;;  %v233_v31 = vmul.f32 %v568_v2, %v145_v24  ;;  %v148_v32 = vsub.f32 %v60_v18, %v563_v1  ;;  %v149_v33 = vsub.f32 %v61_v19, %v563_v1 }
  0x2f   :  { %481 = vst.msk [vmem:[%s1386_s4 + $0x128] sm:$0xff] %vm443_vm0, %v399_v23  ;;  %v150_v34 = vsub.f32 %v62_v20, %v563_v1  ;;  %482 = vst.msk [vmem:[%s1386_s4 + $0x130] sm:$0xff] %vm443_vm0, %v400_v27  ;;  %v234_v35 = vmul.f32 %v568_v2, %v146_v29  ;;  %v235_v36 = vmul.f32 %v568_v2, %v147_v30 }
  0x30   :  { %483 = vst.msk [vmem:[%s1386_s4 + $0x138] sm:$0xff] %vm443_vm0, %v401_v28  ;;  %v151_v37 = vsub.f32 %v63_v25, %v563_v1  ;;  %v152_v38 = vsub.f32 %v64_v26, %v563_v1  ;;  %v321_v39 = vadd.f32 %v574_v4, %v233_v31  ;;  %v236_v40 = vmul.f32 %v568_v2, %v148_v32  ;;  %v73_v26 = vld [vmem:[%s1382_s0 + $0x1c0] sm:$0xff]  ;;  %v74_v31 = vld [vmem:[%s1382_s0 + $0x1c8] sm:$0xff]  ;;  %v75_v32 = vld [vmem:[%s1382_s0 + $0x1d0] sm:$0xff] }
  0x31   :  { %v237_v41 = vmul.f32 %v568_v2, %v149_v33  ;;  %v238_v42 = vmul.f32 %v568_v2, %v150_v34  ;;  %v322_v43 = vadd.f32 %v574_v4, %v234_v35  ;;  %v323_v44 = vadd.f32 %v574_v4, %v235_v36 }
  0x32   :  { %v239_v45 = vmul.f32 %v568_v2, %v151_v37  ;;  %v240_v46 = vmul.f32 %v568_v2, %v152_v38  ;;  %v402_v48 = vmax.f32 %v321_v39, 0.0  ;;  %v324_v49 = vadd.f32 %v574_v4, %v236_v40  ;;  %v76_v37 = vld [vmem:[%s1382_s0 + $0x1d8] sm:$0xff]  ;;  %v77_v38 = vld [vmem:[%s1382_s0 + $0x1e0] sm:$0xff]  ;;  %v78_v39 = vld [vmem:[%s1382_s0 + $0x1e8] sm:$0xff] }
  0x33   :  { %v325_v50 = vadd.f32 %v574_v4, %v237_v41  ;;  %v326_v51 = vadd.f32 %v574_v4, %v238_v42  ;;  %v403_v54 = vmax.f32 %v322_v43, 0.0  ;;  %v404_v55 = vmax.f32 %v323_v44, 0.0  ;;  %v79_v44 = vld [vmem:[%s1382_s0 + $0x1f0] sm:$0xff] }
  0x34   :  { %v327_v56 = vadd.f32 %v574_v4, %v239_v45  ;;  %v328_v57 = vadd.f32 %v574_v4, %v240_v46  ;;  %484 = vst.msk [vmem:[%s1386_s4 + $0x140] sm:$0xff] %vm443_vm0, %v402_v48  ;;  %v405_v61 = vmax.f32 %v324_v49, 0.0  ;;  %v153_v0 = vsub.f32 %v65_v47, %v563_v1  ;;  %v80_v45 = vld [vmem:[%s1382_s0 + $0x1f8] sm:$0xff] }
  0x35   :  { %v406_v62 = vmax.f32 %v325_v50, 0.0  ;;  %v407_v63 = vmax.f32 %v326_v51, 0.0  ;;  %485 = vst.msk [vmem:[%s1386_s4 + $0x148] sm:$0xff] %vm443_vm0, %v403_v54  ;;  %486 = vst.msk [vmem:[%s1386_s4 + $0x150] sm:$0xff] %vm443_vm0, %v404_v55  ;;  %v154_v8 = vsub.f32 %v66_v52, %v563_v1  ;;  %v155_v9 = vsub.f32 %v67_v53, %v563_v1 }
  0x36   :  { %v408_v6 = vmax.f32 %v327_v56, 0.0  ;;  %v409_v7 = vmax.f32 %v328_v57, 0.0  ;;  %487 = vst.msk [vmem:[%s1386_s4 + $0x158] sm:$0xff] %vm443_vm0, %v405_v61  ;;  %v241_v10 = vmul.f32 %v568_v2, %v153_v0  ;;  %v156_v11 = vsub.f32 %v68_v58, %v563_v1 }
  0x37   :  { %488 = vst.msk [vmem:[%s1386_s4 + $0x160] sm:$0xff] %vm443_vm0, %v406_v62  ;;  %489 = vst.msk [vmem:[%s1386_s4 + $0x168] sm:$0xff] %vm443_vm0, %v407_v63  ;;  %v157_v12 = vsub.f32 %v69_v59, %v563_v1  ;;  %v158_v13 = vsub.f32 %v70_v60, %v563_v1  ;;  %v242_v14 = vmul.f32 %v568_v2, %v154_v8 }
  0x38   :  { %490 = vst.msk [vmem:[%s1386_s4 + $0x170] sm:$0xff] %vm443_vm0, %v408_v6  ;;  %491 = vst.msk [vmem:[%s1386_s4 + $0x178] sm:$0xff] %vm443_vm0, %v409_v7  ;;  %v243_v15 = vmul.f32 %v568_v2, %v155_v9  ;;  %v159_v16 = vsub.f32 %v71_v3, %v563_v1  ;;  %v160_v17 = vsub.f32 %v72_v5, %v563_v1  ;;  %v81_v5 = vld [vmem:[%s1382_s0 + $0x200] sm:$0xff] }
  0x39   :  { %v329_v18 = vadd.f32 %v574_v4, %v241_v10  ;;  %v244_v19 = vmul.f32 %v568_v2, %v156_v11  ;;  %v245_v20 = vmul.f32 %v568_v2, %v157_v12  ;;  %v246_v21 = vmul.f32 %v568_v2, %v158_v13  ;;  %v82_v10 = vld [vmem:[%s1382_s0 + $0x208] sm:$0xff]  ;;  %v83_v11 = vld [vmem:[%s1382_s0 + $0x210] sm:$0xff] }
  0x3a   :  { %v330_v22 = vadd.f32 %v574_v4, %v242_v14  ;;  %v331_v23 = vadd.f32 %v574_v4, %v243_v15  ;;  %v247_v24 = vmul.f32 %v568_v2, %v159_v16  ;;  %v248_v25 = vmul.f32 %v568_v2, %v160_v17  ;;  %v84_v16 = vld [vmem:[%s1382_s0 + $0x218] sm:$0xff]  ;;  %v85_v17 = vld [vmem:[%s1382_s0 + $0x220] sm:$0xff] }
  0x3b   :  { %v410_v27 = vmax.f32 %v329_v18, 0.0  ;;  %v332_v28 = vadd.f32 %v574_v4, %v244_v19  ;;  %v333_v29 = vadd.f32 %v574_v4, %v245_v20  ;;  %v334_v30 = vadd.f32 %v574_v4, %v246_v21  ;;  %v86_v18 = vld [vmem:[%s1382_s0 + $0x228] sm:$0xff] }
  0x3c   :  { %v411_v33 = vmax.f32 %v330_v22, 0.0  ;;  %v412_v34 = vmax.f32 %v331_v23, 0.0  ;;  %v335_v35 = vadd.f32 %v574_v4, %v247_v24  ;;  %v336_v36 = vadd.f32 %v574_v4, %v248_v25  ;;  %v87_v23 = vld [vmem:[%s1382_s0 + $0x230] sm:$0xff]  ;;  %v88_v24 = vld [vmem:[%s1382_s0 + $0x238] sm:$0xff] }
  0x3d   :  { %492 = vst.msk [vmem:[%s1386_s4 + $0x180] sm:$0xff] %vm443_vm0, %v410_v27  ;;  %v413_v40 = vmax.f32 %v332_v28, 0.0  ;;  %v414_v41 = vmax.f32 %v333_v29, 0.0  ;;  %v415_v42 = vmax.f32 %v334_v30, 0.0  ;;  %v161_v43 = vsub.f32 %v73_v26, %v563_v1 }
  0x3e   :  { %493 = vst.msk [vmem:[%s1386_s4 + $0x188] sm:$0xff] %vm443_vm0, %v411_v33  ;;  %494 = vst.msk [vmem:[%s1386_s4 + $0x190] sm:$0xff] %vm443_vm0, %v412_v34  ;;  %v416_v46 = vmax.f32 %v335_v35, 0.0  ;;  %v417_v47 = vmax.f32 %v336_v36, 0.0  ;;  %v162_v48 = vsub.f32 %v74_v31, %v563_v1  ;;  %v163_v49 = vsub.f32 %v75_v32, %v563_v1 }
  0x3f   :  { %495 = vst.msk [vmem:[%s1386_s4 + $0x198] sm:$0xff] %vm443_vm0, %v413_v40  ;;  %496 = vst.msk [vmem:[%s1386_s4 + $0x1a0] sm:$0xff] %vm443_vm0, %v414_v41  ;;  %v249_v50 = vmul.f32 %v568_v2, %v161_v43  ;;  %v164_v51 = vsub.f32 %v76_v37, %v563_v1  ;;  %v165_v52 = vsub.f32 %v77_v38, %v563_v1 }
  0x40   :  { %497 = vst.msk [vmem:[%s1386_s4 + $0x1a8] sm:$0xff] %vm443_vm0, %v415_v42  ;;  %v166_v53 = vsub.f32 %v78_v39, %v563_v1  ;;  %498 = vst.msk [vmem:[%s1386_s4 + $0x1b0] sm:$0xff] %vm443_vm0, %v416_v46  ;;  %v250_v54 = vmul.f32 %v568_v2, %v162_v48  ;;  %v251_v55 = vmul.f32 %v568_v2, %v163_v49 }
  0x41   :  { %499 = vst.msk [vmem:[%s1386_s4 + $0x1b8] sm:$0xff] %vm443_vm0, %v417_v47  ;;  %v167_v56 = vsub.f32 %v79_v44, %v563_v1  ;;  %v168_v57 = vsub.f32 %v80_v45, %v563_v1  ;;  %v337_v58 = vadd.f32 %v574_v4, %v249_v50  ;;  %v252_v59 = vmul.f32 %v568_v2, %v164_v51  ;;  %v89_v45 = vld [vmem:[%s1382_s0 + $0x240] sm:$0xff]  ;;  %v90_v50 = vld [vmem:[%s1382_s0 + $0x248] sm:$0xff]  ;;  %v91_v51 = vld [vmem:[%s1382_s0 + $0x250] sm:$0xff] }
  0x42   :  { %v253_v60 = vmul.f32 %v568_v2, %v165_v52  ;;  %v254_v61 = vmul.f32 %v568_v2, %v166_v53  ;;  %v338_v62 = vadd.f32 %v574_v4, %v250_v54  ;;  %v339_v63 = vadd.f32 %v574_v4, %v251_v55 }
  0x43   :  { %v255_v0 = vmul.f32 %v568_v2, %v167_v56  ;;  %v256_v3 = vmul.f32 %v568_v2, %v168_v57  ;;  %v418_v6 = vmax.f32 %v337_v58, 0.0  ;;  %v340_v7 = vadd.f32 %v574_v4, %v252_v59  ;;  %v92_v56 = vld [vmem:[%s1382_s0 + $0x258] sm:$0xff]  ;;  %v93_v57 = vld [vmem:[%s1382_s0 + $0x260] sm:$0xff]  ;;  %v94_v58 = vld [vmem:[%s1382_s0 + $0x268] sm:$0xff] }
  0x44   :  { %v341_v8 = vadd.f32 %v574_v4, %v253_v60  ;;  %v342_v9 = vadd.f32 %v574_v4, %v254_v61  ;;  %v419_v12 = vmax.f32 %v338_v62, 0.0  ;;  %v420_v13 = vmax.f32 %v339_v63, 0.0  ;;  %v95_v63 = vld [vmem:[%s1382_s0 + $0x270] sm:$0xff] }
  0x45   :  { %v343_v14 = vadd.f32 %v574_v4, %v255_v0  ;;  %v344_v15 = vadd.f32 %v574_v4, %v256_v3  ;;  %500 = vst.msk [vmem:[%s1386_s4 + $0x1c0] sm:$0xff] %vm443_vm0, %v418_v6  ;;  %v421_v19 = vmax.f32 %v340_v7, 0.0  ;;  %v169_v22 = vsub.f32 %v81_v5, %v563_v1  ;;  %v96_v0 = vld [vmem:[%s1382_s0 + $0x278] sm:$0xff] }
  0x46   :  { %v422_v20 = vmax.f32 %v341_v8, 0.0  ;;  %v423_v21 = vmax.f32 %v342_v9, 0.0  ;;  %501 = vst.msk [vmem:[%s1386_s4 + $0x1c8] sm:$0xff] %vm443_vm0, %v419_v12  ;;  %502 = vst.msk [vmem:[%s1386_s4 + $0x1d0] sm:$0xff] %vm443_vm0, %v420_v13  ;;  %v170_v27 = vsub.f32 %v82_v10, %v563_v1  ;;  %v171_v28 = vsub.f32 %v83_v11, %v563_v1 }
  0x47   :  { %v424_v25 = vmax.f32 %v343_v14, 0.0  ;;  %v425_v26 = vmax.f32 %v344_v15, 0.0  ;;  %503 = vst.msk [vmem:[%s1386_s4 + $0x1d8] sm:$0xff] %vm443_vm0, %v421_v19  ;;  %v257_v29 = vmul.f32 %v568_v2, %v169_v22  ;;  %v172_v30 = vsub.f32 %v84_v16, %v563_v1 }
  0x48   :  { %504 = vst.msk [vmem:[%s1386_s4 + $0x1e0] sm:$0xff] %vm443_vm0, %v422_v20  ;;  %505 = vst.msk [vmem:[%s1386_s4 + $0x1e8] sm:$0xff] %vm443_vm0, %v423_v21  ;;  %v173_v31 = vsub.f32 %v85_v17, %v563_v1  ;;  %v174_v32 = vsub.f32 %v86_v18, %v563_v1  ;;  %v258_v33 = vmul.f32 %v568_v2, %v170_v27 }
  0x49   :  { %506 = vst.msk [vmem:[%s1386_s4 + $0x1f0] sm:$0xff] %vm443_vm0, %v424_v25  ;;  %507 = vst.msk [vmem:[%s1386_s4 + $0x1f8] sm:$0xff] %vm443_vm0, %v425_v26  ;;  %v259_v34 = vmul.f32 %v568_v2, %v171_v28  ;;  %v175_v35 = vsub.f32 %v87_v23, %v563_v1  ;;  %v176_v36 = vsub.f32 %v88_v24, %v563_v1  ;;  %v97_v24 = vld [vmem:[%s1382_s0 + $0x280] sm:$0xff] }
  0x4a   :  { %v345_v37 = vadd.f32 %v574_v4, %v257_v29  ;;  %v260_v38 = vmul.f32 %v568_v2, %v172_v30  ;;  %v261_v39 = vmul.f32 %v568_v2, %v173_v31  ;;  %v262_v40 = vmul.f32 %v568_v2, %v174_v32 }
  0x4b   :  { %v346_v41 = vadd.f32 %v574_v4, %v258_v33  ;;  %v347_v42 = vadd.f32 %v574_v4, %v259_v34  ;;  %v263_v43 = vmul.f32 %v568_v2, %v175_v35  ;;  %v264_v44 = vmul.f32 %v568_v2, %v176_v36 }
  0x4c   :  { %v426_v46 = vmax.f32 %v345_v37, 0.0  ;;  %v348_v47 = vadd.f32 %v574_v4, %v260_v38  ;;  %v349_v48 = vadd.f32 %v574_v4, %v261_v39  ;;  %v350_v49 = vadd.f32 %v574_v4, %v262_v40 }
  0x4d   :  { %v427_v52 = vmax.f32 %v346_v41, 0.0  ;;  %v428_v53 = vmax.f32 %v347_v42, 0.0  ;;  %v351_v54 = vadd.f32 %v574_v4, %v263_v43  ;;  %v352_v55 = vadd.f32 %v574_v4, %v264_v44 }
  0x4e   :  { %508 = vst.msk [vmem:[%s1386_s4 + $0x200] sm:$0xff] %vm443_vm0, %v426_v46  ;;  %v429_v59 = vmax.f32 %v348_v47, 0.0  ;;  %v430_v60 = vmax.f32 %v349_v48, 0.0  ;;  %v431_v61 = vmax.f32 %v350_v49, 0.0  ;;  %v177_v62 = vsub.f32 %v89_v45, %v563_v1 }
  0x4f   :  { %509 = vst.msk [vmem:[%s1386_s4 + $0x208] sm:$0xff] %vm443_vm0, %v427_v52  ;;  %510 = vst.msk [vmem:[%s1386_s4 + $0x210] sm:$0xff] %vm443_vm0, %v428_v53  ;;  %v432_v3 = vmax.f32 %v351_v54, 0.0  ;;  %v433_v5 = vmax.f32 %v352_v55, 0.0  ;;  %v178_v6 = vsub.f32 %v90_v50, %v563_v1  ;;  %v179_v7 = vsub.f32 %v91_v51, %v563_v1 }
  0x50   :  { %511 = vst.msk [vmem:[%s1386_s4 + $0x218] sm:$0xff] %vm443_vm0, %v429_v59  ;;  %512 = vst.msk [vmem:[%s1386_s4 + $0x220] sm:$0xff] %vm443_vm0, %v430_v60  ;;  %v265_v8 = vmul.f32 %v568_v2, %v177_v62  ;;  %v180_v9 = vsub.f32 %v92_v56, %v563_v1  ;;  %v181_v10 = vsub.f32 %v93_v57, %v563_v1 }
  0x51   :  { %513 = vst.msk [vmem:[%s1386_s4 + $0x228] sm:$0xff] %vm443_vm0, %v431_v61  ;;  %v182_v11 = vsub.f32 %v94_v58, %v563_v1  ;;  %514 = vst.msk [vmem:[%s1386_s4 + $0x230] sm:$0xff] %vm443_vm0, %v432_v3  ;;  %v266_v12 = vmul.f32 %v568_v2, %v178_v6  ;;  %v267_v13 = vmul.f32 %v568_v2, %v179_v7 }
  0x52   :  { %515 = vst.msk [vmem:[%s1386_s4 + $0x238] sm:$0xff] %vm443_vm0, %v433_v5  ;;  %v183_v14 = vsub.f32 %v95_v63, %v563_v1  ;;  %v184_v15 = vsub.f32 %v96_v0, %v563_v1  ;;  %v353_v16 = vadd.f32 %v574_v4, %v265_v8  ;;  %v268_v17 = vmul.f32 %v568_v2, %v180_v9 }
  0x53   :  { %v269_v18 = vmul.f32 %v568_v2, %v181_v10  ;;  %v270_v19 = vmul.f32 %v568_v2, %v182_v11  ;;  %v354_v20 = vadd.f32 %v574_v4, %v266_v12  ;;  %v355_v21 = vadd.f32 %v574_v4, %v267_v13 }
  0x54   :  { %v271_v22 = vmul.f32 %v568_v2, %v183_v14  ;;  %v272_v23 = vmul.f32 %v568_v2, %v184_v15  ;;  %v434_v25 = vmax.f32 %v353_v16, 0.0  ;;  %v356_v26 = vadd.f32 %v574_v4, %v268_v17 }
  0x55   :  { %v357_v27 = vadd.f32 %v574_v4, %v269_v18  ;;  %v358_v28 = vadd.f32 %v574_v4, %v270_v19  ;;  %v435_v29 = vmax.f32 %v354_v20, 0.0  ;;  %v436_v30 = vmax.f32 %v355_v21, 0.0 }
  0x56   :  { %v359_v31 = vadd.f32 %v574_v4, %v271_v22  ;;  %v360_v32 = vadd.f32 %v574_v4, %v272_v23  ;;  %516 = vst.msk [vmem:[%s1386_s4 + $0x240] sm:$0xff] %vm443_vm0, %v434_v25  ;;  %v437_v33 = vmax.f32 %v356_v26, 0.0  ;;  %v185_v36 = vsub.f32 %v97_v24, %v563_v1 }
  0x57   :  { %v438_v34 = vmax.f32 %v357_v27, 0.0  ;;  %v439_v35 = vmax.f32 %v358_v28, 0.0  ;;  %517 = vst.msk [vmem:[%s1386_s4 + $0x248] sm:$0xff] %vm443_vm0, %v435_v29  ;;  %518 = vst.msk [vmem:[%s1386_s4 + $0x250] sm:$0xff] %vm443_vm0, %v436_v30 }
  0x58   :  { %v440_v37 = vmax.f32 %v359_v31, 0.0  ;;  %v441_v38 = vmax.f32 %v360_v32, 0.0  ;;  %519 = vst.msk [vmem:[%s1386_s4 + $0x258] sm:$0xff] %vm443_vm0, %v437_v33  ;;  %v273_v1 = vmul.f32 %v568_v2, %v185_v36 }
  0x59   :  { %520 = vst.msk [vmem:[%s1386_s4 + $0x260] sm:$0xff] %vm443_vm0, %v438_v34  ;;  %521 = vst.msk [vmem:[%s1386_s4 + $0x268] sm:$0xff] %vm443_vm0, %v439_v35 }
  0x5a   :  { %522 = vst.msk [vmem:[%s1386_s4 + $0x270] sm:$0xff] %vm443_vm0, %v440_v37  ;;  %523 = vst.msk [vmem:[%s1386_s4 + $0x278] sm:$0xff] %vm443_vm0, %v441_v38  ;;  %v361_v39 = vadd.f32 %v574_v4, %v273_v1 }
  0x5c   :  { %v442_v40 = vmax.f32 %v361_v39, 0.0 }
  0x5e   :  { %524 = vst.msk [vmem:[%s1386_s4 + $0x280] sm:$0xff] %vm443_vm0, %v442_v40 }

// kernel: up_block_forward.6
= control target key start
LH: loop header
LB: loop body
LE: loop exit
PB: predicated region body
PF: predicated region fallthrough
CT: control target
= control target key end

     0   :  { %s6886_s30 = smov 0   ;;  %s8653_s0 = inlined_call_operand.vmem [shape: f32[2,324,4], index: 0, kind: input, shape index: {}]   ;;  %s8654_s1 = inlined_call_operand.vmem [shape: f32[9,4,4], index: 1, kind: input, shape index: {}]   ;;  %s8655_s2 = inlined_call_operand.vmem [shape: f32[1,4], index: 2, kind: input, shape index: {}]   ;;  %s8656_s3 = inlined_call_operand.vmem [shape: f32[324,1], index: 3, kind: input, shape index: {}]   ;;  %s8657_s4 = inlined_call_operand.vmem [shape: f32[1,4], index: 4, kind: input, shape index: {}]   ;;  %s8658_s5 = inlined_call_operand.vmem [shape: f32[1,4], index: 5, kind: input, shape index: {}]   ;;  %s8659_s6 = inlined_call_operand.vmem [shape: f32[1,4], index: 6, kind: input, shape index: {}]   ;;  %s8660_s7 = inlined_call_operand.vmem [shape: f32[2,324,4], index: 7, kind: output, shape index: {0}]   ;;  %s8661_s8 = inlined_call_operand.vmem [shape: f32[1,4], index: 8, kind: output, shape index: {1}]   ;;  %s8662_s9 = inlined_call_operand.vmem [shape: f32[1,4], index: 9, kind: output, shape index: {2}]  }
   0x1 LB: > { %s6892_s10 = sadd.s32 4294967295, %s6831_s30   ;;  %p5330_p0 = scmp.ge.s32.totalorder %s6831_s30, 1  ;;  %s6831_s30 = sphi %s6886_s30, %s20_s30  }
   0x2   : > { %p282_p1 = scmp.lt.s32.totalorder %s6831_s30, 3 }
   0x4   : > { %p283_p2 = pnand %p5330_p0, %p282_p1 }
   0x6   : > { %286 = sbr.rel (%p283_p2) target bundleno = 923 (0x39b), region = 48 }
   0xd   : > { %v556_v0 = vld [vmem:[%s8656_s3 + $0x10] sm:$0xff]  ;;  %v554_v1 = vld [vmem:[%s8656_s3] sm:$0xff]  ;;  %v8663_v2 = vmov 0   ;;  %v557_v3 = vld [vmem:[%s8656_s3 + $0x18] sm:$0xff]  ;;  %vm1067_vm0 = vcmask 1043456   ;;  %p318_p3 = scmp.lt.s32.totalorder %s6892_s10, 1 }
   0xe   : > { %6821 = vset.pattern.permute.xlu1 %v8663_v2  ;;  %6820 = vset.pattern.permute.xlu0 %v8663_v2  ;;  %v555_v4 = vld [vmem:[%s8656_s3 + $0x8] sm:$0xff]  ;;  %v558_v6 = vld [vmem:[%s8656_s3 + $0x20] sm:$0xff]  ;;  %v561_v7 = vld [vmem:[%s8656_s3 + $0x38] sm:$0xff]  ;;  %vm841_vm1 = vcmask 31744   ;;  %vm882_vm2 = vcmask 27648   ;;  %vm4801_vm3 = vcmask 29696  }
   0xf   : > { %607 = vperm.xlu1 %6821, %v556_v0   ;;  %597 = vperm.xlu0 %6820, %v554_v1   ;;  %v559_v5 = vld [vmem:[%s8656_s3 + $0x28] sm:$0xff]  ;;  %v560_v8 = vld [vmem:[%s8656_s3 + $0x30] sm:$0xff]  ;;  %v562_v10 = vld [vmem:[%s8656_s3 + $0x40] sm:$0xff]  ;;  %s7002_s14 = scalar_select %p318_p3, %s6892_s10, 1 }
  0x10   : > { %v563_v9 = vld [vmem:[%s8656_s3 + $0x48] sm:$0xff]  ;;  %v5336_v11 = vld [vmem:[%s8654_s1 + $0x4] sm:$0xf]  ;;  %v5487_v12 = vld [vmem:[%s8654_s1 + $0x10] sm:$0xf]  ;;  %p5678_p4 = scmp.ne.s32.totalorder %s6892_s10, 0 }
  0x11   : > { %v565_v13 = vld [vmem:[%s8656_s3 + $0x58] sm:$0xff]  ;;  %v564_v14 = vld [vmem:[%s8656_s3 + $0x50] sm:$0xff]  ;;  %6014 = vmatprep.subr.msk.mxu1 %vm1067_vm0, %v5336_v11  ;;  %v6945_v15 = vld [vmem:[%s8654_s1] sm:$0xf]  ;;  %6238 = vmatprep.subr.msk.mxu0 %vm1067_vm0, %v5487_v12  ;;  %s6808_s19 = smul.u32 328, %s7002_s14  ;;  %vm4843_vm4 = vcmask (!%p5678_p4), 24576  }
  0x12   : > { %6015 = vmatpush3.msk.msra.mxu1 %vm1067_vm0, %v5336_v11  ;;  %v6953_v16 = vld [vmem:[%s8654_s1 + $0x14] sm:$0xf]  ;;  %v567_v17 = vld [vmem:[%s8656_s3 + $0x68] sm:$0xff]  ;;  %v566_v18 = vld [vmem:[%s8656_s3 + $0x60] sm:$0xff]  ;;  %6239 = vmatpush3.msk.msra.mxu0 %vm1067_vm0, %v5487_v12 }
  0x13   : > { %612 = vperm.xlu1 %6821, %v557_v3   ;;  %602 = vperm.xlu0 %6820, %v555_v4   ;;  %v569_v19 = vld [vmem:[%s8656_s3 + $0x78] sm:$0xff]  ;;  %v568_v20 = vld [vmem:[%s8656_s3 + $0x70] sm:$0xff]  ;;  %v571_v21 = vld [vmem:[%s8656_s3 + $0x88] sm:$0xff]  ;;  %s7022_s26 = scalar_lea.vmem %s8653_s0, %s6808_s19  ;;  %s7125_s22 = scalar_lea.vmem %s8660_s7, %s6808_s19 }
  0x14   : > { %6070 = vmatprep.subr.msk.mxu1 %vm1067_vm0, %v6945_v15  ;;  %6294 = vmatprep.subr.msk.mxu0 %vm1067_vm0, %v6953_v16  ;;  %v570_v22 = vld [vmem:[%s8656_s3 + $0x80] sm:$0xff]  ;;  %v573_v23 = vld [vmem:[%s8656_s3 + $0x98] sm:$0xff]  ;;  %v572_v24 = vld [vmem:[%s8656_s3 + $0x90] sm:$0xff] }
  0x15   : > { %v575_v25 = vld [vmem:[%s8656_s3 + $0xa8] sm:$0xff]  ;;  %v574_v26 = vld [vmem:[%s8656_s3 + $0xa0] sm:$0xff]  ;;  %v577_v27 = vld [vmem:[%s8656_s3 + $0xb8] sm:$0xff] }
  0x16   : > { %v576_v28 = vld [vmem:[%s8656_s3 + $0xb0] sm:$0xff]  ;;  %v579_v29 = vld [vmem:[%s8656_s3 + $0xc8] sm:$0xff]  ;;  %v578_v30 = vld [vmem:[%s8656_s3 + $0xc0] sm:$0xff] }
  0x17   : > { %622 = vperm.xlu1 %6821, %v559_v5   ;;  %617 = vperm.xlu0 %6820, %v558_v6   ;;  %v581_v31 = vld [vmem:[%s8656_s3 + $0xd8] sm:$0xff]  ;;  %v580_v32 = vld [vmem:[%s8656_s3 + $0xd0] sm:$0xff]  ;;  %v583_v33 = vld [vmem:[%s8656_s3 + $0xe8] sm:$0xff] }
  0x18   : > { %v582_v34 = vld [vmem:[%s8656_s3 + $0xe0] sm:$0xff]  ;;  %v361_v36 = vld [vmem:[%s7022_s26 + $0x108] sm:$0xff]  ;;  %v585_v38 = vld [vmem:[%s8656_s3 + $0xf8] sm:$0xff] }
  0x19   : > { %v7027_v35 = vld [vmem:[%s8657_s4] ss:$0 sm:$0xff]  ;;  %v584_v39 = vld [vmem:[%s8656_s3 + $0xf0] sm:$0xff]  ;;  %v363_v46 = vld [vmem:[%s7022_s26 + $0x118] sm:$0xff] }
  0x1a   : > { %v360_v37 = vld [vmem:[%s7022_s26 + $0x100] sm:$0xff]  ;;  %v409_v40 = vsub.f32 %v361_v36, %v7027_v35  ;;  %v362_v47 = vld [vmem:[%s7022_s26 + $0x110] sm:$0xff]  ;;  %v587_v48 = vld [vmem:[%s8656_s3 + $0x108] sm:$0xff]  ;;  %v411_v52 = vsub.f32 %v363_v46, %v7027_v35 }
  0x1b   : > { %632 = vperm.xlu1 %6821, %v561_v7   ;;  %627 = vperm.xlu0 %6820, %v560_v8   ;;  %v408_v41 = vsub.f32 %v360_v37, %v7027_v35  ;;  %v7042_v42 = vld [vmem:[%s8658_s5] ss:$0 sm:$0xff]  ;;  %v410_v53 = vsub.f32 %v362_v47, %v7027_v35  ;;  %v365_v56 = vld [vmem:[%s7022_s26 + $0x128] sm:$0xff]  ;;  %v589_v58 = vld [vmem:[%s8656_s3 + $0x118] sm:$0xff] }
  0x1c   : > { %v457_v43 = vmul.f32 %v7042_v42, %v409_v40  ;;  %v7049_v45 = vld [vmem:[%s8659_s6] ss:$0 sm:$0xff]  ;;  %v459_v54 = vmul.f32 %v7042_v42, %v411_v52  ;;  %v588_v59 = vld [vmem:[%s8656_s3 + $0x110] sm:$0xff]  ;;  %v413_v62 = vsub.f32 %v365_v56, %v7027_v35  ;;  %v367_v3 = vld [vmem:[%s7022_s26 + $0x138] sm:$0xff] }
  0x1d   : > { %v456_v44 = vmul.f32 %v7042_v42, %v408_v41  ;;  %v586_v49 = vld [vmem:[%s8656_s3 + $0x100] sm:$0xff]  ;;  %v458_v55 = vmul.f32 %v7042_v42, %v410_v53  ;;  %v366_v4 = vld [vmem:[%s7022_s26 + $0x130] sm:$0xff]  ;;  %v591_v5 = vld [vmem:[%s8656_s3 + $0x128] sm:$0xff] }
  0x1e   : > { %v7060_v50 = vadd.f32 %v7049_v45, %v457_v43  ;;  %v364_v57 = vld [vmem:[%s7022_s26 + $0x120] sm:$0xff]  ;;  %v7078_v60 = vadd.f32 %v7049_v45, %v459_v54  ;;  %v461_v0 = vmul.f32 %v7042_v42, %v413_v62  ;;  %v335_v43 = vld [vmem:[%s7022_s26 + $0x38] sm:$0xff]  ;;  %v334_v47 = vld [vmem:[%s7022_s26 + $0x30] sm:$0xff] }
  0x1f   : > { %642 = vperm.xlu1 %6821, %v563_v9   ;;  %637 = vperm.xlu0 %6820, %v562_v10   ;;  %v7063_v51 = vadd.f32 %v7049_v45, %v456_v44  ;;  %v7081_v61 = vadd.f32 %v7049_v45, %v458_v55  ;;  %v412_v63 = vsub.f32 %v364_v57, %v7027_v35  ;;  %v590_v6 = vld [vmem:[%s8656_s3 + $0x120] sm:$0xff] }
  0x20   : > { %v7096_v7 = vadd.f32 %v7049_v45, %v461_v0  ;;  %v415_v9 = vsub.f32 %v367_v3, %v7027_v35  ;;  %v414_v10 = vsub.f32 %v366_v4, %v7027_v35  ;;  %v332_v37 = vld [vmem:[%s7022_s26 + $0x20] sm:$0xff]  ;;  %v382_v55 = vsub.f32 %v334_v47, %v7027_v35 }
  0x21   : > { %v460_v1 = vmul.f32 %v7042_v42, %v412_v63  ;;  %v380_v41 = vsub.f32 %v332_v37, %v7027_v35 }
  0x22   : > { %v463_v11 = vmul.f32 %v7042_v42, %v415_v9  ;;  %v462_v12 = vmul.f32 %v7042_v42, %v414_v10 }
  0x23   : > { %652 = vperm.xlu1 %6821, %v565_v13   ;;  %647 = vperm.xlu0 %6820, %v564_v14   ;;  %v7099_v8 = vadd.f32 %v7049_v45, %v460_v1  ;;  %v368_v13 = vld [vmem:[%s7022_s26 + $0x140] sm:$0xf]  ;;  %v593_v14 = vld [vmem:[%s8656_s3 + $0x138] sm:$0xff]  ;;  %v428_v54 = vmul.f32 %v7042_v42, %v380_v41 }
  0x27   : > { %662 = vperm.xlu1 %6821, %v567_v17   ;;  %657 = vperm.xlu0 %6820, %v566_v18   ;;  %v592_v17 = vld [vmem:[%s8656_s3 + $0x130] sm:$0xff]  ;;  %v7113_v18 = vadd.f32 %v7049_v45, %v463_v11 }
  0x2b   : > { %672 = vperm.xlu1 %6821, %v569_v19   ;;  %667 = vperm.xlu0 %6820, %v568_v20   ;;  %v7116_v19 = vadd.f32 %v7049_v45, %v462_v12  ;;  %v416_v20 = vsub.f32 %v368_v13, %v7027_v35  ;;  %v339_v13 = vld [vmem:[%s7022_s26 + $0x58] sm:$0xff] }
  0x2f   : > { %682 = vperm.xlu1 %6821, %v571_v21   ;;  %677 = vperm.xlu0 %6820, %v570_v22   ;;  %v464_v21 = vmul.f32 %v7042_v42, %v416_v20  ;;  %v594_v22 = vld [vmem:[%s8656_s3 + $0x140] sm:$0xf] }
  0x33   : > { %692 = vperm.xlu1 %6821, %v573_v23   ;;  %687 = vperm.xlu0 %6820, %v572_v24   ;;  %v7131_v23 = vadd.f32 %v7049_v45, %v464_v21  ;;  %v6834_v24 = vmov 0.0  }
  0x34   : > { %4765 = vst.msk [vmem:[%s7125_s22 + $0x140] sm:$0xf] %vm882_vm2, %v6834_v24 }
  0x35   : > { %4725 = vst.msk [vmem:[%s7125_s22] sm:$0xff] %vm841_vm1, %v6834_v24  ;;  %4726 = vst.msk [vmem:[%s7125_s22 + $0x8] sm:$0xff] %vm841_vm1, %v6834_v24 }
  0x36   : > { %4727 = vst.msk [vmem:[%s7125_s22 + $0x10] sm:$0xff] %vm841_vm1, %v6834_v24  ;;  %4728 = vst.msk [vmem:[%s7125_s22 + $0x18] sm:$0xff] %vm841_vm1, %v6834_v24 }
  0x37   : > { %702 = vperm.xlu1 %6821, %v575_v25   ;;  %697 = vperm.xlu0 %6820, %v574_v26   ;;  %4729 = vst.msk [vmem:[%s7125_s22 + $0x20] sm:$0xff] %vm841_vm1, %v6834_v24  ;;  %4730 = vst.msk [vmem:[%s7125_s22 + $0x28] sm:$0xff] %vm841_vm1, %v6834_v24  ;;  %v330_v25 = vld [vmem:[%s7022_s26 + $0x10] sm:$0xff]  ;;  %v328_v26 = vld [vmem:[%s7022_s26] sm:$0xff] }
  0x38   : > { %4731 = vst.msk [vmem:[%s7125_s22 + $0x30] sm:$0xff] %vm841_vm1, %v6834_v24  ;;  %4732 = vst.msk [vmem:[%s7125_s22 + $0x38] sm:$0xff] %vm841_vm1, %v6834_v24 }
  0x39   : > { %4733 = vst.msk [vmem:[%s7125_s22 + $0x40] sm:$0xff] %vm841_vm1, %v6834_v24  ;;  %4734 = vst.msk [vmem:[%s7125_s22 + $0x48] sm:$0xff] %vm841_vm1, %v6834_v24 }
  0x3a   : > { %4735 = vst.msk [vmem:[%s7125_s22 + $0x50] sm:$0xff] %vm841_vm1, %v6834_v24  ;;  %4736 = vst.msk [vmem:[%s7125_s22 + $0x58] sm:$0xff] %vm841_vm1, %v6834_v24 }
  0x3b   : > { %712 = vperm.xlu1 %6821, %v577_v27   ;;  %707 = vperm.xlu0 %6820, %v576_v28   ;;  %4737 = vst.msk [vmem:[%s7125_s22 + $0x60] sm:$0xff] %vm841_vm1, %v6834_v24  ;;  %4738 = vst.msk [vmem:[%s7125_s22 + $0x68] sm:$0xff] %vm841_vm1, %v6834_v24  ;;  %v378_v27 = vsub.f32 %v330_v25, %v7027_v35  ;;  %v376_v28 = vsub.f32 %v328_v26, %v7027_v35 }
  0x3c   : > { %4739 = vst.msk [vmem:[%s7125_s22 + $0x70] sm:$0xff] %vm841_vm1, %v6834_v24  ;;  %4740 = vst.msk [vmem:[%s7125_s22 + $0x78] sm:$0xff] %vm841_vm1, %v6834_v24  ;;  %v387_v26 = vsub.f32 %v339_v13, %v7027_v35  ;;  %v7290_v13 = vld [vmem:[%s8654_s1 + $0x8] sm:$0xf] }
  0x3d   : > { %4741 = vst.msk [vmem:[%s7125_s22 + $0x80] sm:$0xff] %vm841_vm1, %v6834_v24  ;;  %4742 = vst.msk [vmem:[%s7125_s22 + $0x88] sm:$0xff] %vm841_vm1, %v6834_v24  ;;  %v424_v36 = vmul.f32 %v7042_v42, %v376_v28  ;;  %v341_v28 = vld [vmem:[%s7022_s26 + $0x68] sm:$0xff] }
  0x3e   : > { %4743 = vst.msk [vmem:[%s7125_s22 + $0x90] sm:$0xff] %vm841_vm1, %v6834_v24  ;;  %4744 = vst.msk [vmem:[%s7125_s22 + $0x98] sm:$0xff] %vm841_vm1, %v6834_v24 }
  0x3f   : > { %722 = vperm.xlu1 %6821, %v579_v29   ;;  %717 = vperm.xlu0 %6820, %v578_v30   ;;  %4745 = vst.msk [vmem:[%s7125_s22 + $0xa0] sm:$0xff] %vm841_vm1, %v6834_v24  ;;  %4746 = vst.msk [vmem:[%s7125_s22 + $0xa8] sm:$0xff] %vm841_vm1, %v6834_v24  ;;  %v331_v29 = vld [vmem:[%s7022_s26 + $0x18] sm:$0xff]  ;;  %v329_v30 = vld [vmem:[%s7022_s26 + $0x8] sm:$0xff]  ;;  %v472_v46 = vadd.f32 %v7049_v45, %v424_v36  ;;  %v389_v36 = vsub.f32 %v341_v28, %v7027_v35 }
  0x40   : > { %4747 = vst.msk [vmem:[%s7125_s22 + $0xb0] sm:$0xff] %vm841_vm1, %v6834_v24  ;;  %4748 = vst.msk [vmem:[%s7125_s22 + $0xb8] sm:$0xff] %vm841_vm1, %v6834_v24 }
  0x41   : > { %4749 = vst.msk [vmem:[%s7125_s22 + $0xc0] sm:$0xff] %vm841_vm1, %v6834_v24  ;;  %4750 = vst.msk [vmem:[%s7125_s22 + $0xc8] sm:$0xff] %vm841_vm1, %v6834_v24  ;;  %v513_v57 = vmax.f32 %v472_v46, 0.0 }
  0x42   : > { %4751 = vst.msk [vmem:[%s7125_s22 + $0xd0] sm:$0xff] %vm841_vm1, %v6834_v24  ;;  %4752 = vst.msk [vmem:[%s7125_s22 + $0xd8] sm:$0xff] %vm841_vm1, %v6834_v24 }
  0x43   : > { %732 = vperm.xlu1 %6821, %v581_v31   ;;  %727 = vperm.xlu0 %6820, %v580_v32   ;;  %4753 = vst.msk [vmem:[%s7125_s22 + $0xe0] sm:$0xff] %vm841_vm1, %v6834_v24  ;;  %4754 = vst.msk [vmem:[%s7125_s22 + $0xe8] sm:$0xff] %vm841_vm1, %v6834_v24  ;;  %v379_v31 = vsub.f32 %v331_v29, %v7027_v35  ;;  %v377_v32 = vsub.f32 %v329_v30, %v7027_v35 }
  0x44   : > { %4755 = vst.msk [vmem:[%s7125_s22 + $0xf0] sm:$0xff] %vm841_vm1, %v6834_v24  ;;  %4756 = vst.msk [vmem:[%s7125_s22 + $0xf8] sm:$0xff] %vm841_vm1, %v6834_v24 }
  0x45   : > { %4757 = vst.msk [vmem:[%s7125_s22 + $0x100] sm:$0xff] %vm841_vm1, %v6834_v24  ;;  %4758 = vst.msk [vmem:[%s7125_s22 + $0x108] sm:$0xff] %vm841_vm1, %v6834_v24  ;;  %v425_v40 = vmul.f32 %v7042_v42, %v377_v32 }
  0x46   : > { %4759 = vst.msk [vmem:[%s7125_s22 + $0x110] sm:$0xff] %vm841_vm1, %v6834_v24  ;;  %4760 = vst.msk [vmem:[%s7125_s22 + $0x118] sm:$0xff] %vm841_vm1, %v6834_v24 }
  0x47   : > { %742 = vperm.xlu1 %6821, %v583_v33   ;;  %737 = vperm.xlu0 %6820, %v582_v34   ;;  %4761 = vst.msk [vmem:[%s7125_s22 + $0x120] sm:$0xff] %vm841_vm1, %v6834_v24  ;;  %4762 = vst.msk [vmem:[%s7125_s22 + $0x128] sm:$0xff] %vm841_vm1, %v6834_v24  ;;  %v333_v33 = vld [vmem:[%s7022_s26 + $0x28] sm:$0xff]  ;;  %v426_v34 = vmul.f32 %v7042_v42, %v378_v27  ;;  %v473_v53 = vadd.f32 %v7049_v45, %v425_v40 }
  0x48   : > { %4763 = vst.msk [vmem:[%s7125_s22 + $0x130] sm:$0xff] %vm841_vm1, %v6834_v24  ;;  %4764 = vst.msk [vmem:[%s7125_s22 + $0x138] sm:$0xff] %vm841_vm1, %v6834_v24  ;;  %v435_v40 = vmul.f32 %v7042_v42, %v387_v26  ;;  %v347_v26 = vld [vmem:[%s7022_s26 + $0x98] sm:$0xff] }
  0x49   : > { %v474_v44 = vadd.f32 %v7049_v45, %v426_v34  ;;  %v514_v4 = vmax.f32 %v473_v53, 0.0  ;;  %v437_v53 = vmul.f32 %v7042_v42, %v389_v36 }
  0x4b   : > { %752 = vperm.xlu1 %6821, %v585_v38   ;;  %747 = vperm.xlu0 %6820, %v584_v39   ;;  %v381_v38 = vsub.f32 %v333_v33, %v7027_v35  ;;  %v427_v39 = vmul.f32 %v7042_v42, %v379_v31  ;;  %v515_v56 = vmax.f32 %v474_v44, 0.0  ;;  %v340_v33 = vld [vmem:[%s7022_s26 + $0x60] sm:$0xff]  ;;  %v343_v44 = vld [vmem:[%s7022_s26 + $0x78] sm:$0xff] }
  0x4d   : > { %v475_v52 = vadd.f32 %v7049_v45, %v427_v39 }
  0x4f   : > { %762 = vperm.xlu1 %6821, %v587_v48   ;;  %757 = vperm.xlu0 %6820, %v586_v49   ;;  %v429_v48 = vmul.f32 %v7042_v42, %v381_v38  ;;  %v383_v49 = vsub.f32 %v335_v43, %v7027_v35  ;;  %v516_v3 = vmax.f32 %v475_v52, 0.0  ;;  %v388_v43 = vsub.f32 %v340_v33, %v7027_v35  ;;  %v342_v52 = vld [vmem:[%s7022_s26 + $0x70] sm:$0xff] }
  0x51   : > { %v477_v62 = vadd.f32 %v7049_v45, %v429_v48  ;;  %v431_v63 = vmul.f32 %v7042_v42, %v383_v49 }
  0x53   : > { %772 = vperm.xlu1 %6821, %v589_v58   ;;  %767 = vperm.xlu0 %6820, %v588_v59   ;;  %v337_v58 = vld [vmem:[%s7022_s26 + $0x48] sm:$0xff]  ;;  %v336_v59 = vld [vmem:[%s7022_s26 + $0x40] sm:$0xff]  ;;  %v479_v20 = vadd.f32 %v7049_v45, %v431_v63 }
  0x54   : > { %v385_v11 = vsub.f32 %v337_v58, %v7027_v35  ;;  %v384_v12 = vsub.f32 %v336_v59, %v7027_v35  ;;  %v436_v59 = vmul.f32 %v7042_v42, %v388_v43  ;;  %v345_v63 = vld [vmem:[%s7022_s26 + $0x88] sm:$0xff] }
  0x55   : > { %v520_v34 = vmax.f32 %v479_v20, 0.0 }
  0x56   : > { %v433_v31 = vmul.f32 %v7042_v42, %v385_v11  ;;  %v432_v32 = vmul.f32 %v7042_v42, %v384_v12  ;;  %v393_v12 = vsub.f32 %v345_v63, %v7027_v35 }
  0x57   : > { %782 = vperm.xlu1 %6821, %v591_v5   ;;  %777 = vperm.xlu0 %6820, %v590_v6   ;;  %v476_v5 = vadd.f32 %v7049_v45, %v428_v54  ;;  %v430_v6 = vmul.f32 %v7042_v42, %v382_v55  ;;  %v391_v54 = vsub.f32 %v343_v44, %v7027_v35 }
  0x58   : > { %v481_v48 = vadd.f32 %v7049_v45, %v433_v31  ;;  %v480_v49 = vadd.f32 %v7049_v45, %v432_v32  ;;  %v441_v36 = vmul.f32 %v7042_v42, %v393_v12  ;;  %v350_v12 = vld [vmem:[%s7022_s26 + $0xb0] sm:$0xff] }
  0x59   : > { %v517_v24 = vmax.f32 %v476_v5, 0.0  ;;  %v478_v25 = vadd.f32 %v7049_v45, %v430_v6  ;;  %v344_v5 = vld [vmem:[%s7022_s26 + $0x80] sm:$0xff]  ;;  %v439_v11 = vmul.f32 %v7042_v42, %v391_v54 }
  0x5b   : > { %792 = vperm.xlu1 %6821, %v593_v14   ;;  %787 = vperm.xlu0 %6820, %v592_v17   ;;  %v338_v14 = vld [vmem:[%s7022_s26 + $0x50] sm:$0xff]  ;;  %v518_v17 = vmax.f32 %v477_v62, 0.0  ;;  %v519_v39 = vmax.f32 %v478_v25, 0.0  ;;  %v390_v62 = vsub.f32 %v342_v52, %v7027_v35  ;;  %v392_v25 = vsub.f32 %v344_v5, %v7027_v35 }
  0x5c   : > { %v386_v27 = vsub.f32 %v338_v14, %v7027_v35  ;;  %v487_v44 = vadd.f32 %v7049_v45, %v439_v11  ;;  %v351_v11 = vld [vmem:[%s7022_s26 + $0xb8] sm:$0xff] }
  0x5d   : > { %v438_v31 = vmul.f32 %v7042_v42, %v390_v62 }
  0x5e   : > { %v434_v41 = vmul.f32 %v7042_v42, %v386_v27  ;;  %v346_v27 = vld [vmem:[%s7022_s26 + $0x90] sm:$0xff] }
  0x5f   : > { %797 = vperm.xlu0 %6820, %v594_v22   ;;  %v486_v52 = vadd.f32 %v7049_v45, %v438_v31  ;;  %v353_v31 = vld [vmem:[%s7022_s26 + $0xc8] sm:$0xff] }
  0x60   : > { %v482_v58 = vadd.f32 %v7049_v45, %v434_v41 }
  0x8e   : > { %v608_v0 = vpop.permute.xlu1 %607  ;;  %v598_v1 = vpop.permute.xlu0 %597 }
  0x8f   : > { %v802_v9 = vmul.f32 %v608_v0, %v515_v56  ;;  %v800_v10 = vmul.f32 %v598_v1, %v513_v57  ;;  %v483_v57 = vadd.f32 %v7049_v45, %v435_v40 }
  0x91   : > { %844 = vst.msk [vmem:[#allocation2 + $0x10] sm:$0xff] %vm841_vm1, %v802_v9  ;;  %842 = vst.msk [vmem:[#allocation2] sm:$0xff] %vm841_vm1, %v800_v10 }
  0x92   : > { %v613_v21 = vpop.permute.xlu1 %612  ;;  %v603_v22 = vpop.permute.xlu0 %602 }
  0x93   : > { %v803_v29 = vmul.f32 %v613_v21, %v516_v3  ;;  %v801_v30 = vmul.f32 %v603_v22, %v514_v4  ;;  %v522_v3 = vmax.f32 %v481_v48, 0.0  ;;  %v521_v4 = vmax.f32 %v480_v49, 0.0 }
  0x94   : > { %v524_v21 = vmax.f32 %v483_v57, 0.0  ;;  %v485_v22 = vadd.f32 %v7049_v45, %v437_v53  ;;  %v348_v53 = vld [vmem:[%s7022_s26 + $0xa0] sm:$0xff]  ;;  %v489_v57 = vadd.f32 %v7049_v45, %v441_v36  ;;  %v399_v36 = vsub.f32 %v351_v11, %v7027_v35 }
  0x95   : > { %845 = vst.msk [vmem:[#allocation2 + $0x18] sm:$0xff] %vm841_vm1, %v803_v29  ;;  %843 = vst.msk [vmem:[#allocation2 + $0x8] sm:$0xff] %vm841_vm1, %v801_v30  ;;  %v523_v30 = vmax.f32 %v482_v58, 0.0 }
  0x96   : > { %v623_v37 = vpop.permute.xlu1 %622  ;;  %v618_v38 = vpop.permute.xlu0 %617  ;;  %v526_v43 = vmax.f32 %v485_v22, 0.0 }
  0x97   : > { %v805_v46 = vmul.f32 %v623_v37, %v518_v17  ;;  %v804_v47 = vmul.f32 %v618_v38, %v517_v24  ;;  %v484_v24 = vadd.f32 %v7049_v45, %v436_v59  ;;  %v395_v37 = vsub.f32 %v347_v26, %v7027_v35  ;;  %v7313_v38 = vld [vmem:[%s8654_s1 + $0x18] sm:$0xf] }
  0x99   : > { %847 = vst.msk [vmem:[#allocation2 + $0x28] sm:$0xff] %vm841_vm1, %v805_v46  ;;  %846 = vst.msk [vmem:[#allocation2 + $0x20] sm:$0xff] %vm841_vm1, %v804_v47  ;;  %v440_v46 = vmul.f32 %v7042_v42, %v392_v25  ;;  %v525_v49 = vmax.f32 %v484_v24, 0.0  ;;  %v443_v58 = vmul.f32 %v7042_v42, %v395_v37  ;;  %v398_v37 = vsub.f32 %v350_v12, %v7027_v35 }
  0x9a   : > { %v633_v55 = vpop.permute.xlu1 %632  ;;  %v628_v56 = vpop.permute.xlu0 %627 }
  0x9b   : > { %v807_v0 = vmul.f32 %v633_v55, %v520_v34  ;;  %v806_v1 = vmul.f32 %v628_v56, %v519_v39 }
  0x9c   : > { %v921_v6 = vld [vmem:[#allocation2 + $0x1] sm:$0xff]  ;;  %v2532_v9 = vld [vmem:[#allocation2 + $0x13] sm:$0xff]  ;;  %v922_v10 = vld [vmem:[#allocation2 + $0x9] sm:$0xff] }
  0x9d   : > { %849 = vst.msk [vmem:[#allocation2 + $0x38] sm:$0xff] %vm841_vm1, %v807_v0  ;;  %848 = vst.msk [vmem:[#allocation2 + $0x30] sm:$0xff] %vm841_vm1, %v806_v1  ;;  %6016 = vmatprep.mubr.msk.f32.mxu1 %vm841_vm1, %v921_v6  ;;  %6240 = vmatprep.mubr.msk.f32.mxu0 %vm841_vm1, %v2532_v9  ;;  %v923_v20 = vld [vmem:[#allocation2 + $0x11] sm:$0xff]  ;;  %v488_v1 = vadd.f32 %v7049_v45, %v440_v46  ;;  %v528_v9 = vmax.f32 %v487_v44, 0.0 }
  0x9e   : > { %v643_v14 = vpop.permute.xlu1 %642  ;;  %v638_v17 = vpop.permute.xlu0 %637  ;;  %6017 = vmatmul.mubr.msk.f32.vlgmr.msra.gmra.mrb[0].mxu1 %vm841_vm1, %v922_v10  ;;  %v527_v10 = vmax.f32 %v486_v52, 0.0 }
  0x9f   : > { %v809_v28 = vmul.f32 %v643_v14, %v522_v3  ;;  %v808_v29 = vmul.f32 %v638_v17, %v521_v4  ;;  %6019 = vmatprep.mubr.msk.f32.mxu1 %vm841_vm1, %v923_v20  ;;  %6071 = vmatpush3.msk.msra.mxu1 %vm1067_vm0, %v6945_v15  ;;  %v394_v15 = vsub.f32 %v346_v27, %v7027_v35  ;;  %v530_v27 = vmax.f32 %v489_v57, 0.0 }
  0xa0   : > { %v2533_v32 = vld [vmem:[#allocation2 + $0x1b] sm:$0xff]  ;;  %v2534_v34 = vld [vmem:[#allocation2 + $0x23] sm:$0xff]  ;;  %6126 = vmatprep.subr.msk.mxu1 %vm1067_vm0, %v7290_v13  ;;  %v396_v4 = vsub.f32 %v348_v53, %v7027_v35  ;;  %v446_v57 = vmul.f32 %v7042_v42, %v398_v37 }
  0xa1   : > { %v924_v33 = vld [vmem:[#allocation2 + $0x19] sm:$0xff]  ;;  %851 = vst.msk [vmem:[#allocation2 + $0x48] sm:$0xff] %vm841_vm1, %v809_v28  ;;  %850 = vst.msk [vmem:[#allocation2 + $0x40] sm:$0xff] %vm841_vm1, %v808_v29  ;;  %6241 = vmatmul.mubr.msk.f32.vlgmr.msra.gmra.mrb[0].mxu0 %vm841_vm1, %v2533_v32  ;;  %v925_v41 = vld [vmem:[#allocation2 + $0x21] sm:$0xff]  ;;  %v442_v59 = vmul.f32 %v7042_v42, %v394_v15  ;;  %v529_v28 = vmax.f32 %v488_v1, 0.0 }
  0xa2   : > { %6295 = vmatpush3.msk.msra.mxu0 %vm1067_vm0, %v6953_v16  ;;  %v653_v39 = vpop.permute.xlu1 %652  ;;  %v648_v40 = vpop.permute.xlu0 %647  ;;  %6020 = vmatmul.mubr.msk.f32.gmra.mrb[2].mxu1 %vm841_vm1, %v924_v33  ;;  %v349_v16 = vld [vmem:[%s7022_s26 + $0xa8] sm:$0xff]  ;;  %v352_v32 = vld [vmem:[%s7022_s26 + $0xc0] sm:$0xff]  ;;  %v355_v53 = vld [vmem:[%s7022_s26 + $0xd8] sm:$0xff] }
  0xa3   : > { %v811_v47 = vmul.f32 %v653_v39, %v524_v21  ;;  %v810_v48 = vmul.f32 %v648_v40, %v523_v30  ;;  %6243 = vmatprep.mubr.msk.f32.mxu0 %vm841_vm1, %v2534_v34  ;;  %6022 = vmatprep.mubr.msk.f32.mxu1 %vm841_vm1, %v925_v41  ;;  %v397_v3 = vsub.f32 %v349_v16, %v7027_v35 }
  0xa4   : > { %v2535_v54 = vld [vmem:[#allocation2 + $0x2b] sm:$0xff]  ;;  %v2536_v56 = vld [vmem:[#allocation2 + $0x33] sm:$0xff]  ;;  %6350 = vmatprep.subr.msk.mxu0 %vm1067_vm0, %v7313_v38  ;;  %v491_v21 = vadd.f32 %v7049_v45, %v443_v58  ;;  %v490_v22 = vadd.f32 %v7049_v45, %v442_v59  ;;  %v444_v30 = vmul.f32 %v7042_v42, %v396_v4  ;;  %v401_v41 = vsub.f32 %v353_v31, %v7027_v35 }
  0xa5   : > { %v926_v55 = vld [vmem:[#allocation2 + $0x29] sm:$0xff]  ;;  %853 = vst.msk [vmem:[#allocation2 + $0x58] sm:$0xff] %vm841_vm1, %v811_v47  ;;  %852 = vst.msk [vmem:[#allocation2 + $0x50] sm:$0xff] %vm841_vm1, %v810_v48  ;;  %6244 = vmatmul.mubr.msk.f32.gmra.mrb[2].mxu0 %vm841_vm1, %v2535_v54  ;;  %v927_v0 = vld [vmem:[#allocation2 + $0x31] sm:$0xff]  ;;  %v445_v29 = vmul.f32 %v7042_v42, %v397_v3  ;;  %v403_v3 = vsub.f32 %v355_v53, %v7027_v35 }
  0xa6   : > { %v663_v62 = vpop.permute.xlu1 %662  ;;  %v658_v63 = vpop.permute.xlu0 %657  ;;  %6023 = vmatmul.mubr.msk.f32.gmra.mrb[4].mxu1 %vm841_vm1, %v926_v55  ;;  %6246 = vmatprep.mubr.msk.f32.mxu0 %vm841_vm1, %v2536_v56  ;;  %v532_v48 = vmax.f32 %v491_v21, 0.0  ;;  %v492_v16 = vadd.f32 %v7049_v45, %v444_v30  ;;  %v447_v56 = vmul.f32 %v7042_v42, %v399_v36  ;;  %v354_v58 = vld [vmem:[%s7022_s26 + $0xd0] sm:$0xff]  ;;  %v357_v21 = vld [vmem:[%s7022_s26 + $0xe8] sm:$0xff] }
  0xa7   : > { %v813_v5 = vmul.f32 %v663_v62, %v526_v43  ;;  %v812_v6 = vmul.f32 %v658_v63, %v525_v49  ;;  %6025 = vmatprep.mubr.msk.f32.mxu1 %vm841_vm1, %v927_v0  ;;  %v400_v43 = vsub.f32 %v352_v32, %v7027_v35  ;;  %v531_v49 = vmax.f32 %v490_v22, 0.0  ;;  %v356_v22 = vld [vmem:[%s7022_s26 + $0xe0] sm:$0xff] }
  0xa8   : > { %v2537_v14 = vld [vmem:[#allocation2 + $0x3b] sm:$0xff]  ;;  %v2538_v20 = vld [vmem:[#allocation2 + $0x43] sm:$0xff]  ;;  %v493_v52 = vadd.f32 %v7049_v45, %v445_v29  ;;  %v449_v0 = vmul.f32 %v7042_v42, %v401_v41  ;;  %v402_v11 = vsub.f32 %v354_v58, %v7027_v35  ;;  %v451_v29 = vmul.f32 %v7042_v42, %v403_v3 }
  0xa9   : > { %v928_v17 = vld [vmem:[#allocation2 + $0x39] sm:$0xff]  ;;  %855 = vst.msk [vmem:[#allocation2 + $0x68] sm:$0xff] %vm841_vm1, %v813_v5  ;;  %854 = vst.msk [vmem:[#allocation2 + $0x60] sm:$0xff] %vm841_vm1, %v812_v6  ;;  %6247 = vmatmul.mubr.msk.f32.gmra.mrb[4].mxu0 %vm841_vm1, %v2537_v14  ;;  %v929_v26 = vld [vmem:[#allocation2 + $0x41] sm:$0xff]  ;;  %v448_v1 = vmul.f32 %v7042_v42, %v400_v43  ;;  %v404_v36 = vsub.f32 %v356_v22, %v7027_v35 }
  0xaa   : > { %v673_v24 = vpop.permute.xlu1 %672  ;;  %v668_v25 = vpop.permute.xlu0 %667  ;;  %6026 = vmatmul.mubr.msk.f32.gmra.mrb[6].mxu1 %vm841_vm1, %v928_v17  ;;  %6249 = vmatprep.mubr.msk.f32.mxu0 %vm841_vm1, %v2538_v20  ;;  %v495_v17 = vadd.f32 %v7049_v45, %v447_v56  ;;  %v494_v20 = vadd.f32 %v7049_v45, %v446_v57  ;;  %v359_v41 = vld [vmem:[%s7022_s26 + $0xf8] sm:$0xff]  ;;  %v358_v43 = vld [vmem:[%s7022_s26 + $0xf0] sm:$0xff] }
  0xab   : > { %v815_v33 = vmul.f32 %v673_v24, %v528_v9  ;;  %v814_v34 = vmul.f32 %v668_v25, %v527_v10  ;;  %6028 = vmatprep.mubr.msk.f32.mxu1 %vm841_vm1, %v929_v26  ;;  %v534_v9 = vmax.f32 %v493_v52, 0.0  ;;  %v533_v10 = vmax.f32 %v492_v16, 0.0 }
  0xac   : > { %v2539_v15 = vld [vmem:[#allocation2 + $0x4b] sm:$0xff]  ;;  %v2540_v40 = vld [vmem:[#allocation2 + $0x53] sm:$0xff]  ;;  %v452_v57 = vmul.f32 %v7042_v42, %v404_v36  ;;  %v7433_v36 = vld [vmem:[%s8654_s1 + $0x1c] sm:$0xf] }
  0xad   : > { %v930_v39 = vld [vmem:[#allocation2 + $0x49] sm:$0xff]  ;;  %857 = vst.msk [vmem:[#allocation2 + $0x78] sm:$0xff] %vm841_vm1, %v815_v33  ;;  %856 = vst.msk [vmem:[#allocation2 + $0x70] sm:$0xff] %vm841_vm1, %v814_v34  ;;  %6250 = vmatmul.mubr.msk.f32.gmra.mrb[6].mxu0 %vm841_vm1, %v2539_v15  ;;  %v931_v47 = vld [vmem:[#allocation2 + $0x51] sm:$0xff]  ;;  %v450_v33 = vmul.f32 %v7042_v42, %v402_v11  ;;  %v405_v34 = vsub.f32 %v357_v21, %v7027_v35 }
  0xae   : > { %v683_v44 = vpop.permute.xlu1 %682  ;;  %v678_v46 = vpop.permute.xlu0 %677  ;;  %6029 = vmatmul.mubr.msk.f32.gmra.mrb[8].mxu1 %vm841_vm1, %v930_v39  ;;  %6252 = vmatprep.mubr.msk.f32.mxu0 %vm841_vm1, %v2540_v40  ;;  %v536_v39 = vmax.f32 %v495_v17, 0.0  ;;  %v535_v40 = vmax.f32 %v494_v20, 0.0  ;;  %v500_v11 = vadd.f32 %v7049_v45, %v452_v57 }
  0xaf   : > { %v817_v54 = vmul.f32 %v683_v44, %v530_v27  ;;  %v816_v55 = vmul.f32 %v678_v46, %v529_v28  ;;  %6031 = vmatprep.mubr.msk.f32.mxu1 %vm841_vm1, %v931_v47  ;;  %v497_v27 = vadd.f32 %v7049_v45, %v449_v0  ;;  %v496_v28 = vadd.f32 %v7049_v45, %v448_v1 }
  0xb0   : > { %v2541_v59 = vld [vmem:[#allocation2 + $0x5b] sm:$0xff]  ;;  %v2542_v63 = vld [vmem:[#allocation2 + $0x63] sm:$0xff]  ;;  %v453_v56 = vmul.f32 %v7042_v42, %v405_v34 }
  0xb1   : > { %v932_v62 = vld [vmem:[#allocation2 + $0x59] sm:$0xff]  ;;  %859 = vst.msk [vmem:[#allocation2 + $0x88] sm:$0xff] %vm841_vm1, %v817_v54  ;;  %858 = vst.msk [vmem:[#allocation2 + $0x80] sm:$0xff] %vm841_vm1, %v816_v55  ;;  %6253 = vmatmul.mubr.msk.f32.gmra.mrb[8].mxu0 %vm841_vm1, %v2541_v59  ;;  %v933_v6 = vld [vmem:[#allocation2 + $0x61] sm:$0xff]  ;;  %v537_v54 = vmax.f32 %v496_v28, 0.0  ;;  %v498_v55 = vadd.f32 %v7049_v45, %v450_v33 }
  0xb2   : > { %v693_v4 = vpop.permute.xlu1 %692  ;;  %v688_v5 = vpop.permute.xlu0 %687  ;;  %6032 = vmatmul.mubr.msk.f32.gmra.mrb[10].mxu1 %vm841_vm1, %v932_v62  ;;  %6255 = vmatprep.mubr.msk.f32.mxu0 %vm841_vm1, %v2542_v63  ;;  %v407_v62 = vsub.f32 %v359_v41, %v7027_v35  ;;  %v406_v63 = vsub.f32 %v358_v43, %v7027_v35  ;;  %v501_v35 = vadd.f32 %v7049_v45, %v453_v56  ;;  %v2963_v33 = vld [vmem:[#allocation2 + $0x1c] sm:$0xff] }
  0xb3   : > { %v819_v12 = vmul.f32 %v693_v4, %v532_v48  ;;  %v818_v14 = vmul.f32 %v688_v5, %v531_v49  ;;  %6034 = vmatprep.mubr.msk.f32.mxu1 %vm841_vm1, %v933_v6  ;;  %v538_v48 = vmax.f32 %v497_v27, 0.0  ;;  %v499_v49 = vadd.f32 %v7049_v45, %v451_v29  ;;  %v7459_v56 = vld [vmem:[#allocation2 + $0x3c] sm:$0xff] }
  0xb4   : > { %v2543_v24 = vld [vmem:[#allocation2 + $0x6b] sm:$0xff]  ;;  %v2544_v26 = vld [vmem:[#allocation2 + $0x73] sm:$0xff]  ;;  %v455_v17 = vmul.f32 %v7042_v42, %v407_v62  ;;  %v454_v20 = vmul.f32 %v7042_v42, %v406_v63  ;;  %v542_v28 = vmax.f32 %v501_v35, 0.0  ;;  %v541_v29 = vmax.f32 %v500_v11, 0.0 }
  0xb5   : > { %v934_v25 = vld [vmem:[#allocation2 + $0x69] sm:$0xff]  ;;  %861 = vst.msk [vmem:[#allocation2 + $0x98] sm:$0xff] %vm841_vm1, %v819_v12  ;;  %860 = vst.msk [vmem:[#allocation2 + $0x90] sm:$0xff] %vm841_vm1, %v818_v14  ;;  %6256 = vmatmul.mubr.msk.f32.gmra.mrb[10].mxu0 %vm841_vm1, %v2543_v24  ;;  %v935_v32 = vld [vmem:[#allocation2 + $0x71] sm:$0xff]  ;;  %v550_v35 = vmax.f32 %v7096_v7, 0.0  ;;  %v549_v11 = vmax.f32 %v7099_v8, 0.0 }
  0xb6   : > { %v703_v30 = vpop.permute.xlu1 %702  ;;  %v698_v31 = vpop.permute.xlu0 %697  ;;  %6035 = vmatmul.mubr.msk.f32.gmra.mrb[12].mxu1 %vm841_vm1, %v934_v25  ;;  %6258 = vmatprep.mubr.msk.f32.mxu0 %vm841_vm1, %v2544_v26  ;;  %v2962_v24 = vld [vmem:[#allocation2 + $0x14] sm:$0xff] }
  0xb7   : > { %v821_v37 = vmul.f32 %v703_v30, %v534_v9  ;;  %v820_v15 = vmul.f32 %v698_v31, %v533_v10  ;;  %6037 = vmatprep.mubr.msk.f32.mxu1 %vm841_vm1, %v935_v32  ;;  %v540_v9 = vmax.f32 %v499_v49, 0.0  ;;  %v539_v10 = vmax.f32 %v498_v55, 0.0 }
  0xb8   : > { %v2545_v44 = vld [vmem:[#allocation2 + $0x7b] sm:$0xff]  ;;  %v2546_v47 = vld [vmem:[#allocation2 + $0x83] sm:$0xff]  ;;  %v503_v31 = vadd.f32 %v7049_v45, %v455_v17  ;;  %v502_v32 = vadd.f32 %v7049_v45, %v454_v20  ;;  %v545_v55 = vmax.f32 %v7063_v51, 0.0 }
  0xb9   : > { %v936_v46 = vld [vmem:[#allocation2 + $0x79] sm:$0xff]  ;;  %863 = vst.msk [vmem:[#allocation2 + $0xa8] sm:$0xff] %vm841_vm1, %v821_v37  ;;  %862 = vst.msk [vmem:[#allocation2 + $0xa0] sm:$0xff] %vm841_vm1, %v820_v15  ;;  %6259 = vmatmul.mubr.msk.f32.gmra.mrb[12].mxu0 %vm841_vm1, %v2545_v44  ;;  %v937_v53 = vld [vmem:[#allocation2 + $0x81] sm:$0xff] }
  0xba   : > { %v713_v52 = vpop.permute.xlu1 %712  ;;  %v708_v16 = vpop.permute.xlu0 %707  ;;  %6038 = vmatmul.mubr.msk.f32.gmra.mrb[14].mxu1 %vm841_vm1, %v936_v46  ;;  %6261 = vmatprep.mubr.msk.f32.mxu0 %vm841_vm1, %v2546_v47  ;;  %v7438_v45 = vld [vmem:[#allocation2 + $0x24] sm:$0xff]  ;;  %v544_v43 = vmax.f32 %v503_v31, 0.0  ;;  %v543_v44 = vmax.f32 %v502_v32, 0.0  ;;  %v7443_v46 = vld [vmem:[#allocation2 + $0x2c] sm:$0xff]  ;;  %v553_v31 = vmax.f32 %v7131_v23, 0.0  ;;  %v7514_v32 = vld [vmem:[#allocation2 + $0x7c] sm:$0xff] }
  0xbb   : > { %v823_v58 = vmul.f32 %v713_v52, %v536_v39  ;;  %v822_v59 = vmul.f32 %v708_v16, %v535_v40  ;;  %6040 = vmatprep.mubr.msk.f32.mxu1 %vm841_vm1, %v937_v53  ;;  %v7493_v17 = vld [vmem:[#allocation2 + $0x64] sm:$0xff] }
  0xbc   : > { %v2547_v0 = vld [vmem:[#allocation2 + $0x8b] sm:$0xff]  ;;  %v2548_v3 = vld [vmem:[#allocation2 + $0x93] sm:$0xff] }
  0xbd   : > { %v938_v1 = vld [vmem:[#allocation2 + $0x89] sm:$0xff]  ;;  %865 = vst.msk [vmem:[#allocation2 + $0xb8] sm:$0xff] %vm841_vm1, %v823_v58  ;;  %864 = vst.msk [vmem:[#allocation2 + $0xb0] sm:$0xff] %vm841_vm1, %v822_v59  ;;  %6262 = vmatmul.mubr.msk.f32.gmra.mrb[14].mxu0 %vm841_vm1, %v2547_v0  ;;  %v939_v6 = vld [vmem:[#allocation2 + $0x91] sm:$0xff]  ;;  %v548_v0 = vmax.f32 %v7078_v60, 0.0 }
  0xbe   : > { %v723_v4 = vpop.permute.xlu1 %722  ;;  %v718_v5 = vpop.permute.xlu0 %717  ;;  %6041 = vmatmul.mubr.msk.f32.gmra.mrb[16].mxu1 %vm841_vm1, %v938_v1  ;;  %6264 = vmatprep.mubr.msk.f32.mxu0 %vm841_vm1, %v2548_v3  ;;  %v7465_v58 = vld [vmem:[#allocation2 + $0x44] sm:$0xff]  ;;  %v547_v1 = vmax.f32 %v7081_v61, 0.0  ;;  %v7473_v3 = vld [vmem:[#allocation2 + $0x4c] sm:$0xff] }
  0xbf   : > { %v825_v12 = vmul.f32 %v723_v4, %v538_v48  ;;  %v824_v14 = vmul.f32 %v718_v5, %v537_v54  ;;  %6043 = vmatprep.mubr.msk.f32.mxu1 %vm841_vm1, %v939_v6  ;;  %v546_v54 = vmax.f32 %v7060_v50, 0.0  ;;  %v7479_v5 = vld [vmem:[#allocation2 + $0x54] sm:$0xff] }
  0xc0   : > { %v2549_v21 = vld [vmem:[#allocation2 + $0x9b] sm:$0xff] }
  0xc1   : > { %v940_v22 = vld [vmem:[#allocation2 + $0x99] sm:$0xff]  ;;  %867 = vst.msk [vmem:[#allocation2 + $0xc8] sm:$0xff] %vm841_vm1, %v825_v12  ;;  %866 = vst.msk [vmem:[#allocation2 + $0xc0] sm:$0xff] %vm841_vm1, %v824_v14  ;;  %6265 = vmatmul.mubr.msk.f32.gmra.mrb[16].mxu0 %vm841_vm1, %v2549_v21  ;;  %v941_v27 = vld [vmem:[#allocation2 + $0xa1] sm:$0xff] }
  0xc2   : > { %v733_v25 = vpop.permute.xlu1 %732  ;;  %v728_v26 = vpop.permute.xlu0 %727  ;;  %6044 = vmatmul.mubr.msk.f32.gmra.mrb[18].mxu1 %vm841_vm1, %v940_v22  ;;  %6296 = vmatprep.mubr.msk.f32.mxu0 %vm841_vm1, %v2962_v24  ;;  %v7487_v12 = vld [vmem:[#allocation2 + $0x5c] sm:$0xff]  ;;  %v552_v24 = vmax.f32 %v7113_v18, 0.0 }
  0xc3   : > { %v827_v30 = vmul.f32 %v733_v25, %v540_v9  ;;  %v826_v42 = vmul.f32 %v728_v26, %v539_v10  ;;  %6046 = vmatprep.mubr.msk.f32.mxu1 %vm841_vm1, %v941_v27  ;;  %v551_v25 = vmax.f32 %v7116_v19, 0.0  ;;  %v7501_v26 = vld [vmem:[#allocation2 + $0x6c] sm:$0xff] }
  0xc4   : > { %v942_v34 = vld [vmem:[#allocation2 + $0xa9] sm:$0xff]  ;;  %v943_v39 = vld [vmem:[#allocation2 + $0xb1] sm:$0xff] }
  0xc5   : > { %869 = vst.msk [vmem:[#allocation2 + $0xd8] sm:$0xff] %vm841_vm1, %v827_v30  ;;  %868 = vst.msk [vmem:[#allocation2 + $0xd0] sm:$0xff] %vm841_vm1, %v826_v42  ;;  %6297 = vmatmul.mubr.msk.f32.vlgmr.msra.gmra.mrb[0].mxu0 %vm841_vm1, %v2963_v33 }
  0xc6   : > { %6351 = vmatpush3.msk.msra.mxu0 %vm1067_vm0, %v7313_v38  ;;  %v743_v37 = vpop.permute.xlu1 %742  ;;  %v738_v15 = vpop.permute.xlu0 %737  ;;  %6047 = vmatmul.mubr.msk.f32.gmra.mrb[20].mxu1 %vm841_vm1, %v942_v34  ;;  %v7451_v38 = vld [vmem:[#allocation2 + $0x34] sm:$0xff]  ;;  %v7520_v34 = vld [vmem:[#allocation2 + $0x84] sm:$0xff] }
  0xc7   : > { %v829_v40 = vmul.f32 %v743_v37, %v542_v28  ;;  %v828_v41 = vmul.f32 %v738_v15, %v541_v29  ;;  %6299 = vmatprep.mubr.msk.f32.mxu0 %vm841_vm1, %v7438_v45  ;;  %6049 = vmatprep.mubr.msk.f32.mxu1 %vm841_vm1, %v943_v39  ;;  %v7507_v28 = vld [vmem:[#allocation2 + $0x74] sm:$0xff]  ;;  %v7526_v39 = vld [vmem:[#allocation2 + $0x8c] sm:$0xff] }
  0xc8   : > { %v944_v47 = vld [vmem:[#allocation2 + $0xb9] sm:$0xff]  ;;  %6406 = vmatprep.subr.msk.mxu0 %vm1067_vm0, %v7433_v36  ;;  %v945_v52 = vld [vmem:[#allocation2 + $0xc1] sm:$0xff] }
  0xc9   : > { %871 = vst.msk [vmem:[#allocation2 + $0xe8] sm:$0xff] %vm841_vm1, %v829_v40  ;;  %870 = vst.msk [vmem:[#allocation2 + $0xe0] sm:$0xff] %vm841_vm1, %v828_v41  ;;  %6300 = vmatmul.mubr.msk.f32.gmra.mrb[2].mxu0 %vm841_vm1, %v7443_v46  ;;  %v7531_v41 = vld [vmem:[#allocation2 + $0x94] sm:$0xff] }
  0xca   : > { %v753_v48 = vpop.permute.xlu1 %752  ;;  %v748_v49 = vpop.permute.xlu0 %747  ;;  %6050 = vmatmul.mubr.msk.f32.gmra.mrb[22].mxu1 %vm841_vm1, %v944_v47  ;;  %6302 = vmatprep.mubr.msk.f32.mxu0 %vm841_vm1, %v7451_v38  ;;  %v885_v47 = vld [vmem:[#allocation2 + $0x8] sm:$0xff] }
  0xcb   : > { %v831_v16 = vmul.f32 %v753_v48, %v544_v43  ;;  %v830_v53 = vmul.f32 %v748_v49, %v543_v44  ;;  %6052 = vmatprep.mubr.msk.f32.mxu1 %vm841_vm1, %v945_v52  ;;  %v884_v43 = vld [vmem:[#allocation2] sm:$0xff]  ;;  %v7546_v49 = vld [vmem:[%s8654_s1 + $0xc] sm:$0xf]  ;;  %v886_v52 = vld [vmem:[#allocation2 + $0x10] sm:$0xff] }
  0xcc   : > { %v946_v57 = vld [vmem:[#allocation2 + $0xc9] sm:$0xff]  ;;  %v947_v50 = vld [vmem:[#allocation2 + $0xd1] sm:$0xff]  ;;  %v7537_v44 = vld [vmem:[#allocation2 + $0x9c] sm:$0xff] }
  0xcd   : > { %873 = vst.msk [vmem:[#allocation2 + $0xf8] sm:$0xff] %vm841_vm1, %v831_v16  ;;  %872 = vst.msk [vmem:[#allocation2 + $0xf0] sm:$0xff] %vm841_vm1, %v830_v53  ;;  %6303 = vmatmul.mubr.msk.f32.gmra.mrb[4].mxu0 %vm841_vm1, %v7459_v56  ;;  %v7541_v48 = vld [vmem:[#allocation2 + $0xa4] sm:$0xff]  ;;  %v7554_v16 = vld [vmem:[#allocation2 + $0xac] sm:$0xff] }
  0xce   : > { %v763_v59 = vpop.permute.xlu1 %762  ;;  %v758_v62 = vpop.permute.xlu0 %757  ;;  %6053 = vmatmul.mubr.msk.f32.gmra.mrb[24].mxu1 %vm841_vm1, %v946_v57  ;;  %6305 = vmatprep.mubr.msk.f32.mxu0 %vm841_vm1, %v7465_v58  ;;  %v887_v53 = vld [vmem:[#allocation2 + $0x18] sm:$0xff]  ;;  %v889_v57 = vld [vmem:[#allocation2 + $0x28] sm:$0xff] }
  0xcf   : > { %v833_v51 = vmul.f32 %v763_v59, %v546_v54  ;;  %v832_v63 = vmul.f32 %v758_v62, %v545_v55  ;;  %6055 = vmatprep.mubr.msk.f32.mxu1 %vm841_vm1, %v947_v50  ;;  %v7560_v54 = vld [vmem:[#allocation2 + $0xb4] sm:$0xff]  ;;  %v888_v55 = vld [vmem:[#allocation2 + $0x20] sm:$0xff]  ;;  %v7576_v50 = vld [vmem:[#allocation2 + $0xcc] sm:$0xff] }
  0xd0   : > { %v948_v4 = vld [vmem:[#allocation2 + $0xd9] sm:$0xff]  ;;  %v949_v60 = vld [vmem:[#allocation2 + $0xe1] sm:$0xff]  ;;  %v890_v62 = vld [vmem:[#allocation2 + $0x30] sm:$0xff] }
  0xd1   : > { %875 = vst.msk [vmem:[#allocation2 + $0x108] sm:$0xff] %vm841_vm1, %v833_v51  ;;  %874 = vst.msk [vmem:[#allocation2 + $0x100] sm:$0xff] %vm841_vm1, %v832_v63  ;;  %6306 = vmatmul.mubr.msk.f32.gmra.mrb[6].mxu0 %vm841_vm1, %v7473_v3  ;;  %v7570_v59 = vld [vmem:[#allocation2 + $0xc4] sm:$0xff]  ;;  %v891_v51 = vld [vmem:[#allocation2 + $0x38] sm:$0xff] }
  0xd2   : > { %v773_v6 = vpop.permute.xlu1 %772  ;;  %v768_v9 = vpop.permute.xlu0 %767  ;;  %6056 = vmatmul.mubr.msk.f32.gmra.mrb[26].mxu1 %vm841_vm1, %v948_v4  ;;  %6308 = vmatprep.mubr.msk.f32.mxu0 %vm841_vm1, %v7479_v5  ;;  %v7580_v63 = vld [vmem:[#allocation2 + $0xd4] sm:$0xff]  ;;  %v893_v4 = vld [vmem:[#allocation2 + $0x48] sm:$0xff] }
  0xd3   : > { %v835_v61 = vmul.f32 %v773_v6, %v548_v0  ;;  %v834_v10 = vmul.f32 %v768_v9, %v547_v1  ;;  %6058 = vmatprep.mubr.msk.f32.mxu1 %vm841_vm1, %v949_v60  ;;  %v892_v0 = vld [vmem:[#allocation2 + $0x40] sm:$0xff]  ;;  %v894_v9 = vld [vmem:[#allocation2 + $0x50] sm:$0xff] }
  0xd4   : > { %v950_v14 = vld [vmem:[#allocation2 + $0xe9] sm:$0xff]  ;;  %v951_v7 = vld [vmem:[#allocation2 + $0xf1] sm:$0xff]  ;;  %v7586_v1 = vld [vmem:[#allocation2 + $0xdc] sm:$0xff] }
  0xd5   : > { %877 = vst.msk [vmem:[#allocation2 + $0x118] sm:$0xff] %vm841_vm1, %v835_v61  ;;  %876 = vst.msk [vmem:[#allocation2 + $0x110] sm:$0xff] %vm841_vm1, %v834_v10  ;;  %6309 = vmatmul.mubr.msk.f32.gmra.mrb[8].mxu0 %vm841_vm1, %v7487_v12  ;;  %v7590_v6 = vld [vmem:[#allocation2 + $0xe4] sm:$0xff]  ;;  %v7596_v60 = vld [vmem:[#allocation2 + $0xec] sm:$0xff] }
  0xd6   : > { %v783_v20 = vpop.permute.xlu1 %782  ;;  %v778_v21 = vpop.permute.xlu0 %777  ;;  %6059 = vmatmul.mubr.msk.f32.gmra.mrb[28].mxu1 %vm841_vm1, %v950_v14  ;;  %6311 = vmatprep.mubr.msk.f32.mxu0 %vm841_vm1, %v7493_v17  ;;  %v895_v61 = vld [vmem:[#allocation2 + $0x58] sm:$0xff]  ;;  %v897_v14 = vld [vmem:[#allocation2 + $0x68] sm:$0xff] }
  0xd7   : > { %v837_v8 = vmul.f32 %v783_v20, %v550_v35  ;;  %v836_v22 = vmul.f32 %v778_v21, %v549_v11  ;;  %6061 = vmatprep.mubr.msk.f32.mxu1 %vm841_vm1, %v951_v7  ;;  %v7600_v10 = vld [vmem:[#allocation2 + $0xf4] sm:$0xff]  ;;  %v896_v35 = vld [vmem:[#allocation2 + $0x60] sm:$0xff] }
  0xd8   : > { %v952_v27 = vld [vmem:[#allocation2 + $0xf9] sm:$0xff]  ;;  %v953_v18 = vld [vmem:[#allocation2 + $0x101] sm:$0xff]  ;;  %v898_v21 = vld [vmem:[#allocation2 + $0x70] sm:$0xff] }
  0xd9   : > { %879 = vst.msk [vmem:[#allocation2 + $0x128] sm:$0xff] %vm841_vm1, %v837_v8  ;;  %878 = vst.msk [vmem:[#allocation2 + $0x120] sm:$0xff] %vm841_vm1, %v836_v22  ;;  %6312 = vmatmul.mubr.msk.f32.gmra.mrb[10].mxu0 %vm841_vm1, %v7501_v26  ;;  %v7606_v11 = vld [vmem:[#allocation2 + $0xfc] sm:$0xff]  ;;  %v7610_v20 = vld [vmem:[#allocation2 + $0x104] sm:$0xff] }
  0xda   : > { %v793_v29 = vpop.permute.xlu1 %792  ;;  %v788_v30 = vpop.permute.xlu0 %787  ;;  %6062 = vmatmul.mubr.msk.f32.gmra.mrb[30].mxu1 %vm841_vm1, %v952_v27  ;;  %6314 = vmatprep.mubr.msk.f32.mxu0 %vm841_vm1, %v7507_v28  ;;  %v899_v8 = vld [vmem:[#allocation2 + $0x78] sm:$0xff]  ;;  %v901_v27 = vld [vmem:[#allocation2 + $0x88] sm:$0xff] }
  0xdb   : > { %v839_v19 = vmul.f32 %v793_v29, %v552_v24  ;;  %v838_v42 = vmul.f32 %v788_v30, %v551_v25  ;;  %6064 = vmatprep.mubr.msk.f32.mxu1 %vm841_vm1, %v953_v18  ;;  %v900_v24 = vld [vmem:[#allocation2 + $0x80] sm:$0xff]  ;;  %v902_v30 = vld [vmem:[#allocation2 + $0x90] sm:$0xff] }
  0xdc   : > { %v954_v33 = vld [vmem:[#allocation2 + $0x109] sm:$0xff]  ;;  %v955_v15 = vld [vmem:[#allocation2 + $0x111] sm:$0xff]  ;;  %v956_v40 = vld [vmem:[#allocation2 + $0x119] sm:$0x3f] }
  0xdd   : > { %881 = vst.msk [vmem:[#allocation2 + $0x138] sm:$0xff] %vm841_vm1, %v839_v19  ;;  %880 = vst.msk [vmem:[#allocation2 + $0x130] sm:$0xff] %vm841_vm1, %v838_v42  ;;  %6315 = vmatmul.mubr.msk.f32.gmra.mrb[12].mxu0 %vm841_vm1, %v7514_v32  ;;  %v7616_v7 = vld [vmem:[#allocation2 + $0x10c] sm:$0xff]  ;;  %v7620_v22 = vld [vmem:[#allocation2 + $0x114] sm:$0xff] }
  0xde   : > { %v798_v37 = vpop.permute.xlu0 %797  ;;  %6065 = vmatmul.mubr.msk.f32.gmra.mrb[32].mxu1 %vm841_vm1, %v954_v33  ;;  %6317 = vmatprep.mubr.msk.f32.mxu0 %vm841_vm1, %v7520_v34  ;;  %v903_v19 = vld [vmem:[#allocation2 + $0x98] sm:$0xff]  ;;  %v904_v42 = vld [vmem:[#allocation2 + $0xa0] sm:$0xff] }
  0xdf   : > { %v840_v23 = vmul.f32 %v798_v37, %v553_v31  ;;  %6067 = vmatprep.mubr.msk.f32.mxu1 %vm841_vm1, %v955_v15  ;;  %v905_v31 = vld [vmem:[#allocation2 + $0xa8] sm:$0xff]  ;;  %v7646_v33 = vld [vmem:[%s8654_s1 + $0x20] sm:$0xf]  ;;  %v906_v37 = vld [vmem:[#allocation2 + $0xb0] sm:$0xff] }
  0xe0   : > { %v7626_v25 = vld [vmem:[#allocation2 + $0x11c] sm:$0xff]  ;;  %v7630_v29 = vld [vmem:[#allocation2 + $0x124] sm:$0xff] }
  0xe1   : > { %883 = vst.msk [vmem:[#allocation2 + $0x140] sm:$0xf] %vm882_vm2, %v840_v23  ;;  %6318 = vmatmul.mubr.msk.f32.gmra.mrb[14].mxu0 %vm841_vm1, %v7526_v39  ;;  %v1673_v15 = vld [vmem:[#allocation2 + $0xa] sm:$0xff]  ;;  %v7703_v23 = vld [vmem:[#allocation2 + $0x12] sm:$0xff] }
  0xe2   : > { %6068 = vmatmul.mubr.msk.f32.gmra.mrb[34].mxu1 %vm841_vm1, %v956_v40  ;;  %6320 = vmatprep.mubr.msk.f32.mxu0 %vm841_vm1, %v7531_v41  ;;  %v7718_v40 = vld [vmem:[#allocation2 + $0x1a] sm:$0xff] }
  0xe3   : > { %6072 = vmatprep.mubr.msk.f32.mxu1 %vm841_vm1, %v884_v43  ;;  %v7730_v43 = vld [vmem:[#allocation2 + $0x2a] sm:$0xff] }
  0xe4   : > { %v2997_v18 = vld [vmem:[#allocation2 + $0x12c] sm:$0x3f] }
  0xe5   : > { %6321 = vmatmul.mubr.msk.f32.gmra.mrb[16].mxu0 %vm841_vm1, %v7537_v44 }
  0xe6   : > { %6073 = vmatmul.mubr.msk.f32.vlgmr.msra.gmra.mrb[0].mxu1 %vm841_vm1, %v885_v47  ;;  %6323 = vmatprep.mubr.msk.f32.mxu0 %vm841_vm1, %v7541_v48  ;;  %v7742_v47 = vld [vmem:[#allocation2 + $0x3a] sm:$0xff] }
  0xe7   : > { %6075 = vmatprep.mubr.msk.f32.mxu1 %vm841_vm1, %v886_v52  ;;  %6127 = vmatpush3.msk.msra.mxu1 %vm1067_vm0, %v7290_v13  ;;  %v7566_v13 = vld [vmem:[#allocation2 + $0xbc] sm:$0xff]  ;;  %v7760_v52 = vld [vmem:[#allocation2 + $0x52] sm:$0xff] }
  0xe8   : > { %6182 = vmatprep.subr.msk.mxu1 %vm1067_vm0, %v7546_v49 }
  0xe9   : > { %6324 = vmatmul.mubr.msk.f32.gmra.mrb[18].mxu0 %vm841_vm1, %v7554_v16 }
  0xea   : > { %6076 = vmatmul.mubr.msk.f32.gmra.mrb[2].mxu1 %vm841_vm1, %v887_v53  ;;  %6326 = vmatprep.mubr.msk.f32.mxu0 %vm841_vm1, %v7560_v54  ;;  %v7772_v53 = vld [vmem:[#allocation2 + $0x62] sm:$0xff] }
  0xeb   : > { %6078 = vmatprep.mubr.msk.f32.mxu1 %vm841_vm1, %v888_v55  ;;  %v7784_v55 = vld [vmem:[#allocation2 + $0x72] sm:$0xff] }
  0xed   : > { %6327 = vmatmul.mubr.msk.f32.gmra.mrb[20].mxu0 %vm841_vm1, %v7566_v13 }
  0xee   : > { %6079 = vmatmul.mubr.msk.f32.gmra.mrb[4].mxu1 %vm841_vm1, %v889_v57  ;;  %6329 = vmatprep.mubr.msk.f32.mxu0 %vm841_vm1, %v7570_v59  ;;  %v7796_v57 = vld [vmem:[#allocation2 + $0x82] sm:$0xff] }
  0xef   : > { %6081 = vmatprep.mubr.msk.f32.mxu1 %vm841_vm1, %v890_v62  ;;  %v7801_v62 = vld [vmem:[#allocation2 + $0x8a] sm:$0xff] }
  0xf1   : > { %6330 = vmatmul.mubr.msk.f32.gmra.mrb[22].mxu0 %vm841_vm1, %v7576_v50 }
  0xf2   : > { %6082 = vmatmul.mubr.msk.f32.gmra.mrb[6].mxu1 %vm841_vm1, %v891_v51  ;;  %6332 = vmatprep.mubr.msk.f32.mxu0 %vm841_vm1, %v7580_v63  ;;  %v7806_v51 = vld [vmem:[#allocation2 + $0x92] sm:$0xff] }
  0xf3   : > { %6084 = vmatprep.mubr.msk.f32.mxu1 %vm841_vm1, %v892_v0  ;;  %v7811_v0 = vld [vmem:[#allocation2 + $0x9a] sm:$0xff] }
  0xf5   : > { %6333 = vmatmul.mubr.msk.f32.gmra.mrb[24].mxu0 %vm841_vm1, %v7586_v1 }
  0xf6   : > { %6085 = vmatmul.mubr.msk.f32.gmra.mrb[8].mxu1 %vm841_vm1, %v893_v4  ;;  %6335 = vmatprep.mubr.msk.f32.mxu0 %vm841_vm1, %v7590_v6  ;;  %v7816_v4 = vld [vmem:[#allocation2 + $0xa2] sm:$0xff] }
  0xf7   : > { %6087 = vmatprep.mubr.msk.f32.mxu1 %vm841_vm1, %v894_v9  ;;  %v7821_v9 = vld [vmem:[#allocation2 + $0xaa] sm:$0xff] }
  0xf9   : > { %6336 = vmatmul.mubr.msk.f32.gmra.mrb[26].mxu0 %vm841_vm1, %v7596_v60 }
  0xfa   : > { %6088 = vmatmul.mubr.msk.f32.gmra.mrb[10].mxu1 %vm841_vm1, %v895_v61  ;;  %6338 = vmatprep.mubr.msk.f32.mxu0 %vm841_vm1, %v7600_v10  ;;  %v7827_v61 = vld [vmem:[#allocation2 + $0xb2] sm:$0xff] }
  0xfb   : > { %6090 = vmatprep.mubr.msk.f32.mxu1 %vm841_vm1, %v896_v35  ;;  %v7833_v35 = vld [vmem:[#allocation2 + $0xba] sm:$0xff] }
  0xfd   : > { %6339 = vmatmul.mubr.msk.f32.gmra.mrb[28].mxu0 %vm841_vm1, %v7606_v11 }
  0xfe   : > { %6091 = vmatmul.mubr.msk.f32.gmra.mrb[12].mxu1 %vm841_vm1, %v897_v14  ;;  %6341 = vmatprep.mubr.msk.f32.mxu0 %vm841_vm1, %v7610_v20  ;;  %v7838_v14 = vld [vmem:[#allocation2 + $0xc2] sm:$0xff] }
  0xff   : > { %6093 = vmatprep.mubr.msk.f32.mxu1 %vm841_vm1, %v898_v21  ;;  %v7843_v21 = vld [vmem:[#allocation2 + $0xca] sm:$0xff] }
 0x101   : > { %6342 = vmatmul.mubr.msk.f32.gmra.mrb[30].mxu0 %vm841_vm1, %v7616_v7 }
 0x102   : > { %6094 = vmatmul.mubr.msk.f32.gmra.mrb[14].mxu1 %vm841_vm1, %v899_v8  ;;  %6344 = vmatprep.mubr.msk.f32.mxu0 %vm841_vm1, %v7620_v22  ;;  %v7848_v8 = vld [vmem:[#allocation2 + $0xd2] sm:$0xff] }
 0x103   : > { %6096 = vmatprep.mubr.msk.f32.mxu1 %vm841_vm1, %v900_v24  ;;  %v7853_v24 = vld [vmem:[#allocation2 + $0xda] sm:$0xff] }
 0x105   : > { %6345 = vmatmul.mubr.msk.f32.gmra.mrb[32].mxu0 %vm841_vm1, %v7626_v25 }
 0x106   : > { %6097 = vmatmul.mubr.msk.f32.gmra.mrb[16].mxu1 %vm841_vm1, %v901_v27  ;;  %6347 = vmatprep.mubr.msk.f32.mxu0 %vm841_vm1, %v7630_v29  ;;  %v7858_v27 = vld [vmem:[#allocation2 + $0xe2] sm:$0xff] }
 0x107   : > { %6099 = vmatprep.mubr.msk.f32.mxu1 %vm841_vm1, %v902_v30  ;;  %v7863_v30 = vld [vmem:[#allocation2 + $0xea] sm:$0xff] }
 0x109   : > { %6348 = vmatmul.mubr.msk.f32.gmra.mrb[34].mxu0 %vm841_vm1, %v2997_v18  ;;  %v3832_v18 = vld [vmem:[#allocation2 + $0x75] sm:$0xff] }
 0x10a   : > { %6100 = vmatmul.mubr.msk.f32.gmra.mrb[18].mxu1 %vm841_vm1, %v903_v19  ;;  %6352 = vmatprep.mubr.msk.f32.mxu0 %vm841_vm1, %v7438_v45  ;;  %v907_v45 = vld [vmem:[#allocation2 + $0xb8] sm:$0xff] }
 0x10b   : > { %6102 = vmatprep.mubr.msk.f32.mxu1 %vm841_vm1, %v904_v42  ;;  %v7868_v19 = vld [vmem:[#allocation2 + $0xf2] sm:$0xff]  ;;  %v3833_v42 = vld [vmem:[#allocation2 + $0x7d] sm:$0xff] }
 0x10d   : > { %6353 = vmatmul.mubr.msk.f32.vlgmr.msra.gmra.mrb[0].mxu0 %vm841_vm1, %v7443_v46  ;;  %v909_v46 = vld [vmem:[#allocation2 + $0xc8] sm:$0xff] }
 0x10e   : > { %6407 = vmatpush3.msk.msra.mxu0 %vm1067_vm0, %v7433_v36  ;;  %6103 = vmatmul.mubr.msk.f32.gmra.mrb[20].mxu1 %vm841_vm1, %v905_v31  ;;  %v908_v36 = vld [vmem:[#allocation2 + $0xc0] sm:$0xff] }
 0x10f   : > { %6355 = vmatprep.mubr.msk.f32.mxu0 %vm841_vm1, %v7451_v38  ;;  %6105 = vmatprep.mubr.msk.f32.mxu1 %vm841_vm1, %v906_v37  ;;  %v910_v38 = vld [vmem:[#allocation2 + $0xd0] sm:$0xff]  ;;  %v7873_v31 = vld [vmem:[#allocation2 + $0xfa] sm:$0xff]  ;;  %v7878_v37 = vld [vmem:[#allocation2 + $0x102] sm:$0xff] }
 0x110   : > { %6462 = vmatprep.subr.msk.mxu0 %vm1067_vm0, %v7646_v33 }
 0x111   : > { %6356 = vmatmul.mubr.msk.f32.gmra.mrb[2].mxu0 %vm841_vm1, %v7459_v56  ;;  %v911_v56 = vld [vmem:[#allocation2 + $0xd8] sm:$0xff] }
 0x112   : > { %6106 = vmatmul.mubr.msk.f32.gmra.mrb[22].mxu1 %vm841_vm1, %v907_v45  ;;  %6358 = vmatprep.mubr.msk.f32.mxu0 %vm841_vm1, %v7465_v58  ;;  %v912_v58 = vld [vmem:[#allocation2 + $0xe0] sm:$0xff]  ;;  %v3835_v45 = vld [vmem:[#allocation2 + $0x8d] sm:$0xff] }
 0x113   : > { %6108 = vmatprep.mubr.msk.f32.mxu1 %vm841_vm1, %v908_v36  ;;  %v7883_v36 = vld [vmem:[#allocation2 + $0x10a] sm:$0xff] }
 0x115   : > { %6359 = vmatmul.mubr.msk.f32.gmra.mrb[4].mxu0 %vm841_vm1, %v7473_v3  ;;  %v913_v3 = vld [vmem:[#allocation2 + $0xe8] sm:$0xff] }
 0x116   : > { %6109 = vmatmul.mubr.msk.f32.gmra.mrb[24].mxu1 %vm841_vm1, %v909_v46  ;;  %6361 = vmatprep.mubr.msk.f32.mxu0 %vm841_vm1, %v7479_v5  ;;  %v914_v5 = vld [vmem:[#allocation2 + $0xf0] sm:$0xff] }
 0x117   : > { %6111 = vmatprep.mubr.msk.f32.mxu1 %vm841_vm1, %v910_v38  ;;  %v3836_v46 = vld [vmem:[#allocation2 + $0x95] sm:$0xff] }
 0x118   : > { %v7888_v38 = vld [vmem:[#allocation2 + $0x112] sm:$0xff] }
 0x119   : > { %6362 = vmatmul.mubr.msk.f32.gmra.mrb[6].mxu0 %vm841_vm1, %v7487_v12  ;;  %v915_v12 = vld [vmem:[#allocation2 + $0xf8] sm:$0xff] }
 0x11a   : > { %6112 = vmatmul.mubr.msk.f32.gmra.mrb[26].mxu1 %vm841_vm1, %v911_v56  ;;  %6364 = vmatprep.mubr.msk.f32.mxu0 %vm841_vm1, %v7493_v17  ;;  %v916_v17 = vld [vmem:[#allocation2 + $0x100] sm:$0xff] }
 0x11b   : > { %6114 = vmatprep.mubr.msk.f32.mxu1 %vm841_vm1, %v912_v58  ;;  %v3837_v56 = vld [vmem:[#allocation2 + $0x9d] sm:$0xff] }
 0x11c   : > { %v1707_v58 = vld [vmem:[#allocation2 + $0x11a] sm:$0x3f] }
 0x11d   : > { %6365 = vmatmul.mubr.msk.f32.gmra.mrb[8].mxu0 %vm841_vm1, %v7501_v26  ;;  %v917_v26 = vld [vmem:[#allocation2 + $0x108] sm:$0xff] }
 0x11e   : > { %6115 = vmatmul.mubr.msk.f32.gmra.mrb[28].mxu1 %vm841_vm1, %v913_v3  ;;  %6367 = vmatprep.mubr.msk.f32.mxu0 %vm841_vm1, %v7507_v28  ;;  %v918_v28 = vld [vmem:[#allocation2 + $0x110] sm:$0xff]  ;;  %v3838_v3 = vld [vmem:[#allocation2 + $0xa5] sm:$0xff] }
 0x11f   : > { %6117 = vmatprep.mubr.msk.f32.mxu1 %vm841_vm1, %v914_v5  ;;  %v3839_v5 = vld [vmem:[#allocation2 + $0xad] sm:$0xff] }
 0x121   : > { %6368 = vmatmul.mubr.msk.f32.gmra.mrb[10].mxu0 %vm841_vm1, %v7514_v32  ;;  %v919_v32 = vld [vmem:[#allocation2 + $0x118] sm:$0x3f] }
 0x122   : > { %6118 = vmatmul.mubr.msk.f32.gmra.mrb[30].mxu1 %vm841_vm1, %v915_v12  ;;  %6370 = vmatprep.mubr.msk.f32.mxu0 %vm841_vm1, %v7520_v34  ;;  %v1672_v34 = vld [vmem:[#allocation2 + $0x2] sm:$0xff]  ;;  %v3840_v12 = vld [vmem:[#allocation2 + $0xb5] sm:$0xff] }
 0x123   : > { %6120 = vmatprep.mubr.msk.f32.mxu1 %vm841_vm1, %v916_v17  ;;  %v3841_v17 = vld [vmem:[#allocation2 + $0xbd] sm:$0xff] }
 0x125   : > { %6371 = vmatmul.mubr.msk.f32.gmra.mrb[12].mxu0 %vm841_vm1, %v7526_v39  ;;  %v7712_v39 = vld [vmem:[%s8654_s1 + $0x10] sm:$0xf] }
 0x126   : > { %6121 = vmatmul.mubr.msk.f32.gmra.mrb[32].mxu1 %vm841_vm1, %v917_v26  ;;  %6373 = vmatprep.mubr.msk.f32.mxu0 %vm841_vm1, %v7531_v41  ;;  %v7724_v41 = vld [vmem:[#allocation2 + $0x22] sm:$0xff] }
 0x127   : > { %6123 = vmatprep.mubr.msk.f32.mxu1 %vm841_vm1, %v918_v28  ;;  %v3842_v26 = vld [vmem:[#allocation2 + $0xc5] sm:$0xff]  ;;  %v3843_v28 = vld [vmem:[#allocation2 + $0xcd] sm:$0xff] }
 0x129   : > { %6374 = vmatmul.mubr.msk.f32.gmra.mrb[14].mxu0 %vm841_vm1, %v7537_v44  ;;  %v7736_v44 = vld [vmem:[#allocation2 + $0x32] sm:$0xff] }
 0x12a   : > { %6124 = vmatmul.mubr.msk.f32.gmra.mrb[34].mxu1 %vm841_vm1, %v919_v32  ;;  %6376 = vmatprep.mubr.msk.f32.mxu0 %vm841_vm1, %v7541_v48  ;;  %v7748_v48 = vld [vmem:[#allocation2 + $0x42] sm:$0xff]  ;;  %v3844_v32 = vld [vmem:[#allocation2 + $0xd5] sm:$0xff] }
 0x12b   : > { %6128 = vmatprep.mubr.msk.f32.mxu1 %vm841_vm1, %v1672_v34  ;;  %v3845_v34 = vld [vmem:[#allocation2 + $0xdd] sm:$0xff] }
 0x12d   : > { %6377 = vmatmul.mubr.msk.f32.gmra.mrb[16].mxu0 %vm841_vm1, %v7554_v16  ;;  %v7766_v16 = vld [vmem:[#allocation2 + $0x5a] sm:$0xff] }
 0x12e   : > { %6129 = vmatmul.mubr.msk.f32.vlgmr.msra.gmra.mrb[0].mxu1 %vm841_vm1, %v1673_v15  ;;  %6379 = vmatprep.mubr.msk.f32.mxu0 %vm841_vm1, %v7560_v54  ;;  %v7778_v54 = vld [vmem:[#allocation2 + $0x6a] sm:$0xff] }
 0x12f   : > { %6131 = vmatprep.mubr.msk.f32.mxu1 %vm841_vm1, %v7703_v23  ;;  %6183 = vmatpush3.msk.msra.mxu1 %vm1067_vm0, %v7546_v49  ;;  %v7754_v49 = vld [vmem:[#allocation2 + $0x4a] sm:$0xff] }
 0x130   : > { %6518 = vmatprep.subr.msk.mxu1 %vm1067_vm0, %v7712_v39  ;;  %v3846_v15 = vld [vmem:[#allocation2 + $0xe5] sm:$0xff] }
 0x131   : > { %6380 = vmatmul.mubr.msk.f32.gmra.mrb[18].mxu0 %vm841_vm1, %v7566_v13  ;;  %v7790_v13 = vld [vmem:[#allocation2 + $0x7a] sm:$0xff] }
 0x132   : > { %6132 = vmatmul.mubr.msk.f32.gmra.mrb[2].mxu1 %vm841_vm1, %v7718_v40  ;;  %6382 = vmatprep.mubr.msk.f32.mxu0 %vm841_vm1, %v7570_v59  ;;  %v3425_v59 = vld [vmem:[#allocation2 + $0x12c] sm:$0xff] }
 0x133   : > { %6134 = vmatprep.mubr.msk.f32.mxu1 %vm841_vm1, %v7724_v41 }
 0x135   : > { %6383 = vmatmul.mubr.msk.f32.gmra.mrb[20].mxu0 %vm841_vm1, %v7576_v50  ;;  %v3426_v50 = vld [vmem:[#allocation2 + $0x134] sm:$0xff] }
 0x136   : > { %6135 = vmatmul.mubr.msk.f32.gmra.mrb[4].mxu1 %vm841_vm1, %v7730_v43  ;;  %6385 = vmatprep.mubr.msk.f32.mxu0 %vm841_vm1, %v7580_v63  ;;  %v3427_v63 = vld [vmem:[#allocation2 + $0x13c] sm:$0x3f] }
 0x137   : > { %6137 = vmatprep.mubr.msk.f32.mxu1 %vm841_vm1, %v7736_v44 }
 0x139   : > { %6386 = vmatmul.mubr.msk.f32.gmra.mrb[22].mxu0 %vm841_vm1, %v7586_v1  ;;  %v3822_v1 = vld [vmem:[#allocation2 + $0x25] sm:$0xff] }
 0x13a   : > { %6138 = vmatmul.mubr.msk.f32.gmra.mrb[6].mxu1 %vm841_vm1, %v7742_v47  ;;  %6388 = vmatprep.mubr.msk.f32.mxu0 %vm841_vm1, %v7590_v6  ;;  %v3823_v6 = vld [vmem:[#allocation2 + $0x2d] sm:$0xff] }
 0x13b   : > { %6140 = vmatprep.mubr.msk.f32.mxu1 %vm841_vm1, %v7748_v48 }
 0x13d   : > { %6389 = vmatmul.mubr.msk.f32.gmra.mrb[24].mxu0 %vm841_vm1, %v7596_v60  ;;  %v3824_v60 = vld [vmem:[#allocation2 + $0x35] sm:$0xff] }
 0x13e   : > { %6141 = vmatmul.mubr.msk.f32.gmra.mrb[8].mxu1 %vm841_vm1, %v7754_v49  ;;  %6391 = vmatprep.mubr.msk.f32.mxu0 %vm841_vm1, %v7600_v10  ;;  %v3825_v10 = vld [vmem:[#allocation2 + $0x3d] sm:$0xff] }
 0x13f   : > { %6143 = vmatprep.mubr.msk.f32.mxu1 %vm841_vm1, %v7760_v52 }
 0x141   : > { %6392 = vmatmul.mubr.msk.f32.gmra.mrb[26].mxu0 %vm841_vm1, %v7606_v11  ;;  %v3826_v11 = vld [vmem:[#allocation2 + $0x45] sm:$0xff] }
 0x142   : > { %6144 = vmatmul.mubr.msk.f32.gmra.mrb[10].mxu1 %vm841_vm1, %v7766_v16  ;;  %6394 = vmatprep.mubr.msk.f32.mxu0 %vm841_vm1, %v7610_v20  ;;  %v3827_v20 = vld [vmem:[#allocation2 + $0x4d] sm:$0xff] }
 0x143   : > { %6146 = vmatprep.mubr.msk.f32.mxu1 %vm841_vm1, %v7772_v53 }
 0x145   : > { %6395 = vmatmul.mubr.msk.f32.gmra.mrb[28].mxu0 %vm841_vm1, %v7616_v7  ;;  %v3828_v7 = vld [vmem:[#allocation2 + $0x55] sm:$0xff] }
 0x146   : > { %6147 = vmatmul.mubr.msk.f32.gmra.mrb[12].mxu1 %vm841_vm1, %v7778_v54  ;;  %6397 = vmatprep.mubr.msk.f32.mxu0 %vm841_vm1, %v7620_v22  ;;  %v3829_v22 = vld [vmem:[#allocation2 + $0x5d] sm:$0xff] }
 0x147   : > { %6149 = vmatprep.mubr.msk.f32.mxu1 %vm841_vm1, %v7784_v55 }
 0x149   : > { %6398 = vmatmul.mubr.msk.f32.gmra.mrb[30].mxu0 %vm841_vm1, %v7626_v25  ;;  %v3830_v25 = vld [vmem:[#allocation2 + $0x65] sm:$0xff] }
 0x14a   : > { %6150 = vmatmul.mubr.msk.f32.gmra.mrb[14].mxu1 %vm841_vm1, %v7790_v13  ;;  %6400 = vmatprep.mubr.msk.f32.mxu0 %vm841_vm1, %v7630_v29  ;;  %v3831_v29 = vld [vmem:[#allocation2 + $0x6d] sm:$0xff] }
 0x14b   : > { %6152 = vmatprep.mubr.msk.f32.mxu1 %vm841_vm1, %v7796_v57 }
 0x14d   : > { %6401 = vmatmul.mubr.msk.f32.gmra.mrb[32].mxu0 %vm841_vm1, %v3425_v59  ;;  %v4257_v59 = vld [vmem:[#allocation2 + $0x4e] sm:$0xff] }
 0x14e   : > { %6153 = vmatmul.mubr.msk.f32.gmra.mrb[16].mxu1 %vm841_vm1, %v7801_v62  ;;  %6403 = vmatprep.mubr.msk.f32.mxu0 %vm841_vm1, %v3426_v50  ;;  %v4259_v50 = vld [vmem:[#allocation2 + $0x5e] sm:$0xff] }
 0x14f   : > { %6155 = vmatprep.mubr.msk.f32.mxu1 %vm841_vm1, %v7806_v51 }
 0x151   : > { %6404 = vmatmul.mubr.msk.f32.gmra.mrb[34].mxu0 %vm841_vm1, %v3427_v63  ;;  %v4261_v63 = vld [vmem:[#allocation2 + $0x6e] sm:$0xff] }
 0x152   : > { %6156 = vmatmul.mubr.msk.f32.gmra.mrb[18].mxu1 %vm841_vm1, %v7811_v0  ;;  %6408 = vmatprep.mubr.msk.f32.mxu0 %vm841_vm1, %v3822_v1  ;;  %v4263_v1 = vld [vmem:[#allocation2 + $0x7e] sm:$0xff] }
 0x153   : > { %6158 = vmatprep.mubr.msk.f32.mxu1 %vm841_vm1, %v7816_v4 }
 0x155   : > { %6409 = vmatmul.mubr.msk.f32.vlgmr.msra.gmra.mrb[0].mxu0 %vm841_vm1, %v3823_v6  ;;  %v4265_v6 = vld [vmem:[#allocation2 + $0x8e] sm:$0xff] }
 0x156   : > { %6463 = vmatpush3.msk.msra.mxu0 %vm1067_vm0, %v7646_v33  ;;  %6159 = vmatmul.mubr.msk.f32.gmra.mrb[20].mxu1 %vm841_vm1, %v7821_v9  ;;  %v3834_v33 = vld [vmem:[#allocation2 + $0x85] sm:$0xff] }
 0x157   : > { %6411 = vmatprep.mubr.msk.f32.mxu0 %vm841_vm1, %v3824_v60  ;;  %6161 = vmatprep.mubr.msk.f32.mxu1 %vm841_vm1, %v7827_v61  ;;  %v4266_v60 = vld [vmem:[#allocation2 + $0x96] sm:$0xff] }
 0x159   : > { %6412 = vmatmul.mubr.msk.f32.gmra.mrb[2].mxu0 %vm841_vm1, %v3825_v10  ;;  %v4267_v10 = vld [vmem:[#allocation2 + $0x9e] sm:$0xff] }
 0x15a   : > { %6162 = vmatmul.mubr.msk.f32.gmra.mrb[22].mxu1 %vm841_vm1, %v7833_v35  ;;  %6414 = vmatprep.mubr.msk.f32.mxu0 %vm841_vm1, %v3826_v11  ;;  %v4268_v11 = vld [vmem:[#allocation2 + $0xa6] sm:$0xff] }
 0x15b   : > { %6164 = vmatprep.mubr.msk.f32.mxu1 %vm841_vm1, %v7838_v14 }
 0x15d   : > { %6415 = vmatmul.mubr.msk.f32.gmra.mrb[4].mxu0 %vm841_vm1, %v3827_v20  ;;  %v4269_v20 = vld [vmem:[#allocation2 + $0xae] sm:$0xff] }
 0x15e   : > { %6165 = vmatmul.mubr.msk.f32.gmra.mrb[24].mxu1 %vm841_vm1, %v7843_v21  ;;  %6417 = vmatprep.mubr.msk.f32.mxu0 %vm841_vm1, %v3828_v7  ;;  %v4270_v7 = vld [vmem:[#allocation2 + $0xb6] sm:$0xff] }
 0x15f   : > { %6167 = vmatprep.mubr.msk.f32.mxu1 %vm841_vm1, %v7848_v8 }
 0x161   : > { %6418 = vmatmul.mubr.msk.f32.gmra.mrb[6].mxu0 %vm841_vm1, %v3829_v22  ;;  %v4271_v22 = vld [vmem:[#allocation2 + $0xbe] sm:$0xff] }
 0x162   : > { %6168 = vmatmul.mubr.msk.f32.gmra.mrb[26].mxu1 %vm841_vm1, %v7853_v24  ;;  %6420 = vmatprep.mubr.msk.f32.mxu0 %vm841_vm1, %v3830_v25  ;;  %v4272_v25 = vld [vmem:[#allocation2 + $0xc6] sm:$0xff] }
 0x163   : > { %6170 = vmatprep.mubr.msk.f32.mxu1 %vm841_vm1, %v7858_v27 }
 0x165   : > { %6421 = vmatmul.mubr.msk.f32.gmra.mrb[8].mxu0 %vm841_vm1, %v3831_v29  ;;  %v4273_v29 = vld [vmem:[#allocation2 + $0xce] sm:$0xff] }
 0x166   : > { %6171 = vmatmul.mubr.msk.f32.gmra.mrb[28].mxu1 %vm841_vm1, %v7863_v30  ;;  %6423 = vmatprep.mubr.msk.f32.mxu0 %vm841_vm1, %v3832_v18  ;;  %v4274_v18 = vld [vmem:[#allocation2 + $0xd6] sm:$0xff] }
 0x167   : > { %6173 = vmatprep.mubr.msk.f32.mxu1 %vm841_vm1, %v7868_v19 }
 0x169   : > { %6424 = vmatmul.mubr.msk.f32.gmra.mrb[10].mxu0 %vm841_vm1, %v3833_v42  ;;  %v4275_v42 = vld [vmem:[#allocation2 + $0xde] sm:$0xff] }
 0x16a   : > { %6174 = vmatmul.mubr.msk.f32.gmra.mrb[30].mxu1 %vm841_vm1, %v7873_v31  ;;  %6426 = vmatprep.mubr.msk.f32.mxu0 %vm841_vm1, %v3834_v33  ;;  %v4276_v33 = vld [vmem:[#allocation2 + $0xe6] sm:$0xff] }
 0x16b   : > { %6176 = vmatprep.mubr.msk.f32.mxu1 %vm841_vm1, %v7878_v37 }
 0x16d   : > { %6427 = vmatmul.mubr.msk.f32.gmra.mrb[12].mxu0 %vm841_vm1, %v3835_v45  ;;  %v4277_v45 = vld [vmem:[#allocation2 + $0xee] sm:$0xff] }
 0x16e   : > { %6177 = vmatmul.mubr.msk.f32.gmra.mrb[32].mxu1 %vm841_vm1, %v7883_v36  ;;  %6429 = vmatprep.mubr.msk.f32.mxu0 %vm841_vm1, %v3836_v46  ;;  %v4278_v46 = vld [vmem:[#allocation2 + $0xf6] sm:$0xff] }
 0x16f   : > { %6179 = vmatprep.mubr.msk.f32.mxu1 %vm841_vm1, %v7888_v38 }
 0x171   : > { %6430 = vmatmul.mubr.msk.f32.gmra.mrb[14].mxu0 %vm841_vm1, %v3837_v56  ;;  %v4279_v56 = vld [vmem:[#allocation2 + $0xfe] sm:$0xff] }
 0x172   : > { %6180 = vmatmul.mubr.msk.f32.gmra.mrb[34].mxu1 %vm841_vm1, %v1707_v58  ;;  %6432 = vmatprep.mubr.msk.f32.mxu0 %vm841_vm1, %v3838_v3  ;;  %v2561_v58 = vld [vmem:[#allocation2 + $0xfb] sm:$0xff]  ;;  %v4280_v3 = vld [vmem:[#allocation2 + $0x106] sm:$0xff] }
 0x173   : > { %6184 = vmatprep.mubr.msk.f32.mxu1 %vm841_vm1, %v7703_v23  ;;  %v3847_v23 = vld [vmem:[#allocation2 + $0xed] sm:$0xff] }
 0x175   : > { %6433 = vmatmul.mubr.msk.f32.gmra.mrb[16].mxu0 %vm841_vm1, %v3839_v5  ;;  %v2562_v5 = vld [vmem:[#allocation2 + $0x103] sm:$0xff] }
 0x176   : > { %6185 = vmatmul.mubr.msk.f32.vlgmr.msra.gmra.mrb[0].mxu1 %vm841_vm1, %v7718_v40  ;;  %6435 = vmatprep.mubr.msk.f32.mxu0 %vm841_vm1, %v3840_v12  ;;  %v3849_v40 = vld [vmem:[#allocation2 + $0xfd] sm:$0xff]  ;;  %v4281_v12 = vld [vmem:[#allocation2 + $0x10e] sm:$0xff] }
 0x177   : > { %6187 = vmatprep.mubr.msk.f32.mxu1 %vm841_vm1, %v7724_v41  ;;  %6519 = vmatpush3.msk.msra.mxu1 %vm1067_vm0, %v7712_v39  ;;  %v3848_v39 = vld [vmem:[#allocation2 + $0xf5] sm:$0xff]  ;;  %v3850_v41 = vld [vmem:[#allocation2 + $0x105] sm:$0xff] }
 0x179   : > { %6436 = vmatmul.mubr.msk.f32.gmra.mrb[18].mxu0 %vm841_vm1, %v3841_v17  ;;  %v2563_v17 = vld [vmem:[#allocation2 + $0x10b] sm:$0xff] }
 0x17a   : > { %6188 = vmatmul.mubr.msk.f32.gmra.mrb[2].mxu1 %vm841_vm1, %v7730_v43  ;;  %6438 = vmatprep.mubr.msk.f32.mxu0 %vm841_vm1, %v3842_v26  ;;  %v3851_v43 = vld [vmem:[#allocation2 + $0x10d] sm:$0xff]  ;;  %v4282_v26 = vld [vmem:[#allocation2 + $0x116] sm:$0xff] }
 0x17b   : > { %6190 = vmatprep.mubr.msk.f32.mxu1 %vm841_vm1, %v7736_v44  ;;  %v3852_v44 = vld [vmem:[#allocation2 + $0x115] sm:$0xff] }
 0x17d   : > { %6439 = vmatmul.mubr.msk.f32.gmra.mrb[20].mxu0 %vm841_vm1, %v3843_v28  ;;  %v2564_v28 = vld [vmem:[#allocation2 + $0x113] sm:$0xff] }
 0x17e   : > { %6191 = vmatmul.mubr.msk.f32.gmra.mrb[4].mxu1 %vm841_vm1, %v7742_v47  ;;  %6441 = vmatprep.mubr.msk.f32.mxu0 %vm841_vm1, %v3844_v32  ;;  %v3853_v47 = vld [vmem:[#allocation2 + $0x11d] sm:$0xff] }
 0x17f   : > { %6193 = vmatprep.mubr.msk.f32.mxu1 %vm841_vm1, %v7748_v48  ;;  %v3854_v48 = vld [vmem:[#allocation2 + $0x125] sm:$0xff] }
 0x180   : > { %v4283_v32 = vld [vmem:[#allocation2 + $0x11e] sm:$0xff] }
 0x181   : > { %6442 = vmatmul.mubr.msk.f32.gmra.mrb[22].mxu0 %vm841_vm1, %v3845_v34  ;;  %v2565_v34 = vld [vmem:[#allocation2 + $0x11b] sm:$0xff] }
 0x182   : > { %6194 = vmatmul.mubr.msk.f32.gmra.mrb[6].mxu1 %vm841_vm1, %v7754_v49  ;;  %6444 = vmatprep.mubr.msk.f32.mxu0 %vm841_vm1, %v3846_v15  ;;  %v3855_v49 = vld [vmem:[#allocation2 + $0x12d] sm:$0xff] }
 0x183   : > { %6196 = vmatprep.mubr.msk.f32.mxu1 %vm841_vm1, %v7760_v52  ;;  %v3856_v52 = vld [vmem:[#allocation2 + $0x135] sm:$0xff]  ;;  %v4284_v15 = vld [vmem:[#allocation2 + $0x126] sm:$0xff] }
 0x185   : > { %6445 = vmatmul.mubr.msk.f32.gmra.mrb[24].mxu0 %vm841_vm1, %v3847_v23  ;;  %v2566_v23 = vld [vmem:[#allocation2 + $0x123] sm:$0xff] }
 0x186   : > { %6197 = vmatmul.mubr.msk.f32.gmra.mrb[8].mxu1 %vm841_vm1, %v7766_v16  ;;  %6447 = vmatprep.mubr.msk.f32.mxu0 %vm841_vm1, %v3848_v39  ;;  %v3857_v16 = vld [vmem:[#allocation2 + $0x13d] sm:$0x3f]  ;;  %v4285_v39 = vld [vmem:[#allocation2 + $0x12e] sm:$0xff] }
 0x187   : > { %6199 = vmatprep.mubr.msk.f32.mxu1 %vm841_vm1, %v7772_v53  ;;  %v4252_v53 = vld [vmem:[#allocation2 + $0x26] sm:$0xff] }
 0x189   : > { %6448 = vmatmul.mubr.msk.f32.gmra.mrb[26].mxu0 %vm841_vm1, %v3849_v40  ;;  %v2567_v40 = vld [vmem:[#allocation2 + $0x12b] sm:$0x3f] }
 0x18a   : > { %6200 = vmatmul.mubr.msk.f32.gmra.mrb[10].mxu1 %vm841_vm1, %v7778_v54  ;;  %6450 = vmatprep.mubr.msk.f32.mxu0 %vm841_vm1, %v3850_v41  ;;  %v4253_v54 = vld [vmem:[#allocation2 + $0x2e] sm:$0xff]  ;;  %v4286_v41 = vld [vmem:[#allocation2 + $0x136] sm:$0xff] }
 0x18b   : > { %6202 = vmatprep.mubr.msk.f32.mxu1 %vm841_vm1, %v7784_v55  ;;  %v4254_v55 = vld [vmem:[#allocation2 + $0x36] sm:$0xff] }
 0x18d   : > { %6451 = vmatmul.mubr.msk.f32.gmra.mrb[28].mxu0 %vm841_vm1, %v3851_v43  ;;  %v4287_v43 = vld [vmem:[#allocation2 + $0x13e] sm:$0x3f] }
 0x18e   : > { %6203 = vmatmul.mubr.msk.f32.gmra.mrb[12].mxu1 %vm841_vm1, %v7790_v13  ;;  %6453 = vmatprep.mubr.msk.f32.mxu0 %vm841_vm1, %v3852_v44  ;;  %v4255_v13 = vld [vmem:[#allocation2 + $0x3e] sm:$0xff]  ;;  %v8042_v44 = vld [vmem:[%s8656_s3 + $0x13] sm:$0xff] }
 0x18f   : > { %6205 = vmatprep.mubr.msk.f32.mxu1 %vm841_vm1, %v7796_v57  ;;  %v4256_v57 = vld [vmem:[#allocation2 + $0x46] sm:$0xff] }
 0x191   : > { %6454 = vmatmul.mubr.msk.f32.gmra.mrb[30].mxu0 %vm841_vm1, %v3853_v47  ;;  %v8047_v47 = vld [vmem:[%s8656_s3 + $0x1b] sm:$0xff] }
 0x192   : > { %6206 = vmatmul.mubr.msk.f32.gmra.mrb[14].mxu1 %vm841_vm1, %v7801_v62  ;;  %6456 = vmatprep.mubr.msk.f32.mxu0 %vm841_vm1, %v3854_v48  ;;  %v4258_v62 = vld [vmem:[#allocation2 + $0x56] sm:$0xff]  ;;  %v8052_v48 = vld [vmem:[%s8656_s3 + $0x23] sm:$0xff] }
 0x193   : > { %6208 = vmatprep.mubr.msk.f32.mxu1 %vm841_vm1, %v7806_v51  ;;  %v4260_v51 = vld [vmem:[#allocation2 + $0x66] sm:$0xff] }
 0x195   : > { %6457 = vmatmul.mubr.msk.f32.gmra.mrb[32].mxu0 %vm841_vm1, %v3855_v49  ;;  %v8057_v49 = vld [vmem:[%s8656_s3 + $0x2b] sm:$0xff] }
 0x196   : > { %6209 = vmatmul.mubr.msk.f32.gmra.mrb[16].mxu1 %vm841_vm1, %v7811_v0  ;;  %6459 = vmatprep.mubr.msk.f32.mxu0 %vm841_vm1, %v3856_v52  ;;  %v4262_v0 = vld [vmem:[#allocation2 + $0x76] sm:$0xff] }
 0x197   : > { %6211 = vmatprep.mubr.msk.f32.mxu1 %vm841_vm1, %v7816_v4  ;;  %v4264_v4 = vld [vmem:[#allocation2 + $0x86] sm:$0xff]  ;;  %v8062_v52 = vld [vmem:[%s8656_s3 + $0x33] sm:$0xff] }
 0x199   : > { %6460 = vmatmul.mubr.msk.f32.gmra.mrb[34].mxu0 %vm841_vm1, %v3857_v16  ;;  %v8067_v16 = vld [vmem:[%s8656_s3 + $0x3b] sm:$0xff] }
 0x19a   : > { %6212 = vmatmul.mubr.msk.f32.gmra.mrb[18].mxu1 %vm841_vm1, %v7821_v9  ;;  %6464 = vmatprep.mubr.msk.f32.mxu0 %vm841_vm1, %v4252_v53  ;;  %v2135_v9 = vld [vmem:[#allocation2 + $0x11a] sm:$0xff]  ;;  %v8072_v53 = vld [vmem:[%s8656_s3 + $0x43] sm:$0xff] }
 0x19b   : > { %6214 = vmatprep.mubr.msk.f32.mxu1 %vm841_vm1, %v7827_v61  ;;  %v2136_v61 = vld [vmem:[#allocation2 + $0x122] sm:$0xff] }
 0x19d   : > { %6465 = vmatmul.mubr.msk.f32.vlgmr.msra.gmra.mrb[0].mxu0 %vm841_vm1, %v4253_v54  ;;  %v8077_v54 = vld [vmem:[%s8656_s3 + $0x4b] sm:$0xff] }
 0x19e   : > { %6215 = vmatmul.mubr.msk.f32.gmra.mrb[20].mxu1 %vm841_vm1, %v7833_v35  ;;  %6467 = vmatprep.mubr.msk.f32.mxu0 %vm841_vm1, %v4254_v55  ;;  %v2137_v35 = vld [vmem:[#allocation2 + $0x12a] sm:$0x3f]  ;;  %v8082_v55 = vld [vmem:[%s8656_s3 + $0x53] sm:$0xff] }
 0x19f   : > { %6217 = vmatprep.mubr.msk.f32.mxu1 %vm841_vm1, %v7838_v14  ;;  %v2550_v14 = vld [vmem:[#allocation2 + $0xa3] sm:$0xff] }
 0x1a1   : > { %6468 = vmatmul.mubr.msk.f32.gmra.mrb[2].mxu0 %vm841_vm1, %v4255_v13  ;;  %v8087_v13 = vld [vmem:[%s8656_s3 + $0x5b] sm:$0xff] }
 0x1a2   : > { %6218 = vmatmul.mubr.msk.f32.gmra.mrb[22].mxu1 %vm841_vm1, %v7843_v21  ;;  %6470 = vmatprep.mubr.msk.f32.mxu0 %vm841_vm1, %v4256_v57  ;;  %v2551_v21 = vld [vmem:[#allocation2 + $0xab] sm:$0xff]  ;;  %v8092_v57 = vld [vmem:[%s8656_s3 + $0x63] sm:$0xff] }
 0x1a3   : > { %6220 = vmatprep.mubr.msk.f32.mxu1 %vm841_vm1, %v7848_v8  ;;  %v2552_v8 = vld [vmem:[#allocation2 + $0xb3] sm:$0xff] }
 0x1a5   : > { %6471 = vmatmul.mubr.msk.f32.gmra.mrb[4].mxu0 %vm841_vm1, %v4257_v59  ;;  %v8097_v59 = vld [vmem:[%s8656_s3 + $0x6b] sm:$0xff] }
 0x1a6   : > { %6221 = vmatmul.mubr.msk.f32.gmra.mrb[24].mxu1 %vm841_vm1, %v7853_v24  ;;  %6473 = vmatprep.mubr.msk.f32.mxu0 %vm841_vm1, %v4258_v62  ;;  %v2553_v24 = vld [vmem:[#allocation2 + $0xbb] sm:$0xff]  ;;  %v8102_v62 = vld [vmem:[%s8656_s3 + $0x73] sm:$0xff] }
 0x1a7   : > { %6223 = vmatprep.mubr.msk.f32.mxu1 %vm841_vm1, %v7858_v27  ;;  %v2554_v27 = vld [vmem:[#allocation2 + $0xc3] sm:$0xff] }
 0x1a9   : > { %6474 = vmatmul.mubr.msk.f32.gmra.mrb[6].mxu0 %vm841_vm1, %v4259_v50  ;;  %v8107_v50 = vld [vmem:[%s8656_s3 + $0x7b] sm:$0xff] }
 0x1aa   : > { %6224 = vmatmul.mubr.msk.f32.gmra.mrb[26].mxu1 %vm841_vm1, %v7863_v30  ;;  %6476 = vmatprep.mubr.msk.f32.mxu0 %vm841_vm1, %v4260_v51  ;;  %v2555_v30 = vld [vmem:[#allocation2 + $0xcb] sm:$0xff]  ;;  %v8112_v51 = vld [vmem:[%s8656_s3 + $0x83] sm:$0xff] }
 0x1ab   : > { %6226 = vmatprep.mubr.msk.f32.mxu1 %vm841_vm1, %v7868_v19  ;;  %v2556_v19 = vld [vmem:[#allocation2 + $0xd3] sm:$0xff] }
 0x1ad   : > { %6477 = vmatmul.mubr.msk.f32.gmra.mrb[8].mxu0 %vm841_vm1, %v4261_v63  ;;  %v8117_v63 = vld [vmem:[%s8656_s3 + $0x8b] sm:$0xff] }
 0x1ae   : > { %6227 = vmatmul.mubr.msk.f32.gmra.mrb[28].mxu1 %vm841_vm1, %v7873_v31  ;;  %6479 = vmatprep.mubr.msk.f32.mxu0 %vm841_vm1, %v4262_v0  ;;  %v2557_v31 = vld [vmem:[#allocation2 + $0xdb] sm:$0xff]  ;;  %v8122_v0 = vld [vmem:[%s8656_s3 + $0x93] sm:$0xff] }
 0x1af   : > { %6229 = vmatprep.mubr.msk.f32.mxu1 %vm841_vm1, %v7878_v37  ;;  %v2558_v37 = vld [vmem:[#allocation2 + $0xe3] sm:$0xff] }
 0x1b1   : > { %6480 = vmatmul.mubr.msk.f32.gmra.mrb[10].mxu0 %vm841_vm1, %v4263_v1  ;;  %v8127_v1 = vld [vmem:[%s8656_s3 + $0x9b] sm:$0xff] }
 0x1b2   : > { %6230 = vmatmul.mubr.msk.f32.gmra.mrb[30].mxu1 %vm841_vm1, %v7883_v36  ;;  %6482 = vmatprep.mubr.msk.f32.mxu0 %vm841_vm1, %v4264_v4  ;;  %v2559_v36 = vld [vmem:[#allocation2 + $0xeb] sm:$0xff]  ;;  %v8132_v4 = vld [vmem:[%s8656_s3 + $0xa3] sm:$0xff] }
 0x1b3   : > { %6232 = vmatprep.mubr.msk.f32.mxu1 %vm841_vm1, %v7888_v38  ;;  %v2560_v38 = vld [vmem:[#allocation2 + $0xf3] sm:$0xff] }
 0x1b5   : > { %6483 = vmatmul.mubr.msk.f32.gmra.mrb[12].mxu0 %vm841_vm1, %v4265_v6  ;;  %v8137_v6 = vld [vmem:[%s8656_s3 + $0xab] sm:$0xff] }
 0x1b6   : > { %6233 = vmatmul.mubr.msk.f32.gmra.mrb[32].mxu1 %vm841_vm1, %v2135_v9  ;;  %6485 = vmatprep.mubr.msk.f32.mxu0 %vm841_vm1, %v4266_v60  ;;  %v8142_v9 = vld [vmem:[%s8656_s3 + $0xb3] sm:$0xff]  ;;  %v8147_v60 = vld [vmem:[%s8656_s3 + $0xbb] sm:$0xff] }
 0x1b7   : > { %6235 = vmatprep.mubr.msk.f32.mxu1 %vm841_vm1, %v2136_v61  ;;  %v8152_v61 = vld [vmem:[%s8656_s3 + $0xc3] sm:$0xff] }
 0x1b9   : > { %6486 = vmatmul.mubr.msk.f32.gmra.mrb[14].mxu0 %vm841_vm1, %v4267_v10  ;;  %v8157_v10 = vld [vmem:[%s8656_s3 + $0xcb] sm:$0xff] }
 0x1ba   : > { %6236 = vmatmul.mubr.msk.f32.gmra.mrb[34].mxu1 %vm841_vm1, %v2137_v35  ;;  %6488 = vmatprep.mubr.msk.f32.mxu0 %vm841_vm1, %v4268_v11  ;;  %v8162_v35 = vld [vmem:[%s8656_s3 + $0xd3] sm:$0xff]  ;;  %v8167_v11 = vld [vmem:[%s8656_s3 + $0xdb] sm:$0xff] }
 0x1bb   : > { %6267 = vmatprep.mubr.msk.f32.mxu1 %vm841_vm1, %v2550_v14  ;;  %v8172_v14 = vld [vmem:[%s8656_s3 + $0xe3] sm:$0xff] }
 0x1bd   : > { %6489 = vmatmul.mubr.msk.f32.gmra.mrb[16].mxu0 %vm841_vm1, %v4269_v20  ;;  %v8177_v20 = vld [vmem:[%s8656_s3 + $0xeb] sm:$0xff] }
 0x1be   : > { %6268 = vmatmul.mubr.msk.f32.vlgmr.msra.gmra.mrb[18].mxu1 %vm841_vm1, %v2551_v21  ;;  %6491 = vmatprep.mubr.msk.f32.mxu0 %vm841_vm1, %v4270_v7  ;;  %v8182_v21 = vld [vmem:[%s8656_s3 + $0xf3] sm:$0xff]  ;;  %v8187_v7 = vld [vmem:[%s8656_s3 + $0xfb] sm:$0xff] }
 0x1bf   : > { %6270 = vmatprep.mubr.msk.f32.mxu1 %vm841_vm1, %v2552_v8  ;;  %v8192_v8 = vld [vmem:[%s8656_s3 + $0x103] sm:$0xff] }
 0x1c1   : > { %6492 = vmatmul.mubr.msk.f32.gmra.mrb[18].mxu0 %vm841_vm1, %v4271_v22  ;;  %v8197_v22 = vld [vmem:[%s8656_s3 + $0x10b] sm:$0xff] }
 0x1c2   : > { %6271 = vmatmul.mubr.msk.f32.gmra.mrb[20].mxu1 %vm841_vm1, %v2553_v24  ;;  %6494 = vmatprep.mubr.msk.f32.mxu0 %vm841_vm1, %v4272_v25  ;;  %v8202_v24 = vld [vmem:[%s8656_s3 + $0x113] sm:$0xff]  ;;  %v8207_v25 = vld [vmem:[%s8656_s3 + $0x11b] sm:$0xff] }
 0x1c3   : > { %6273 = vmatprep.mubr.msk.f32.mxu1 %vm841_vm1, %v2554_v27  ;;  %v8212_v27 = vld [vmem:[%s8656_s3 + $0x123] sm:$0xff] }
 0x1c5   : > { %6495 = vmatmul.mubr.msk.f32.gmra.mrb[20].mxu0 %vm841_vm1, %v4273_v29  ;;  %v8217_v29 = vld [vmem:[%s8656_s3 + $0x12b] sm:$0x3f] }
 0x1c6   : > { %6274 = vmatmul.mubr.msk.f32.gmra.mrb[22].mxu1 %vm841_vm1, %v2555_v30  ;;  %6497 = vmatprep.mubr.msk.f32.mxu0 %vm841_vm1, %v4274_v18 }
 0x1c7   : > { %6276 = vmatprep.mubr.msk.f32.mxu1 %vm841_vm1, %v2556_v19 }
 0x1c9   : > { %6498 = vmatmul.mubr.msk.f32.gmra.mrb[22].mxu0 %vm841_vm1, %v4275_v42 }
 0x1ca   : > { %6277 = vmatmul.mubr.msk.f32.gmra.mrb[24].mxu1 %vm841_vm1, %v2557_v31  ;;  %6500 = vmatprep.mubr.msk.f32.mxu0 %vm841_vm1, %v4276_v33 }
 0x1cb   : > { %6279 = vmatprep.mubr.msk.f32.mxu1 %vm841_vm1, %v2558_v37 }
 0x1cd   : > { %6501 = vmatmul.mubr.msk.f32.gmra.mrb[24].mxu0 %vm841_vm1, %v4277_v45 }
 0x1ce   : > { %6280 = vmatmul.mubr.msk.f32.gmra.mrb[26].mxu1 %vm841_vm1, %v2559_v36  ;;  %6503 = vmatprep.mubr.msk.f32.mxu0 %vm841_vm1, %v4278_v46 }
 0x1cf   : > { %6282 = vmatprep.mubr.msk.f32.mxu1 %vm841_vm1, %v2560_v38 }
 0x1d1   : > { %6504 = vmatmul.mubr.msk.f32.gmra.mrb[26].mxu0 %vm841_vm1, %v4279_v56 }
 0x1d2   : > { %6283 = vmatmul.mubr.msk.f32.gmra.mrb[28].mxu1 %vm841_vm1, %v2561_v58  ;;  %6506 = vmatprep.mubr.msk.f32.mxu0 %vm841_vm1, %v4280_v3 }
 0x1d3   : > { %6285 = vmatprep.mubr.msk.f32.mxu1 %vm841_vm1, %v2562_v5 }
 0x1d5   : > { %6507 = vmatmul.mubr.msk.f32.gmra.mrb[28].mxu0 %vm841_vm1, %v4281_v12 }
 0x1d6   : > { %6286 = vmatmul.mubr.msk.f32.gmra.mrb[30].mxu1 %vm841_vm1, %v2563_v17  ;;  %6509 = vmatprep.mubr.msk.f32.mxu0 %vm841_vm1, %v4282_v26 }
 0x1d7   : > { %6288 = vmatprep.mubr.msk.f32.mxu1 %vm841_vm1, %v2564_v28 }
 0x1d9   : > { %6510 = vmatmul.mubr.msk.f32.gmra.mrb[30].mxu0 %vm841_vm1, %v4283_v32  ;;  %v8228_v32 = vld [vmem:[%s8655_s2] ss:$0 sm:$0xff] }
 0x1da   : > { %6289 = vmatmul.mubr.msk.f32.gmra.mrb[32].mxu1 %vm841_vm1, %v2565_v34  ;;  %6512 = vmatprep.mubr.msk.f32.mxu0 %vm841_vm1, %v4284_v15 }
 0x1db   : > { %6291 = vmatprep.mubr.msk.f32.mxu1 %vm841_vm1, %v2566_v23 }
 0x1dd   : > { %6513 = vmatmul.mubr.msk.f32.gmra.mrb[32].mxu0 %vm841_vm1, %v4285_v39 }
 0x1de   : > { %6292 = vmatmul.mubr.msk.f32.gmra.mrb[34].mxu1 %vm841_vm1, %v2567_v40  ;;  %6515 = vmatprep.mubr.msk.f32.mxu0 %vm841_vm1, %v4286_v41 }
 0x1e1   : > { %6516 = vmatmul.mubr.msk.f32.gmra.mrb[34].mxu0 %vm841_vm1, %v4287_v43 }
 0x249   : > { %v6186_v30 = vpop.f32.mrb[0].mxu1 }
 0x24a   : > { %v2317_v18 = vpop.f32.mrb[1].mxu1 }
 0x24d   : > { %v6189_v19 = vpop.f32.mrb[2].mxu1 }
 0x24e   : > { %v2327_v42 = vpop.f32.mrb[3].mxu1 }
 0x251   : > { %v6192_v31 = vpop.f32.mrb[4].mxu1 }
 0x252   : > { %v2337_v33 = vpop.f32.mrb[5].mxu1 }
 0x255   : > { %v6195_v37 = vpop.f32.mrb[6].mxu1 }
 0x256   : > { %v2347_v45 = vpop.f32.mrb[7].mxu1 }
 0x259   : > { %v6198_v36 = vpop.f32.mrb[8].mxu1 }
 0x25a   : > { %v2357_v46 = vpop.f32.mrb[9].mxu1 }
 0x25d   : > { %v6201_v38 = vpop.f32.mrb[10].mxu1 }
 0x25e   : > { %v2367_v56 = vpop.f32.mrb[11].mxu1 }
 0x261   : > { %v6204_v58 = vpop.f32.mrb[12].mxu1 }
 0x262   : > { %v2377_v3 = vpop.f32.mrb[13].mxu1 }
 0x265   : > { %v6207_v5 = vpop.f32.mrb[14].mxu1 }
 0x266   : > { %v8219_v12 = vpop.f32.mrb[15].mxu1 }
 0x269   : > { %v8221_v17 = vpop.f32.mrb[16].mxu1 }
 0x26a   : > { %v8223_v26 = vpop.f32.mrb[17].mxu1 }
 0x270   : > { %v6466_v28 = vpop.f32.mrb[0].mxu0 }
 0x271   : > { %v6520_v34 = vadd.f32 %v6466_v28, %v6186_v30  ;;  %v4467_v15 = vpop.f32.mrb[1].mxu0 }
 0x272   : > { %v6521_v23 = vadd.f32 %v4467_v15, %v2317_v18 }
 0x273   : > { %v8231_v39 = vadd.f32 %v6520_v34, %v8228_v32 }
 0x274   : > { %v8234_v40 = vadd.f32 %v6521_v23, %v8228_v32  ;;  %v6469_v41 = vpop.f32.mrb[2].mxu0 }
 0x275   : > { %4767 = vst.msk [vmem:[%s7125_s22 + $0x1b] sm:$0xff] %vm841_vm1, %v8231_v39  ;;  %v6522_v43 = vadd.f32 %v6469_v41, %v6189_v19  ;;  %v4477_v2 = vpop.f32.mrb[3].mxu0 }
 0x276   : > { %4766 = vst.msk [vmem:[%s7125_s22 + $0x13] sm:$0xff] %vm841_vm1, %v8234_v40  ;;  %v6523_v30 = vadd.f32 %v4477_v2, %v2327_v42 }
 0x277   : > { %v8243_v18 = vadd.f32 %v6522_v43, %v8228_v32 }
 0x278   : > { %v8246_v28 = vadd.f32 %v6523_v30, %v8228_v32  ;;  %v6472_v34 = vpop.f32.mrb[4].mxu0 }
 0x279   : > { %4769 = vst.msk [vmem:[%s7125_s22 + $0x2b] sm:$0xff] %vm841_vm1, %v8243_v18  ;;  %v6524_v15 = vadd.f32 %v6472_v34, %v6192_v31  ;;  %v4487_v23 = vpop.f32.mrb[5].mxu0 }
 0x27a   : > { %4768 = vst.msk [vmem:[%s7125_s22 + $0x23] sm:$0xff] %vm841_vm1, %v8246_v28  ;;  %v6525_v19 = vadd.f32 %v4487_v23, %v2337_v33 }
 0x27b   : > { %v8255_v2 = vadd.f32 %v6524_v15, %v8228_v32 }
 0x27c   : > { %v8258_v42 = vadd.f32 %v6525_v19, %v8228_v32  ;;  %v6475_v41 = vpop.f32.mrb[6].mxu0 }
 0x27d   : > { %4771 = vst.msk [vmem:[%s7125_s22 + $0x3b] sm:$0xff] %vm841_vm1, %v8255_v2  ;;  %v6526_v43 = vadd.f32 %v6475_v41, %v6195_v37  ;;  %v4497_v30 = vpop.f32.mrb[7].mxu0 }
 0x27e   : > { %4770 = vst.msk [vmem:[%s7125_s22 + $0x33] sm:$0xff] %vm841_vm1, %v8258_v42  ;;  %v6527_v31 = vadd.f32 %v4497_v30, %v2347_v45 }
 0x27f   : > { %v8267_v33 = vadd.f32 %v6526_v43, %v8228_v32 }
 0x280   : > { %v8270_v34 = vadd.f32 %v6527_v31, %v8228_v32  ;;  %v6478_v15 = vpop.f32.mrb[8].mxu0 }
 0x281   : > { %4773 = vst.msk [vmem:[%s7125_s22 + $0x4b] sm:$0xff] %vm841_vm1, %v8267_v33  ;;  %v6528_v23 = vadd.f32 %v6478_v15, %v6198_v36  ;;  %v4507_v19 = vpop.f32.mrb[9].mxu0 }
 0x282   : > { %4772 = vst.msk [vmem:[%s7125_s22 + $0x43] sm:$0xff] %vm841_vm1, %v8270_v34  ;;  %v6529_v37 = vadd.f32 %v4507_v19, %v2357_v46 }
 0x283   : > { %v8279_v45 = vadd.f32 %v6528_v23, %v8228_v32 }
 0x284   : > { %v8282_v41 = vadd.f32 %v6529_v37, %v8228_v32  ;;  %v6481_v43 = vpop.f32.mrb[10].mxu0 }
 0x285   : > { %4775 = vst.msk [vmem:[%s7125_s22 + $0x5b] sm:$0xff] %vm841_vm1, %v8279_v45  ;;  %v6530_v30 = vadd.f32 %v6481_v43, %v6201_v38  ;;  %v4517_v31 = vpop.f32.mrb[11].mxu0 }
 0x286   : > { %4774 = vst.msk [vmem:[%s7125_s22 + $0x53] sm:$0xff] %vm841_vm1, %v8282_v41  ;;  %v6531_v36 = vadd.f32 %v4517_v31, %v2367_v56 }
 0x287   : > { %v8291_v46 = vadd.f32 %v6530_v30, %v8228_v32 }
 0x288   : > { %v8294_v15 = vadd.f32 %v6531_v36, %v8228_v32  ;;  %v6484_v23 = vpop.f32.mrb[12].mxu0 }
 0x289   : > { %4777 = vst.msk [vmem:[%s7125_s22 + $0x6b] sm:$0xff] %vm841_vm1, %v8291_v46  ;;  %v6532_v19 = vadd.f32 %v6484_v23, %v6204_v58  ;;  %v4527_v37 = vpop.f32.mrb[13].mxu0 }
 0x28a   : > { %4776 = vst.msk [vmem:[%s7125_s22 + $0x63] sm:$0xff] %vm841_vm1, %v8294_v15  ;;  %v6533_v38 = vadd.f32 %v4527_v37, %v2377_v3 }
 0x28b   : > { %v8303_v56 = vadd.f32 %v6532_v19, %v8228_v32 }
 0x28c   : > { %v8306_v43 = vadd.f32 %v6533_v38, %v8228_v32  ;;  %v6487_v30 = vpop.f32.mrb[14].mxu0 }
 0x28d   : > { %4779 = vst.msk [vmem:[%s7125_s22 + $0x7b] sm:$0xff] %vm841_vm1, %v8303_v56  ;;  %v6534_v31 = vadd.f32 %v6487_v30, %v6207_v5  ;;  %v4537_v36 = vpop.f32.mrb[15].mxu0 }
 0x28e   : > { %4778 = vst.msk [vmem:[%s7125_s22 + $0x73] sm:$0xff] %vm841_vm1, %v8306_v43  ;;  %v6535_v58 = vadd.f32 %v4537_v36, %v8219_v12 }
 0x28f   : > { %v8316_v3 = vadd.f32 %v6534_v31, %v8228_v32 }
 0x290   : > { %v8319_v23 = vadd.f32 %v6535_v58, %v8228_v32  ;;  %v6490_v19 = vpop.f32.mrb[16].mxu0 }
 0x291   : > { %8699 = vst [vmem:[#allocation3_spill] sm:$0xff] %v8316_v3  ;;  %4781 = vst.msk [vmem:[%s7125_s22 + $0x8b] sm:$0xff] %vm841_vm1, %v8316_v3  ;;  %v6536_v5 = vadd.f32 %v6490_v19, %v8221_v17  ;;  %v6269_v37 = vpop.f32.mrb[18].mxu1  ;;  %v4547_v38 = vpop.f32.mrb[17].mxu0 }
 0x292   : > { %8700 = vst [vmem:[#allocation4_spill] sm:$0xff] %v8319_v23  ;;  %4780 = vst.msk [vmem:[%s7125_s22 + $0x83] sm:$0xff] %vm841_vm1, %v8319_v23  ;;  %v6537_v12 = vadd.f32 %v4547_v38, %v8223_v26  ;;  %v2837_v30 = vpop.f32.mrb[19].mxu1 }
 0x293   : > { %v8330_v31 = vadd.f32 %v6536_v5, %v8228_v32 }
 0x294   : > { %v8333_v36 = vadd.f32 %v6537_v12, %v8228_v32  ;;  %v6493_v58 = vpop.f32.mrb[18].mxu0 }
 0x295   : > { %8701 = vst [vmem:[#allocation5_spill] sm:$0xff] %v8330_v31  ;;  %4783 = vst.msk [vmem:[%s7125_s22 + $0x9b] sm:$0xff] %vm841_vm1, %v8330_v31  ;;  %v6538_v17 = vadd.f32 %v6493_v58, %v6269_v37  ;;  %v6272_v19 = vpop.f32.mrb[20].mxu1  ;;  %v4557_v3 = vpop.f32.mrb[19].mxu0 }
 0x296   : > { %8702 = vst [vmem:[#allocation6_spill] sm:$0xff] %v8333_v36  ;;  %4782 = vst.msk [vmem:[%s7125_s22 + $0x93] sm:$0xff] %vm841_vm1, %v8333_v36  ;;  %v6539_v26 = vadd.f32 %v4557_v3, %v2837_v30  ;;  %v2847_v38 = vpop.f32.mrb[21].mxu1 }
 0x297   : > { %v8342_v5 = vadd.f32 %v6538_v17, %v8228_v32 }
 0x298   : > { %v8345_v12 = vadd.f32 %v6539_v26, %v8228_v32  ;;  %v6496_v23 = vpop.f32.mrb[20].mxu0 }
 0x299   : > { %8703 = vst [vmem:[#allocation7_spill] sm:$0xff] %v8342_v5  ;;  %4785 = vst.msk [vmem:[%s7125_s22 + $0xab] sm:$0xff] %vm841_vm1, %v8342_v5  ;;  %v6540_v37 = vadd.f32 %v6496_v23, %v6272_v19  ;;  %v6275_v58 = vpop.f32.mrb[22].mxu1  ;;  %v4567_v31 = vpop.f32.mrb[21].mxu0 }
 0x29a   : > { %8704 = vst [vmem:[#allocation8_spill] sm:$0xff] %v8345_v12  ;;  %4784 = vst.msk [vmem:[%s7125_s22 + $0xa3] sm:$0xff] %vm841_vm1, %v8345_v12  ;;  %v6541_v3 = vadd.f32 %v4567_v31, %v2847_v38  ;;  %v2857_v30 = vpop.f32.mrb[23].mxu1 }
 0x29b   : > { %v8354_v17 = vadd.f32 %v6540_v37, %v8228_v32 }
 0x29c   : > { %v8357_v26 = vadd.f32 %v6541_v3, %v8228_v32  ;;  %v6499_v36 = vpop.f32.mrb[22].mxu0 }
 0x29d   : > { %8705 = vst [vmem:[#allocation9_spill] sm:$0xff] %v8354_v17  ;;  %4787 = vst.msk [vmem:[%s7125_s22 + $0xbb] sm:$0xff] %vm841_vm1, %v8354_v17  ;;  %v6542_v23 = vadd.f32 %v6499_v36, %v6275_v58  ;;  %v6278_v19 = vpop.f32.mrb[24].mxu1  ;;  %v4577_v5 = vpop.f32.mrb[23].mxu0 }
 0x29e   : > { %8706 = vst [vmem:[#allocation10_spill] sm:$0xff] %v8357_v26  ;;  %4786 = vst.msk [vmem:[%s7125_s22 + $0xb3] sm:$0xff] %vm841_vm1, %v8357_v26  ;;  %v6543_v31 = vadd.f32 %v4577_v5, %v2857_v30  ;;  %v2867_v38 = vpop.f32.mrb[25].mxu1 }
 0x29f   : > { %v8366_v37 = vadd.f32 %v6542_v23, %v8228_v32 }
 0x2a0   : > { %v8369_v3 = vadd.f32 %v6543_v31, %v8228_v32  ;;  %v6502_v12 = vpop.f32.mrb[24].mxu0 }
 0x2a1   : > { %8707 = vst [vmem:[#allocation11_spill] sm:$0xff] %v8366_v37  ;;  %4789 = vst.msk [vmem:[%s7125_s22 + $0xcb] sm:$0xff] %vm841_vm1, %v8366_v37  ;;  %v6544_v36 = vadd.f32 %v6502_v12, %v6278_v19  ;;  %v6281_v58 = vpop.f32.mrb[26].mxu1  ;;  %v4587_v17 = vpop.f32.mrb[25].mxu0 }
 0x2a2   : > { %8708 = vst [vmem:[#allocation12_spill] sm:$0xff] %v8369_v3  ;;  %4788 = vst.msk [vmem:[%s7125_s22 + $0xc3] sm:$0xff] %vm841_vm1, %v8369_v3  ;;  %v6545_v5 = vadd.f32 %v4587_v17, %v2867_v38  ;;  %v2877_v30 = vpop.f32.mrb[27].mxu1 }
 0x2a3   : > { %v8378_v23 = vadd.f32 %v6544_v36, %v8228_v32 }
 0x2a4   : > { %v8381_v31 = vadd.f32 %v6545_v5, %v8228_v32  ;;  %v6505_v26 = vpop.f32.mrb[26].mxu0 }
 0x2a5   : > { %8709 = vst [vmem:[#allocation13_spill] sm:$0xff] %v8378_v23  ;;  %4791 = vst.msk [vmem:[%s7125_s22 + $0xdb] sm:$0xff] %vm841_vm1, %v8378_v23  ;;  %v6546_v12 = vadd.f32 %v6505_v26, %v6281_v58  ;;  %v6284_v19 = vpop.f32.mrb[28].mxu1  ;;  %v4597_v37 = vpop.f32.mrb[27].mxu0 }
 0x2a6   : > { %8710 = vst [vmem:[#allocation14_spill] sm:$0xff] %v8381_v31  ;;  %4790 = vst.msk [vmem:[%s7125_s22 + $0xd3] sm:$0xff] %vm841_vm1, %v8381_v31  ;;  %v6547_v17 = vadd.f32 %v4597_v37, %v2877_v30  ;;  %v2887_v38 = vpop.f32.mrb[29].mxu1 }
 0x2a7   : > { %v8390_v36 = vadd.f32 %v6546_v12, %v8228_v32 }
 0x2a8   : > { %v8393_v5 = vadd.f32 %v6547_v17, %v8228_v32  ;;  %v6508_v3 = vpop.f32.mrb[28].mxu0 }
 0x2a9   : > { %8711 = vst [vmem:[#allocation15_spill] sm:$0xff] %v8390_v36  ;;  %4793 = vst.msk [vmem:[%s7125_s22 + $0xeb] sm:$0xff] %vm841_vm1, %v8390_v36  ;;  %v6548_v26 = vadd.f32 %v6508_v3, %v6284_v19  ;;  %v6287_v58 = vpop.f32.mrb[30].mxu1  ;;  %v4607_v23 = vpop.f32.mrb[29].mxu0 }
 0x2aa   : > { %8712 = vst [vmem:[#allocation16_spill] sm:$0xff] %v8393_v5  ;;  %4792 = vst.msk [vmem:[%s7125_s22 + $0xe3] sm:$0xff] %vm841_vm1, %v8393_v5  ;;  %v6549_v37 = vadd.f32 %v4607_v23, %v2887_v38  ;;  %v2897_v30 = vpop.f32.mrb[31].mxu1 }
 0x2ab   : > { %v8402_v12 = vadd.f32 %v6548_v26, %v8228_v32 }
 0x2ac   : > { %v8405_v17 = vadd.f32 %v6549_v37, %v8228_v32  ;;  %v6511_v31 = vpop.f32.mrb[30].mxu0 }
 0x2ad   : > { %8713 = vst [vmem:[#allocation17_spill] sm:$0xff] %v8402_v12  ;;  %4795 = vst.msk [vmem:[%s7125_s22 + $0xfb] sm:$0xff] %vm841_vm1, %v8402_v12  ;;  %v6550_v3 = vadd.f32 %v6511_v31, %v6287_v58  ;;  %v6290_v19 = vpop.f32.mrb[32].mxu1  ;;  %v4617_v36 = vpop.f32.mrb[31].mxu0 }
 0x2ae   : > { %8714 = vst [vmem:[#allocation18_spill] sm:$0xff] %v8405_v17  ;;  %4794 = vst.msk [vmem:[%s7125_s22 + $0xf3] sm:$0xff] %vm841_vm1, %v8405_v17  ;;  %v6551_v23 = vadd.f32 %v4617_v36, %v2897_v30  ;;  %v2907_v38 = vpop.f32.mrb[33].mxu1 }
 0x2af   : > { %v8414_v26 = vadd.f32 %v6550_v3, %v8228_v32 }
 0x2b0   : > { %v8417_v37 = vadd.f32 %v6551_v23, %v8228_v32  ;;  %v6514_v5 = vpop.f32.mrb[32].mxu0 }
 0x2b1   : > { %8715 = vst [vmem:[#allocation19_spill] sm:$0xff] %v8414_v26  ;;  %4797 = vst.msk [vmem:[%s7125_s22 + $0x10b] sm:$0xff] %vm841_vm1, %v8414_v26  ;;  %v6552_v31 = vadd.f32 %v6514_v5, %v6290_v19  ;;  %v6293_v58 = vpop.f32.mrb[34].mxu1  ;;  %v4627_v12 = vpop.f32.mrb[33].mxu0 }
 0x2b2   : > { %4796 = vst.msk [vmem:[%s7125_s22 + $0x103] sm:$0xff] %vm841_vm1, %v8417_v37  ;;  %v6553_v36 = vadd.f32 %v4627_v12, %v2907_v38  ;;  %v2917_v30 = vpop.f32.mrb[35].mxu1 }
 0x2b3   : > { %v8426_v3 = vadd.f32 %v6552_v31, %v8228_v32 }
 0x2b4   : > { %v8429_v23 = vadd.f32 %v6553_v36, %v8228_v32  ;;  %v6517_v17 = vpop.f32.mrb[34].mxu0  ;;  %4842 = sbr.rel (%p5678_p4) target bundleno = 699 (0x2bb), region = 52 }
 0x2b5   : > { %4799 = vst.msk [vmem:[%s7125_s22 + $0x11b] sm:$0xff] %vm841_vm1, %v8426_v3  ;;  %v6554_v5 = vadd.f32 %v6517_v17, %v6293_v58  ;;  %v4637_v19 = vpop.f32.mrb[35].mxu0  ;;  %v6835_v17 = vmov (!%p5678_p4), 0.0  }
 0x2b6   : > { %4798 = vst.msk [vmem:[%s7125_s22 + $0x113] sm:$0xff] %vm841_vm1, %v8429_v23  ;;  %v6555_v26 = vadd.f32 %v4637_v19, %v2917_v30 }
 0x2b7   : > { %v8438_v12 = vadd.f32 %v6554_v5, %v8228_v32  ;;  %4844 = vst.msk [vmem:[%s8661_s8] sm:$0x1] (!%p5678_p4), %vm4843_vm4, %v6835_v17  ;;  %4845 = vst.msk [vmem:[%s8662_s9] sm:$0x1] (!%p5678_p4), %vm4843_vm4, %v6835_v17 }
 0x2b8   : > { %v8441_v38 = vadd.f32 %v6555_v26, %v8228_v32 }
 0x2b9   : > { %4802 = vst.msk [vmem:[%s7125_s22 + $0x12b] sm:$0x3f] %vm4801_vm3, %v8438_v12 }
 0x2ba   : > { %4800 = vst.msk [vmem:[%s7125_s22 + $0x123] sm:$0xff] %vm841_vm1, %v8441_v38 }
 0x2bb PF: > { %v8716_v32 = vmov 0   ;;  %vm5141_vm5 = vcmask 24576  }
 0x2bc   : > { %6824 = vset.pattern.permute.xlu1 %v8716_v32  ;;  %6823 = vset.pattern.permute.xlu0 %v8716_v32 }
 0x2bd   : > { %4859 = vperm.xlu1 %6824, %v8052_v48   ;;  %4849 = vperm.xlu0 %6823, %v8042_v44  }
 0x2c1   : > { %4864 = vperm.xlu1 %6824, %v8057_v49   ;;  %4854 = vperm.xlu0 %6823, %v8047_v47  }
 0x2c5   : > { %4874 = vperm.xlu1 %6824, %v8067_v16   ;;  %4869 = vperm.xlu0 %6823, %v8062_v52  }
 0x2c9   : > { %4884 = vperm.xlu1 %6824, %v8077_v54   ;;  %4879 = vperm.xlu0 %6823, %v8072_v53  }
 0x2cd   : > { %4894 = vperm.xlu1 %6824, %v8087_v13   ;;  %4889 = vperm.xlu0 %6823, %v8082_v55  }
 0x2d1   : > { %4904 = vperm.xlu1 %6824, %v8097_v59   ;;  %4899 = vperm.xlu0 %6823, %v8092_v57  }
 0x2d5   : > { %4914 = vperm.xlu1 %6824, %v8107_v50   ;;  %4909 = vperm.xlu0 %6823, %v8102_v62  }
 0x2d9   : > { %4924 = vperm.xlu1 %6824, %v8117_v63   ;;  %4919 = vperm.xlu0 %6823, %v8112_v51  }
 0x2dd   : > { %4934 = vperm.xlu1 %6824, %v8127_v1   ;;  %4929 = vperm.xlu0 %6823, %v8122_v0  }
 0x2e1   : > { %4944 = vperm.xlu1 %6824, %v8137_v6   ;;  %4939 = vperm.xlu0 %6823, %v8132_v4  }
 0x2e5   : > { %4954 = vperm.xlu1 %6824, %v8147_v60   ;;  %4949 = vperm.xlu0 %6823, %v8142_v9  }
 0x2e9   : > { %4964 = vperm.xlu1 %6824, %v8157_v10   ;;  %4959 = vperm.xlu0 %6823, %v8152_v61  }
 0x2ed   : > { %4974 = vperm.xlu1 %6824, %v8167_v11   ;;  %4969 = vperm.xlu0 %6823, %v8162_v35  }
 0x2f1   : > { %4984 = vperm.xlu1 %6824, %v8177_v20   ;;  %4979 = vperm.xlu0 %6823, %v8172_v14  }
 0x2f5   : > { %4994 = vperm.xlu1 %6824, %v8187_v7   ;;  %4989 = vperm.xlu0 %6823, %v8182_v21  }
 0x2f9   : > { %5004 = vperm.xlu1 %6824, %v8197_v22   ;;  %4999 = vperm.xlu0 %6823, %v8192_v8  }
 0x2fd   : > { %5014 = vperm.xlu1 %6824, %v8207_v25   ;;  %5009 = vperm.xlu0 %6823, %v8202_v24  }
 0x301   : > { %5024 = vperm.xlu1 %6824, %v8217_v29   ;;  %5019 = vperm.xlu0 %6823, %v8212_v27  }
 0x33c   : > { %v4860_v44 = vpop.permute.xlu1 %4859  ;;  %v4850_v47 = vpop.permute.xlu0 %4849 }
 0x33d   : > { %v5027_v48 = vmul.f32 %v4850_v47, %v8234_v40  ;;  %v5029_v49 = vmul.f32 %v4860_v44, %v8246_v28 }
 0x33f   : > { %v5144_v53 = vmul.f32 %v5027_v48, %v8234_v40  ;;  %v5146_v13 = vmul.f32 %v5029_v49, %v8246_v28  ;;  %v5063_v57 = vsel %vm841_vm1, %v5027_v48, 0.0  ;;  %v5066_v50 = vsel %vm841_vm1, %v5029_v49, 0.0 }
 0x340   : > { %v4865_v52 = vpop.permute.xlu1 %4864  ;;  %v4855_v16 = vpop.permute.xlu0 %4854 }
 0x341   : > { %v5030_v54 = vmul.f32 %v4865_v52, %v8243_v18  ;;  %v5028_v55 = vmul.f32 %v4855_v16, %v8231_v39  ;;  %v5180_v4 = vsel %vm841_vm1, %v5144_v53, 0.0  ;;  %v5183_v35 = vsel %vm841_vm1, %v5146_v13, 0.0 }
 0x343   : > { %v5064_v59 = vsel %vm841_vm1, %v5028_v55, 0.0  ;;  %v5145_v62 = vmul.f32 %v5028_v55, %v8231_v39  ;;  %v5147_v51 = vmul.f32 %v5030_v54, %v8243_v18  ;;  %v5068_v11 = vsel %vm841_vm1, %v5030_v54, 0.0 }
 0x344   : > { %v5065_v63 = vadd.f32 %v5064_v59, %v5063_v57  ;;  %v4875_v0 = vpop.permute.xlu1 %4874  ;;  %v4870_v1 = vpop.permute.xlu0 %4869 }
 0x345   : > { %v5181_v6 = vsel %vm841_vm1, %v5145_v62, 0.0  ;;  %v5032_v9 = vmul.f32 %v4875_v0, %v8255_v2  ;;  %v5031_v60 = vmul.f32 %v4870_v1, %v8258_v42  ;;  %v5185_v20 = vsel %vm841_vm1, %v5147_v51, 0.0 }
 0x346   : > { %v5067_v61 = vadd.f32 %v5066_v50, %v5065_v63  ;;  %v5182_v10 = vadd.f32 %v5181_v6, %v5180_v4 }
 0x347   : > { %v5148_v14 = vmul.f32 %v5031_v60, %v8258_v42  ;;  %v5149_v24 = vmul.f32 %v5032_v9, %v8255_v2  ;;  %v5070_v25 = vsel %vm841_vm1, %v5031_v60, 0.0  ;;  %v5072_v18 = vsel %vm841_vm1, %v5032_v9, 0.0 }
 0x348   : > { %v5184_v21 = vadd.f32 %v5183_v35, %v5182_v10  ;;  %v5069_v7 = vadd.f32 %v5068_v11, %v5067_v61  ;;  %v4885_v8 = vpop.permute.xlu1 %4884  ;;  %v4880_v22 = vpop.permute.xlu0 %4879 }
 0x349   : > { %v5034_v27 = vmul.f32 %v4885_v8, %v8267_v33  ;;  %v5033_v29 = vmul.f32 %v4880_v22, %v8270_v34  ;;  %v5187_v28 = vsel %vm841_vm1, %v5148_v14, 0.0  ;;  %v5189_v30 = vsel %vm841_vm1, %v5149_v24, 0.0 }
 0x34a   : > { %v5186_v39 = vadd.f32 %v5185_v20, %v5184_v21  ;;  %v5071_v40 = vadd.f32 %v5070_v25, %v5069_v7  ;;  %v8717_v25 = vld [vmem:[#allocation3_spill] sm:$0xff] }
 0x34b   : > { %v5150_v42 = vmul.f32 %v5033_v29, %v8270_v34  ;;  %v5151_v31 = vmul.f32 %v5034_v27, %v8267_v33  ;;  %v5074_v5 = vsel %vm841_vm1, %v5033_v29, 0.0  ;;  %v5076_v47 = vsel %vm841_vm1, %v5034_v27, 0.0  ;;  %v8718_v29 = vld [vmem:[#allocation4_spill] sm:$0xff] }
 0x34c   : > { %v5188_v26 = vadd.f32 %v5187_v28, %v5186_v39  ;;  %v5073_v58 = vadd.f32 %v5072_v18, %v5071_v40  ;;  %v4895_v36 = vpop.permute.xlu1 %4894  ;;  %v4890_v2 = vpop.permute.xlu0 %4889 }
 0x34d   : > { %v5036_v19 = vmul.f32 %v4895_v36, %v8279_v45  ;;  %v5035_v17 = vmul.f32 %v4890_v2, %v8282_v41  ;;  %v5191_v34 = vsel %vm841_vm1, %v5150_v42, 0.0  ;;  %v5193_v33 = vsel %vm841_vm1, %v5151_v31, 0.0 }
 0x34e   : > { %v5190_v32 = vadd.f32 %v5189_v30, %v5188_v26  ;;  %v5075_v44 = vadd.f32 %v5074_v5, %v5073_v58  ;;  %v8719_v5 = vld [vmem:[#allocation5_spill] sm:$0xff] }
 0x34f   : > { %v5152_v48 = vmul.f32 %v5035_v17, %v8282_v41  ;;  %v5153_v54 = vmul.f32 %v5036_v19, %v8279_v45  ;;  %v5078_v55 = vsel %vm841_vm1, %v5035_v17, 0.0  ;;  %v5080_v50 = vsel %vm841_vm1, %v5036_v19, 0.0  ;;  %v8720_v17 = vld [vmem:[#allocation6_spill] sm:$0xff] }
 0x350   : > { %v5192_v49 = vadd.f32 %v5191_v34, %v5190_v32  ;;  %v5077_v52 = vadd.f32 %v5076_v47, %v5075_v44  ;;  %v4905_v16 = vpop.permute.xlu1 %4904  ;;  %v4900_v53 = vpop.permute.xlu0 %4899 }
 0x351   : > { %v5038_v13 = vmul.f32 %v4905_v16, %v8291_v46  ;;  %v5037_v57 = vmul.f32 %v4900_v53, %v8294_v15  ;;  %v5195_v41 = vsel %vm841_vm1, %v5152_v48, 0.0  ;;  %v5197_v6 = vsel %vm841_vm1, %v5153_v54, 0.0 }
 0x352   : > { %v5194_v59 = vadd.f32 %v5193_v33, %v5192_v49  ;;  %v5079_v62 = vadd.f32 %v5078_v55, %v5077_v52 }
 0x353   : > { %v5154_v51 = vmul.f32 %v5037_v57, %v8294_v15  ;;  %v5155_v0 = vmul.f32 %v5038_v13, %v8291_v46  ;;  %v5082_v9 = vsel %vm841_vm1, %v5037_v57, 0.0  ;;  %v5084_v11 = vsel %vm841_vm1, %v5038_v13, 0.0  ;;  %v8721_v57 = vld [vmem:[#allocation7_spill] sm:$0xff] }
 0x354   : > { %v5196_v63 = vadd.f32 %v5195_v41, %v5194_v59  ;;  %v5081_v1 = vadd.f32 %v5080_v50, %v5079_v62  ;;  %v4915_v4 = vpop.permute.xlu1 %4914  ;;  %v4910_v45 = vpop.permute.xlu0 %4909  ;;  %v8722_v62 = vld [vmem:[#allocation8_spill] sm:$0xff] }
 0x355   : > { %v5040_v60 = vmul.f32 %v4915_v4, %v8303_v56  ;;  %v5039_v61 = vmul.f32 %v4910_v45, %v8306_v43  ;;  %v5199_v15 = vsel %vm841_vm1, %v5154_v51, 0.0  ;;  %v5201_v46 = vsel %vm841_vm1, %v5155_v0, 0.0 }
 0x356   : > { %v5198_v10 = vadd.f32 %v5197_v6, %v5196_v63  ;;  %v5083_v35 = vadd.f32 %v5082_v9, %v5081_v1 }
 0x357   : > { %v5156_v14 = vmul.f32 %v5039_v61, %v8306_v43  ;;  %v5157_v22 = vmul.f32 %v5040_v60, %v8303_v56  ;;  %v5086_v24 = vsel %vm841_vm1, %v5039_v61, 0.0  ;;  %v5088_v28 = vsel %vm841_vm1, %v5040_v60, 0.0 }
 0x358   : > { %v5200_v20 = vadd.f32 %v5199_v15, %v5198_v10  ;;  %v5085_v21 = vadd.f32 %v5084_v11, %v5083_v35  ;;  %v4925_v7 = vpop.permute.xlu1 %4924  ;;  %v4920_v8 = vpop.permute.xlu0 %4919  ;;  %v8723_v35 = vld [vmem:[#allocation9_spill] sm:$0xff]  ;;  %v8724_v15 = vld [vmem:[#allocation10_spill] sm:$0xff] }
 0x359   : > { %v5042_v27 = vmul.f32 %v4925_v7, %v8717_v25  ;;  %v5041_v39 = vmul.f32 %v4920_v8, %v8718_v29  ;;  %v5203_v43 = vsel %vm841_vm1, %v5156_v14, 0.0  ;;  %v5205_v2 = vsel %vm841_vm1, %v5157_v22, 0.0 }
 0x35a   : > { %v5202_v40 = vadd.f32 %v5201_v46, %v5200_v20  ;;  %v5087_v18 = vadd.f32 %v5086_v24, %v5085_v21 }
 0x35b   : > { %v5158_v42 = vmul.f32 %v5041_v39, %v8718_v29  ;;  %v5159_v31 = vmul.f32 %v5042_v27, %v8717_v25  ;;  %v5090_v30 = vsel %vm841_vm1, %v5041_v39, 0.0  ;;  %v5092_v34 = vsel %vm841_vm1, %v5042_v27, 0.0 }
 0x35c   : > { %v5204_v26 = vadd.f32 %v5203_v43, %v5202_v40  ;;  %v5089_v58 = vadd.f32 %v5088_v28, %v5087_v18  ;;  %v4935_v36 = vpop.permute.xlu1 %4934  ;;  %v4930_v56 = vpop.permute.xlu0 %4929  ;;  %v8725_v18 = vld [vmem:[#allocation11_spill] sm:$0xff]  ;;  %v8726_v43 = vld [vmem:[#allocation12_spill] sm:$0xff] }
 0x35d   : > { %v5044_v19 = vmul.f32 %v4935_v36, %v8719_v5  ;;  %v5043_v32 = vmul.f32 %v4930_v56, %v8720_v17  ;;  %v5207_v48 = vsel %vm841_vm1, %v5158_v42, 0.0  ;;  %v5209_v49 = vsel %vm841_vm1, %v5159_v31, 0.0 }
 0x35e   : > { %v5206_v44 = vadd.f32 %v5205_v2, %v5204_v26  ;;  %v5091_v47 = vadd.f32 %v5090_v30, %v5089_v58 }
 0x35f   : > { %v5160_v33 = vmul.f32 %v5043_v32, %v8720_v17  ;;  %v5161_v55 = vmul.f32 %v5044_v19, %v8719_v5  ;;  %v5094_v13 = vsel %vm841_vm1, %v5043_v32, 0.0  ;;  %v5096_v63 = vsel %vm841_vm1, %v5044_v19, 0.0 }
 0x360   : > { %v5208_v52 = vadd.f32 %v5207_v48, %v5206_v44  ;;  %v5093_v16 = vadd.f32 %v5092_v34, %v5091_v47  ;;  %v4945_v53 = vpop.permute.xlu1 %4944  ;;  %v4940_v54 = vpop.permute.xlu0 %4939  ;;  %v8727_v47 = vld [vmem:[#allocation13_spill] sm:$0xff]  ;;  %v8728_v48 = vld [vmem:[#allocation14_spill] sm:$0xff] }
 0x361   : > { %v5046_v59 = vmul.f32 %v4945_v53, %v8721_v57  ;;  %v5045_v50 = vmul.f32 %v4940_v54, %v8722_v62  ;;  %v5211_v0 = vsel %vm841_vm1, %v5160_v33, 0.0  ;;  %v5213_v61 = vsel %vm841_vm1, %v5161_v55, 0.0 }
 0x362   : > { %v5210_v41 = vadd.f32 %v5209_v49, %v5208_v52  ;;  %v5095_v51 = vadd.f32 %v5094_v13, %v5093_v16 }
 0x363   : > { %v5162_v1 = vmul.f32 %v5045_v50, %v8722_v62  ;;  %v5163_v45 = vmul.f32 %v5046_v59, %v8721_v57  ;;  %v5098_v10 = vsel %vm841_vm1, %v5045_v50, 0.0  ;;  %v5100_v21 = vsel %vm841_vm1, %v5046_v59, 0.0 }
 0x364   : > { %v5212_v4 = vadd.f32 %v5211_v0, %v5210_v41  ;;  %v5097_v6 = vadd.f32 %v5096_v63, %v5095_v51  ;;  %v4955_v9 = vpop.permute.xlu1 %4954  ;;  %v4950_v60 = vpop.permute.xlu0 %4949  ;;  %v8729_v51 = vld [vmem:[#allocation15_spill] sm:$0xff]  ;;  %v8730_v0 = vld [vmem:[#allocation16_spill] sm:$0xff] }
 0x365   : > { %v5048_v11 = vmul.f32 %v4955_v9, %v8723_v35  ;;  %v5047_v14 = vmul.f32 %v4950_v60, %v8724_v15  ;;  %v5215_v7 = vsel %vm841_vm1, %v5162_v1, 0.0  ;;  %v5217_v22 = vsel %vm841_vm1, %v5163_v45, 0.0 }
 0x366   : > { %v5214_v46 = vadd.f32 %v5213_v61, %v5212_v4  ;;  %v5099_v20 = vadd.f32 %v5098_v10, %v5097_v6 }
 0x367   : > { %v5164_v8 = vmul.f32 %v5047_v14, %v8724_v15  ;;  %v5165_v39 = vmul.f32 %v5048_v11, %v8723_v35  ;;  %v5102_v40 = vsel %vm841_vm1, %v5047_v14, 0.0  ;;  %v5104_v58 = vsel %vm841_vm1, %v5048_v11, 0.0 }
 0x368   : > { %v5216_v24 = vadd.f32 %v5215_v7, %v5214_v46  ;;  %v5101_v25 = vadd.f32 %v5100_v21, %v5099_v20  ;;  %v4965_v27 = vpop.permute.xlu1 %4964  ;;  %v4960_v29 = vpop.permute.xlu0 %4959  ;;  %v8731_v20 = vld [vmem:[#allocation17_spill] sm:$0xff]  ;;  %v8732_v7 = vld [vmem:[#allocation18_spill] sm:$0xff] }
 0x369   : > { %v5050_v28 = vmul.f32 %v4965_v27, %v8725_v18  ;;  %v5049_v42 = vmul.f32 %v4960_v29, %v8726_v43  ;;  %v5219_v36 = vsel %vm841_vm1, %v5164_v8, 0.0  ;;  %v5221_v32 = vsel %vm841_vm1, %v5165_v39, 0.0 }
 0x36a   : > { %v5218_v26 = vadd.f32 %v5217_v22, %v5216_v24  ;;  %v5103_v31 = vadd.f32 %v5102_v40, %v5101_v25 }
 0x36b   : > { %v5166_v56 = vmul.f32 %v5049_v42, %v8726_v43  ;;  %v5167_v30 = vmul.f32 %v5050_v28, %v8725_v18  ;;  %v5106_v44 = vsel %vm841_vm1, %v5049_v42, 0.0  ;;  %v5108_v16 = vsel %vm841_vm1, %v5050_v28, 0.0 }
 0x36c   : > { %v5220_v2 = vadd.f32 %v5219_v36, %v5218_v26  ;;  %v5105_v5 = vadd.f32 %v5104_v58, %v5103_v31  ;;  %v4975_v19 = vpop.permute.xlu1 %4974  ;;  %v4970_v17 = vpop.permute.xlu0 %4969  ;;  %v8733_v31 = vld [vmem:[#allocation19_spill] sm:$0xff] }
 0x36d   : > { %v5052_v34 = vmul.f32 %v4975_v19, %v8727_v47  ;;  %v5051_v33 = vmul.f32 %v4970_v17, %v8728_v48  ;;  %v5223_v53 = vsel %vm841_vm1, %v5166_v56, 0.0  ;;  %v5225_v55 = vsel %vm841_vm1, %v5167_v30, 0.0 }
 0x36e   : > { %v5222_v49 = vadd.f32 %v5221_v32, %v5220_v2  ;;  %v5107_v52 = vadd.f32 %v5106_v44, %v5105_v5 }
 0x36f   : > { %v5168_v54 = vmul.f32 %v5051_v33, %v8728_v48  ;;  %v5169_v50 = vmul.f32 %v5052_v34, %v8727_v47  ;;  %v5110_v41 = vsel %vm841_vm1, %v5051_v33, 0.0  ;;  %v5112_v6 = vsel %vm841_vm1, %v5052_v34, 0.0 }
 0x370   : > { %v5224_v13 = vadd.f32 %v5223_v53, %v5222_v49  ;;  %v5109_v57 = vadd.f32 %v5108_v16, %v5107_v52  ;;  %v4985_v59 = vpop.permute.xlu1 %4984  ;;  %v4980_v62 = vpop.permute.xlu0 %4979 }
 0x371   : > { %v5054_v63 = vmul.f32 %v4985_v59, %v8729_v51  ;;  %v5053_v1 = vmul.f32 %v4980_v62, %v8730_v0  ;;  %v5227_v9 = vsel %vm841_vm1, %v5168_v54, 0.0  ;;  %v5229_v14 = vsel %vm841_vm1, %v5169_v50, 0.0 }
 0x372   : > { %v5226_v4 = vadd.f32 %v5225_v55, %v5224_v13  ;;  %v5111_v45 = vadd.f32 %v5110_v41, %v5109_v57 }
 0x373   : > { %v5170_v60 = vmul.f32 %v5053_v1, %v8730_v0  ;;  %v5171_v10 = vmul.f32 %v5054_v63, %v8729_v51  ;;  %v5114_v46 = vsel %vm841_vm1, %v5053_v1, 0.0  ;;  %v5116_v25 = vsel %vm841_vm1, %v5054_v63, 0.0 }
 0x374   : > { %v5228_v61 = vadd.f32 %v5227_v9, %v5226_v4  ;;  %v5113_v35 = vadd.f32 %v5112_v6, %v5111_v45  ;;  %v4995_v11 = vpop.permute.xlu1 %4994  ;;  %v4990_v15 = vpop.permute.xlu0 %4989 }
 0x375   : > { %v5056_v21 = vmul.f32 %v4995_v11, %v8731_v20  ;;  %v5055_v8 = vmul.f32 %v4990_v15, %v8732_v7  ;;  %v5231_v27 = vsel %vm841_vm1, %v5170_v60, 0.0  ;;  %v5233_v39 = vsel %vm841_vm1, %v5171_v10, 0.0 }
 0x376   : > { %v5230_v22 = vadd.f32 %v5229_v14, %v5228_v61  ;;  %v5115_v24 = vadd.f32 %v5114_v46, %v5113_v35 }
 0x377   : > { %v5172_v29 = vmul.f32 %v5055_v8, %v8732_v7  ;;  %v5173_v42 = vmul.f32 %v5056_v21, %v8731_v20  ;;  %v5118_v26 = vsel %vm841_vm1, %v5055_v8, 0.0  ;;  %v5120_v30 = vsel %vm841_vm1, %v5056_v21, 0.0 }
 0x378   : > { %v5232_v40 = vadd.f32 %v5231_v27, %v5230_v22  ;;  %v5117_v18 = vadd.f32 %v5116_v25, %v5115_v24  ;;  %v5005_v28 = vpop.permute.xlu1 %5004  ;;  %v5000_v43 = vpop.permute.xlu0 %4999 }
 0x379   : > { %v5058_v58 = vmul.f32 %v5005_v28, %v8733_v31  ;;  %v5057_v36 = vmul.f32 %v5000_v43, %v8417_v37  ;;  %v5235_v5 = vsel %vm841_vm1, %v5172_v29, 0.0  ;;  %v5237_v48 = vsel %vm841_vm1, %v5173_v42, 0.0  ;;  %v5143_v43 = vld [vmem:[%s8662_s9] sm:$0x1] }
 0x37a   : > { %v5234_v56 = vadd.f32 %v5233_v39, %v5232_v40  ;;  %v5119_v2 = vadd.f32 %v5118_v26, %v5117_v18  ;;  %v4846_v40 = vld [vmem:[%s8661_s8] sm:$0x1] }
 0x37b   : > { %v5174_v19 = vmul.f32 %v5057_v36, %v8417_v37  ;;  %v5175_v32 = vmul.f32 %v5058_v58, %v8733_v31  ;;  %v5122_v33 = vsel %vm841_vm1, %v5057_v36, 0.0  ;;  %v5124_v54 = vsel %vm841_vm1, %v5058_v58, 0.0 }
 0x37c   : > { %v5236_v17 = vadd.f32 %v5235_v5, %v5234_v56  ;;  %v5121_v44 = vadd.f32 %v5120_v30, %v5119_v2  ;;  %v5015_v47 = vpop.permute.xlu1 %5014  ;;  %v5010_v34 = vpop.permute.xlu0 %5009 }
 0x37d   : > { %v5060_v49 = vmul.f32 %v5015_v47, %v8426_v3  ;;  %v5059_v52 = vmul.f32 %v5010_v34, %v8429_v23  ;;  %v5239_v37 = vsel %vm841_vm1, %v5174_v19, 0.0  ;;  %v5241_v13 = vsel %vm841_vm1, %v5175_v32, 0.0 }
 0x37e   : > { %v5238_v16 = vadd.f32 %v5237_v48, %v5236_v17  ;;  %v5123_v53 = vadd.f32 %v5122_v33, %v5121_v44 }
 0x37f   : > { %v5176_v55 = vmul.f32 %v5059_v52, %v8429_v23  ;;  %v5177_v41 = vmul.f32 %v5060_v49, %v8426_v3  ;;  %v5126_v51 = vsel %vm841_vm1, %v5059_v52, 0.0  ;;  %v5128_v45 = vsel %vm841_vm1, %v5060_v49, 0.0 }
 0x380   : > { %v5240_v57 = vadd.f32 %v5239_v37, %v5238_v16  ;;  %v5125_v59 = vadd.f32 %v5124_v54, %v5123_v53  ;;  %v5025_v62 = vpop.permute.xlu1 %5024  ;;  %v5020_v50 = vpop.permute.xlu0 %5019 }
 0x381   : > { %v5062_v63 = vmul.f32 %v5025_v62, %v8438_v12  ;;  %v5061_v0 = vmul.f32 %v5020_v50, %v8441_v38  ;;  %v5243_v23 = vsel %vm841_vm1, %v5176_v55, 0.0  ;;  %v5245_v61 = vsel %vm841_vm1, %v5177_v41, 0.0 }
 0x382   : > { %v5242_v1 = vadd.f32 %v5241_v13, %v5240_v57  ;;  %v5127_v4 = vadd.f32 %v5126_v51, %v5125_v59 }
 0x383   : > { %v5178_v6 = vmul.f32 %v5061_v0, %v8441_v38  ;;  %v5179_v3 = vmul.f32 %v5062_v63, %v8438_v12  ;;  %v5130_v10 = vsel %vm841_vm1, %v5061_v0, 0.0  ;;  %v5132_v15 = vsel %vm4801_vm3, %v5062_v63, 0.0 }
 0x384   : > { %v5244_v9 = vadd.f32 %v5243_v23, %v5242_v1  ;;  %v5129_v60 = vadd.f32 %v5128_v45, %v5127_v4 }
 0x385   : > { %v5247_v14 = vsel %vm841_vm1, %v5178_v6, 0.0  ;;  %v5249_v21 = vsel %vm4801_vm3, %v5179_v3, 0.0 }
 0x386   : > { %v5246_v35 = vadd.f32 %v5245_v61, %v5244_v9  ;;  %v5131_v11 = vadd.f32 %v5130_v10, %v5129_v60 }
 0x388   : > { %v5133_v46 = vadd.f32 %v5132_v15, %v5131_v11  ;;  %v5248_v20 = vadd.f32 %v5247_v14, %v5246_v35 }
 0x38a   : > { %v5134_v7 = vrot.slane %v5133_v46, 4  ;;  %v5250_v38 = vadd.f32 %v5249_v21, %v5248_v20 }
 0x38c   : > { %v5135_v8 = vadd.f32 %v5134_v7, %v5133_v46  ;;  %v5251_v22 = vrot.slane %v5250_v38, 4 }
 0x38e   : > { %v5136_v24 = vrot.slane %v5135_v8, 2  ;;  %v5252_v25 = vadd.f32 %v5251_v22, %v5250_v38 }
 0x390   : > { %v5137_v27 = vadd.f32 %v5136_v24, %v5135_v8  ;;  %v5253_v12 = vrot.slane %v5252_v25, 2 }
 0x392   : > { %v5138_v29 = vrot.slane %v5137_v27, 1  ;;  %v5254_v39 = vadd.f32 %v5253_v12, %v5252_v25 }
 0x394   : > { %v5139_v18 = vadd.f32 %v5138_v29, %v5137_v27  ;;  %v5255_v28 = vrot.slane %v5254_v39, 1 }
 0x396   : > { %v5140_v42 = vadd.f32 %v5139_v18, %v4846_v40  ;;  %v5256_v26 = vadd.f32 %v5255_v28, %v5254_v39 }
 0x398   : > { %5142 = vst.msk [vmem:[%s8661_s8] sm:$0x1] %vm5141_vm5, %v5140_v42  ;;  %v5257_v31 = vadd.f32 %v5256_v26, %v5143_v43 }
 0x39a   : > { %5258 = vst.msk [vmem:[%s8662_s9] sm:$0x1] %vm5141_vm5, %v5257_v31 }
 0x39b PF: > { %s20_s30 = sadd.s32 1, %s6831_s30  }
 0x39c   : > { %p17_p5 = scmp.ge.s32.totalorder %s20_s30, 4  }
 0x39e   :  { %19 = sbr.rel (!%p17_p5) target bundleno = 1 (0x1), region = 106 }

// kernel: up_block_forward.5
= control target key start
LH: loop header
LB: loop body
LE: loop exit
PB: predicated region body
PF: predicated region fallthrough
CT: control target
= control target key end

     0   :  { %s11696_s27 = smov 0   ;;  %s14250_s0 = inlined_call_operand.vmem [shape: f32[2,324,4], index: 0, kind: input, shape index: {}]   ;;  %s14251_s1 = inlined_call_operand.vmem [shape: f32[2,324,4], index: 1, kind: input, shape index: {}]   ;;  %s14252_s2 = inlined_call_operand.vmem [shape: f32[9,4,4], index: 2, kind: input, shape index: {}]   ;;  %s14253_s3 = inlined_call_operand.vmem [shape: f32[9,4,4], index: 3, kind: input, shape index: {}]   ;;  %s14254_s4 = inlined_call_operand.vmem [shape: f32[1,4], index: 4, kind: input, shape index: {}]   ;;  %s14255_s5 = inlined_call_operand.vmem [shape: f32[324,1], index: 5, kind: input, shape index: {}]   ;;  %s14256_s6 = inlined_call_operand.vmem [shape: f32[2,324,4], index: 6, kind: output, shape index: {0}]   ;;  %s14257_s7 = inlined_call_operand.vmem [shape: f32[1,4], index: 7, kind: output, shape index: {1}]   ;;  %s14258_s8 = inlined_call_operand.vmem [shape: f32[1,4], index: 8, kind: output, shape index: {2}]  }
   0x1 LB: > { %s11702_s28 = sadd.s32 4294967295, %s11646_s27   ;;  %p8650_p0 = scmp.ge.s32.totalorder %s11646_s27, 1  ;;  %s11646_s27 = sphi %s11696_s27, %s19_s27  }
   0x2   : > { %p267_p1 = scmp.lt.s32.totalorder %s11646_s27, 3 }
   0x4   : > { %p268_p2 = pnand %p8650_p0, %p267_p1 }
   0x6   : > { %271 = sbr.rel (%p268_p2) target bundleno = 1108 (0x454), region = 44 }
   0xd   : > { %v394_v0 = vld [vmem:[%s14253_s3] sm:$0xf]  ;;  %vm504_vm0 = vcmask 1043456   ;;  %v8994_v1 = vld [vmem:[%s14253_s3 + $0x10] sm:$0xf]  ;;  %p306_p3 = scmp.lt.s32.totalorder %s11702_s28, 1 }
   0xe   : > { %10006 = vmatprep.subr.msk.mxu1 %vm504_vm0, %v394_v0  ;;  %10510 = vmatprep.subr.msk.mxu0 %vm504_vm0, %v8994_v1  ;;  %v357_v2 = vld [vmem:[%s14252_s2] sm:$0xf]  ;;  %v9032_v3 = vld [vmem:[%s14252_s2 + $0x14] sm:$0xf]  ;;  %vm395_vm1 = vcmask 31744   ;;  %vm8072_vm2 = vcmask 27648  }
   0xf   : > { %10007 = vmatpush3.msk.msra.mxu1 %vm504_vm0, %v394_v0  ;;  %10511 = vmatpush3.msk.msra.mxu0 %vm504_vm0, %v8994_v1  ;;  %s307_s15 = scalar_select %p306_p3, %s11702_s28, 1  ;;  %v11747_v10 = vld [vmem:[%s14252_s2 + $0x4] sm:$0xf]  ;;  %v11752_v11 = vld [vmem:[%s14253_s3 + $0x14] sm:$0xf]  ;;  %vm8109_vm3 = vcmask 29696  }
  0x10   : > { %10062 = vmatprep.subr.msk.mxu1 %vm504_vm0, %v357_v2  ;;  %10566 = vmatprep.subr.msk.mxu0 %vm504_vm0, %v9032_v3  ;;  %p9337_p4 = scmp.ne.s32.totalorder %s11702_s28, 0 }
  0x11   : > { %s11726_s16 = smul.u32 328, %s307_s15  ;;  %vm8151_vm4 = vcmask (!%p9337_p4), 24576  }
  0x13   : > { %s11732_s19 = scalar_lea.vmem %s14251_s1, %s11726_s16  ;;  %s11890_s26 = scalar_lea.vmem %s14250_s0, %s11726_s16 }
  0x14   : > { %v358_v4 = vld [vmem:[%s11732_s19] sm:$0xff]  ;;  %v4119_v5 = vld [vmem:[%s11732_s19 + $0x13] sm:$0xff]  ;;  %v359_v6 = vld [vmem:[%s11732_s19 + $0x8] sm:$0xff]  ;;  %s13564_s17 = scalar_lea.vmem %s14256_s6, %s11726_s16 }
  0x15   : > { %10008 = vmatprep.mubr.msk.f32.mxu1 %vm395_vm1, %v358_v4  ;;  %10512 = vmatprep.mubr.msk.f32.mxu0 %vm395_vm1, %v4119_v5  ;;  %v4120_v7 = vld [vmem:[%s11732_s19 + $0x1b] sm:$0xff]  ;;  %v360_v8 = vld [vmem:[%s11732_s19 + $0x10] sm:$0xff]  ;;  %v4121_v9 = vld [vmem:[%s11732_s19 + $0x23] sm:$0xff] }
  0x16   : > { %10009 = vmatmul.mubr.msk.f32.vlgmr.msra.gmra.mrb[0].mxu1 %vm395_vm1, %v359_v6  ;;  %10513 = vmatmul.mubr.msk.f32.vlgmr.msra.gmra.mrb[0].mxu0 %vm395_vm1, %v4120_v7  ;;  %v361_v12 = vld [vmem:[%s11732_s19 + $0x18] sm:$0xff]  ;;  %v4122_v13 = vld [vmem:[%s11732_s19 + $0x2b] sm:$0xff]  ;;  %v362_v14 = vld [vmem:[%s11732_s19 + $0x20] sm:$0xff] }
  0x17   : > { %10063 = vmatpush3.msk.msra.mxu1 %vm504_vm0, %v357_v2  ;;  %10567 = vmatpush3.msk.msra.mxu0 %vm504_vm0, %v9032_v3  ;;  %v4123_v15 = vld [vmem:[%s11732_s19 + $0x33] sm:$0xff]  ;;  %v363_v16 = vld [vmem:[%s11732_s19 + $0x28] sm:$0xff]  ;;  %v4124_v17 = vld [vmem:[%s11732_s19 + $0x3b] sm:$0xff] }
  0x18   : > { %10011 = vmatprep.mubr.msk.f32.mxu1 %vm395_vm1, %v360_v8  ;;  %10515 = vmatprep.mubr.msk.f32.mxu0 %vm395_vm1, %v4121_v9  ;;  %v364_v18 = vld [vmem:[%s11732_s19 + $0x30] sm:$0xff]  ;;  %v4125_v19 = vld [vmem:[%s11732_s19 + $0x43] sm:$0xff]  ;;  %v365_v20 = vld [vmem:[%s11732_s19 + $0x38] sm:$0xff] }
  0x19   : > { %10118 = vmatprep.subr.msk.mxu1 %vm504_vm0, %v11747_v10  ;;  %10622 = vmatprep.subr.msk.mxu0 %vm504_vm0, %v11752_v11  ;;  %v4126_v21 = vld [vmem:[%s11732_s19 + $0x4b] sm:$0xff]  ;;  %v366_v22 = vld [vmem:[%s11732_s19 + $0x40] sm:$0xff]  ;;  %v4127_v23 = vld [vmem:[%s11732_s19 + $0x53] sm:$0xff] }
  0x1a   : > { %10012 = vmatmul.mubr.msk.f32.gmra.mrb[2].mxu1 %vm395_vm1, %v361_v12  ;;  %10516 = vmatmul.mubr.msk.f32.gmra.mrb[2].mxu0 %vm395_vm1, %v4122_v13  ;;  %v367_v24 = vld [vmem:[%s11732_s19 + $0x48] sm:$0xff]  ;;  %v4128_v25 = vld [vmem:[%s11732_s19 + $0x5b] sm:$0xff]  ;;  %v368_v26 = vld [vmem:[%s11732_s19 + $0x50] sm:$0xff] }
  0x1b   : > { %10014 = vmatprep.mubr.msk.f32.mxu1 %vm395_vm1, %v362_v14  ;;  %10518 = vmatprep.mubr.msk.f32.mxu0 %vm395_vm1, %v4123_v15  ;;  %v4129_v27 = vld [vmem:[%s11732_s19 + $0x63] sm:$0xff]  ;;  %v369_v28 = vld [vmem:[%s11732_s19 + $0x58] sm:$0xff]  ;;  %v4130_v29 = vld [vmem:[%s11732_s19 + $0x6b] sm:$0xff] }
  0x1c   : > { %v370_v30 = vld [vmem:[%s11732_s19 + $0x60] sm:$0xff]  ;;  %v4131_v31 = vld [vmem:[%s11732_s19 + $0x73] sm:$0xff]  ;;  %v371_v32 = vld [vmem:[%s11732_s19 + $0x68] sm:$0xff] }
  0x1d   : > { %v4132_v33 = vld [vmem:[%s11732_s19 + $0x7b] sm:$0xff]  ;;  %v372_v34 = vld [vmem:[%s11732_s19 + $0x70] sm:$0xff]  ;;  %v4133_v35 = vld [vmem:[%s11732_s19 + $0x83] sm:$0xff] }
  0x1e   : > { %10015 = vmatmul.mubr.msk.f32.gmra.mrb[4].mxu1 %vm395_vm1, %v363_v16  ;;  %10519 = vmatmul.mubr.msk.f32.gmra.mrb[4].mxu0 %vm395_vm1, %v4124_v17  ;;  %v373_v36 = vld [vmem:[%s11732_s19 + $0x78] sm:$0xff]  ;;  %v4134_v37 = vld [vmem:[%s11732_s19 + $0x8b] sm:$0xff]  ;;  %v374_v38 = vld [vmem:[%s11732_s19 + $0x80] sm:$0xff] }
  0x1f   : > { %10017 = vmatprep.mubr.msk.f32.mxu1 %vm395_vm1, %v364_v18  ;;  %10521 = vmatprep.mubr.msk.f32.mxu0 %vm395_vm1, %v4125_v19  ;;  %v4135_v39 = vld [vmem:[%s11732_s19 + $0x93] sm:$0xff]  ;;  %v375_v40 = vld [vmem:[%s11732_s19 + $0x88] sm:$0xff]  ;;  %v4136_v41 = vld [vmem:[%s11732_s19 + $0x9b] sm:$0xff] }
  0x20   : > { %v376_v42 = vld [vmem:[%s11732_s19 + $0x90] sm:$0xff]  ;;  %v4137_v43 = vld [vmem:[%s11732_s19 + $0xa3] sm:$0xff]  ;;  %v377_v44 = vld [vmem:[%s11732_s19 + $0x98] sm:$0xff] }
  0x21   : > { %v4138_v45 = vld [vmem:[%s11732_s19 + $0xab] sm:$0xff]  ;;  %v378_v46 = vld [vmem:[%s11732_s19 + $0xa0] sm:$0xff]  ;;  %v4139_v47 = vld [vmem:[%s11732_s19 + $0xb3] sm:$0xff] }
  0x22   : > { %10018 = vmatmul.mubr.msk.f32.gmra.mrb[6].mxu1 %vm395_vm1, %v365_v20  ;;  %10522 = vmatmul.mubr.msk.f32.gmra.mrb[6].mxu0 %vm395_vm1, %v4126_v21  ;;  %v379_v48 = vld [vmem:[%s11732_s19 + $0xa8] sm:$0xff]  ;;  %v4140_v49 = vld [vmem:[%s11732_s19 + $0xbb] sm:$0xff]  ;;  %v380_v50 = vld [vmem:[%s11732_s19 + $0xb0] sm:$0xff] }
  0x23   : > { %10020 = vmatprep.mubr.msk.f32.mxu1 %vm395_vm1, %v366_v22  ;;  %10524 = vmatprep.mubr.msk.f32.mxu0 %vm395_vm1, %v4127_v23  ;;  %v4141_v51 = vld [vmem:[%s11732_s19 + $0xc3] sm:$0xff]  ;;  %v381_v52 = vld [vmem:[%s11732_s19 + $0xb8] sm:$0xff]  ;;  %v4142_v53 = vld [vmem:[%s11732_s19 + $0xcb] sm:$0xff] }
  0x24   : > { %v382_v54 = vld [vmem:[%s11732_s19 + $0xc0] sm:$0xff]  ;;  %v4143_v55 = vld [vmem:[%s11732_s19 + $0xd3] sm:$0xff]  ;;  %v383_v56 = vld [vmem:[%s11732_s19 + $0xc8] sm:$0xff] }
  0x25   : > { %v4144_v57 = vld [vmem:[%s11732_s19 + $0xdb] sm:$0xff]  ;;  %v384_v58 = vld [vmem:[%s11732_s19 + $0xd0] sm:$0xff]  ;;  %v4145_v59 = vld [vmem:[%s11732_s19 + $0xe3] sm:$0xff] }
  0x26   : > { %10021 = vmatmul.mubr.msk.f32.gmra.mrb[8].mxu1 %vm395_vm1, %v367_v24  ;;  %10525 = vmatmul.mubr.msk.f32.gmra.mrb[8].mxu0 %vm395_vm1, %v4128_v25  ;;  %v385_v60 = vld [vmem:[%s11732_s19 + $0xd8] sm:$0xff]  ;;  %v4146_v61 = vld [vmem:[%s11732_s19 + $0xeb] sm:$0xff]  ;;  %v386_v62 = vld [vmem:[%s11732_s19 + $0xe0] sm:$0xff] }
  0x27   : > { %10023 = vmatprep.mubr.msk.f32.mxu1 %vm395_vm1, %v368_v26  ;;  %10527 = vmatprep.mubr.msk.f32.mxu0 %vm395_vm1, %v4129_v27  ;;  %v4147_v63 = vld [vmem:[%s11732_s19 + $0xf3] sm:$0xff]  ;;  %v387_v0 = vld [vmem:[%s11732_s19 + $0xe8] sm:$0xff]  ;;  %v4148_v1 = vld [vmem:[%s11732_s19 + $0xfb] sm:$0xff] }
  0x28   : > { %v388_v2 = vld [vmem:[%s11732_s19 + $0xf0] sm:$0xff]  ;;  %v4149_v3 = vld [vmem:[%s11732_s19 + $0x103] sm:$0xff]  ;;  %v389_v4 = vld [vmem:[%s11732_s19 + $0xf8] sm:$0xff] }
  0x29   : > { %v4150_v5 = vld [vmem:[%s11732_s19 + $0x10b] sm:$0xff]  ;;  %v390_v6 = vld [vmem:[%s11732_s19 + $0x100] sm:$0xff]  ;;  %v4151_v7 = vld [vmem:[%s11732_s19 + $0x113] sm:$0xff] }
  0x2a   : > { %10024 = vmatmul.mubr.msk.f32.gmra.mrb[10].mxu1 %vm395_vm1, %v369_v28  ;;  %10528 = vmatmul.mubr.msk.f32.gmra.mrb[10].mxu0 %vm395_vm1, %v4130_v29  ;;  %v391_v8 = vld [vmem:[%s11732_s19 + $0x108] sm:$0xff]  ;;  %v4152_v9 = vld [vmem:[%s11732_s19 + $0x11b] sm:$0xff]  ;;  %v392_v12 = vld [vmem:[%s11732_s19 + $0x110] sm:$0xff] }
  0x2b   : > { %10026 = vmatprep.mubr.msk.f32.mxu1 %vm395_vm1, %v370_v30  ;;  %10530 = vmatprep.mubr.msk.f32.mxu0 %vm395_vm1, %v4131_v31  ;;  %v4153_v13 = vld [vmem:[%s11732_s19 + $0x123] sm:$0xff]  ;;  %v393_v14 = vld [vmem:[%s11732_s19 + $0x118] sm:$0x3f]  ;;  %v4154_v15 = vld [vmem:[%s11732_s19 + $0x12b] sm:$0x3f] }
  0x2c   : > { %v321_v16 = vld [vmem:[%s11890_s26] sm:$0xff]  ;;  %v4549_v17 = vld [vmem:[%s11890_s26 + $0x14] sm:$0xff]  ;;  %v322_v18 = vld [vmem:[%s11890_s26 + $0x8] sm:$0xff] }
  0x2d   : > { %v4550_v19 = vld [vmem:[%s11890_s26 + $0x1c] sm:$0xff]  ;;  %v323_v20 = vld [vmem:[%s11890_s26 + $0x10] sm:$0xff]  ;;  %v11908_v21 = vld [vmem:[%s11890_s26 + $0x24] sm:$0xff] }
  0x2e   : > { %10027 = vmatmul.mubr.msk.f32.gmra.mrb[12].mxu1 %vm395_vm1, %v371_v32  ;;  %10531 = vmatmul.mubr.msk.f32.gmra.mrb[12].mxu0 %vm395_vm1, %v4132_v33  ;;  %v11915_v22 = vld [vmem:[%s14253_s3 + $0x4] sm:$0xf]  ;;  %v11920_v23 = vld [vmem:[%s14252_s2 + $0x18] sm:$0xf]  ;;  %v11928_v25 = vld [vmem:[%s11890_s26 + $0x2c] sm:$0xff] }
  0x2f   : > { %10029 = vmatprep.mubr.msk.f32.mxu1 %vm395_vm1, %v372_v34  ;;  %10533 = vmatprep.mubr.msk.f32.mxu0 %vm395_vm1, %v4133_v35  ;;  %v324_v24 = vld [vmem:[%s11890_s26 + $0x18] sm:$0xff]  ;;  %v325_v26 = vld [vmem:[%s11890_s26 + $0x20] sm:$0xff]  ;;  %v327_v28 = vld [vmem:[%s11890_s26 + $0x30] sm:$0xff] }
  0x30   : > { %v11935_v27 = vld [vmem:[%s11890_s26 + $0x34] sm:$0xff]  ;;  %v11953_v29 = vld [vmem:[%s11890_s26 + $0x44] sm:$0xff]  ;;  %v11963_v31 = vld [vmem:[%s11890_s26 + $0x4c] sm:$0xff] }
  0x31   : > { %v328_v30 = vld [vmem:[%s11890_s26 + $0x38] sm:$0xff]  ;;  %v329_v32 = vld [vmem:[%s11890_s26 + $0x40] sm:$0xff]  ;;  %v330_v34 = vld [vmem:[%s11890_s26 + $0x48] sm:$0xff] }
  0x32   : > { %10030 = vmatmul.mubr.msk.f32.gmra.mrb[14].mxu1 %vm395_vm1, %v373_v36  ;;  %10534 = vmatmul.mubr.msk.f32.gmra.mrb[14].mxu0 %vm395_vm1, %v4134_v37  ;;  %v11967_v33 = vld [vmem:[%s11890_s26 + $0x54] sm:$0xff]  ;;  %v11977_v35 = vld [vmem:[%s11890_s26 + $0x5c] sm:$0xff]  ;;  %v11981_v37 = vld [vmem:[%s11890_s26 + $0x64] sm:$0xff] }
  0x33   : > { %10032 = vmatprep.mubr.msk.f32.mxu1 %vm395_vm1, %v374_v38  ;;  %10536 = vmatprep.mubr.msk.f32.mxu0 %vm395_vm1, %v4135_v39  ;;  %v331_v36 = vld [vmem:[%s11890_s26 + $0x50] sm:$0xff]  ;;  %v332_v38 = vld [vmem:[%s11890_s26 + $0x58] sm:$0xff] }
  0x34   : > { %v11991_v39 = vld [vmem:[%s11890_s26 + $0x6c] sm:$0xff] }
  0x36   : > { %10033 = vmatmul.mubr.msk.f32.gmra.mrb[16].mxu1 %vm395_vm1, %v375_v40  ;;  %10537 = vmatmul.mubr.msk.f32.gmra.mrb[16].mxu0 %vm395_vm1, %v4136_v41  ;;  %v333_v40 = vld [vmem:[%s11890_s26 + $0x60] sm:$0xff]  ;;  %v11995_v41 = vld [vmem:[%s11890_s26 + $0x74] sm:$0xff] }
  0x37   : > { %10035 = vmatprep.mubr.msk.f32.mxu1 %vm395_vm1, %v376_v42  ;;  %10539 = vmatprep.mubr.msk.f32.mxu0 %vm395_vm1, %v4137_v43  ;;  %v334_v42 = vld [vmem:[%s11890_s26 + $0x68] sm:$0xff]  ;;  %v12005_v43 = vld [vmem:[%s11890_s26 + $0x7c] sm:$0xff] }
  0x3a   : > { %10036 = vmatmul.mubr.msk.f32.gmra.mrb[18].mxu1 %vm395_vm1, %v377_v44  ;;  %10540 = vmatmul.mubr.msk.f32.gmra.mrb[18].mxu0 %vm395_vm1, %v4138_v45  ;;  %v335_v44 = vld [vmem:[%s11890_s26 + $0x70] sm:$0xff]  ;;  %v12009_v45 = vld [vmem:[%s11890_s26 + $0x84] sm:$0xff] }
  0x3b   : > { %10038 = vmatprep.mubr.msk.f32.mxu1 %vm395_vm1, %v378_v46  ;;  %10542 = vmatprep.mubr.msk.f32.mxu0 %vm395_vm1, %v4139_v47  ;;  %v336_v46 = vld [vmem:[%s11890_s26 + $0x78] sm:$0xff]  ;;  %v12019_v47 = vld [vmem:[%s11890_s26 + $0x8c] sm:$0xff] }
  0x3e   : > { %10039 = vmatmul.mubr.msk.f32.gmra.mrb[20].mxu1 %vm395_vm1, %v379_v48  ;;  %10543 = vmatmul.mubr.msk.f32.gmra.mrb[20].mxu0 %vm395_vm1, %v4140_v49  ;;  %v337_v48 = vld [vmem:[%s11890_s26 + $0x80] sm:$0xff]  ;;  %v12023_v49 = vld [vmem:[%s11890_s26 + $0x94] sm:$0xff] }
  0x3f   : > { %10041 = vmatprep.mubr.msk.f32.mxu1 %vm395_vm1, %v380_v50  ;;  %10545 = vmatprep.mubr.msk.f32.mxu0 %vm395_vm1, %v4141_v51  ;;  %v338_v50 = vld [vmem:[%s11890_s26 + $0x88] sm:$0xff]  ;;  %v12033_v51 = vld [vmem:[%s11890_s26 + $0x9c] sm:$0xff] }
  0x42   : > { %10042 = vmatmul.mubr.msk.f32.gmra.mrb[22].mxu1 %vm395_vm1, %v381_v52  ;;  %10546 = vmatmul.mubr.msk.f32.gmra.mrb[22].mxu0 %vm395_vm1, %v4142_v53  ;;  %v339_v52 = vld [vmem:[%s11890_s26 + $0x90] sm:$0xff]  ;;  %v12037_v53 = vld [vmem:[%s11890_s26 + $0xa4] sm:$0xff] }
  0x43   : > { %10044 = vmatprep.mubr.msk.f32.mxu1 %vm395_vm1, %v382_v54  ;;  %10548 = vmatprep.mubr.msk.f32.mxu0 %vm395_vm1, %v4143_v55  ;;  %v340_v54 = vld [vmem:[%s11890_s26 + $0x98] sm:$0xff]  ;;  %v12047_v55 = vld [vmem:[%s11890_s26 + $0xac] sm:$0xff] }
  0x46   : > { %10045 = vmatmul.mubr.msk.f32.gmra.mrb[24].mxu1 %vm395_vm1, %v383_v56  ;;  %10549 = vmatmul.mubr.msk.f32.gmra.mrb[24].mxu0 %vm395_vm1, %v4144_v57  ;;  %v341_v56 = vld [vmem:[%s11890_s26 + $0xa0] sm:$0xff]  ;;  %v12051_v57 = vld [vmem:[%s11890_s26 + $0xb4] sm:$0xff] }
  0x47   : > { %10047 = vmatprep.mubr.msk.f32.mxu1 %vm395_vm1, %v384_v58  ;;  %10551 = vmatprep.mubr.msk.f32.mxu0 %vm395_vm1, %v4145_v59  ;;  %v342_v58 = vld [vmem:[%s11890_s26 + $0xa8] sm:$0xff]  ;;  %v12061_v59 = vld [vmem:[%s11890_s26 + $0xbc] sm:$0xff] }
  0x4a   : > { %10048 = vmatmul.mubr.msk.f32.gmra.mrb[26].mxu1 %vm395_vm1, %v385_v60  ;;  %10552 = vmatmul.mubr.msk.f32.gmra.mrb[26].mxu0 %vm395_vm1, %v4146_v61  ;;  %v343_v60 = vld [vmem:[%s11890_s26 + $0xb0] sm:$0xff]  ;;  %v12065_v61 = vld [vmem:[%s11890_s26 + $0xc4] sm:$0xff] }
  0x4b   : > { %10050 = vmatprep.mubr.msk.f32.mxu1 %vm395_vm1, %v386_v62  ;;  %10554 = vmatprep.mubr.msk.f32.mxu0 %vm395_vm1, %v4147_v63  ;;  %v344_v62 = vld [vmem:[%s11890_s26 + $0xb8] sm:$0xff]  ;;  %v12075_v63 = vld [vmem:[%s11890_s26 + $0xcc] sm:$0xff] }
  0x4e   : > { %10051 = vmatmul.mubr.msk.f32.gmra.mrb[28].mxu1 %vm395_vm1, %v387_v0  ;;  %10555 = vmatmul.mubr.msk.f32.gmra.mrb[28].mxu0 %vm395_vm1, %v4148_v1  ;;  %v345_v0 = vld [vmem:[%s11890_s26 + $0xc0] sm:$0xff]  ;;  %v12079_v1 = vld [vmem:[%s11890_s26 + $0xd4] sm:$0xff] }
  0x4f   : > { %10053 = vmatprep.mubr.msk.f32.mxu1 %vm395_vm1, %v388_v2  ;;  %10557 = vmatprep.mubr.msk.f32.mxu0 %vm395_vm1, %v4149_v3  ;;  %v346_v2 = vld [vmem:[%s11890_s26 + $0xc8] sm:$0xff]  ;;  %v12089_v3 = vld [vmem:[%s11890_s26 + $0xdc] sm:$0xff] }
  0x52   : > { %10054 = vmatmul.mubr.msk.f32.gmra.mrb[30].mxu1 %vm395_vm1, %v389_v4  ;;  %10558 = vmatmul.mubr.msk.f32.gmra.mrb[30].mxu0 %vm395_vm1, %v4150_v5  ;;  %v347_v4 = vld [vmem:[%s11890_s26 + $0xd0] sm:$0xff]  ;;  %v12093_v5 = vld [vmem:[%s11890_s26 + $0xe4] sm:$0xff] }
  0x53   : > { %10056 = vmatprep.mubr.msk.f32.mxu1 %vm395_vm1, %v390_v6  ;;  %10560 = vmatprep.mubr.msk.f32.mxu0 %vm395_vm1, %v4151_v7  ;;  %v348_v6 = vld [vmem:[%s11890_s26 + $0xd8] sm:$0xff]  ;;  %v12103_v7 = vld [vmem:[%s11890_s26 + $0xec] sm:$0xff] }
  0x56   : > { %10057 = vmatmul.mubr.msk.f32.gmra.mrb[32].mxu1 %vm395_vm1, %v391_v8  ;;  %10561 = vmatmul.mubr.msk.f32.gmra.mrb[32].mxu0 %vm395_vm1, %v4152_v9  ;;  %v349_v8 = vld [vmem:[%s11890_s26 + $0xe0] sm:$0xff]  ;;  %v12107_v9 = vld [vmem:[%s11890_s26 + $0xf4] sm:$0xff] }
  0x57   : > { %10059 = vmatprep.mubr.msk.f32.mxu1 %vm395_vm1, %v392_v12  ;;  %10563 = vmatprep.mubr.msk.f32.mxu0 %vm395_vm1, %v4153_v13  ;;  %v350_v12 = vld [vmem:[%s11890_s26 + $0xe8] sm:$0xff]  ;;  %v12117_v13 = vld [vmem:[%s11890_s26 + $0xfc] sm:$0xff] }
  0x5a   : > { %10060 = vmatmul.mubr.msk.f32.gmra.mrb[34].mxu1 %vm395_vm1, %v393_v14  ;;  %10564 = vmatmul.mubr.msk.f32.gmra.mrb[34].mxu0 %vm395_vm1, %v4154_v15  ;;  %v351_v14 = vld [vmem:[%s11890_s26 + $0xf0] sm:$0xff]  ;;  %v12121_v15 = vld [vmem:[%s11890_s26 + $0x104] sm:$0xff] }
  0x5b   : > { %10064 = vmatprep.mubr.msk.f32.mxu1 %vm395_vm1, %v321_v16  ;;  %10568 = vmatprep.mubr.msk.f32.mxu0 %vm395_vm1, %v4549_v17  ;;  %v352_v16 = vld [vmem:[%s11890_s26 + $0xf8] sm:$0xff]  ;;  %v12131_v17 = vld [vmem:[%s11890_s26 + $0x10c] sm:$0xff] }
  0x5e   : > { %10065 = vmatmul.mubr.msk.f32.vlgmr.msra.gmra.mrb[0].mxu1 %vm395_vm1, %v322_v18  ;;  %10569 = vmatmul.mubr.msk.f32.vlgmr.msra.gmra.mrb[0].mxu0 %vm395_vm1, %v4550_v19  ;;  %v353_v18 = vld [vmem:[%s11890_s26 + $0x100] sm:$0xff]  ;;  %v12135_v19 = vld [vmem:[%s11890_s26 + $0x114] sm:$0xff] }
  0x5f   : > { %10119 = vmatpush3.msk.msra.mxu1 %vm504_vm0, %v11747_v10  ;;  %10623 = vmatpush3.msk.msra.mxu0 %vm504_vm0, %v11752_v11  ;;  %v326_v10 = vld [vmem:[%s11890_s26 + $0x28] sm:$0xff]  ;;  %v11949_v11 = vld [vmem:[%s11890_s26 + $0x3c] sm:$0xff] }
  0x60   : > { %10067 = vmatprep.mubr.msk.f32.mxu1 %vm395_vm1, %v323_v20  ;;  %10571 = vmatprep.mubr.msk.f32.mxu0 %vm395_vm1, %v11908_v21  ;;  %v354_v20 = vld [vmem:[%s11890_s26 + $0x108] sm:$0xff] }
  0x61   : > { %10174 = vmatprep.subr.msk.mxu1 %vm504_vm0, %v11915_v22  ;;  %10678 = vmatprep.subr.msk.mxu0 %vm504_vm0, %v11920_v23 }
  0x62   : > { %10068 = vmatmul.mubr.msk.f32.gmra.mrb[2].mxu1 %vm395_vm1, %v324_v24  ;;  %10572 = vmatmul.mubr.msk.f32.gmra.mrb[2].mxu0 %vm395_vm1, %v11928_v25  ;;  %v12145_v24 = vld [vmem:[%s11890_s26 + $0x11c] sm:$0xff] }
  0x63   : > { %10070 = vmatprep.mubr.msk.f32.mxu1 %vm395_vm1, %v325_v26  ;;  %10574 = vmatprep.mubr.msk.f32.mxu0 %vm395_vm1, %v11935_v27  ;;  %v355_v26 = vld [vmem:[%s11890_s26 + $0x110] sm:$0xff] }
  0x66   : > { %10071 = vmatmul.mubr.msk.f32.gmra.mrb[4].mxu1 %vm395_vm1, %v326_v10  ;;  %10575 = vmatmul.mubr.msk.f32.gmra.mrb[4].mxu0 %vm395_vm1, %v11949_v11  ;;  %v12149_v10 = vld [vmem:[%s11890_s26 + $0x124] sm:$0xff] }
  0x67   : > { %10073 = vmatprep.mubr.msk.f32.mxu1 %vm395_vm1, %v327_v28  ;;  %10577 = vmatprep.mubr.msk.f32.mxu0 %vm395_vm1, %v11953_v29  ;;  %v356_v28 = vld [vmem:[%s11890_s26 + $0x118] sm:$0x3f] }
  0x6a   : > { %10074 = vmatmul.mubr.msk.f32.gmra.mrb[6].mxu1 %vm395_vm1, %v328_v30  ;;  %10578 = vmatmul.mubr.msk.f32.gmra.mrb[6].mxu0 %vm395_vm1, %v11963_v31  ;;  %v4584_v30 = vld [vmem:[%s11890_s26 + $0x12c] sm:$0x3f] }
  0x6b   : > { %10076 = vmatprep.mubr.msk.f32.mxu1 %vm395_vm1, %v329_v32  ;;  %10580 = vmatprep.mubr.msk.f32.mxu0 %vm395_vm1, %v11967_v33  ;;  %v1109_v32 = vld [vmem:[%s11890_s26 + $0x1] sm:$0xff] }
  0x6e   : > { %10077 = vmatmul.mubr.msk.f32.gmra.mrb[8].mxu1 %vm395_vm1, %v330_v34  ;;  %10581 = vmatmul.mubr.msk.f32.gmra.mrb[8].mxu0 %vm395_vm1, %v11977_v35  ;;  %v4979_v34 = vld [vmem:[%s11732_s19 + $0x14] sm:$0xff] }
  0x6f   : > { %10079 = vmatprep.mubr.msk.f32.mxu1 %vm395_vm1, %v331_v36  ;;  %10583 = vmatprep.mubr.msk.f32.mxu0 %vm395_vm1, %v11981_v37  ;;  %v1110_v36 = vld [vmem:[%s11890_s26 + $0x9] sm:$0xff] }
  0x72   : > { %10080 = vmatmul.mubr.msk.f32.gmra.mrb[10].mxu1 %vm395_vm1, %v332_v38  ;;  %10584 = vmatmul.mubr.msk.f32.gmra.mrb[10].mxu0 %vm395_vm1, %v11991_v39  ;;  %v4980_v38 = vld [vmem:[%s11732_s19 + $0x1c] sm:$0xff] }
  0x73   : > { %10082 = vmatprep.mubr.msk.f32.mxu1 %vm395_vm1, %v333_v40  ;;  %10586 = vmatprep.mubr.msk.f32.mxu0 %vm395_vm1, %v11995_v41  ;;  %v1111_v40 = vld [vmem:[%s11890_s26 + $0x11] sm:$0xff] }
  0x76   : > { %10083 = vmatmul.mubr.msk.f32.gmra.mrb[12].mxu1 %vm395_vm1, %v334_v42  ;;  %10587 = vmatmul.mubr.msk.f32.gmra.mrb[12].mxu0 %vm395_vm1, %v12005_v43  ;;  %v12169_v42 = vld [vmem:[%s11732_s19 + $0x24] sm:$0xff] }
  0x77   : > { %10085 = vmatprep.mubr.msk.f32.mxu1 %vm395_vm1, %v335_v44  ;;  %10589 = vmatprep.mubr.msk.f32.mxu0 %vm395_vm1, %v12009_v45  ;;  %v12176_v44 = vld [vmem:[%s14252_s2 + $0x8] sm:$0xf] }
  0x7a   : > { %10086 = vmatmul.mubr.msk.f32.gmra.mrb[14].mxu1 %vm395_vm1, %v336_v46  ;;  %10590 = vmatmul.mubr.msk.f32.gmra.mrb[14].mxu0 %vm395_vm1, %v12019_v47  ;;  %v12181_v46 = vld [vmem:[%s14253_s3 + $0x18] sm:$0xf] }
  0x7b   : > { %10088 = vmatprep.mubr.msk.f32.mxu1 %vm395_vm1, %v337_v48  ;;  %10592 = vmatprep.mubr.msk.f32.mxu0 %vm395_vm1, %v12023_v49  ;;  %v1112_v48 = vld [vmem:[%s11890_s26 + $0x19] sm:$0xff] }
  0x7e   : > { %10089 = vmatmul.mubr.msk.f32.gmra.mrb[16].mxu1 %vm395_vm1, %v338_v50  ;;  %10593 = vmatmul.mubr.msk.f32.gmra.mrb[16].mxu0 %vm395_vm1, %v12033_v51  ;;  %v12189_v50 = vld [vmem:[%s11732_s19 + $0x2c] sm:$0xff] }
  0x7f   : > { %10091 = vmatprep.mubr.msk.f32.mxu1 %vm395_vm1, %v339_v52  ;;  %10595 = vmatprep.mubr.msk.f32.mxu0 %vm395_vm1, %v12037_v53  ;;  %v1113_v52 = vld [vmem:[%s11890_s26 + $0x21] sm:$0xff] }
  0x82   : > { %10092 = vmatmul.mubr.msk.f32.gmra.mrb[18].mxu1 %vm395_vm1, %v340_v54  ;;  %10596 = vmatmul.mubr.msk.f32.gmra.mrb[18].mxu0 %vm395_vm1, %v12047_v55  ;;  %v12196_v54 = vld [vmem:[%s11732_s19 + $0x34] sm:$0xff] }
  0x83   : > { %10094 = vmatprep.mubr.msk.f32.mxu1 %vm395_vm1, %v341_v56  ;;  %10598 = vmatprep.mubr.msk.f32.mxu0 %vm395_vm1, %v12051_v57  ;;  %v1115_v56 = vld [vmem:[%s11890_s26 + $0x31] sm:$0xff] }
  0x86   : > { %10095 = vmatmul.mubr.msk.f32.gmra.mrb[20].mxu1 %vm395_vm1, %v342_v58  ;;  %10599 = vmatmul.mubr.msk.f32.gmra.mrb[20].mxu0 %vm395_vm1, %v12061_v59  ;;  %v12214_v58 = vld [vmem:[%s11732_s19 + $0x44] sm:$0xff] }
  0x87   : > { %10097 = vmatprep.mubr.msk.f32.mxu1 %vm395_vm1, %v343_v60  ;;  %10601 = vmatprep.mubr.msk.f32.mxu0 %vm395_vm1, %v12065_v61  ;;  %v1116_v60 = vld [vmem:[%s11890_s26 + $0x39] sm:$0xff] }
  0x8a   : > { %10098 = vmatmul.mubr.msk.f32.gmra.mrb[22].mxu1 %vm395_vm1, %v344_v62  ;;  %10602 = vmatmul.mubr.msk.f32.gmra.mrb[22].mxu0 %vm395_vm1, %v12075_v63  ;;  %v12224_v62 = vld [vmem:[%s11732_s19 + $0x4c] sm:$0xff] }
  0x8b   : > { %10100 = vmatprep.mubr.msk.f32.mxu1 %vm395_vm1, %v345_v0  ;;  %10604 = vmatprep.mubr.msk.f32.mxu0 %vm395_vm1, %v12079_v1  ;;  %v1117_v0 = vld [vmem:[%s11890_s26 + $0x41] sm:$0xff] }
  0x8e   : > { %10101 = vmatmul.mubr.msk.f32.gmra.mrb[24].mxu1 %vm395_vm1, %v346_v2  ;;  %10605 = vmatmul.mubr.msk.f32.gmra.mrb[24].mxu0 %vm395_vm1, %v12089_v3  ;;  %v12228_v2 = vld [vmem:[%s11732_s19 + $0x54] sm:$0xff] }
  0x8f   : > { %10103 = vmatprep.mubr.msk.f32.mxu1 %vm395_vm1, %v347_v4  ;;  %10607 = vmatprep.mubr.msk.f32.mxu0 %vm395_vm1, %v12093_v5  ;;  %v1118_v4 = vld [vmem:[%s11890_s26 + $0x49] sm:$0xff] }
  0x92   : > { %10104 = vmatmul.mubr.msk.f32.gmra.mrb[26].mxu1 %vm395_vm1, %v348_v6  ;;  %10608 = vmatmul.mubr.msk.f32.gmra.mrb[26].mxu0 %vm395_vm1, %v12103_v7  ;;  %v12238_v6 = vld [vmem:[%s11732_s19 + $0x5c] sm:$0xff] }
  0x93   : > { %10106 = vmatprep.mubr.msk.f32.mxu1 %vm395_vm1, %v349_v8  ;;  %10610 = vmatprep.mubr.msk.f32.mxu0 %vm395_vm1, %v12107_v9  ;;  %v1119_v8 = vld [vmem:[%s11890_s26 + $0x51] sm:$0xff] }
  0x96   : > { %10107 = vmatmul.mubr.msk.f32.gmra.mrb[28].mxu1 %vm395_vm1, %v350_v12  ;;  %10611 = vmatmul.mubr.msk.f32.gmra.mrb[28].mxu0 %vm395_vm1, %v12117_v13  ;;  %v12242_v12 = vld [vmem:[%s11732_s19 + $0x64] sm:$0xff] }
  0x97   : > { %10109 = vmatprep.mubr.msk.f32.mxu1 %vm395_vm1, %v351_v14  ;;  %10613 = vmatprep.mubr.msk.f32.mxu0 %vm395_vm1, %v12121_v15  ;;  %v1120_v14 = vld [vmem:[%s11890_s26 + $0x59] sm:$0xff] }
  0x9a   : > { %10110 = vmatmul.mubr.msk.f32.gmra.mrb[30].mxu1 %vm395_vm1, %v352_v16  ;;  %10614 = vmatmul.mubr.msk.f32.gmra.mrb[30].mxu0 %vm395_vm1, %v12131_v17  ;;  %v12252_v16 = vld [vmem:[%s11732_s19 + $0x6c] sm:$0xff] }
  0x9b   : > { %10112 = vmatprep.mubr.msk.f32.mxu1 %vm395_vm1, %v353_v18  ;;  %10616 = vmatprep.mubr.msk.f32.mxu0 %vm395_vm1, %v12135_v19  ;;  %v1121_v18 = vld [vmem:[%s11890_s26 + $0x61] sm:$0xff] }
  0x9e   : > { %10113 = vmatmul.mubr.msk.f32.gmra.mrb[32].mxu1 %vm395_vm1, %v354_v20  ;;  %10617 = vmatmul.mubr.msk.f32.gmra.mrb[32].mxu0 %vm395_vm1, %v12145_v24  ;;  %v12256_v20 = vld [vmem:[%s11732_s19 + $0x74] sm:$0xff] }
  0x9f   : > { %10115 = vmatprep.mubr.msk.f32.mxu1 %vm395_vm1, %v355_v26  ;;  %10619 = vmatprep.mubr.msk.f32.mxu0 %vm395_vm1, %v12149_v10  ;;  %v1122_v26 = vld [vmem:[%s11890_s26 + $0x69] sm:$0xff] }
  0xa2   : > { %10116 = vmatmul.mubr.msk.f32.gmra.mrb[34].mxu1 %vm395_vm1, %v356_v28  ;;  %10620 = vmatmul.mubr.msk.f32.gmra.mrb[34].mxu0 %vm395_vm1, %v4584_v30  ;;  %v12266_v28 = vld [vmem:[%s11732_s19 + $0x7c] sm:$0xff]  ;;  %v1123_v30 = vld [vmem:[%s11890_s26 + $0x71] sm:$0xff] }
  0xa3   : > { %10120 = vmatprep.mubr.msk.f32.mxu1 %vm395_vm1, %v1109_v32  ;;  %10624 = vmatprep.mubr.msk.f32.mxu0 %vm395_vm1, %v4979_v34  ;;  %v12270_v32 = vld [vmem:[%s11732_s19 + $0x84] sm:$0xff]  ;;  %v1124_v34 = vld [vmem:[%s11890_s26 + $0x79] sm:$0xff] }
  0xa6   : > { %10121 = vmatmul.mubr.msk.f32.vlgmr.msra.gmra.mrb[0].mxu1 %vm395_vm1, %v1110_v36  ;;  %10625 = vmatmul.mubr.msk.f32.vlgmr.msra.gmra.mrb[0].mxu0 %vm395_vm1, %v4980_v38  ;;  %v12280_v36 = vld [vmem:[%s11732_s19 + $0x8c] sm:$0xff]  ;;  %v1125_v38 = vld [vmem:[%s11890_s26 + $0x81] sm:$0xff] }
  0xa7   : > { %10175 = vmatpush3.msk.msra.mxu1 %vm504_vm0, %v11915_v22  ;;  %10679 = vmatpush3.msk.msra.mxu0 %vm504_vm0, %v11920_v23  ;;  %v1114_v22 = vld [vmem:[%s11890_s26 + $0x29] sm:$0xff]  ;;  %v12210_v23 = vld [vmem:[%s11732_s19 + $0x3c] sm:$0xff] }
  0xa8   : > { %10123 = vmatprep.mubr.msk.f32.mxu1 %vm395_vm1, %v1111_v40  ;;  %10627 = vmatprep.mubr.msk.f32.mxu0 %vm395_vm1, %v12169_v42  ;;  %v12284_v40 = vld [vmem:[%s11732_s19 + $0x94] sm:$0xff] }
  0xa9   : > { %10230 = vmatprep.subr.msk.mxu1 %vm504_vm0, %v12176_v44  ;;  %10734 = vmatprep.subr.msk.mxu0 %vm504_vm0, %v12181_v46 }
  0xaa   : > { %10124 = vmatmul.mubr.msk.f32.gmra.mrb[2].mxu1 %vm395_vm1, %v1112_v48  ;;  %10628 = vmatmul.mubr.msk.f32.gmra.mrb[2].mxu0 %vm395_vm1, %v12189_v50  ;;  %v1126_v48 = vld [vmem:[%s11890_s26 + $0x89] sm:$0xff] }
  0xab   : > { %10126 = vmatprep.mubr.msk.f32.mxu1 %vm395_vm1, %v1113_v52  ;;  %10630 = vmatprep.mubr.msk.f32.mxu0 %vm395_vm1, %v12196_v54  ;;  %v12294_v52 = vld [vmem:[%s11732_s19 + $0x9c] sm:$0xff] }
  0xae   : > { %10127 = vmatmul.mubr.msk.f32.gmra.mrb[4].mxu1 %vm395_vm1, %v1114_v22  ;;  %10631 = vmatmul.mubr.msk.f32.gmra.mrb[4].mxu0 %vm395_vm1, %v12210_v23  ;;  %v1127_v22 = vld [vmem:[%s11890_s26 + $0x91] sm:$0xff] }
  0xaf   : > { %10129 = vmatprep.mubr.msk.f32.mxu1 %vm395_vm1, %v1115_v56  ;;  %10633 = vmatprep.mubr.msk.f32.mxu0 %vm395_vm1, %v12214_v58  ;;  %v12298_v56 = vld [vmem:[%s11732_s19 + $0xa4] sm:$0xff] }
  0xb2   : > { %10130 = vmatmul.mubr.msk.f32.gmra.mrb[6].mxu1 %vm395_vm1, %v1116_v60  ;;  %10634 = vmatmul.mubr.msk.f32.gmra.mrb[6].mxu0 %vm395_vm1, %v12224_v62  ;;  %v1128_v60 = vld [vmem:[%s11890_s26 + $0x99] sm:$0xff] }
  0xb3   : > { %10132 = vmatprep.mubr.msk.f32.mxu1 %vm395_vm1, %v1117_v0  ;;  %10636 = vmatprep.mubr.msk.f32.mxu0 %vm395_vm1, %v12228_v2  ;;  %v12308_v0 = vld [vmem:[%s11732_s19 + $0xac] sm:$0xff] }
  0xb6   : > { %10133 = vmatmul.mubr.msk.f32.gmra.mrb[8].mxu1 %vm395_vm1, %v1118_v4  ;;  %10637 = vmatmul.mubr.msk.f32.gmra.mrb[8].mxu0 %vm395_vm1, %v12238_v6  ;;  %v1129_v4 = vld [vmem:[%s11890_s26 + $0xa1] sm:$0xff] }
  0xb7   : > { %10135 = vmatprep.mubr.msk.f32.mxu1 %vm395_vm1, %v1119_v8  ;;  %10639 = vmatprep.mubr.msk.f32.mxu0 %vm395_vm1, %v12242_v12  ;;  %v12312_v8 = vld [vmem:[%s11732_s19 + $0xb4] sm:$0xff] }
  0xba   : > { %10136 = vmatmul.mubr.msk.f32.gmra.mrb[10].mxu1 %vm395_vm1, %v1120_v14  ;;  %10640 = vmatmul.mubr.msk.f32.gmra.mrb[10].mxu0 %vm395_vm1, %v12252_v16  ;;  %v1130_v14 = vld [vmem:[%s11890_s26 + $0xa9] sm:$0xff] }
  0xbb   : > { %10138 = vmatprep.mubr.msk.f32.mxu1 %vm395_vm1, %v1121_v18  ;;  %10642 = vmatprep.mubr.msk.f32.mxu0 %vm395_vm1, %v12256_v20  ;;  %v12322_v18 = vld [vmem:[%s11732_s19 + $0xbc] sm:$0xff] }
  0xbe   : > { %10139 = vmatmul.mubr.msk.f32.gmra.mrb[12].mxu1 %vm395_vm1, %v1122_v26  ;;  %10643 = vmatmul.mubr.msk.f32.gmra.mrb[12].mxu0 %vm395_vm1, %v12266_v28  ;;  %v1131_v26 = vld [vmem:[%s11890_s26 + $0xb1] sm:$0xff] }
  0xbf   : > { %10141 = vmatprep.mubr.msk.f32.mxu1 %vm395_vm1, %v1123_v30  ;;  %10645 = vmatprep.mubr.msk.f32.mxu0 %vm395_vm1, %v12270_v32  ;;  %v12326_v30 = vld [vmem:[%s11732_s19 + $0xc4] sm:$0xff] }
  0xc2   : > { %10142 = vmatmul.mubr.msk.f32.gmra.mrb[14].mxu1 %vm395_vm1, %v1124_v34  ;;  %10646 = vmatmul.mubr.msk.f32.gmra.mrb[14].mxu0 %vm395_vm1, %v12280_v36  ;;  %v1132_v34 = vld [vmem:[%s11890_s26 + $0xb9] sm:$0xff] }
  0xc3   : > { %10144 = vmatprep.mubr.msk.f32.mxu1 %vm395_vm1, %v1125_v38  ;;  %10648 = vmatprep.mubr.msk.f32.mxu0 %vm395_vm1, %v12284_v40  ;;  %v12336_v38 = vld [vmem:[%s11732_s19 + $0xcc] sm:$0xff] }
  0xc4   : > { %14313 = vst [vmem:[#allocation2_spill] sm:$0xff] %v12336_v38 }
  0xc6   : > { %10145 = vmatmul.mubr.msk.f32.gmra.mrb[16].mxu1 %vm395_vm1, %v1126_v48  ;;  %10649 = vmatmul.mubr.msk.f32.gmra.mrb[16].mxu0 %vm395_vm1, %v12294_v52  ;;  %v1133_v48 = vld [vmem:[%s11890_s26 + $0xc1] sm:$0xff] }
  0xc7   : > { %10147 = vmatprep.mubr.msk.f32.mxu1 %vm395_vm1, %v1127_v22  ;;  %10651 = vmatprep.mubr.msk.f32.mxu0 %vm395_vm1, %v12298_v56  ;;  %v12340_v22 = vld [vmem:[%s11732_s19 + $0xd4] sm:$0xff] }
  0xc8   : > { %14314 = vst [vmem:[#allocation3_spill] sm:$0xff] %v12340_v22 }
  0xca   : > { %10148 = vmatmul.mubr.msk.f32.gmra.mrb[18].mxu1 %vm395_vm1, %v1128_v60  ;;  %10652 = vmatmul.mubr.msk.f32.gmra.mrb[18].mxu0 %vm395_vm1, %v12308_v0  ;;  %v1134_v60 = vld [vmem:[%s11890_s26 + $0xc9] sm:$0xff] }
  0xcb   : > { %10150 = vmatprep.mubr.msk.f32.mxu1 %vm395_vm1, %v1129_v4  ;;  %10654 = vmatprep.mubr.msk.f32.mxu0 %vm395_vm1, %v12312_v8  ;;  %v12350_v4 = vld [vmem:[%s11732_s19 + $0xdc] sm:$0xff] }
  0xcc   : > { %14315 = vst [vmem:[#allocation4_spill] sm:$0xff] %v12350_v4 }
  0xce   : > { %10151 = vmatmul.mubr.msk.f32.gmra.mrb[20].mxu1 %vm395_vm1, %v1130_v14  ;;  %10655 = vmatmul.mubr.msk.f32.gmra.mrb[20].mxu0 %vm395_vm1, %v12322_v18  ;;  %v1135_v14 = vld [vmem:[%s11890_s26 + $0xd1] sm:$0xff] }
  0xcf   : > { %10153 = vmatprep.mubr.msk.f32.mxu1 %vm395_vm1, %v1131_v26  ;;  %10657 = vmatprep.mubr.msk.f32.mxu0 %vm395_vm1, %v12326_v30  ;;  %v12354_v26 = vld [vmem:[%s11732_s19 + $0xe4] sm:$0xff] }
  0xd0   : > { %14316 = vst [vmem:[#allocation5_spill] sm:$0xff] %v12354_v26 }
  0xd2   : > { %10154 = vmatmul.mubr.msk.f32.gmra.mrb[22].mxu1 %vm395_vm1, %v1132_v34  ;;  %10658 = vmatmul.mubr.msk.f32.gmra.mrb[22].mxu0 %vm395_vm1, %v12336_v38  ;;  %v1136_v34 = vld [vmem:[%s11890_s26 + $0xd9] sm:$0xff] }
  0xd3   : > { %10156 = vmatprep.mubr.msk.f32.mxu1 %vm395_vm1, %v1133_v48  ;;  %10660 = vmatprep.mubr.msk.f32.mxu0 %vm395_vm1, %v12340_v22  ;;  %v12364_v48 = vld [vmem:[%s11732_s19 + $0xec] sm:$0xff]  ;;  %v1137_v22 = vld [vmem:[%s11890_s26 + $0xe1] sm:$0xff]  ;;  %v12368_v38 = vld [vmem:[%s11732_s19 + $0xf4] sm:$0xff] }
  0xd4   : > { %14317 = vst [vmem:[#allocation6_spill] sm:$0xff] %v12364_v48  ;;  %14318 = vst [vmem:[#allocation7_spill] sm:$0xff] %v12368_v38 }
  0xd6   : > { %10157 = vmatmul.mubr.msk.f32.gmra.mrb[24].mxu1 %vm395_vm1, %v1134_v60  ;;  %10661 = vmatmul.mubr.msk.f32.gmra.mrb[24].mxu0 %vm395_vm1, %v12350_v4  ;;  %v1138_v60 = vld [vmem:[%s11890_s26 + $0xe9] sm:$0xff] }
  0xd7   : > { %10159 = vmatprep.mubr.msk.f32.mxu1 %vm395_vm1, %v1135_v14  ;;  %10663 = vmatprep.mubr.msk.f32.mxu0 %vm395_vm1, %v12354_v26  ;;  %v12378_v14 = vld [vmem:[%s11732_s19 + $0xfc] sm:$0xff]  ;;  %v1139_v26 = vld [vmem:[%s11890_s26 + $0xf1] sm:$0xff]  ;;  %v12382_v4 = vld [vmem:[%s11732_s19 + $0x104] sm:$0xff] }
  0xd8   : > { %14319 = vst [vmem:[#allocation8_spill] sm:$0xff] %v12378_v14  ;;  %14320 = vst [vmem:[#allocation9_spill] sm:$0xff] %v12382_v4 }
  0xda   : > { %10160 = vmatmul.mubr.msk.f32.gmra.mrb[26].mxu1 %vm395_vm1, %v1136_v34  ;;  %10664 = vmatmul.mubr.msk.f32.gmra.mrb[26].mxu0 %vm395_vm1, %v12364_v48  ;;  %v12392_v34 = vld [vmem:[%s11732_s19 + $0x10c] sm:$0xff]  ;;  %v12396_v48 = vld [vmem:[%s11732_s19 + $0x114] sm:$0xff] }
  0xdb   : > { %10162 = vmatprep.mubr.msk.f32.mxu1 %vm395_vm1, %v1137_v22  ;;  %10666 = vmatprep.mubr.msk.f32.mxu0 %vm395_vm1, %v12368_v38  ;;  %v1140_v22 = vld [vmem:[%s11890_s26 + $0xf9] sm:$0xff]  ;;  %v1141_v38 = vld [vmem:[%s11890_s26 + $0x101] sm:$0xff]  ;;  %14321 = vst [vmem:[#allocation10_spill] sm:$0xff] %v12396_v48 }
  0xde   : > { %10163 = vmatmul.mubr.msk.f32.gmra.mrb[28].mxu1 %vm395_vm1, %v1138_v60  ;;  %10667 = vmatmul.mubr.msk.f32.gmra.mrb[28].mxu0 %vm395_vm1, %v12378_v14  ;;  %v12406_v60 = vld [vmem:[%s11732_s19 + $0x11c] sm:$0xff]  ;;  %v12410_v14 = vld [vmem:[%s11732_s19 + $0x124] sm:$0xff] }
  0xdf   : > { %10165 = vmatprep.mubr.msk.f32.mxu1 %vm395_vm1, %v1139_v26  ;;  %10669 = vmatprep.mubr.msk.f32.mxu0 %vm395_vm1, %v12382_v4  ;;  %v1142_v26 = vld [vmem:[%s11890_s26 + $0x109] sm:$0xff]  ;;  %14322 = vst [vmem:[#allocation11_spill] sm:$0xff] %v12406_v60  ;;  %v1143_v4 = vld [vmem:[%s11890_s26 + $0x111] sm:$0xff] }
  0xe2   : > { %10166 = vmatmul.mubr.msk.f32.gmra.mrb[30].mxu1 %vm395_vm1, %v1140_v22  ;;  %10670 = vmatmul.mubr.msk.f32.gmra.mrb[30].mxu0 %vm395_vm1, %v12392_v34  ;;  %v5014_v22 = vld [vmem:[%s11732_s19 + $0x12c] sm:$0x3f] }
  0xe3   : > { %10168 = vmatprep.mubr.msk.f32.mxu1 %vm395_vm1, %v1141_v38  ;;  %10672 = vmatprep.mubr.msk.f32.mxu0 %vm395_vm1, %v12396_v48  ;;  %v1144_v38 = vld [vmem:[%s11890_s26 + $0x119] sm:$0x3f]  ;;  %v1539_v48 = vld [vmem:[%s11732_s19 + $0x1] sm:$0xff] }
  0xe6   : > { %10169 = vmatmul.mubr.msk.f32.gmra.mrb[32].mxu1 %vm395_vm1, %v1142_v26  ;;  %10673 = vmatmul.mubr.msk.f32.gmra.mrb[32].mxu0 %vm395_vm1, %v12406_v60  ;;  %v1540_v26 = vld [vmem:[%s11732_s19 + $0x9] sm:$0xff]  ;;  %v1541_v60 = vld [vmem:[%s11732_s19 + $0x11] sm:$0xff] }
  0xe7   : > { %10171 = vmatprep.mubr.msk.f32.mxu1 %vm395_vm1, %v1143_v4  ;;  %10675 = vmatprep.mubr.msk.f32.mxu0 %vm395_vm1, %v12410_v14  ;;  %v12434_v4 = vld [vmem:[%s14253_s3 + $0x8] sm:$0xf] }
  0xea   : > { %10172 = vmatmul.mubr.msk.f32.gmra.mrb[34].mxu1 %vm395_vm1, %v1144_v38  ;;  %10676 = vmatmul.mubr.msk.f32.gmra.mrb[34].mxu0 %vm395_vm1, %v5014_v22  ;;  %v5444_v38 = vld [vmem:[%s11890_s26 + $0x13c] sm:$0x3f]  ;;  %v1969_v22 = vld [vmem:[%s11890_s26 + $0x2] sm:$0xff] }
  0xeb   : > { %10176 = vmatprep.mubr.msk.f32.mxu1 %vm395_vm1, %v1539_v48  ;;  %10680 = vmatprep.mubr.msk.f32.mxu0 %vm395_vm1, %v11908_v21  ;;  %v12439_v48 = vld [vmem:[%s14252_s2 + $0x1c] sm:$0xf] }
  0xec   : > { %v1542_v21 = vld [vmem:[%s11732_s19 + $0x19] sm:$0xff] }
  0xee   : > { %10177 = vmatmul.mubr.msk.f32.vlgmr.msra.gmra.mrb[0].mxu1 %vm395_vm1, %v1540_v26  ;;  %10681 = vmatmul.mubr.msk.f32.vlgmr.msra.gmra.mrb[0].mxu0 %vm395_vm1, %v11928_v25  ;;  %v1543_v25 = vld [vmem:[%s11732_s19 + $0x21] sm:$0xff]  ;;  %v12590_v26 = vld [vmem:[%s11890_s26 + $0x12] sm:$0xff] }
  0xef   : > { %10231 = vmatpush3.msk.msra.mxu1 %vm504_vm0, %v12176_v44  ;;  %10735 = vmatpush3.msk.msra.mxu0 %vm504_vm0, %v12181_v46  ;;  %v1545_v44 = vld [vmem:[%s11732_s19 + $0x31] sm:$0xff]  ;;  %v1547_v46 = vld [vmem:[%s11732_s19 + $0x41] sm:$0xff] }
  0xf0   : > { %10179 = vmatprep.mubr.msk.f32.mxu1 %vm395_vm1, %v1541_v60  ;;  %10683 = vmatprep.mubr.msk.f32.mxu0 %vm395_vm1, %v11935_v27  ;;  %v1544_v27 = vld [vmem:[%s11732_s19 + $0x29] sm:$0xff]  ;;  %v1573_v60 = vld [vmem:[%s11732_s19 + $0x111] sm:$0xff] }
  0xf1   : > { %10286 = vmatprep.subr.msk.mxu1 %vm504_vm0, %v12434_v4  ;;  %10790 = vmatprep.subr.msk.mxu0 %vm504_vm0, %v12439_v48 }
  0xf2   : > { %10180 = vmatmul.mubr.msk.f32.gmra.mrb[2].mxu1 %vm395_vm1, %v1542_v21  ;;  %10684 = vmatmul.mubr.msk.f32.gmra.mrb[2].mxu0 %vm395_vm1, %v11949_v11  ;;  %v1546_v11 = vld [vmem:[%s11732_s19 + $0x39] sm:$0xff]  ;;  %v12598_v21 = vld [vmem:[%s14252_s2 + $0xc] sm:$0xf] }
  0xf3   : > { %10182 = vmatprep.mubr.msk.f32.mxu1 %vm395_vm1, %v1543_v25  ;;  %10686 = vmatprep.mubr.msk.f32.mxu0 %vm395_vm1, %v11953_v29  ;;  %v1548_v29 = vld [vmem:[%s11732_s19 + $0x49] sm:$0xff]  ;;  %v12603_v25 = vld [vmem:[%s14253_s3 + $0x1c] sm:$0xf] }
  0xf6   : > { %10183 = vmatmul.mubr.msk.f32.gmra.mrb[4].mxu1 %vm395_vm1, %v1544_v27  ;;  %10687 = vmatmul.mubr.msk.f32.gmra.mrb[4].mxu0 %vm395_vm1, %v11963_v31  ;;  %v1549_v31 = vld [vmem:[%s11732_s19 + $0x51] sm:$0xff]  ;;  %v12758_v27 = vld [vmem:[%s11890_s26 + $0xba] sm:$0xff] }
  0xf7   : > { %10185 = vmatprep.mubr.msk.f32.mxu1 %vm395_vm1, %v1545_v44  ;;  %10689 = vmatprep.mubr.msk.f32.mxu0 %vm395_vm1, %v11967_v33  ;;  %v1550_v33 = vld [vmem:[%s11732_s19 + $0x59] sm:$0xff]  ;;  %v14325_v44 = vld [vmem:[#allocation4_spill] sm:$0xff] }
  0xfa   : > { %10186 = vmatmul.mubr.msk.f32.gmra.mrb[6].mxu1 %vm395_vm1, %v1546_v11  ;;  %10690 = vmatmul.mubr.msk.f32.gmra.mrb[6].mxu0 %vm395_vm1, %v11977_v35  ;;  %v1551_v35 = vld [vmem:[%s11732_s19 + $0x61] sm:$0xff]  ;;  %v14326_v11 = vld [vmem:[#allocation5_spill] sm:$0xff] }
  0xfb   : > { %10188 = vmatprep.mubr.msk.f32.mxu1 %vm395_vm1, %v1547_v46  ;;  %10692 = vmatprep.mubr.msk.f32.mxu0 %vm395_vm1, %v11981_v37  ;;  %v1552_v37 = vld [vmem:[%s11732_s19 + $0x69] sm:$0xff] }
  0xfc   : > { %v12772_v46 = vld [vmem:[%s11890_s26 + $0xca] sm:$0xff] }
  0xfe   : > { %10189 = vmatmul.mubr.msk.f32.gmra.mrb[8].mxu1 %vm395_vm1, %v1548_v29  ;;  %10693 = vmatmul.mubr.msk.f32.gmra.mrb[8].mxu0 %vm395_vm1, %v11991_v39  ;;  %v1553_v39 = vld [vmem:[%s11732_s19 + $0x71] sm:$0xff] }
  0xff   : > { %10191 = vmatprep.mubr.msk.f32.mxu1 %vm395_vm1, %v1549_v31  ;;  %10695 = vmatprep.mubr.msk.f32.mxu0 %vm395_vm1, %v11995_v41  ;;  %v1554_v41 = vld [vmem:[%s11732_s19 + $0x79] sm:$0xff] }
 0x100   : > { %v12775_v29 = vld [vmem:[%s11890_s26 + $0xd2] sm:$0xff]  ;;  %v14327_v31 = vld [vmem:[#allocation6_spill] sm:$0xff] }
 0x102   : > { %10192 = vmatmul.mubr.msk.f32.gmra.mrb[10].mxu1 %vm395_vm1, %v1550_v33  ;;  %10696 = vmatmul.mubr.msk.f32.gmra.mrb[10].mxu0 %vm395_vm1, %v12005_v43  ;;  %v1555_v43 = vld [vmem:[%s11732_s19 + $0x81] sm:$0xff] }
 0x103   : > { %10194 = vmatprep.mubr.msk.f32.mxu1 %vm395_vm1, %v1551_v35  ;;  %10698 = vmatprep.mubr.msk.f32.mxu0 %vm395_vm1, %v12009_v45  ;;  %v1556_v45 = vld [vmem:[%s11732_s19 + $0x89] sm:$0xff]  ;;  %v12786_v35 = vld [vmem:[%s11890_s26 + $0xda] sm:$0xff] }
 0x104   : > { %v14328_v33 = vld [vmem:[#allocation7_spill] sm:$0xff] }
 0x106   : > { %10195 = vmatmul.mubr.msk.f32.gmra.mrb[12].mxu1 %vm395_vm1, %v1552_v37  ;;  %10699 = vmatmul.mubr.msk.f32.gmra.mrb[12].mxu0 %vm395_vm1, %v12019_v47  ;;  %v1557_v47 = vld [vmem:[%s11732_s19 + $0x91] sm:$0xff]  ;;  %v12789_v37 = vld [vmem:[%s11890_s26 + $0xe2] sm:$0xff] }
 0x107   : > { %10197 = vmatprep.mubr.msk.f32.mxu1 %vm395_vm1, %v1553_v39  ;;  %10701 = vmatprep.mubr.msk.f32.mxu0 %vm395_vm1, %v12023_v49  ;;  %v1558_v49 = vld [vmem:[%s11732_s19 + $0x99] sm:$0xff]  ;;  %v14329_v39 = vld [vmem:[#allocation8_spill] sm:$0xff] }
 0x10a   : > { %10198 = vmatmul.mubr.msk.f32.gmra.mrb[14].mxu1 %vm395_vm1, %v1554_v41  ;;  %10702 = vmatmul.mubr.msk.f32.gmra.mrb[14].mxu0 %vm395_vm1, %v12033_v51  ;;  %v1559_v51 = vld [vmem:[%s11732_s19 + $0xa1] sm:$0xff]  ;;  %v14330_v41 = vld [vmem:[#allocation9_spill] sm:$0xff] }
 0x10b   : > { %10200 = vmatprep.mubr.msk.f32.mxu1 %vm395_vm1, %v1555_v43  ;;  %10704 = vmatprep.mubr.msk.f32.mxu0 %vm395_vm1, %v12037_v53  ;;  %v1560_v53 = vld [vmem:[%s11732_s19 + $0xa9] sm:$0xff] }
 0x10c   : > { %v12800_v43 = vld [vmem:[%s11890_s26 + $0xea] sm:$0xff] }
 0x10e   : > { %10201 = vmatmul.mubr.msk.f32.gmra.mrb[16].mxu1 %vm395_vm1, %v1556_v45  ;;  %10705 = vmatmul.mubr.msk.f32.gmra.mrb[16].mxu0 %vm395_vm1, %v12047_v55  ;;  %v1561_v55 = vld [vmem:[%s11732_s19 + $0xb1] sm:$0xff] }
 0x10f   : > { %10203 = vmatprep.mubr.msk.f32.mxu1 %vm395_vm1, %v1557_v47  ;;  %10707 = vmatprep.mubr.msk.f32.mxu0 %vm395_vm1, %v12051_v57  ;;  %v1562_v57 = vld [vmem:[%s11732_s19 + $0xb9] sm:$0xff] }
 0x110   : > { %v12803_v45 = vld [vmem:[%s11890_s26 + $0xf2] sm:$0xff]  ;;  %v14331_v47 = vld [vmem:[#allocation10_spill] sm:$0xff] }
 0x112   : > { %10204 = vmatmul.mubr.msk.f32.gmra.mrb[18].mxu1 %vm395_vm1, %v1558_v49  ;;  %10708 = vmatmul.mubr.msk.f32.gmra.mrb[18].mxu0 %vm395_vm1, %v12061_v59  ;;  %v1563_v59 = vld [vmem:[%s11732_s19 + $0xc1] sm:$0xff] }
 0x113   : > { %10206 = vmatprep.mubr.msk.f32.mxu1 %vm395_vm1, %v1559_v51  ;;  %10710 = vmatprep.mubr.msk.f32.mxu0 %vm395_vm1, %v12065_v61  ;;  %v1564_v61 = vld [vmem:[%s11732_s19 + $0xc9] sm:$0xff]  ;;  %v12814_v49 = vld [vmem:[%s11890_s26 + $0xfa] sm:$0xff] }
 0x114   : > { %v12817_v51 = vld [vmem:[%s11890_s26 + $0x102] sm:$0xff] }
 0x116   : > { %10207 = vmatmul.mubr.msk.f32.gmra.mrb[20].mxu1 %vm395_vm1, %v1560_v53  ;;  %10711 = vmatmul.mubr.msk.f32.gmra.mrb[20].mxu0 %vm395_vm1, %v12075_v63  ;;  %v1565_v63 = vld [vmem:[%s11732_s19 + $0xd1] sm:$0xff]  ;;  %v14332_v53 = vld [vmem:[#allocation11_spill] sm:$0xff] }
 0x117   : > { %10209 = vmatprep.mubr.msk.f32.mxu1 %vm395_vm1, %v1561_v55  ;;  %10713 = vmatprep.mubr.msk.f32.mxu0 %vm395_vm1, %v12079_v1  ;;  %v1566_v1 = vld [vmem:[%s11732_s19 + $0xd9] sm:$0xff]  ;;  %v5872_v55 = vld [vmem:[%s11732_s19 + $0x12c] sm:$0xff] }
 0x11a   : > { %10210 = vmatmul.mubr.msk.f32.gmra.mrb[22].mxu1 %vm395_vm1, %v1562_v57  ;;  %10714 = vmatmul.mubr.msk.f32.gmra.mrb[22].mxu0 %vm395_vm1, %v12089_v3  ;;  %v1567_v3 = vld [vmem:[%s11732_s19 + $0xe1] sm:$0xff]  ;;  %v12832_v57 = vld [vmem:[%s11890_s26 + $0x112] sm:$0xff] }
 0x11b   : > { %10212 = vmatprep.mubr.msk.f32.mxu1 %vm395_vm1, %v1563_v59  ;;  %10716 = vmatprep.mubr.msk.f32.mxu0 %vm395_vm1, %v12093_v5  ;;  %v1568_v5 = vld [vmem:[%s11732_s19 + $0xe9] sm:$0xff]  ;;  %v5873_v59 = vld [vmem:[%s11732_s19 + $0x134] sm:$0xff] }
 0x11e   : > { %10213 = vmatmul.mubr.msk.f32.gmra.mrb[24].mxu1 %vm395_vm1, %v1564_v61  ;;  %10717 = vmatmul.mubr.msk.f32.gmra.mrb[24].mxu0 %vm395_vm1, %v12103_v7  ;;  %v1569_v7 = vld [vmem:[%s11732_s19 + $0xf1] sm:$0xff]  ;;  %v5874_v61 = vld [vmem:[%s11732_s19 + $0x13c] sm:$0x3f] }
 0x11f   : > { %10215 = vmatprep.mubr.msk.f32.mxu1 %vm395_vm1, %v1565_v63  ;;  %10719 = vmatprep.mubr.msk.f32.mxu0 %vm395_vm1, %v12107_v9  ;;  %v1570_v9 = vld [vmem:[%s11732_s19 + $0xf9] sm:$0xff]  ;;  %v2399_v63 = vld [vmem:[%s11732_s19 + $0x2] sm:$0xff] }
 0x122   : > { %10216 = vmatmul.mubr.msk.f32.gmra.mrb[26].mxu1 %vm395_vm1, %v1566_v1  ;;  %10720 = vmatmul.mubr.msk.f32.gmra.mrb[26].mxu0 %vm395_vm1, %v12117_v13  ;;  %v1571_v13 = vld [vmem:[%s11732_s19 + $0x101] sm:$0xff] }
 0x123   : > { %10218 = vmatprep.mubr.msk.f32.mxu1 %vm395_vm1, %v1567_v3  ;;  %10722 = vmatprep.mubr.msk.f32.mxu0 %vm395_vm1, %v12121_v15  ;;  %v1572_v15 = vld [vmem:[%s11732_s19 + $0x109] sm:$0xff] }
 0x124   : > { %v6269_v1 = vld [vmem:[%s11890_s26 + $0x25] sm:$0xff] }
 0x125   : > { %v2400_v3 = vld [vmem:[%s11732_s19 + $0xa] sm:$0xff] }
 0x126   : > { %10219 = vmatmul.mubr.msk.f32.gmra.mrb[28].mxu1 %vm395_vm1, %v1568_v5  ;;  %10723 = vmatmul.mubr.msk.f32.gmra.mrb[28].mxu0 %vm395_vm1, %v12131_v17  ;;  %v5442_v17 = vld [vmem:[%s11890_s26 + $0x12c] sm:$0xff] }
 0x127   : > { %10221 = vmatprep.mubr.msk.f32.mxu1 %vm395_vm1, %v1569_v7  ;;  %10725 = vmatprep.mubr.msk.f32.mxu0 %vm395_vm1, %v12135_v19  ;;  %v5443_v19 = vld [vmem:[%s11890_s26 + $0x134] sm:$0xff] }
 0x128   : > { %v6270_v5 = vld [vmem:[%s11890_s26 + $0x2d] sm:$0xff] }
 0x129   : > { %v12852_v7 = vld [vmem:[%s11732_s19 + $0x12] sm:$0xff] }
 0x12a   : > { %10222 = vmatmul.mubr.msk.f32.gmra.mrb[30].mxu1 %vm395_vm1, %v1570_v9  ;;  %10726 = vmatmul.mubr.msk.f32.gmra.mrb[30].mxu0 %vm395_vm1, %v12145_v24  ;;  %v1574_v24 = vld [vmem:[%s11732_s19 + $0x119] sm:$0x3f] }
 0x12b   : > { %10224 = vmatprep.mubr.msk.f32.mxu1 %vm395_vm1, %v1571_v13  ;;  %10728 = vmatprep.mubr.msk.f32.mxu0 %vm395_vm1, %v12149_v10  ;;  %v1970_v10 = vld [vmem:[%s11890_s26 + $0xa] sm:$0xff]  ;;  %v6271_v9 = vld [vmem:[%s11890_s26 + $0x35] sm:$0xff] }
 0x12c   : > { %v12860_v13 = vld [vmem:[%s14253_s3 + $0xc] sm:$0xf] }
 0x12e   : > { %10225 = vmatmul.mubr.msk.f32.gmra.mrb[32].mxu1 %vm395_vm1, %v1572_v15  ;;  %10729 = vmatmul.mubr.msk.f32.gmra.mrb[32].mxu0 %vm395_vm1, %v5442_v17  ;;  %v12865_v15 = vld [vmem:[%s14252_s2 + $0x20] sm:$0xf] }
 0x12f   : > { %10227 = vmatprep.mubr.msk.f32.mxu1 %vm395_vm1, %v1573_v60  ;;  %10731 = vmatprep.mubr.msk.f32.mxu0 %vm395_vm1, %v5443_v19  ;;  %v12872_v17 = vld [vmem:[%s11732_s19 + $0x1a] sm:$0xff]  ;;  %v12879_v19 = vld [vmem:[%s11732_s19 + $0x22] sm:$0xff] }
 0x130   : > { %v6272_v60 = vld [vmem:[%s11890_s26 + $0x3d] sm:$0xff] }
 0x132   : > { %10228 = vmatmul.mubr.msk.f32.gmra.mrb[34].mxu1 %vm395_vm1, %v1574_v24  ;;  %10732 = vmatmul.mubr.msk.f32.gmra.mrb[34].mxu0 %vm395_vm1, %v5444_v38  ;;  %v6273_v24 = vld [vmem:[%s11890_s26 + $0x45] sm:$0xff] }
 0x133   : > { %10232 = vmatprep.mubr.msk.f32.mxu1 %vm395_vm1, %v1969_v22  ;;  %10736 = vmatprep.mubr.msk.f32.mxu0 %vm395_vm1, %v12169_v42  ;;  %v12610_v42 = vld [vmem:[%s11890_s26 + $0x1a] sm:$0xff]  ;;  %v12893_v38 = vld [vmem:[%s11732_s19 + $0x2a] sm:$0xff] }
 0x134   : > { %v6274_v22 = vld [vmem:[%s11890_s26 + $0x4d] sm:$0xff] }
 0x136   : > { %10233 = vmatmul.mubr.msk.f32.vlgmr.msra.gmra.mrb[0].mxu1 %vm395_vm1, %v1970_v10  ;;  %10737 = vmatmul.mubr.msk.f32.vlgmr.msra.gmra.mrb[0].mxu0 %vm395_vm1, %v12189_v50  ;;  %v12617_v50 = vld [vmem:[%s11890_s26 + $0x22] sm:$0xff]  ;;  %v12897_v10 = vld [vmem:[%s11732_s19 + $0x32] sm:$0xff] }
 0x137   : > { %10287 = vmatpush3.msk.msra.mxu1 %vm504_vm0, %v12434_v4  ;;  %10791 = vmatpush3.msk.msra.mxu0 %vm504_vm0, %v12439_v48  ;;  %v12635_v4 = vld [vmem:[%s11890_s26 + $0x32] sm:$0xff]  ;;  %v14323_v48 = vld [vmem:[#allocation2_spill] sm:$0xff] }
 0x138   : > { %10235 = vmatprep.mubr.msk.f32.mxu1 %vm395_vm1, %v12590_v26  ;;  %10739 = vmatprep.mubr.msk.f32.mxu0 %vm395_vm1, %v12196_v54  ;;  %v12632_v54 = vld [vmem:[%s11890_s26 + $0x2a] sm:$0xff] }
 0x139   : > { %10342 = vmatprep.subr.msk.mxu1 %vm504_vm0, %v12598_v21  ;;  %10846 = vmatprep.subr.msk.mxu0 %vm504_vm0, %v12603_v25 }
 0x13a   : > { %10236 = vmatmul.mubr.msk.f32.gmra.mrb[2].mxu1 %vm395_vm1, %v12610_v42  ;;  %10740 = vmatmul.mubr.msk.f32.gmra.mrb[2].mxu0 %vm395_vm1, %v12210_v23  ;;  %v12646_v23 = vld [vmem:[%s11890_s26 + $0x3a] sm:$0xff] }
 0x13b   : > { %10238 = vmatprep.mubr.msk.f32.mxu1 %vm395_vm1, %v12617_v50  ;;  %10742 = vmatprep.mubr.msk.f32.mxu0 %vm395_vm1, %v12214_v58  ;;  %v12649_v58 = vld [vmem:[%s11890_s26 + $0x42] sm:$0xff] }
 0x13e   : > { %10239 = vmatmul.mubr.msk.f32.gmra.mrb[4].mxu1 %vm395_vm1, %v12632_v54  ;;  %10743 = vmatmul.mubr.msk.f32.gmra.mrb[4].mxu0 %vm395_vm1, %v12224_v62  ;;  %v12660_v62 = vld [vmem:[%s11890_s26 + $0x4a] sm:$0xff] }
 0x13f   : > { %10241 = vmatprep.mubr.msk.f32.mxu1 %vm395_vm1, %v12635_v4  ;;  %10745 = vmatprep.mubr.msk.f32.mxu0 %vm395_vm1, %v12228_v2  ;;  %v12663_v2 = vld [vmem:[%s11890_s26 + $0x52] sm:$0xff] }
 0x142   : > { %10242 = vmatmul.mubr.msk.f32.gmra.mrb[6].mxu1 %vm395_vm1, %v12646_v23  ;;  %10746 = vmatmul.mubr.msk.f32.gmra.mrb[6].mxu0 %vm395_vm1, %v12238_v6  ;;  %v12674_v6 = vld [vmem:[%s11890_s26 + $0x5a] sm:$0xff] }
 0x143   : > { %10244 = vmatprep.mubr.msk.f32.mxu1 %vm395_vm1, %v12649_v58  ;;  %10748 = vmatprep.mubr.msk.f32.mxu0 %vm395_vm1, %v12242_v12  ;;  %v12677_v12 = vld [vmem:[%s11890_s26 + $0x62] sm:$0xff] }
 0x146   : > { %10245 = vmatmul.mubr.msk.f32.gmra.mrb[8].mxu1 %vm395_vm1, %v12660_v62  ;;  %10749 = vmatmul.mubr.msk.f32.gmra.mrb[8].mxu0 %vm395_vm1, %v12252_v16  ;;  %v12688_v16 = vld [vmem:[%s11890_s26 + $0x6a] sm:$0xff] }
 0x147   : > { %10247 = vmatprep.mubr.msk.f32.mxu1 %vm395_vm1, %v12663_v2  ;;  %10751 = vmatprep.mubr.msk.f32.mxu0 %vm395_vm1, %v12256_v20  ;;  %v12691_v20 = vld [vmem:[%s11890_s26 + $0x72] sm:$0xff] }
 0x14a   : > { %10248 = vmatmul.mubr.msk.f32.gmra.mrb[10].mxu1 %vm395_vm1, %v12674_v6  ;;  %10752 = vmatmul.mubr.msk.f32.gmra.mrb[10].mxu0 %vm395_vm1, %v12266_v28  ;;  %v12702_v28 = vld [vmem:[%s11890_s26 + $0x7a] sm:$0xff] }
 0x14b   : > { %10250 = vmatprep.mubr.msk.f32.mxu1 %vm395_vm1, %v12677_v12  ;;  %10754 = vmatprep.mubr.msk.f32.mxu0 %vm395_vm1, %v12270_v32  ;;  %v12705_v32 = vld [vmem:[%s11890_s26 + $0x82] sm:$0xff] }
 0x14e   : > { %10251 = vmatmul.mubr.msk.f32.gmra.mrb[12].mxu1 %vm395_vm1, %v12688_v16  ;;  %10755 = vmatmul.mubr.msk.f32.gmra.mrb[12].mxu0 %vm395_vm1, %v12280_v36  ;;  %v12716_v36 = vld [vmem:[%s11890_s26 + $0x8a] sm:$0xff] }
 0x14f   : > { %10253 = vmatprep.mubr.msk.f32.mxu1 %vm395_vm1, %v12691_v20  ;;  %10757 = vmatprep.mubr.msk.f32.mxu0 %vm395_vm1, %v12284_v40  ;;  %v12719_v40 = vld [vmem:[%s11890_s26 + $0x92] sm:$0xff] }
 0x152   : > { %10254 = vmatmul.mubr.msk.f32.gmra.mrb[14].mxu1 %vm395_vm1, %v12702_v28  ;;  %10758 = vmatmul.mubr.msk.f32.gmra.mrb[14].mxu0 %vm395_vm1, %v12294_v52  ;;  %v12730_v52 = vld [vmem:[%s11890_s26 + $0x9a] sm:$0xff] }
 0x153   : > { %10256 = vmatprep.mubr.msk.f32.mxu1 %vm395_vm1, %v12705_v32  ;;  %10760 = vmatprep.mubr.msk.f32.mxu0 %vm395_vm1, %v12298_v56  ;;  %v12733_v56 = vld [vmem:[%s11890_s26 + $0xa2] sm:$0xff] }
 0x156   : > { %10257 = vmatmul.mubr.msk.f32.gmra.mrb[16].mxu1 %vm395_vm1, %v12716_v36  ;;  %10761 = vmatmul.mubr.msk.f32.gmra.mrb[16].mxu0 %vm395_vm1, %v12308_v0  ;;  %v12744_v0 = vld [vmem:[%s11890_s26 + $0xaa] sm:$0xff] }
 0x157   : > { %10259 = vmatprep.mubr.msk.f32.mxu1 %vm395_vm1, %v12719_v40  ;;  %10763 = vmatprep.mubr.msk.f32.mxu0 %vm395_vm1, %v12312_v8  ;;  %v12747_v8 = vld [vmem:[%s11890_s26 + $0xb2] sm:$0xff] }
 0x15a   : > { %10260 = vmatmul.mubr.msk.f32.gmra.mrb[18].mxu1 %vm395_vm1, %v12730_v52  ;;  %10764 = vmatmul.mubr.msk.f32.gmra.mrb[18].mxu0 %vm395_vm1, %v12322_v18  ;;  %v14324_v18 = vld [vmem:[#allocation3_spill] sm:$0xff] }
 0x15b   : > { %10262 = vmatprep.mubr.msk.f32.mxu1 %vm395_vm1, %v12733_v56  ;;  %10766 = vmatprep.mubr.msk.f32.mxu0 %vm395_vm1, %v12326_v30  ;;  %v12761_v30 = vld [vmem:[%s11890_s26 + $0xc2] sm:$0xff] }
 0x15e   : > { %10263 = vmatmul.mubr.msk.f32.gmra.mrb[20].mxu1 %vm395_vm1, %v12744_v0  ;;  %10767 = vmatmul.mubr.msk.f32.gmra.mrb[20].mxu0 %vm395_vm1, %v14323_v48  ;;  %v6276_v48 = vld [vmem:[%s11890_s26 + $0x5d] sm:$0xff] }
 0x15f   : > { %10265 = vmatprep.mubr.msk.f32.mxu1 %vm395_vm1, %v12747_v8  ;;  %10769 = vmatprep.mubr.msk.f32.mxu0 %vm395_vm1, %v14324_v18  ;;  %v12911_v18 = vld [vmem:[%s11732_s19 + $0x42] sm:$0xff] }
 0x162   : > { %10266 = vmatmul.mubr.msk.f32.gmra.mrb[22].mxu1 %vm395_vm1, %v12758_v27  ;;  %10770 = vmatmul.mubr.msk.f32.gmra.mrb[22].mxu0 %vm395_vm1, %v14325_v44  ;;  %v6277_v44 = vld [vmem:[%s11890_s26 + $0x65] sm:$0xff] }
 0x163   : > { %10268 = vmatprep.mubr.msk.f32.mxu1 %vm395_vm1, %v12761_v30  ;;  %10772 = vmatprep.mubr.msk.f32.mxu0 %vm395_vm1, %v14326_v11  ;;  %v12921_v11 = vld [vmem:[%s11732_s19 + $0x4a] sm:$0xff] }
 0x166   : > { %10269 = vmatmul.mubr.msk.f32.gmra.mrb[24].mxu1 %vm395_vm1, %v12772_v46  ;;  %10773 = vmatmul.mubr.msk.f32.gmra.mrb[24].mxu0 %vm395_vm1, %v14327_v31  ;;  %v6278_v31 = vld [vmem:[%s11890_s26 + $0x6d] sm:$0xff] }
 0x167   : > { %10271 = vmatprep.mubr.msk.f32.mxu1 %vm395_vm1, %v12775_v29  ;;  %10775 = vmatprep.mubr.msk.f32.mxu0 %vm395_vm1, %v14328_v33  ;;  %v12925_v33 = vld [vmem:[%s11732_s19 + $0x52] sm:$0xff] }
 0x16a   : > { %10272 = vmatmul.mubr.msk.f32.gmra.mrb[26].mxu1 %vm395_vm1, %v12786_v35  ;;  %10776 = vmatmul.mubr.msk.f32.gmra.mrb[26].mxu0 %vm395_vm1, %v14329_v39  ;;  %v6279_v39 = vld [vmem:[%s11890_s26 + $0x75] sm:$0xff] }
 0x16b   : > { %10274 = vmatprep.mubr.msk.f32.mxu1 %vm395_vm1, %v12789_v37  ;;  %10778 = vmatprep.mubr.msk.f32.mxu0 %vm395_vm1, %v14330_v41  ;;  %v12935_v41 = vld [vmem:[%s11732_s19 + $0x5a] sm:$0xff] }
 0x16e   : > { %10275 = vmatmul.mubr.msk.f32.gmra.mrb[28].mxu1 %vm395_vm1, %v12800_v43  ;;  %10779 = vmatmul.mubr.msk.f32.gmra.mrb[28].mxu0 %vm395_vm1, %v12392_v34  ;;  %v12828_v34 = vld [vmem:[%s11890_s26 + $0x10a] sm:$0xff] }
 0x16f   : > { %10277 = vmatprep.mubr.msk.f32.mxu1 %vm395_vm1, %v12803_v45  ;;  %10781 = vmatprep.mubr.msk.f32.mxu0 %vm395_vm1, %v14331_v47  ;;  %v6280_v47 = vld [vmem:[%s11890_s26 + $0x7d] sm:$0xff] }
 0x172   : > { %10278 = vmatmul.mubr.msk.f32.gmra.mrb[30].mxu1 %vm395_vm1, %v12814_v49  ;;  %10782 = vmatmul.mubr.msk.f32.gmra.mrb[30].mxu0 %vm395_vm1, %v14332_v53  ;;  %v12939_v53 = vld [vmem:[%s11732_s19 + $0x62] sm:$0xff] }
 0x173   : > { %10280 = vmatprep.mubr.msk.f32.mxu1 %vm395_vm1, %v12817_v51  ;;  %10784 = vmatprep.mubr.msk.f32.mxu0 %vm395_vm1, %v12410_v14  ;;  %v2004_v14 = vld [vmem:[%s11890_s26 + $0x11a] sm:$0x3f] }
 0x176   : > { %10281 = vmatmul.mubr.msk.f32.gmra.mrb[32].mxu1 %vm395_vm1, %v12828_v34  ;;  %10785 = vmatmul.mubr.msk.f32.gmra.mrb[32].mxu0 %vm395_vm1, %v5872_v55  ;;  %v6281_v55 = vld [vmem:[%s11890_s26 + $0x85] sm:$0xff] }
 0x177   : > { %10283 = vmatprep.mubr.msk.f32.mxu1 %vm395_vm1, %v12832_v57  ;;  %10787 = vmatprep.mubr.msk.f32.mxu0 %vm395_vm1, %v5873_v59  ;;  %v12949_v59 = vld [vmem:[%s11732_s19 + $0x6a] sm:$0xff] }
 0x17a   : > { %10284 = vmatmul.mubr.msk.f32.gmra.mrb[34].mxu1 %vm395_vm1, %v2004_v14  ;;  %10788 = vmatmul.mubr.msk.f32.gmra.mrb[34].mxu0 %vm395_vm1, %v5874_v61  ;;  %v6282_v14 = vld [vmem:[%s11890_s26 + $0x8d] sm:$0xff] }
 0x17b   : > { %10288 = vmatprep.mubr.msk.f32.mxu1 %vm395_vm1, %v2399_v63  ;;  %10792 = vmatprep.mubr.msk.f32.mxu0 %vm395_vm1, %v6269_v1  ;;  %v12953_v61 = vld [vmem:[%s11732_s19 + $0x72] sm:$0xff]  ;;  %v12963_v1 = vld [vmem:[%s11732_s19 + $0x7a] sm:$0xff] }
 0x17c   : > { %v6283_v63 = vld [vmem:[%s11890_s26 + $0x95] sm:$0xff] }
 0x17e   : > { %10289 = vmatmul.mubr.msk.f32.vlgmr.msra.gmra.mrb[0].mxu1 %vm395_vm1, %v2400_v3  ;;  %10793 = vmatmul.mubr.msk.f32.vlgmr.msra.gmra.mrb[0].mxu0 %vm395_vm1, %v6270_v5  ;;  %v6284_v3 = vld [vmem:[%s11890_s26 + $0x9d] sm:$0xff] }
 0x17f   : > { %10343 = vmatpush3.msk.msra.mxu1 %vm504_vm0, %v12598_v21  ;;  %10847 = vmatpush3.msk.msra.mxu0 %vm504_vm0, %v12603_v25  ;;  %v6275_v21 = vld [vmem:[%s11890_s26 + $0x55] sm:$0xff]  ;;  %v12967_v5 = vld [vmem:[%s11732_s19 + $0x82] sm:$0xff] }
 0x180   : > { %10291 = vmatprep.mubr.msk.f32.mxu1 %vm395_vm1, %v12852_v7  ;;  %10795 = vmatprep.mubr.msk.f32.mxu0 %vm395_vm1, %v6271_v9  ;;  %v12907_v25 = vld [vmem:[%s11732_s19 + $0x3a] sm:$0xff]  ;;  %v6285_v9 = vld [vmem:[%s11890_s26 + $0xa5] sm:$0xff] }
 0x181   : > { %10398 = vmatprep.subr.msk.mxu1 %vm504_vm0, %v12860_v13  ;;  %10902 = vmatprep.subr.msk.mxu0 %vm504_vm0, %v12865_v15 }
 0x182   : > { %10292 = vmatmul.mubr.msk.f32.gmra.mrb[2].mxu1 %vm395_vm1, %v12872_v17  ;;  %10796 = vmatmul.mubr.msk.f32.gmra.mrb[2].mxu0 %vm395_vm1, %v6272_v60  ;;  %v12977_v60 = vld [vmem:[%s11732_s19 + $0x8a] sm:$0xff] }
 0x183   : > { %10294 = vmatprep.mubr.msk.f32.mxu1 %vm395_vm1, %v12879_v19  ;;  %10798 = vmatprep.mubr.msk.f32.mxu0 %vm395_vm1, %v6273_v24  ;;  %v6286_v24 = vld [vmem:[%s11890_s26 + $0xad] sm:$0xff] }
 0x186   : > { %10295 = vmatmul.mubr.msk.f32.gmra.mrb[4].mxu1 %vm395_vm1, %v12893_v38  ;;  %10799 = vmatmul.mubr.msk.f32.gmra.mrb[4].mxu0 %vm395_vm1, %v6274_v22  ;;  %v12981_v22 = vld [vmem:[%s11732_s19 + $0x92] sm:$0xff] }
 0x187   : > { %10297 = vmatprep.mubr.msk.f32.mxu1 %vm395_vm1, %v12897_v10  ;;  %10801 = vmatprep.mubr.msk.f32.mxu0 %vm395_vm1, %v6275_v21  ;;  %v6287_v21 = vld [vmem:[%s11890_s26 + $0xb5] sm:$0xff] }
 0x18a   : > { %10298 = vmatmul.mubr.msk.f32.gmra.mrb[6].mxu1 %vm395_vm1, %v12907_v25  ;;  %10802 = vmatmul.mubr.msk.f32.gmra.mrb[6].mxu0 %vm395_vm1, %v6276_v48  ;;  %v12991_v48 = vld [vmem:[%s11732_s19 + $0x9a] sm:$0xff] }
 0x18b   : > { %10300 = vmatprep.mubr.msk.f32.mxu1 %vm395_vm1, %v12911_v18  ;;  %10804 = vmatprep.mubr.msk.f32.mxu0 %vm395_vm1, %v6277_v44  ;;  %v6288_v44 = vld [vmem:[%s11890_s26 + $0xbd] sm:$0xff] }
 0x18e   : > { %10301 = vmatmul.mubr.msk.f32.gmra.mrb[8].mxu1 %vm395_vm1, %v12921_v11  ;;  %10805 = vmatmul.mubr.msk.f32.gmra.mrb[8].mxu0 %vm395_vm1, %v6278_v31  ;;  %v12995_v31 = vld [vmem:[%s11732_s19 + $0xa2] sm:$0xff] }
 0x18f   : > { %10303 = vmatprep.mubr.msk.f32.mxu1 %vm395_vm1, %v12925_v33  ;;  %10807 = vmatprep.mubr.msk.f32.mxu0 %vm395_vm1, %v6279_v39  ;;  %v6289_v39 = vld [vmem:[%s11890_s26 + $0xc5] sm:$0xff] }
 0x192   : > { %10304 = vmatmul.mubr.msk.f32.gmra.mrb[10].mxu1 %vm395_vm1, %v12935_v41  ;;  %10808 = vmatmul.mubr.msk.f32.gmra.mrb[10].mxu0 %vm395_vm1, %v6280_v47  ;;  %v13005_v47 = vld [vmem:[%s11732_s19 + $0xaa] sm:$0xff] }
 0x193   : > { %10306 = vmatprep.mubr.msk.f32.mxu1 %vm395_vm1, %v12939_v53  ;;  %10810 = vmatprep.mubr.msk.f32.mxu0 %vm395_vm1, %v6281_v55  ;;  %v6290_v55 = vld [vmem:[%s11890_s26 + $0xcd] sm:$0xff] }
 0x196   : > { %10307 = vmatmul.mubr.msk.f32.gmra.mrb[12].mxu1 %vm395_vm1, %v12949_v59  ;;  %10811 = vmatmul.mubr.msk.f32.gmra.mrb[12].mxu0 %vm395_vm1, %v6282_v14  ;;  %v13009_v14 = vld [vmem:[%s11732_s19 + $0xb2] sm:$0xff] }
 0x197   : > { %10309 = vmatprep.mubr.msk.f32.mxu1 %vm395_vm1, %v12953_v61  ;;  %10813 = vmatprep.mubr.msk.f32.mxu0 %vm395_vm1, %v6283_v63  ;;  %v6291_v63 = vld [vmem:[%s11890_s26 + $0xd5] sm:$0xff] }
 0x19a   : > { %10310 = vmatmul.mubr.msk.f32.gmra.mrb[14].mxu1 %vm395_vm1, %v12963_v1  ;;  %10814 = vmatmul.mubr.msk.f32.gmra.mrb[14].mxu0 %vm395_vm1, %v6284_v3  ;;  %v13019_v3 = vld [vmem:[%s11732_s19 + $0xba] sm:$0xff] }
 0x19b   : > { %10312 = vmatprep.mubr.msk.f32.mxu1 %vm395_vm1, %v12967_v5  ;;  %10816 = vmatprep.mubr.msk.f32.mxu0 %vm395_vm1, %v6285_v9  ;;  %14333 = vst [vmem:[#allocation2_spill] sm:$0xff] %v13019_v3  ;;  %v6292_v9 = vld [vmem:[%s11890_s26 + $0xdd] sm:$0xff] }
 0x19e   : > { %10313 = vmatmul.mubr.msk.f32.gmra.mrb[16].mxu1 %vm395_vm1, %v12977_v60  ;;  %10817 = vmatmul.mubr.msk.f32.gmra.mrb[16].mxu0 %vm395_vm1, %v6286_v24  ;;  %v13023_v24 = vld [vmem:[%s11732_s19 + $0xc2] sm:$0xff] }
 0x19f   : > { %10315 = vmatprep.mubr.msk.f32.mxu1 %vm395_vm1, %v12981_v22  ;;  %10819 = vmatprep.mubr.msk.f32.mxu0 %vm395_vm1, %v6287_v21  ;;  %14334 = vst [vmem:[#allocation3_spill] sm:$0xff] %v13023_v24  ;;  %v6293_v21 = vld [vmem:[%s11890_s26 + $0xe5] sm:$0xff] }
 0x1a2   : > { %10316 = vmatmul.mubr.msk.f32.gmra.mrb[18].mxu1 %vm395_vm1, %v12991_v48  ;;  %10820 = vmatmul.mubr.msk.f32.gmra.mrb[18].mxu0 %vm395_vm1, %v6288_v44  ;;  %v13033_v44 = vld [vmem:[%s11732_s19 + $0xca] sm:$0xff] }
 0x1a3   : > { %10318 = vmatprep.mubr.msk.f32.mxu1 %vm395_vm1, %v12995_v31  ;;  %10822 = vmatprep.mubr.msk.f32.mxu0 %vm395_vm1, %v6289_v39  ;;  %14335 = vst [vmem:[#allocation4_spill] sm:$0xff] %v13033_v44  ;;  %v6294_v39 = vld [vmem:[%s11890_s26 + $0xed] sm:$0xff] }
 0x1a6   : > { %10319 = vmatmul.mubr.msk.f32.gmra.mrb[20].mxu1 %vm395_vm1, %v13005_v47  ;;  %10823 = vmatmul.mubr.msk.f32.gmra.mrb[20].mxu0 %vm395_vm1, %v6290_v55  ;;  %v13037_v55 = vld [vmem:[%s11732_s19 + $0xd2] sm:$0xff] }
 0x1a7   : > { %10321 = vmatprep.mubr.msk.f32.mxu1 %vm395_vm1, %v13009_v14  ;;  %10825 = vmatprep.mubr.msk.f32.mxu0 %vm395_vm1, %v6291_v63  ;;  %14336 = vst [vmem:[#allocation5_spill] sm:$0xff] %v13037_v55  ;;  %v6295_v63 = vld [vmem:[%s11890_s26 + $0xf5] sm:$0xff] }
 0x1aa   : > { %10322 = vmatmul.mubr.msk.f32.gmra.mrb[22].mxu1 %vm395_vm1, %v13019_v3  ;;  %10826 = vmatmul.mubr.msk.f32.gmra.mrb[22].mxu0 %vm395_vm1, %v6292_v9  ;;  %v13047_v9 = vld [vmem:[%s11732_s19 + $0xda] sm:$0xff]  ;;  %v6297_v3 = vld [vmem:[%s11890_s26 + $0x105] sm:$0xff] }
 0x1ab   : > { %10324 = vmatprep.mubr.msk.f32.mxu1 %vm395_vm1, %v13023_v24  ;;  %10828 = vmatprep.mubr.msk.f32.mxu0 %vm395_vm1, %v6293_v21  ;;  %14337 = vst [vmem:[#allocation6_spill] sm:$0xff] %v13047_v9  ;;  %v6296_v21 = vld [vmem:[%s11890_s26 + $0xfd] sm:$0xff] }
 0x1ac   : > { %v13051_v24 = vld [vmem:[%s11732_s19 + $0xe2] sm:$0xff] }
 0x1ad   : > { %14338 = vst [vmem:[#allocation7_spill] sm:$0xff] %v13051_v24 }
 0x1ae   : > { %10325 = vmatmul.mubr.msk.f32.gmra.mrb[24].mxu1 %vm395_vm1, %v13033_v44  ;;  %10829 = vmatmul.mubr.msk.f32.gmra.mrb[24].mxu0 %vm395_vm1, %v6294_v39  ;;  %v13061_v39 = vld [vmem:[%s11732_s19 + $0xea] sm:$0xff]  ;;  %v6299_v44 = vld [vmem:[%s11890_s26 + $0x115] sm:$0xff] }
 0x1af   : > { %10327 = vmatprep.mubr.msk.f32.mxu1 %vm395_vm1, %v13037_v55  ;;  %10831 = vmatprep.mubr.msk.f32.mxu0 %vm395_vm1, %v6295_v63  ;;  %14339 = vst [vmem:[#allocation8_spill] sm:$0xff] %v13061_v39  ;;  %v6298_v63 = vld [vmem:[%s11890_s26 + $0x10d] sm:$0xff] }
 0x1b0   : > { %v13065_v55 = vld [vmem:[%s11732_s19 + $0xf2] sm:$0xff] }
 0x1b1   : > { %14340 = vst [vmem:[#allocation9_spill] sm:$0xff] %v13065_v55 }
 0x1b2   : > { %10328 = vmatmul.mubr.msk.f32.gmra.mrb[26].mxu1 %vm395_vm1, %v13047_v9  ;;  %10832 = vmatmul.mubr.msk.f32.gmra.mrb[26].mxu0 %vm395_vm1, %v6296_v21  ;;  %v6300_v21 = vld [vmem:[%s11890_s26 + $0x11d] sm:$0xff]  ;;  %v6301_v9 = vld [vmem:[%s11890_s26 + $0x125] sm:$0xff] }
 0x1b3   : > { %10330 = vmatprep.mubr.msk.f32.mxu1 %vm395_vm1, %v13051_v24  ;;  %10834 = vmatprep.mubr.msk.f32.mxu0 %vm395_vm1, %v6297_v3  ;;  %v13075_v3 = vld [vmem:[%s11732_s19 + $0xfa] sm:$0xff]  ;;  %v13079_v24 = vld [vmem:[%s11732_s19 + $0x102] sm:$0xff] }
 0x1b4   : > { %14341 = vst [vmem:[#allocation10_spill] sm:$0xff] %v13079_v24 }
 0x1b6   : > { %10331 = vmatmul.mubr.msk.f32.gmra.mrb[28].mxu1 %vm395_vm1, %v13061_v39  ;;  %10835 = vmatmul.mubr.msk.f32.gmra.mrb[28].mxu0 %vm395_vm1, %v6298_v63  ;;  %v6302_v63 = vld [vmem:[%s11890_s26 + $0x12d] sm:$0xff]  ;;  %v6303_v39 = vld [vmem:[%s11890_s26 + $0x135] sm:$0xff] }
 0x1b7   : > { %10333 = vmatprep.mubr.msk.f32.mxu1 %vm395_vm1, %v13065_v55  ;;  %10837 = vmatprep.mubr.msk.f32.mxu0 %vm395_vm1, %v6299_v44  ;;  %v13089_v44 = vld [vmem:[%s11732_s19 + $0x10a] sm:$0xff]  ;;  %v13093_v55 = vld [vmem:[%s11732_s19 + $0x112] sm:$0xff] }
 0x1b8   : > { %14342 = vst [vmem:[#allocation11_spill] sm:$0xff] %v13089_v44 }
 0x1ba   : > { %10334 = vmatmul.mubr.msk.f32.gmra.mrb[30].mxu1 %vm395_vm1, %v13075_v3  ;;  %10838 = vmatmul.mubr.msk.f32.gmra.mrb[30].mxu0 %vm395_vm1, %v6300_v21  ;;  %v6304_v21 = vld [vmem:[%s11890_s26 + $0x13d] sm:$0x3f] }
 0x1bb   : > { %10336 = vmatprep.mubr.msk.f32.mxu1 %vm395_vm1, %v13079_v24  ;;  %10840 = vmatprep.mubr.msk.f32.mxu0 %vm395_vm1, %v6301_v9  ;;  %v2434_v9 = vld [vmem:[%s11732_s19 + $0x11a] sm:$0x3f]  ;;  %v6699_v24 = vld [vmem:[%s11732_s19 + $0x25] sm:$0xff] }
 0x1be   : > { %10337 = vmatmul.mubr.msk.f32.gmra.mrb[32].mxu1 %vm395_vm1, %v13089_v44  ;;  %10841 = vmatmul.mubr.msk.f32.gmra.mrb[32].mxu0 %vm395_vm1, %v6302_v63  ;;  %v6700_v63 = vld [vmem:[%s11732_s19 + $0x2d] sm:$0xff]  ;;  %v6701_v44 = vld [vmem:[%s11732_s19 + $0x35] sm:$0xff] }
 0x1bf   : > { %10339 = vmatprep.mubr.msk.f32.mxu1 %vm395_vm1, %v13093_v55  ;;  %10843 = vmatprep.mubr.msk.f32.mxu0 %vm395_vm1, %v6303_v39  ;;  %v13118_v39 = vld [vmem:[%s14252_s2 + $0x10] sm:$0xf] }
 0x1c2   : > { %10340 = vmatmul.mubr.msk.f32.gmra.mrb[34].mxu1 %vm395_vm1, %v2434_v9  ;;  %10844 = vmatmul.mubr.msk.f32.gmra.mrb[34].mxu0 %vm395_vm1, %v6304_v21  ;;  %v7129_v9 = vld [vmem:[%s11890_s26 + $0x26] sm:$0xff]  ;;  %v7130_v21 = vld [vmem:[%s11890_s26 + $0x2e] sm:$0xff] }
 0x1c3   : > { %10344 = vmatprep.mubr.msk.f32.mxu1 %vm395_vm1, %v12590_v26  ;;  %10848 = vmatprep.mubr.msk.f32.mxu0 %vm395_vm1, %v6699_v24  ;;  %v13123_v26 = vld [vmem:[%s14253_s3 + $0x20] sm:$0xf]  ;;  %v6703_v24 = vld [vmem:[%s11732_s19 + $0x45] sm:$0xff] }
 0x1c6   : > { %10345 = vmatmul.mubr.msk.f32.vlgmr.msra.gmra.mrb[0].mxu1 %vm395_vm1, %v12610_v42  ;;  %10849 = vmatmul.mubr.msk.f32.vlgmr.msra.gmra.mrb[0].mxu0 %vm395_vm1, %v6700_v63  ;;  %v6702_v42 = vld [vmem:[%s11732_s19 + $0x3d] sm:$0xff] }
 0x1c7   : > { %10399 = vmatpush3.msk.msra.mxu1 %vm504_vm0, %v12860_v13  ;;  %10903 = vmatpush3.msk.msra.mxu0 %vm504_vm0, %v12865_v15  ;;  %v6705_v13 = vld [vmem:[%s11732_s19 + $0x55] sm:$0xff]  ;;  %v6707_v15 = vld [vmem:[%s11732_s19 + $0x65] sm:$0xff] }
 0x1c8   : > { %10347 = vmatprep.mubr.msk.f32.mxu1 %vm395_vm1, %v12617_v50  ;;  %10851 = vmatprep.mubr.msk.f32.mxu0 %vm395_vm1, %v6701_v44  ;;  %v6704_v50 = vld [vmem:[%s11732_s19 + $0x4d] sm:$0xff]  ;;  %v6733_v44 = vld [vmem:[%s11732_s19 + $0x135] sm:$0xff] }
 0x1c9   : > { %10454 = vmatprep.subr.msk.mxu1 %vm504_vm0, %v13118_v39  ;;  %10958 = vmatprep.subr.msk.mxu0 %vm504_vm0, %v13123_v26  ;;  %v7131_v63 = vld [vmem:[%s11890_s26 + $0x36] sm:$0xff] }
 0x1ca   : > { %10348 = vmatmul.mubr.msk.f32.gmra.mrb[2].mxu1 %vm395_vm1, %v12632_v54  ;;  %10852 = vmatmul.mubr.msk.f32.gmra.mrb[2].mxu0 %vm395_vm1, %v6702_v42  ;;  %v6706_v54 = vld [vmem:[%s11732_s19 + $0x5d] sm:$0xff]  ;;  %v7133_v42 = vld [vmem:[%s11890_s26 + $0x46] sm:$0xff] }
 0x1cb   : > { %10350 = vmatprep.mubr.msk.f32.mxu1 %vm395_vm1, %v12635_v4  ;;  %10854 = vmatprep.mubr.msk.f32.mxu0 %vm395_vm1, %v6703_v24  ;;  %v6708_v4 = vld [vmem:[%s11732_s19 + $0x6d] sm:$0xff] }
 0x1cc   : > { %v7153_v24 = vld [vmem:[%s11890_s26 + $0xe6] sm:$0xff] }
 0x1ce   : > { %10351 = vmatmul.mubr.msk.f32.gmra.mrb[4].mxu1 %vm395_vm1, %v12646_v23  ;;  %10855 = vmatmul.mubr.msk.f32.gmra.mrb[4].mxu0 %vm395_vm1, %v6704_v50  ;;  %v6709_v23 = vld [vmem:[%s11732_s19 + $0x75] sm:$0xff] }
 0x1cf   : > { %10353 = vmatprep.mubr.msk.f32.mxu1 %vm395_vm1, %v12649_v58  ;;  %10857 = vmatprep.mubr.msk.f32.mxu0 %vm395_vm1, %v6705_v13  ;;  %v6710_v58 = vld [vmem:[%s11732_s19 + $0x7d] sm:$0xff]  ;;  %v14345_v50 = vld [vmem:[#allocation4_spill] sm:$0xff] }
 0x1d0   : > { %v7154_v13 = vld [vmem:[%s11890_s26 + $0xee] sm:$0xff] }
 0x1d2   : > { %10354 = vmatmul.mubr.msk.f32.gmra.mrb[6].mxu1 %vm395_vm1, %v12660_v62  ;;  %10858 = vmatmul.mubr.msk.f32.gmra.mrb[6].mxu0 %vm395_vm1, %v6706_v54  ;;  %v6711_v62 = vld [vmem:[%s11732_s19 + $0x85] sm:$0xff]  ;;  %v7155_v54 = vld [vmem:[%s11890_s26 + $0xf6] sm:$0xff] }
 0x1d3   : > { %10356 = vmatprep.mubr.msk.f32.mxu1 %vm395_vm1, %v12663_v2  ;;  %10860 = vmatprep.mubr.msk.f32.mxu0 %vm395_vm1, %v6707_v15  ;;  %v6712_v2 = vld [vmem:[%s11732_s19 + $0x8d] sm:$0xff]  ;;  %v14347_v15 = vld [vmem:[#allocation6_spill] sm:$0xff] }
 0x1d6   : > { %10357 = vmatmul.mubr.msk.f32.gmra.mrb[8].mxu1 %vm395_vm1, %v12674_v6  ;;  %10861 = vmatmul.mubr.msk.f32.gmra.mrb[8].mxu0 %vm395_vm1, %v6708_v4  ;;  %v6713_v6 = vld [vmem:[%s11732_s19 + $0x95] sm:$0xff]  ;;  %v14348_v4 = vld [vmem:[#allocation7_spill] sm:$0xff] }
 0x1d7   : > { %10359 = vmatprep.mubr.msk.f32.mxu1 %vm395_vm1, %v12677_v12  ;;  %10863 = vmatprep.mubr.msk.f32.mxu0 %vm395_vm1, %v6709_v23  ;;  %v6714_v12 = vld [vmem:[%s11732_s19 + $0x9d] sm:$0xff] }
 0x1d8   : > { %v7156_v23 = vld [vmem:[%s11890_s26 + $0xfe] sm:$0xff] }
 0x1da   : > { %10360 = vmatmul.mubr.msk.f32.gmra.mrb[10].mxu1 %vm395_vm1, %v12688_v16  ;;  %10864 = vmatmul.mubr.msk.f32.gmra.mrb[10].mxu0 %vm395_vm1, %v6710_v58  ;;  %v6715_v16 = vld [vmem:[%s11732_s19 + $0xa5] sm:$0xff] }
 0x1db   : > { %10362 = vmatprep.mubr.msk.f32.mxu1 %vm395_vm1, %v12691_v20  ;;  %10866 = vmatprep.mubr.msk.f32.mxu0 %vm395_vm1, %v6711_v62  ;;  %v6716_v20 = vld [vmem:[%s11732_s19 + $0xad] sm:$0xff] }
 0x1dc   : > { %v7157_v58 = vld [vmem:[%s11890_s26 + $0x106] sm:$0xff]  ;;  %v14349_v62 = vld [vmem:[#allocation8_spill] sm:$0xff] }
 0x1de   : > { %10363 = vmatmul.mubr.msk.f32.gmra.mrb[12].mxu1 %vm395_vm1, %v12702_v28  ;;  %10867 = vmatmul.mubr.msk.f32.gmra.mrb[12].mxu0 %vm395_vm1, %v6712_v2  ;;  %v6717_v28 = vld [vmem:[%s11732_s19 + $0xb5] sm:$0xff] }
 0x1df   : > { %10365 = vmatprep.mubr.msk.f32.mxu1 %vm395_vm1, %v12705_v32  ;;  %10869 = vmatprep.mubr.msk.f32.mxu0 %vm395_vm1, %v6713_v6  ;;  %v6718_v32 = vld [vmem:[%s11732_s19 + $0xbd] sm:$0xff]  ;;  %v7158_v6 = vld [vmem:[%s11890_s26 + $0x10e] sm:$0xff] }
 0x1e0   : > { %v14350_v2 = vld [vmem:[#allocation9_spill] sm:$0xff] }
 0x1e2   : > { %10366 = vmatmul.mubr.msk.f32.gmra.mrb[14].mxu1 %vm395_vm1, %v12716_v36  ;;  %10870 = vmatmul.mubr.msk.f32.gmra.mrb[14].mxu0 %vm395_vm1, %v6714_v12  ;;  %v6719_v36 = vld [vmem:[%s11732_s19 + $0xc5] sm:$0xff]  ;;  %v7159_v12 = vld [vmem:[%s11890_s26 + $0x116] sm:$0xff] }
 0x1e3   : > { %10368 = vmatprep.mubr.msk.f32.mxu1 %vm395_vm1, %v12719_v40  ;;  %10872 = vmatprep.mubr.msk.f32.mxu0 %vm395_vm1, %v6715_v16  ;;  %v6720_v40 = vld [vmem:[%s11732_s19 + $0xcd] sm:$0xff]  ;;  %v14351_v16 = vld [vmem:[#allocation10_spill] sm:$0xff] }
 0x1e6   : > { %10369 = vmatmul.mubr.msk.f32.gmra.mrb[16].mxu1 %vm395_vm1, %v12730_v52  ;;  %10873 = vmatmul.mubr.msk.f32.gmra.mrb[16].mxu0 %vm395_vm1, %v6716_v20  ;;  %v6721_v52 = vld [vmem:[%s11732_s19 + $0xd5] sm:$0xff]  ;;  %v7160_v20 = vld [vmem:[%s11890_s26 + $0x11e] sm:$0xff] }
 0x1e7   : > { %10371 = vmatprep.mubr.msk.f32.mxu1 %vm395_vm1, %v12733_v56  ;;  %10875 = vmatprep.mubr.msk.f32.mxu0 %vm395_vm1, %v6717_v28  ;;  %v6722_v56 = vld [vmem:[%s11732_s19 + $0xdd] sm:$0xff]  ;;  %v7161_v28 = vld [vmem:[%s11890_s26 + $0x126] sm:$0xff] }
 0x1ea   : > { %10372 = vmatmul.mubr.msk.f32.gmra.mrb[18].mxu1 %vm395_vm1, %v12744_v0  ;;  %10876 = vmatmul.mubr.msk.f32.gmra.mrb[18].mxu0 %vm395_vm1, %v6718_v32  ;;  %v6723_v0 = vld [vmem:[%s11732_s19 + $0xe5] sm:$0xff] }
 0x1eb   : > { %10374 = vmatprep.mubr.msk.f32.mxu1 %vm395_vm1, %v12747_v8  ;;  %10878 = vmatprep.mubr.msk.f32.mxu0 %vm395_vm1, %v6719_v36  ;;  %v6724_v8 = vld [vmem:[%s11732_s19 + $0xed] sm:$0xff] }
 0x1ec   : > { %v14352_v32 = vld [vmem:[#allocation11_spill] sm:$0xff] }
 0x1ed   : > { %v7162_v36 = vld [vmem:[%s11890_s26 + $0x12e] sm:$0xff] }
 0x1ee   : > { %10375 = vmatmul.mubr.msk.f32.gmra.mrb[20].mxu1 %vm395_vm1, %v12758_v27  ;;  %10879 = vmatmul.mubr.msk.f32.gmra.mrb[20].mxu0 %vm395_vm1, %v6720_v40  ;;  %v6725_v27 = vld [vmem:[%s11732_s19 + $0xf5] sm:$0xff]  ;;  %v3293_v40 = vld [vmem:[%s11732_s19 + $0x122] sm:$0xff] }
 0x1ef   : > { %10377 = vmatprep.mubr.msk.f32.mxu1 %vm395_vm1, %v12761_v30  ;;  %10881 = vmatprep.mubr.msk.f32.mxu0 %vm395_vm1, %v6721_v52  ;;  %v6726_v30 = vld [vmem:[%s11732_s19 + $0xfd] sm:$0xff] }
 0x1f0   : > { %v7163_v52 = vld [vmem:[%s11890_s26 + $0x136] sm:$0xff] }
 0x1f2   : > { %10378 = vmatmul.mubr.msk.f32.gmra.mrb[22].mxu1 %vm395_vm1, %v12772_v46  ;;  %10882 = vmatmul.mubr.msk.f32.gmra.mrb[22].mxu0 %vm395_vm1, %v6722_v56  ;;  %v6727_v46 = vld [vmem:[%s11732_s19 + $0x105] sm:$0xff] }
 0x1f3   : > { %10380 = vmatprep.mubr.msk.f32.mxu1 %vm395_vm1, %v12775_v29  ;;  %10884 = vmatprep.mubr.msk.f32.mxu0 %vm395_vm1, %v6723_v0  ;;  %v6728_v29 = vld [vmem:[%s11732_s19 + $0x10d] sm:$0xff] }
 0x1f4   : > { %v3294_v56 = vld [vmem:[%s11732_s19 + $0x12a] sm:$0x3f]  ;;  %v3689_v0 = vld [vmem:[%s11890_s26 + $0x13] sm:$0xff] }
 0x1f6   : > { %10381 = vmatmul.mubr.msk.f32.gmra.mrb[24].mxu1 %vm395_vm1, %v12786_v35  ;;  %10885 = vmatmul.mubr.msk.f32.gmra.mrb[24].mxu0 %vm395_vm1, %v6724_v8  ;;  %v6729_v35 = vld [vmem:[%s11732_s19 + $0x115] sm:$0xff]  ;;  %v7559_v8 = vld [vmem:[%s11732_s19 + $0x26] sm:$0xff] }
 0x1f7   : > { %10383 = vmatprep.mubr.msk.f32.mxu1 %vm395_vm1, %v12789_v37  ;;  %10887 = vmatprep.mubr.msk.f32.mxu0 %vm395_vm1, %v6725_v27  ;;  %v6730_v37 = vld [vmem:[%s11732_s19 + $0x11d] sm:$0xff] }
 0x1f8   : > { %v3690_v27 = vld [vmem:[%s11890_s26 + $0x1b] sm:$0xff] }
 0x1fa   : > { %10384 = vmatmul.mubr.msk.f32.gmra.mrb[26].mxu1 %vm395_vm1, %v12800_v43  ;;  %10888 = vmatmul.mubr.msk.f32.gmra.mrb[26].mxu0 %vm395_vm1, %v6726_v30  ;;  %v6731_v43 = vld [vmem:[%s11732_s19 + $0x125] sm:$0xff]  ;;  %v7560_v30 = vld [vmem:[%s11732_s19 + $0x2e] sm:$0xff] }
 0x1fb   : > { %10386 = vmatprep.mubr.msk.f32.mxu1 %vm395_vm1, %v12803_v45  ;;  %10890 = vmatprep.mubr.msk.f32.mxu0 %vm395_vm1, %v6727_v46  ;;  %v2862_v45 = vld [vmem:[%s11890_s26 + $0x11a] sm:$0xff]  ;;  %v3691_v46 = vld [vmem:[%s11890_s26 + $0x23] sm:$0xff] }
 0x1fe   : > { %10387 = vmatmul.mubr.msk.f32.gmra.mrb[28].mxu1 %vm395_vm1, %v12814_v49  ;;  %10891 = vmatmul.mubr.msk.f32.gmra.mrb[28].mxu0 %vm395_vm1, %v6728_v29  ;;  %v6732_v49 = vld [vmem:[%s11732_s19 + $0x12d] sm:$0xff]  ;;  %v7561_v29 = vld [vmem:[%s11732_s19 + $0x36] sm:$0xff] }
 0x1ff   : > { %10389 = vmatprep.mubr.msk.f32.mxu1 %vm395_vm1, %v12817_v51  ;;  %10893 = vmatprep.mubr.msk.f32.mxu0 %vm395_vm1, %v6729_v35  ;;  %v2863_v51 = vld [vmem:[%s11890_s26 + $0x122] sm:$0xff]  ;;  %v3692_v35 = vld [vmem:[%s11890_s26 + $0x2b] sm:$0xff] }
 0x202   : > { %10390 = vmatmul.mubr.msk.f32.gmra.mrb[30].mxu1 %vm395_vm1, %v12828_v34  ;;  %10894 = vmatmul.mubr.msk.f32.gmra.mrb[30].mxu0 %vm395_vm1, %v6730_v37  ;;  %v2864_v34 = vld [vmem:[%s11890_s26 + $0x12a] sm:$0x3f]  ;;  %v7562_v37 = vld [vmem:[%s11732_s19 + $0x3e] sm:$0xff] }
 0x203   : > { %10392 = vmatprep.mubr.msk.f32.mxu1 %vm395_vm1, %v12832_v57  ;;  %10896 = vmatprep.mubr.msk.f32.mxu0 %vm395_vm1, %v6731_v43  ;;  %v6734_v57 = vld [vmem:[%s11732_s19 + $0x13d] sm:$0x3f]  ;;  %v3693_v43 = vld [vmem:[%s11890_s26 + $0x33] sm:$0xff] }
 0x206   : > { %10393 = vmatmul.mubr.msk.f32.gmra.mrb[32].mxu1 %vm395_vm1, %v2862_v45  ;;  %10897 = vmatmul.mubr.msk.f32.gmra.mrb[32].mxu0 %vm395_vm1, %v6732_v49  ;;  %v7563_v45 = vld [vmem:[%s11732_s19 + $0x46] sm:$0xff]  ;;  %v3694_v49 = vld [vmem:[%s11890_s26 + $0x3b] sm:$0xff] }
 0x207   : > { %10395 = vmatprep.mubr.msk.f32.mxu1 %vm395_vm1, %v2863_v51  ;;  %10899 = vmatprep.mubr.msk.f32.mxu0 %vm395_vm1, %v6733_v44  ;;  %v7564_v51 = vld [vmem:[%s11732_s19 + $0x4e] sm:$0xff]  ;;  %v3695_v44 = vld [vmem:[%s11890_s26 + $0x43] sm:$0xff] }
 0x20a   : > { %10396 = vmatmul.mubr.msk.f32.gmra.mrb[34].mxu1 %vm395_vm1, %v2864_v34  ;;  %10900 = vmatmul.mubr.msk.f32.gmra.mrb[34].mxu0 %vm395_vm1, %v6734_v57  ;;  %v7565_v34 = vld [vmem:[%s11732_s19 + $0x56] sm:$0xff]  ;;  %v3696_v57 = vld [vmem:[%s11890_s26 + $0x4b] sm:$0xff] }
 0x20b   : > { %10400 = vmatprep.mubr.msk.f32.mxu1 %vm395_vm1, %v12852_v7  ;;  %10904 = vmatprep.mubr.msk.f32.mxu0 %vm395_vm1, %v7129_v9  ;;  %v7132_v7 = vld [vmem:[%s11890_s26 + $0x3e] sm:$0xff] }
 0x20c   : > { %v7566_v9 = vld [vmem:[%s11732_s19 + $0x5e] sm:$0xff] }
 0x20e   : > { %10401 = vmatmul.mubr.msk.f32.vlgmr.msra.gmra.mrb[0].mxu1 %vm395_vm1, %v12872_v17  ;;  %10905 = vmatmul.mubr.msk.f32.vlgmr.msra.gmra.mrb[0].mxu0 %vm395_vm1, %v7130_v21  ;;  %v7134_v17 = vld [vmem:[%s11890_s26 + $0x4e] sm:$0xff] }
 0x20f   : > { %10455 = vmatpush3.msk.msra.mxu1 %vm504_vm0, %v13118_v39  ;;  %10959 = vmatpush3.msk.msra.mxu0 %vm504_vm0, %v13123_v26  ;;  %v7135_v39 = vld [vmem:[%s11890_s26 + $0x56] sm:$0xff]  ;;  %v14343_v26 = vld [vmem:[#allocation2_spill] sm:$0xff] }
 0x210   : > { %10403 = vmatprep.mubr.msk.f32.mxu1 %vm395_vm1, %v12879_v19  ;;  %10907 = vmatprep.mubr.msk.f32.mxu0 %vm395_vm1, %v7131_v63  ;;  %v7136_v19 = vld [vmem:[%s11890_s26 + $0x5e] sm:$0xff]  ;;  %v3697_v21 = vld [vmem:[%s11890_s26 + $0x53] sm:$0xff]  ;;  %v7567_v63 = vld [vmem:[%s11732_s19 + $0x66] sm:$0xff] }
 0x212   : > { %10404 = vmatmul.mubr.msk.f32.gmra.mrb[2].mxu1 %vm395_vm1, %v12893_v38  ;;  %10908 = vmatmul.mubr.msk.f32.gmra.mrb[2].mxu0 %vm395_vm1, %v7132_v7  ;;  %v7137_v38 = vld [vmem:[%s11890_s26 + $0x66] sm:$0xff]  ;;  %v3698_v7 = vld [vmem:[%s11890_s26 + $0x5b] sm:$0xff] }
 0x213   : > { %10406 = vmatprep.mubr.msk.f32.mxu1 %vm395_vm1, %v12897_v10  ;;  %10910 = vmatprep.mubr.msk.f32.mxu0 %vm395_vm1, %v7133_v42  ;;  %v7138_v10 = vld [vmem:[%s11890_s26 + $0x6e] sm:$0xff] }
 0x214   : > { %v7568_v42 = vld [vmem:[%s11732_s19 + $0x6e] sm:$0xff] }
 0x216   : > { %10407 = vmatmul.mubr.msk.f32.gmra.mrb[4].mxu1 %vm395_vm1, %v12907_v25  ;;  %10911 = vmatmul.mubr.msk.f32.gmra.mrb[4].mxu0 %vm395_vm1, %v7134_v17  ;;  %v7139_v25 = vld [vmem:[%s11890_s26 + $0x76] sm:$0xff]  ;;  %v3699_v17 = vld [vmem:[%s11890_s26 + $0x63] sm:$0xff] }
 0x217   : > { %10409 = vmatprep.mubr.msk.f32.mxu1 %vm395_vm1, %v12911_v18  ;;  %10913 = vmatprep.mubr.msk.f32.mxu0 %vm395_vm1, %v7135_v39  ;;  %v7140_v18 = vld [vmem:[%s11890_s26 + $0x7e] sm:$0xff]  ;;  %v7569_v39 = vld [vmem:[%s11732_s19 + $0x76] sm:$0xff] }
 0x21a   : > { %10410 = vmatmul.mubr.msk.f32.gmra.mrb[6].mxu1 %vm395_vm1, %v12921_v11  ;;  %10914 = vmatmul.mubr.msk.f32.gmra.mrb[6].mxu0 %vm395_vm1, %v7136_v19  ;;  %v7141_v11 = vld [vmem:[%s11890_s26 + $0x86] sm:$0xff] }
 0x21b   : > { %10412 = vmatprep.mubr.msk.f32.mxu1 %vm395_vm1, %v12925_v33  ;;  %10916 = vmatprep.mubr.msk.f32.mxu0 %vm395_vm1, %v7137_v38  ;;  %v7142_v33 = vld [vmem:[%s11890_s26 + $0x8e] sm:$0xff]  ;;  %v7570_v38 = vld [vmem:[%s11732_s19 + $0x7e] sm:$0xff] }
 0x21c   : > { %v3700_v19 = vld [vmem:[%s11890_s26 + $0x6b] sm:$0xff] }
 0x21e   : > { %10413 = vmatmul.mubr.msk.f32.gmra.mrb[8].mxu1 %vm395_vm1, %v12935_v41  ;;  %10917 = vmatmul.mubr.msk.f32.gmra.mrb[8].mxu0 %vm395_vm1, %v7138_v10  ;;  %v7143_v41 = vld [vmem:[%s11890_s26 + $0x96] sm:$0xff] }
 0x21f   : > { %10415 = vmatprep.mubr.msk.f32.mxu1 %vm395_vm1, %v12939_v53  ;;  %10919 = vmatprep.mubr.msk.f32.mxu0 %vm395_vm1, %v7139_v25  ;;  %v7144_v53 = vld [vmem:[%s11890_s26 + $0x9e] sm:$0xff]  ;;  %v3701_v10 = vld [vmem:[%s11890_s26 + $0x73] sm:$0xff]  ;;  %v7571_v25 = vld [vmem:[%s11732_s19 + $0x86] sm:$0xff] }
 0x222   : > { %10416 = vmatmul.mubr.msk.f32.gmra.mrb[10].mxu1 %vm395_vm1, %v12949_v59  ;;  %10920 = vmatmul.mubr.msk.f32.gmra.mrb[10].mxu0 %vm395_vm1, %v7140_v18  ;;  %v7145_v59 = vld [vmem:[%s11890_s26 + $0xa6] sm:$0xff]  ;;  %v3702_v18 = vld [vmem:[%s11890_s26 + $0x7b] sm:$0xff] }
 0x223   : > { %10418 = vmatprep.mubr.msk.f32.mxu1 %vm395_vm1, %v12953_v61  ;;  %10922 = vmatprep.mubr.msk.f32.mxu0 %vm395_vm1, %v7141_v11  ;;  %v7146_v61 = vld [vmem:[%s11890_s26 + $0xae] sm:$0xff] }
 0x224   : > { %v7572_v11 = vld [vmem:[%s11732_s19 + $0x8e] sm:$0xff] }
 0x226   : > { %10419 = vmatmul.mubr.msk.f32.gmra.mrb[12].mxu1 %vm395_vm1, %v12963_v1  ;;  %10923 = vmatmul.mubr.msk.f32.gmra.mrb[12].mxu0 %vm395_vm1, %v7142_v33  ;;  %v7147_v1 = vld [vmem:[%s11890_s26 + $0xb6] sm:$0xff]  ;;  %v3703_v33 = vld [vmem:[%s11890_s26 + $0x83] sm:$0xff] }
 0x227   : > { %10421 = vmatprep.mubr.msk.f32.mxu1 %vm395_vm1, %v12967_v5  ;;  %10925 = vmatprep.mubr.msk.f32.mxu0 %vm395_vm1, %v7143_v41  ;;  %v7148_v5 = vld [vmem:[%s11890_s26 + $0xbe] sm:$0xff]  ;;  %v7573_v41 = vld [vmem:[%s11732_s19 + $0x96] sm:$0xff] }
 0x22a   : > { %10422 = vmatmul.mubr.msk.f32.gmra.mrb[14].mxu1 %vm395_vm1, %v12977_v60  ;;  %10926 = vmatmul.mubr.msk.f32.gmra.mrb[14].mxu0 %vm395_vm1, %v7144_v53  ;;  %v7149_v60 = vld [vmem:[%s11890_s26 + $0xc6] sm:$0xff] }
 0x22b   : > { %10424 = vmatprep.mubr.msk.f32.mxu1 %vm395_vm1, %v12981_v22  ;;  %10928 = vmatprep.mubr.msk.f32.mxu0 %vm395_vm1, %v7145_v59  ;;  %v7150_v22 = vld [vmem:[%s11890_s26 + $0xce] sm:$0xff]  ;;  %v7574_v59 = vld [vmem:[%s11732_s19 + $0x9e] sm:$0xff] }
 0x22c   : > { %v3704_v53 = vld [vmem:[%s11890_s26 + $0x8b] sm:$0xff] }
 0x22e   : > { %10425 = vmatmul.mubr.msk.f32.gmra.mrb[16].mxu1 %vm395_vm1, %v12991_v48  ;;  %10929 = vmatmul.mubr.msk.f32.gmra.mrb[16].mxu0 %vm395_vm1, %v7146_v61  ;;  %v7151_v48 = vld [vmem:[%s11890_s26 + $0xd6] sm:$0xff] }
 0x22f   : > { %10427 = vmatprep.mubr.msk.f32.mxu1 %vm395_vm1, %v12995_v31  ;;  %10931 = vmatprep.mubr.msk.f32.mxu0 %vm395_vm1, %v7147_v1  ;;  %v14344_v31 = vld [vmem:[#allocation3_spill] sm:$0xff]  ;;  %v3705_v61 = vld [vmem:[%s11890_s26 + $0x93] sm:$0xff] }
 0x230   : > { %v7575_v1 = vld [vmem:[%s11732_s19 + $0xa6] sm:$0xff] }
 0x232   : > { %10428 = vmatmul.mubr.msk.f32.gmra.mrb[18].mxu1 %vm395_vm1, %v13005_v47  ;;  %10932 = vmatmul.mubr.msk.f32.gmra.mrb[18].mxu0 %vm395_vm1, %v7148_v5  ;;  %v7152_v47 = vld [vmem:[%s11890_s26 + $0xde] sm:$0xff] }
 0x233   : > { %10430 = vmatprep.mubr.msk.f32.mxu1 %vm395_vm1, %v13009_v14  ;;  %10934 = vmatprep.mubr.msk.f32.mxu0 %vm395_vm1, %v7149_v60  ;;  %v14346_v14 = vld [vmem:[#allocation5_spill] sm:$0xff]  ;;  %v7576_v60 = vld [vmem:[%s11732_s19 + $0xae] sm:$0xff] }
 0x234   : > { %v3706_v5 = vld [vmem:[%s11890_s26 + $0x9b] sm:$0xff] }
 0x236   : > { %10431 = vmatmul.mubr.msk.f32.gmra.mrb[20].mxu1 %vm395_vm1, %v14343_v26  ;;  %10935 = vmatmul.mubr.msk.f32.gmra.mrb[20].mxu0 %vm395_vm1, %v7150_v22  ;;  %v3707_v22 = vld [vmem:[%s11890_s26 + $0xa3] sm:$0xff]  ;;  %v3708_v26 = vld [vmem:[%s11890_s26 + $0xab] sm:$0xff] }
 0x237   : > { %10433 = vmatprep.mubr.msk.f32.mxu1 %vm395_vm1, %v14344_v31  ;;  %10937 = vmatprep.mubr.msk.f32.mxu0 %vm395_vm1, %v7151_v48  ;;  %v7577_v48 = vld [vmem:[%s11732_s19 + $0xb6] sm:$0xff]  ;;  %v7578_v31 = vld [vmem:[%s11732_s19 + $0xbe] sm:$0xff] }
 0x23a   : > { %10434 = vmatmul.mubr.msk.f32.gmra.mrb[22].mxu1 %vm395_vm1, %v14345_v50  ;;  %10938 = vmatmul.mubr.msk.f32.gmra.mrb[22].mxu0 %vm395_vm1, %v7152_v47  ;;  %v3709_v47 = vld [vmem:[%s11890_s26 + $0xb3] sm:$0xff]  ;;  %v3710_v50 = vld [vmem:[%s11890_s26 + $0xbb] sm:$0xff] }
 0x23b   : > { %10436 = vmatprep.mubr.msk.f32.mxu1 %vm395_vm1, %v14346_v14  ;;  %10940 = vmatprep.mubr.msk.f32.mxu0 %vm395_vm1, %v7153_v24  ;;  %v7579_v24 = vld [vmem:[%s11732_s19 + $0xc6] sm:$0xff]  ;;  %v7580_v14 = vld [vmem:[%s11732_s19 + $0xce] sm:$0xff] }
 0x23e   : > { %10437 = vmatmul.mubr.msk.f32.gmra.mrb[24].mxu1 %vm395_vm1, %v14347_v15  ;;  %10941 = vmatmul.mubr.msk.f32.gmra.mrb[24].mxu0 %vm395_vm1, %v7154_v13  ;;  %v3711_v13 = vld [vmem:[%s11890_s26 + $0xc3] sm:$0xff]  ;;  %v3712_v15 = vld [vmem:[%s11890_s26 + $0xcb] sm:$0xff] }
 0x23f   : > { %10439 = vmatprep.mubr.msk.f32.mxu1 %vm395_vm1, %v14348_v4  ;;  %10943 = vmatprep.mubr.msk.f32.mxu0 %vm395_vm1, %v7155_v54  ;;  %v7581_v54 = vld [vmem:[%s11732_s19 + $0xd6] sm:$0xff]  ;;  %v7582_v4 = vld [vmem:[%s11732_s19 + $0xde] sm:$0xff] }
 0x242   : > { %10440 = vmatmul.mubr.msk.f32.gmra.mrb[26].mxu1 %vm395_vm1, %v14349_v62  ;;  %10944 = vmatmul.mubr.msk.f32.gmra.mrb[26].mxu0 %vm395_vm1, %v7156_v23  ;;  %v3713_v23 = vld [vmem:[%s11890_s26 + $0xd3] sm:$0xff]  ;;  %v3714_v62 = vld [vmem:[%s11890_s26 + $0xdb] sm:$0xff] }
 0x243   : > { %10442 = vmatprep.mubr.msk.f32.mxu1 %vm395_vm1, %v14350_v2  ;;  %10946 = vmatprep.mubr.msk.f32.mxu0 %vm395_vm1, %v7157_v58  ;;  %v7583_v58 = vld [vmem:[%s11732_s19 + $0xe6] sm:$0xff]  ;;  %v7584_v2 = vld [vmem:[%s11732_s19 + $0xee] sm:$0xff] }
 0x246   : > { %10443 = vmatmul.mubr.msk.f32.gmra.mrb[28].mxu1 %vm395_vm1, %v13075_v3  ;;  %10947 = vmatmul.mubr.msk.f32.gmra.mrb[28].mxu0 %vm395_vm1, %v7158_v6  ;;  %v3292_v3 = vld [vmem:[%s11732_s19 + $0x11a] sm:$0xff]  ;;  %v3715_v6 = vld [vmem:[%s11890_s26 + $0xe3] sm:$0xff] }
 0x247   : > { %10445 = vmatprep.mubr.msk.f32.mxu1 %vm395_vm1, %v14351_v16  ;;  %10949 = vmatprep.mubr.msk.f32.mxu0 %vm395_vm1, %v7159_v12  ;;  %v7585_v12 = vld [vmem:[%s11732_s19 + $0xf6] sm:$0xff]  ;;  %v3716_v16 = vld [vmem:[%s11890_s26 + $0xeb] sm:$0xff] }
 0x24a   : > { %10446 = vmatmul.mubr.msk.f32.gmra.mrb[30].mxu1 %vm395_vm1, %v14352_v32  ;;  %10950 = vmatmul.mubr.msk.f32.gmra.mrb[30].mxu0 %vm395_vm1, %v7160_v20  ;;  %v7586_v20 = vld [vmem:[%s11732_s19 + $0xfe] sm:$0xff]  ;;  %v7587_v32 = vld [vmem:[%s11732_s19 + $0x106] sm:$0xff] }
 0x24b   : > { %10448 = vmatprep.mubr.msk.f32.mxu1 %vm395_vm1, %v13093_v55  ;;  %10952 = vmatprep.mubr.msk.f32.mxu0 %vm395_vm1, %v7161_v28  ;;  %v7164_v55 = vld [vmem:[%s11890_s26 + $0x13e] sm:$0x3f]  ;;  %v3717_v28 = vld [vmem:[%s11890_s26 + $0xf3] sm:$0xff] }
 0x24e   : > { %10449 = vmatmul.mubr.msk.f32.gmra.mrb[32].mxu1 %vm395_vm1, %v3292_v3  ;;  %10953 = vmatmul.mubr.msk.f32.gmra.mrb[32].mxu0 %vm395_vm1, %v7162_v36  ;;  %v3718_v3 = vld [vmem:[%s11890_s26 + $0xfb] sm:$0xff]  ;;  %v7588_v36 = vld [vmem:[%s11732_s19 + $0x10e] sm:$0xff] }
 0x24f   : > { %10451 = vmatprep.mubr.msk.f32.mxu1 %vm395_vm1, %v3293_v40  ;;  %10955 = vmatprep.mubr.msk.f32.mxu0 %vm395_vm1, %v7163_v52  ;;  %v3719_v40 = vld [vmem:[%s11890_s26 + $0x103] sm:$0xff]  ;;  %v7589_v52 = vld [vmem:[%s11732_s19 + $0x116] sm:$0xff] }
 0x252   : > { %10452 = vmatmul.mubr.msk.f32.gmra.mrb[34].mxu1 %vm395_vm1, %v3294_v56  ;;  %10956 = vmatmul.mubr.msk.f32.gmra.mrb[34].mxu0 %vm395_vm1, %v7164_v55  ;;  %v3720_v56 = vld [vmem:[%s11890_s26 + $0x10b] sm:$0xff]  ;;  %v7590_v55 = vld [vmem:[%s11732_s19 + $0x11e] sm:$0xff] }
 0x253   : > { %10456 = vmatprep.mubr.msk.f32.mxu1 %vm395_vm1, %v3689_v0  ;;  %10960 = vmatprep.mubr.msk.f32.mxu0 %vm395_vm1, %v7559_v8  ;;  %v3721_v0 = vld [vmem:[%s11890_s26 + $0x113] sm:$0xff]  ;;  %v7591_v8 = vld [vmem:[%s11732_s19 + $0x126] sm:$0xff] }
 0x256   : > { %10457 = vmatmul.mubr.msk.f32.vlgmr.msra.gmra.mrb[0].mxu1 %vm395_vm1, %v3690_v27  ;;  %10961 = vmatmul.mubr.msk.f32.vlgmr.msra.gmra.mrb[0].mxu0 %vm395_vm1, %v7560_v30  ;;  %v3722_v27 = vld [vmem:[%s11890_s26 + $0x11b] sm:$0xff]  ;;  %v7592_v30 = vld [vmem:[%s11732_s19 + $0x12e] sm:$0xff] }
 0x257   : > { %10459 = vmatprep.mubr.msk.f32.mxu1 %vm395_vm1, %v3691_v46  ;;  %10963 = vmatprep.mubr.msk.f32.mxu0 %vm395_vm1, %v7561_v29  ;;  %v3723_v46 = vld [vmem:[%s11890_s26 + $0x123] sm:$0xff]  ;;  %v7593_v29 = vld [vmem:[%s11732_s19 + $0x136] sm:$0xff] }
 0x25a   : > { %10460 = vmatmul.mubr.msk.f32.gmra.mrb[2].mxu1 %vm395_vm1, %v3692_v35  ;;  %10964 = vmatmul.mubr.msk.f32.gmra.mrb[2].mxu0 %vm395_vm1, %v7562_v37  ;;  %v3724_v35 = vld [vmem:[%s11890_s26 + $0x12b] sm:$0x3f]  ;;  %v7594_v37 = vld [vmem:[%s11732_s19 + $0x13e] sm:$0x3f] }
 0x25b   : > { %10462 = vmatprep.mubr.msk.f32.mxu1 %vm395_vm1, %v3693_v43  ;;  %10966 = vmatprep.mubr.msk.f32.mxu0 %vm395_vm1, %v7563_v45  ;;  %v11648_v43 = vmov 0.0   ;;  %v13650_v45 = vld [vmem:[%s14255_s5 + $0x13] sm:$0xff] }
 0x25c   : > { %8035 = vst.msk [vmem:[%s13564_s17 + $0x18] sm:$0xff] %vm395_vm1, %v11648_v43  ;;  %8036 = vst.msk [vmem:[%s13564_s17 + $0x20] sm:$0xff] %vm395_vm1, %v11648_v43 }
 0x25d   : > { %8032 = vst.msk [vmem:[%s13564_s17] sm:$0xff] %vm395_vm1, %v11648_v43  ;;  %8033 = vst.msk [vmem:[%s13564_s17 + $0x8] sm:$0xff] %vm395_vm1, %v11648_v43 }
 0x25e   : > { %10463 = vmatmul.mubr.msk.f32.gmra.mrb[4].mxu1 %vm395_vm1, %v3694_v49  ;;  %10967 = vmatmul.mubr.msk.f32.gmra.mrb[4].mxu0 %vm395_vm1, %v7564_v51  ;;  %8034 = vst.msk [vmem:[%s13564_s17 + $0x10] sm:$0xff] %vm395_vm1, %v11648_v43  ;;  %8037 = vst.msk [vmem:[%s13564_s17 + $0x28] sm:$0xff] %vm395_vm1, %v11648_v43  ;;  %v13655_v49 = vld [vmem:[%s14255_s5 + $0x1b] sm:$0xff]  ;;  %v13660_v51 = vld [vmem:[%s14255_s5 + $0x23] sm:$0xff] }
 0x25f   : > { %10465 = vmatprep.mubr.msk.f32.mxu1 %vm395_vm1, %v3695_v44  ;;  %10969 = vmatprep.mubr.msk.f32.mxu0 %vm395_vm1, %v7565_v34  ;;  %8038 = vst.msk [vmem:[%s13564_s17 + $0x30] sm:$0xff] %vm395_vm1, %v11648_v43  ;;  %8039 = vst.msk [vmem:[%s13564_s17 + $0x38] sm:$0xff] %vm395_vm1, %v11648_v43  ;;  %v13665_v44 = vld [vmem:[%s14255_s5 + $0x2b] sm:$0xff]  ;;  %v13670_v34 = vld [vmem:[%s14255_s5 + $0x33] sm:$0xff] }
 0x260   : > { %8040 = vst.msk [vmem:[%s13564_s17 + $0x40] sm:$0xff] %vm395_vm1, %v11648_v43  ;;  %8041 = vst.msk [vmem:[%s13564_s17 + $0x48] sm:$0xff] %vm395_vm1, %v11648_v43 }
 0x261   : > { %8042 = vst.msk [vmem:[%s13564_s17 + $0x50] sm:$0xff] %vm395_vm1, %v11648_v43  ;;  %8043 = vst.msk [vmem:[%s13564_s17 + $0x58] sm:$0xff] %vm395_vm1, %v11648_v43 }
 0x262   : > { %10466 = vmatmul.mubr.msk.f32.gmra.mrb[6].mxu1 %vm395_vm1, %v3696_v57  ;;  %10970 = vmatmul.mubr.msk.f32.gmra.mrb[6].mxu0 %vm395_vm1, %v7566_v9  ;;  %8044 = vst.msk [vmem:[%s13564_s17 + $0x60] sm:$0xff] %vm395_vm1, %v11648_v43  ;;  %8045 = vst.msk [vmem:[%s13564_s17 + $0x68] sm:$0xff] %vm395_vm1, %v11648_v43  ;;  %v13675_v57 = vld [vmem:[%s14255_s5 + $0x3b] sm:$0xff]  ;;  %v13680_v9 = vld [vmem:[%s14255_s5 + $0x43] sm:$0xff] }
 0x263   : > { %10468 = vmatprep.mubr.msk.f32.mxu1 %vm395_vm1, %v3697_v21  ;;  %10972 = vmatprep.mubr.msk.f32.mxu0 %vm395_vm1, %v7567_v63  ;;  %8046 = vst.msk [vmem:[%s13564_s17 + $0x70] sm:$0xff] %vm395_vm1, %v11648_v43  ;;  %8047 = vst.msk [vmem:[%s13564_s17 + $0x78] sm:$0xff] %vm395_vm1, %v11648_v43  ;;  %v13685_v21 = vld [vmem:[%s14255_s5 + $0x4b] sm:$0xff]  ;;  %v13690_v63 = vld [vmem:[%s14255_s5 + $0x53] sm:$0xff] }
 0x264   : > { %8048 = vst.msk [vmem:[%s13564_s17 + $0x80] sm:$0xff] %vm395_vm1, %v11648_v43  ;;  %8049 = vst.msk [vmem:[%s13564_s17 + $0x88] sm:$0xff] %vm395_vm1, %v11648_v43 }
 0x265   : > { %8050 = vst.msk [vmem:[%s13564_s17 + $0x90] sm:$0xff] %vm395_vm1, %v11648_v43  ;;  %8051 = vst.msk [vmem:[%s13564_s17 + $0x98] sm:$0xff] %vm395_vm1, %v11648_v43 }
 0x266   : > { %10469 = vmatmul.mubr.msk.f32.gmra.mrb[8].mxu1 %vm395_vm1, %v3698_v7  ;;  %10973 = vmatmul.mubr.msk.f32.gmra.mrb[8].mxu0 %vm395_vm1, %v7568_v42  ;;  %8052 = vst.msk [vmem:[%s13564_s17 + $0xa0] sm:$0xff] %vm395_vm1, %v11648_v43  ;;  %8053 = vst.msk [vmem:[%s13564_s17 + $0xa8] sm:$0xff] %vm395_vm1, %v11648_v43  ;;  %v13695_v7 = vld [vmem:[%s14255_s5 + $0x5b] sm:$0xff]  ;;  %v13700_v42 = vld [vmem:[%s14255_s5 + $0x63] sm:$0xff] }
 0x267   : > { %10471 = vmatprep.mubr.msk.f32.mxu1 %vm395_vm1, %v3699_v17  ;;  %10975 = vmatprep.mubr.msk.f32.mxu0 %vm395_vm1, %v7569_v39  ;;  %8054 = vst.msk [vmem:[%s13564_s17 + $0xb0] sm:$0xff] %vm395_vm1, %v11648_v43  ;;  %8055 = vst.msk [vmem:[%s13564_s17 + $0xb8] sm:$0xff] %vm395_vm1, %v11648_v43  ;;  %v13705_v17 = vld [vmem:[%s14255_s5 + $0x6b] sm:$0xff]  ;;  %v13710_v39 = vld [vmem:[%s14255_s5 + $0x73] sm:$0xff] }
 0x268   : > { %8056 = vst.msk [vmem:[%s13564_s17 + $0xc0] sm:$0xff] %vm395_vm1, %v11648_v43  ;;  %8057 = vst.msk [vmem:[%s13564_s17 + $0xc8] sm:$0xff] %vm395_vm1, %v11648_v43 }
 0x269   : > { %8058 = vst.msk [vmem:[%s13564_s17 + $0xd0] sm:$0xff] %vm395_vm1, %v11648_v43  ;;  %8059 = vst.msk [vmem:[%s13564_s17 + $0xd8] sm:$0xff] %vm395_vm1, %v11648_v43 }
 0x26a   : > { %10472 = vmatmul.mubr.msk.f32.gmra.mrb[10].mxu1 %vm395_vm1, %v3700_v19  ;;  %10976 = vmatmul.mubr.msk.f32.gmra.mrb[10].mxu0 %vm395_vm1, %v7570_v38  ;;  %8060 = vst.msk [vmem:[%s13564_s17 + $0xe0] sm:$0xff] %vm395_vm1, %v11648_v43  ;;  %8061 = vst.msk [vmem:[%s13564_s17 + $0xe8] sm:$0xff] %vm395_vm1, %v11648_v43  ;;  %v13715_v19 = vld [vmem:[%s14255_s5 + $0x7b] sm:$0xff]  ;;  %v13720_v38 = vld [vmem:[%s14255_s5 + $0x83] sm:$0xff] }
 0x26b   : > { %10474 = vmatprep.mubr.msk.f32.mxu1 %vm395_vm1, %v3701_v10  ;;  %10978 = vmatprep.mubr.msk.f32.mxu0 %vm395_vm1, %v7571_v25  ;;  %8062 = vst.msk [vmem:[%s13564_s17 + $0xf0] sm:$0xff] %vm395_vm1, %v11648_v43  ;;  %8063 = vst.msk [vmem:[%s13564_s17 + $0xf8] sm:$0xff] %vm395_vm1, %v11648_v43  ;;  %v13725_v10 = vld [vmem:[%s14255_s5 + $0x8b] sm:$0xff]  ;;  %v13730_v25 = vld [vmem:[%s14255_s5 + $0x93] sm:$0xff] }
 0x26c   : > { %8064 = vst.msk [vmem:[%s13564_s17 + $0x100] sm:$0xff] %vm395_vm1, %v11648_v43  ;;  %8065 = vst.msk [vmem:[%s13564_s17 + $0x108] sm:$0xff] %vm395_vm1, %v11648_v43 }
 0x26d   : > { %8066 = vst.msk [vmem:[%s13564_s17 + $0x110] sm:$0xff] %vm395_vm1, %v11648_v43  ;;  %8067 = vst.msk [vmem:[%s13564_s17 + $0x118] sm:$0xff] %vm395_vm1, %v11648_v43 }
 0x26e   : > { %10475 = vmatmul.mubr.msk.f32.gmra.mrb[12].mxu1 %vm395_vm1, %v3702_v18  ;;  %10979 = vmatmul.mubr.msk.f32.gmra.mrb[12].mxu0 %vm395_vm1, %v7572_v11  ;;  %8068 = vst.msk [vmem:[%s13564_s17 + $0x120] sm:$0xff] %vm395_vm1, %v11648_v43  ;;  %8069 = vst.msk [vmem:[%s13564_s17 + $0x128] sm:$0xff] %vm395_vm1, %v11648_v43  ;;  %v13735_v18 = vld [vmem:[%s14255_s5 + $0x9b] sm:$0xff]  ;;  %v13740_v11 = vld [vmem:[%s14255_s5 + $0xa3] sm:$0xff] }
 0x26f   : > { %10477 = vmatprep.mubr.msk.f32.mxu1 %vm395_vm1, %v3703_v33  ;;  %10981 = vmatprep.mubr.msk.f32.mxu0 %vm395_vm1, %v7573_v41  ;;  %8070 = vst.msk [vmem:[%s13564_s17 + $0x130] sm:$0xff] %vm395_vm1, %v11648_v43  ;;  %8071 = vst.msk [vmem:[%s13564_s17 + $0x138] sm:$0xff] %vm395_vm1, %v11648_v43  ;;  %v13745_v33 = vld [vmem:[%s14255_s5 + $0xab] sm:$0xff]  ;;  %v13750_v41 = vld [vmem:[%s14255_s5 + $0xb3] sm:$0xff] }
 0x270   : > { %8073 = vst.msk [vmem:[%s13564_s17 + $0x140] sm:$0xf] %vm8072_vm2, %v11648_v43 }
 0x272   : > { %10478 = vmatmul.mubr.msk.f32.gmra.mrb[14].mxu1 %vm395_vm1, %v3704_v53  ;;  %10982 = vmatmul.mubr.msk.f32.gmra.mrb[14].mxu0 %vm395_vm1, %v7574_v59  ;;  %v13755_v53 = vld [vmem:[%s14255_s5 + $0xbb] sm:$0xff]  ;;  %v13760_v59 = vld [vmem:[%s14255_s5 + $0xc3] sm:$0xff] }
 0x273   : > { %10480 = vmatprep.mubr.msk.f32.mxu1 %vm395_vm1, %v3705_v61  ;;  %10984 = vmatprep.mubr.msk.f32.mxu0 %vm395_vm1, %v7575_v1  ;;  %v13765_v61 = vld [vmem:[%s14255_s5 + $0xcb] sm:$0xff]  ;;  %v13770_v1 = vld [vmem:[%s14255_s5 + $0xd3] sm:$0xff] }
 0x276   : > { %10481 = vmatmul.mubr.msk.f32.gmra.mrb[16].mxu1 %vm395_vm1, %v3706_v5  ;;  %10985 = vmatmul.mubr.msk.f32.gmra.mrb[16].mxu0 %vm395_vm1, %v7576_v60  ;;  %v13775_v5 = vld [vmem:[%s14255_s5 + $0xdb] sm:$0xff]  ;;  %v13780_v60 = vld [vmem:[%s14255_s5 + $0xe3] sm:$0xff] }
 0x277   : > { %10483 = vmatprep.mubr.msk.f32.mxu1 %vm395_vm1, %v3707_v22  ;;  %10987 = vmatprep.mubr.msk.f32.mxu0 %vm395_vm1, %v7577_v48  ;;  %v13785_v22 = vld [vmem:[%s14255_s5 + $0xeb] sm:$0xff]  ;;  %v13790_v48 = vld [vmem:[%s14255_s5 + $0xf3] sm:$0xff] }
 0x27a   : > { %10484 = vmatmul.mubr.msk.f32.gmra.mrb[18].mxu1 %vm395_vm1, %v3708_v26  ;;  %10988 = vmatmul.mubr.msk.f32.gmra.mrb[18].mxu0 %vm395_vm1, %v7578_v31  ;;  %v13795_v26 = vld [vmem:[%s14255_s5 + $0xfb] sm:$0xff]  ;;  %v13800_v31 = vld [vmem:[%s14255_s5 + $0x103] sm:$0xff] }
 0x27b   : > { %10486 = vmatprep.mubr.msk.f32.mxu1 %vm395_vm1, %v3709_v47  ;;  %10990 = vmatprep.mubr.msk.f32.mxu0 %vm395_vm1, %v7579_v24  ;;  %v13805_v47 = vld [vmem:[%s14255_s5 + $0x10b] sm:$0xff]  ;;  %v13810_v24 = vld [vmem:[%s14255_s5 + $0x113] sm:$0xff] }
 0x27e   : > { %10487 = vmatmul.mubr.msk.f32.gmra.mrb[20].mxu1 %vm395_vm1, %v3710_v50  ;;  %10991 = vmatmul.mubr.msk.f32.gmra.mrb[20].mxu0 %vm395_vm1, %v7580_v14  ;;  %v13815_v50 = vld [vmem:[%s14255_s5 + $0x11b] sm:$0xff]  ;;  %v13820_v14 = vld [vmem:[%s14255_s5 + $0x123] sm:$0xff] }
 0x27f   : > { %10489 = vmatprep.mubr.msk.f32.mxu1 %vm395_vm1, %v3711_v13  ;;  %10993 = vmatprep.mubr.msk.f32.mxu0 %vm395_vm1, %v7581_v54  ;;  %v13825_v13 = vld [vmem:[%s14255_s5 + $0x12b] sm:$0x3f] }
 0x282   : > { %10490 = vmatmul.mubr.msk.f32.gmra.mrb[22].mxu1 %vm395_vm1, %v3712_v15  ;;  %10994 = vmatmul.mubr.msk.f32.gmra.mrb[22].mxu0 %vm395_vm1, %v7582_v4  ;;  %v13830_v4 = vld [vmem:[%s14254_s4] ss:$0 sm:$0xff] }
 0x283   : > { %10492 = vmatprep.mubr.msk.f32.mxu1 %vm395_vm1, %v3713_v23  ;;  %10996 = vmatprep.mubr.msk.f32.mxu0 %vm395_vm1, %v7583_v58 }
 0x286   : > { %10493 = vmatmul.mubr.msk.f32.gmra.mrb[24].mxu1 %vm395_vm1, %v3714_v62  ;;  %10997 = vmatmul.mubr.msk.f32.gmra.mrb[24].mxu0 %vm395_vm1, %v7584_v2 }
 0x287   : > { %10495 = vmatprep.mubr.msk.f32.mxu1 %vm395_vm1, %v3715_v6  ;;  %10999 = vmatprep.mubr.msk.f32.mxu0 %vm395_vm1, %v7585_v12 }
 0x28a   : > { %10496 = vmatmul.mubr.msk.f32.gmra.mrb[26].mxu1 %vm395_vm1, %v3716_v16  ;;  %11000 = vmatmul.mubr.msk.f32.gmra.mrb[26].mxu0 %vm395_vm1, %v7586_v20 }
 0x28b   : > { %10498 = vmatprep.mubr.msk.f32.mxu1 %vm395_vm1, %v3717_v28  ;;  %11002 = vmatprep.mubr.msk.f32.mxu0 %vm395_vm1, %v7587_v32 }
 0x28e   : > { %10499 = vmatmul.mubr.msk.f32.gmra.mrb[28].mxu1 %vm395_vm1, %v3718_v3  ;;  %11003 = vmatmul.mubr.msk.f32.gmra.mrb[28].mxu0 %vm395_vm1, %v7588_v36 }
 0x28f   : > { %10501 = vmatprep.mubr.msk.f32.mxu1 %vm395_vm1, %v3719_v40  ;;  %11005 = vmatprep.mubr.msk.f32.mxu0 %vm395_vm1, %v7589_v52 }
 0x292   : > { %10502 = vmatmul.mubr.msk.f32.gmra.mrb[30].mxu1 %vm395_vm1, %v3720_v56  ;;  %11006 = vmatmul.mubr.msk.f32.gmra.mrb[30].mxu0 %vm395_vm1, %v7590_v55 }
 0x293   : > { %10504 = vmatprep.mubr.msk.f32.mxu1 %vm395_vm1, %v3721_v0  ;;  %11008 = vmatprep.mubr.msk.f32.mxu0 %vm395_vm1, %v7591_v8 }
 0x296   : > { %10505 = vmatmul.mubr.msk.f32.gmra.mrb[32].mxu1 %vm395_vm1, %v3722_v27  ;;  %11009 = vmatmul.mubr.msk.f32.gmra.mrb[32].mxu0 %vm395_vm1, %v7592_v30 }
 0x297   : > { %10507 = vmatprep.mubr.msk.f32.mxu1 %vm395_vm1, %v3723_v46  ;;  %11011 = vmatprep.mubr.msk.f32.mxu0 %vm395_vm1, %v7593_v29 }
 0x29a   : > { %10508 = vmatmul.mubr.msk.f32.gmra.mrb[34].mxu1 %vm395_vm1, %v3724_v35  ;;  %11012 = vmatmul.mubr.msk.f32.gmra.mrb[34].mxu0 %vm395_vm1, %v7594_v37 }
 0x329   : > { %v10458_v54 = vpop.f32.mrb[0].mxu1  ;;  %v10962_v15 = vpop.f32.mrb[0].mxu0 }
 0x32a   : > { %v11014_v23 = vadd.f32 %v10962_v15, %v10458_v54  ;;  %v3904_v58 = vpop.f32.mrb[1].mxu1  ;;  %v7774_v62 = vpop.f32.mrb[1].mxu0 }
 0x32b   : > { %v11015_v2 = vadd.f32 %v7774_v62, %v3904_v58 }
 0x32c   : > { %v13833_v6 = vadd.f32 %v11014_v23, %v13830_v4 }
 0x32d   : > { %v13836_v12 = vadd.f32 %v11015_v2, %v13830_v4  ;;  %v10461_v16 = vpop.f32.mrb[2].mxu1  ;;  %v10965_v20 = vpop.f32.mrb[2].mxu0 }
 0x32e   : > { %8075 = vst.msk [vmem:[%s13564_s17 + $0x1b] sm:$0xff] %vm395_vm1, %v13833_v6  ;;  %v11016_v28 = vadd.f32 %v10965_v20, %v10461_v16  ;;  %v3914_v32 = vpop.f32.mrb[3].mxu1  ;;  %v7784_v3 = vpop.f32.mrb[3].mxu0 }
 0x32f   : > { %8074 = vst.msk [vmem:[%s13564_s17 + $0x13] sm:$0xff] %vm395_vm1, %v13836_v12  ;;  %v11017_v36 = vadd.f32 %v7784_v3, %v3914_v32 }
 0x330   : > { %v13845_v40 = vadd.f32 %v11016_v28, %v13830_v4 }
 0x331   : > { %v13848_v52 = vadd.f32 %v11017_v36, %v13830_v4  ;;  %v10464_v56 = vpop.f32.mrb[4].mxu1  ;;  %v10968_v55 = vpop.f32.mrb[4].mxu0 }
 0x332   : > { %8077 = vst.msk [vmem:[%s13564_s17 + $0x2b] sm:$0xff] %vm395_vm1, %v13845_v40  ;;  %v11018_v0 = vadd.f32 %v10968_v55, %v10464_v56  ;;  %v3924_v8 = vpop.f32.mrb[5].mxu1  ;;  %v7794_v27 = vpop.f32.mrb[5].mxu0 }
 0x333   : > { %8076 = vst.msk [vmem:[%s13564_s17 + $0x23] sm:$0xff] %vm395_vm1, %v13848_v52  ;;  %v11019_v30 = vadd.f32 %v7794_v27, %v3924_v8 }
 0x334   : > { %v13857_v46 = vadd.f32 %v11018_v0, %v13830_v4 }
 0x335   : > { %v13860_v29 = vadd.f32 %v11019_v30, %v13830_v4  ;;  %v10467_v35 = vpop.f32.mrb[6].mxu1  ;;  %v10971_v37 = vpop.f32.mrb[6].mxu0 }
 0x336   : > { %8079 = vst.msk [vmem:[%s13564_s17 + $0x3b] sm:$0xff] %vm395_vm1, %v13857_v46  ;;  %v11020_v43 = vadd.f32 %v10971_v37, %v10467_v35  ;;  %v3934_v54 = vpop.f32.mrb[7].mxu1  ;;  %v7804_v15 = vpop.f32.mrb[7].mxu0 }
 0x337   : > { %8078 = vst.msk [vmem:[%s13564_s17 + $0x33] sm:$0xff] %vm395_vm1, %v13860_v29  ;;  %v11021_v23 = vadd.f32 %v7804_v15, %v3934_v54 }
 0x338   : > { %v13869_v58 = vadd.f32 %v11020_v43, %v13830_v4 }
 0x339   : > { %v13872_v62 = vadd.f32 %v11021_v23, %v13830_v4  ;;  %v10470_v2 = vpop.f32.mrb[8].mxu1  ;;  %v10974_v16 = vpop.f32.mrb[8].mxu0 }
 0x33a   : > { %8081 = vst.msk [vmem:[%s13564_s17 + $0x4b] sm:$0xff] %vm395_vm1, %v13869_v58  ;;  %v11022_v20 = vadd.f32 %v10974_v16, %v10470_v2  ;;  %v3944_v28 = vpop.f32.mrb[9].mxu1  ;;  %v7814_v32 = vpop.f32.mrb[9].mxu0 }
 0x33b   : > { %8080 = vst.msk [vmem:[%s13564_s17 + $0x43] sm:$0xff] %vm395_vm1, %v13872_v62  ;;  %v11023_v3 = vadd.f32 %v7814_v32, %v3944_v28 }
 0x33c   : > { %v13881_v36 = vadd.f32 %v11022_v20, %v13830_v4 }
 0x33d   : > { %v13884_v56 = vadd.f32 %v11023_v3, %v13830_v4  ;;  %v10473_v55 = vpop.f32.mrb[10].mxu1  ;;  %v10977_v0 = vpop.f32.mrb[10].mxu0 }
 0x33e   : > { %8083 = vst.msk [vmem:[%s13564_s17 + $0x5b] sm:$0xff] %vm395_vm1, %v13881_v36  ;;  %v11024_v8 = vadd.f32 %v10977_v0, %v10473_v55  ;;  %v3954_v27 = vpop.f32.mrb[11].mxu1  ;;  %v7824_v30 = vpop.f32.mrb[11].mxu0 }
 0x33f   : > { %8082 = vst.msk [vmem:[%s13564_s17 + $0x53] sm:$0xff] %vm395_vm1, %v13884_v56  ;;  %v11025_v35 = vadd.f32 %v7824_v30, %v3954_v27 }
 0x340   : > { %v13893_v37 = vadd.f32 %v11024_v8, %v13830_v4 }
 0x341   : > { %v13896_v43 = vadd.f32 %v11025_v35, %v13830_v4  ;;  %v10476_v54 = vpop.f32.mrb[12].mxu1  ;;  %v10980_v15 = vpop.f32.mrb[12].mxu0 }
 0x342   : > { %8085 = vst.msk [vmem:[%s13564_s17 + $0x6b] sm:$0xff] %vm395_vm1, %v13893_v37  ;;  %v11026_v23 = vadd.f32 %v10980_v15, %v10476_v54  ;;  %v3964_v2 = vpop.f32.mrb[13].mxu1  ;;  %v7834_v16 = vpop.f32.mrb[13].mxu0 }
 0x343   : > { %8084 = vst.msk [vmem:[%s13564_s17 + $0x63] sm:$0xff] %vm395_vm1, %v13896_v43  ;;  %v11027_v20 = vadd.f32 %v7834_v16, %v3964_v2 }
 0x344   : > { %v13905_v28 = vadd.f32 %v11026_v23, %v13830_v4 }
 0x345   : > { %v13908_v32 = vadd.f32 %v11027_v20, %v13830_v4  ;;  %v10479_v3 = vpop.f32.mrb[14].mxu1  ;;  %v10983_v55 = vpop.f32.mrb[14].mxu0 }
 0x346   : > { %8087 = vst.msk [vmem:[%s13564_s17 + $0x7b] sm:$0xff] %vm395_vm1, %v13905_v28  ;;  %v11028_v0 = vadd.f32 %v10983_v55, %v10479_v3  ;;  %v3974_v8 = vpop.f32.mrb[15].mxu1  ;;  %v7844_v27 = vpop.f32.mrb[15].mxu0 }
 0x347   : > { %8086 = vst.msk [vmem:[%s13564_s17 + $0x73] sm:$0xff] %vm395_vm1, %v13908_v32  ;;  %v11029_v30 = vadd.f32 %v7844_v27, %v3974_v8 }
 0x348   : > { %v13917_v35 = vadd.f32 %v11028_v0, %v13830_v4 }
 0x349   : > { %v13920_v54 = vadd.f32 %v11029_v30, %v13830_v4  ;;  %v10482_v15 = vpop.f32.mrb[16].mxu1  ;;  %v10986_v23 = vpop.f32.mrb[16].mxu0 }
 0x34a   : > { %8089 = vst.msk [vmem:[%s13564_s17 + $0x8b] sm:$0xff] %vm395_vm1, %v13917_v35  ;;  %v11030_v2 = vadd.f32 %v10986_v23, %v10482_v15  ;;  %v3984_v16 = vpop.f32.mrb[17].mxu1  ;;  %v7854_v20 = vpop.f32.mrb[17].mxu0 }
 0x34b   : > { %14353 = vst [vmem:[#allocation2_spill] sm:$0xff] %v13920_v54  ;;  %8088 = vst.msk [vmem:[%s13564_s17 + $0x83] sm:$0xff] %vm395_vm1, %v13920_v54  ;;  %v11031_v3 = vadd.f32 %v7854_v20, %v3984_v16 }
 0x34c   : > { %v13929_v55 = vadd.f32 %v11030_v2, %v13830_v4 }
 0x34d   : > { %v13932_v0 = vadd.f32 %v11031_v3, %v13830_v4  ;;  %v10485_v8 = vpop.f32.mrb[18].mxu1  ;;  %v10989_v27 = vpop.f32.mrb[18].mxu0 }
 0x34e   : > { %14354 = vst [vmem:[#allocation3_spill] sm:$0xff] %v13929_v55  ;;  %8091 = vst.msk [vmem:[%s13564_s17 + $0x9b] sm:$0xff] %vm395_vm1, %v13929_v55  ;;  %v11032_v30 = vadd.f32 %v10989_v27, %v10485_v8  ;;  %v3994_v15 = vpop.f32.mrb[19].mxu1  ;;  %v7864_v23 = vpop.f32.mrb[19].mxu0 }
 0x34f   : > { %14355 = vst [vmem:[#allocation4_spill] sm:$0xff] %v13932_v0  ;;  %8090 = vst.msk [vmem:[%s13564_s17 + $0x93] sm:$0xff] %vm395_vm1, %v13932_v0  ;;  %v11033_v16 = vadd.f32 %v7864_v23, %v3994_v15 }
 0x350   : > { %v13941_v2 = vadd.f32 %v11032_v30, %v13830_v4 }
 0x351   : > { %v13944_v20 = vadd.f32 %v11033_v16, %v13830_v4  ;;  %v10488_v3 = vpop.f32.mrb[20].mxu1  ;;  %v10992_v54 = vpop.f32.mrb[20].mxu0 }
 0x352   : > { %14356 = vst [vmem:[#allocation5_spill] sm:$0xff] %v13941_v2  ;;  %8093 = vst.msk [vmem:[%s13564_s17 + $0xab] sm:$0xff] %vm395_vm1, %v13941_v2  ;;  %v11034_v8 = vadd.f32 %v10992_v54, %v10488_v3  ;;  %v4004_v27 = vpop.f32.mrb[21].mxu1  ;;  %v7874_v55 = vpop.f32.mrb[21].mxu0 }
 0x353   : > { %14357 = vst [vmem:[#allocation6_spill] sm:$0xff] %v13944_v20  ;;  %8092 = vst.msk [vmem:[%s13564_s17 + $0xa3] sm:$0xff] %vm395_vm1, %v13944_v20  ;;  %v11035_v15 = vadd.f32 %v7874_v55, %v4004_v27 }
 0x354   : > { %v13953_v30 = vadd.f32 %v11034_v8, %v13830_v4 }
 0x355   : > { %v13956_v23 = vadd.f32 %v11035_v15, %v13830_v4  ;;  %v10491_v16 = vpop.f32.mrb[22].mxu1  ;;  %v10995_v0 = vpop.f32.mrb[22].mxu0 }
 0x356   : > { %14358 = vst [vmem:[#allocation7_spill] sm:$0xff] %v13953_v30  ;;  %8095 = vst.msk [vmem:[%s13564_s17 + $0xbb] sm:$0xff] %vm395_vm1, %v13953_v30  ;;  %v11036_v54 = vadd.f32 %v10995_v0, %v10491_v16  ;;  %v4014_v3 = vpop.f32.mrb[23].mxu1  ;;  %v7884_v2 = vpop.f32.mrb[23].mxu0 }
 0x357   : > { %14359 = vst [vmem:[#allocation8_spill] sm:$0xff] %v13956_v23  ;;  %8094 = vst.msk [vmem:[%s13564_s17 + $0xb3] sm:$0xff] %vm395_vm1, %v13956_v23  ;;  %v11037_v55 = vadd.f32 %v7884_v2, %v4014_v3 }
 0x358   : > { %v13965_v8 = vadd.f32 %v11036_v54, %v13830_v4 }
 0x359   : > { %v13968_v27 = vadd.f32 %v11037_v55, %v13830_v4  ;;  %v10494_v15 = vpop.f32.mrb[24].mxu1  ;;  %v10998_v20 = vpop.f32.mrb[24].mxu0 }
 0x35a   : > { %14360 = vst [vmem:[#allocation9_spill] sm:$0xff] %v13965_v8  ;;  %8097 = vst.msk [vmem:[%s13564_s17 + $0xcb] sm:$0xff] %vm395_vm1, %v13965_v8  ;;  %v11038_v0 = vadd.f32 %v10998_v20, %v10494_v15  ;;  %v4024_v16 = vpop.f32.mrb[25].mxu1  ;;  %v7894_v30 = vpop.f32.mrb[25].mxu0 }
 0x35b   : > { %14361 = vst [vmem:[#allocation10_spill] sm:$0xff] %v13968_v27  ;;  %8096 = vst.msk [vmem:[%s13564_s17 + $0xc3] sm:$0xff] %vm395_vm1, %v13968_v27  ;;  %v11039_v2 = vadd.f32 %v7894_v30, %v4024_v16 }
 0x35c   : > { %v13977_v54 = vadd.f32 %v11038_v0, %v13830_v4 }
 0x35d   : > { %v13980_v3 = vadd.f32 %v11039_v2, %v13830_v4  ;;  %v10497_v55 = vpop.f32.mrb[26].mxu1  ;;  %v11001_v23 = vpop.f32.mrb[26].mxu0 }
 0x35e   : > { %14362 = vst [vmem:[#allocation11_spill] sm:$0xff] %v13977_v54  ;;  %8099 = vst.msk [vmem:[%s13564_s17 + $0xdb] sm:$0xff] %vm395_vm1, %v13977_v54  ;;  %v11040_v20 = vadd.f32 %v11001_v23, %v10497_v55  ;;  %v4034_v15 = vpop.f32.mrb[27].mxu1  ;;  %v7904_v8 = vpop.f32.mrb[27].mxu0 }
 0x35f   : > { %14363 = vst [vmem:[#allocation12_spill] sm:$0xff] %v13980_v3  ;;  %8098 = vst.msk [vmem:[%s13564_s17 + $0xd3] sm:$0xff] %vm395_vm1, %v13980_v3  ;;  %v11041_v30 = vadd.f32 %v7904_v8, %v4034_v15 }
 0x360   : > { %v13989_v0 = vadd.f32 %v11040_v20, %v13830_v4 }
 0x361   : > { %v13992_v16 = vadd.f32 %v11041_v30, %v13830_v4  ;;  %v10500_v2 = vpop.f32.mrb[28].mxu1  ;;  %v11004_v27 = vpop.f32.mrb[28].mxu0 }
 0x362   : > { %14364 = vst [vmem:[#allocation13_spill] sm:$0xff] %v13989_v0  ;;  %8101 = vst.msk [vmem:[%s13564_s17 + $0xeb] sm:$0xff] %vm395_vm1, %v13989_v0  ;;  %v11042_v23 = vadd.f32 %v11004_v27, %v10500_v2  ;;  %v4044_v55 = vpop.f32.mrb[29].mxu1  ;;  %v7914_v54 = vpop.f32.mrb[29].mxu0 }
 0x363   : > { %14365 = vst [vmem:[#allocation14_spill] sm:$0xff] %v13992_v16  ;;  %8100 = vst.msk [vmem:[%s13564_s17 + $0xe3] sm:$0xff] %vm395_vm1, %v13992_v16  ;;  %v11043_v8 = vadd.f32 %v7914_v54, %v4044_v55 }
 0x364   : > { %v14001_v20 = vadd.f32 %v11042_v23, %v13830_v4 }
 0x365   : > { %v14004_v15 = vadd.f32 %v11043_v8, %v13830_v4  ;;  %v10503_v30 = vpop.f32.mrb[30].mxu1  ;;  %v11007_v3 = vpop.f32.mrb[30].mxu0 }
 0x366   : > { %14366 = vst [vmem:[#allocation15_spill] sm:$0xff] %v14001_v20  ;;  %8103 = vst.msk [vmem:[%s13564_s17 + $0xfb] sm:$0xff] %vm395_vm1, %v14001_v20  ;;  %v11044_v27 = vadd.f32 %v11007_v3, %v10503_v30  ;;  %v4054_v2 = vpop.f32.mrb[31].mxu1  ;;  %v7924_v0 = vpop.f32.mrb[31].mxu0 }
 0x367   : > { %14367 = vst [vmem:[#allocation16_spill] sm:$0xff] %v14004_v15  ;;  %8102 = vst.msk [vmem:[%s13564_s17 + $0xf3] sm:$0xff] %vm395_vm1, %v14004_v15  ;;  %v11045_v54 = vadd.f32 %v7924_v0, %v4054_v2 }
 0x368   : > { %v14013_v23 = vadd.f32 %v11044_v27, %v13830_v4 }
 0x369   : > { %v14016_v55 = vadd.f32 %v11045_v54, %v13830_v4  ;;  %v10506_v8 = vpop.f32.mrb[32].mxu1  ;;  %v11010_v16 = vpop.f32.mrb[32].mxu0 }
 0x36a   : > { %14368 = vst [vmem:[#allocation17_spill] sm:$0xff] %v14013_v23  ;;  %8105 = vst.msk [vmem:[%s13564_s17 + $0x10b] sm:$0xff] %vm395_vm1, %v14013_v23  ;;  %v11046_v3 = vadd.f32 %v11010_v16, %v10506_v8  ;;  %v4064_v30 = vpop.f32.mrb[33].mxu1  ;;  %v7934_v20 = vpop.f32.mrb[33].mxu0 }
 0x36b   : > { %14369 = vst [vmem:[#allocation18_spill] sm:$0xff] %v14016_v55  ;;  %8104 = vst.msk [vmem:[%s13564_s17 + $0x103] sm:$0xff] %vm395_vm1, %v14016_v55  ;;  %v11047_v0 = vadd.f32 %v7934_v20, %v4064_v30 }
 0x36c   : > { %v14025_v27 = vadd.f32 %v11046_v3, %v13830_v4 }
 0x36d   : > { %v14028_v2 = vadd.f32 %v11047_v0, %v13830_v4  ;;  %v10509_v54 = vpop.f32.mrb[34].mxu1  ;;  %v11013_v15 = vpop.f32.mrb[34].mxu0  ;;  %8150 = sbr.rel (%p9337_p4) target bundleno = 884 (0x374), region = 48 }
 0x36e   : > { %8107 = vst.msk [vmem:[%s13564_s17 + $0x11b] sm:$0xff] %vm395_vm1, %v14025_v27  ;;  %v11048_v16 = vadd.f32 %v11013_v15, %v10509_v54  ;;  %v4074_v8 = vpop.f32.mrb[35].mxu1  ;;  %v7944_v23 = vpop.f32.mrb[35].mxu0  ;;  %v11649_v15 = vmov (!%p9337_p4), 0.0  }
 0x36f   : > { %8106 = vst.msk [vmem:[%s13564_s17 + $0x113] sm:$0xff] %vm395_vm1, %v14028_v2  ;;  %v11049_v55 = vadd.f32 %v7944_v23, %v4074_v8 }
 0x370   : > { %v14037_v20 = vadd.f32 %v11048_v16, %v13830_v4  ;;  %8152 = vst.msk [vmem:[%s14257_s7] sm:$0x1] (!%p9337_p4), %vm8151_vm4, %v11649_v15  ;;  %8153 = vst.msk [vmem:[%s14258_s8] sm:$0x1] (!%p9337_p4), %vm8151_vm4, %v11649_v15 }
 0x371   : > { %v14040_v3 = vadd.f32 %v11049_v55, %v13830_v4 }
 0x372   : > { %8110 = vst.msk [vmem:[%s13564_s17 + $0x12b] sm:$0x3f] %vm8109_vm3, %v14037_v20 }
 0x373   : > { %8108 = vst.msk [vmem:[%s13564_s17 + $0x123] sm:$0xff] %vm395_vm1, %v14040_v3 }
 0x374 PF: > { %v11650_v4 = vmov 0   ;;  %vm8449_vm5 = vcmask 24576  }
 0x375   : > { %11639 = vset.pattern.permute.xlu1 %v11650_v4  ;;  %11638 = vset.pattern.permute.xlu0 %v11650_v4 }
 0x376   : > { %8167 = vperm.xlu1 %11639, %v13660_v51   ;;  %8157 = vperm.xlu0 %11638, %v13650_v45  }
 0x37a   : > { %8172 = vperm.xlu1 %11639, %v13665_v44   ;;  %8162 = vperm.xlu0 %11638, %v13655_v49  }
 0x37e   : > { %8182 = vperm.xlu1 %11639, %v13675_v57   ;;  %8177 = vperm.xlu0 %11638, %v13670_v34  }
 0x382   : > { %8192 = vperm.xlu1 %11639, %v13685_v21   ;;  %8187 = vperm.xlu0 %11638, %v13680_v9  }
 0x386   : > { %8202 = vperm.xlu1 %11639, %v13695_v7   ;;  %8197 = vperm.xlu0 %11638, %v13690_v63  }
 0x38a   : > { %8212 = vperm.xlu1 %11639, %v13705_v17   ;;  %8207 = vperm.xlu0 %11638, %v13700_v42  }
 0x38e   : > { %8222 = vperm.xlu1 %11639, %v13715_v19   ;;  %8217 = vperm.xlu0 %11638, %v13710_v39  }
 0x392   : > { %8232 = vperm.xlu1 %11639, %v13725_v10   ;;  %8227 = vperm.xlu0 %11638, %v13720_v38  }
 0x396   : > { %8242 = vperm.xlu1 %11639, %v13735_v18   ;;  %8237 = vperm.xlu0 %11638, %v13730_v25  }
 0x39a   : > { %8252 = vperm.xlu1 %11639, %v13745_v33   ;;  %8247 = vperm.xlu0 %11638, %v13740_v11  }
 0x39e   : > { %8262 = vperm.xlu1 %11639, %v13755_v53   ;;  %8257 = vperm.xlu0 %11638, %v13750_v41  }
 0x3a2   : > { %8272 = vperm.xlu1 %11639, %v13765_v61   ;;  %8267 = vperm.xlu0 %11638, %v13760_v59  }
 0x3a6   : > { %8282 = vperm.xlu1 %11639, %v13775_v5   ;;  %8277 = vperm.xlu0 %11638, %v13770_v1  }
 0x3aa   : > { %8292 = vperm.xlu1 %11639, %v13785_v22   ;;  %8287 = vperm.xlu0 %11638, %v13780_v60  }
 0x3ae   : > { %8302 = vperm.xlu1 %11639, %v13795_v26   ;;  %8297 = vperm.xlu0 %11638, %v13790_v48  }
 0x3b2   : > { %8312 = vperm.xlu1 %11639, %v13805_v47   ;;  %8307 = vperm.xlu0 %11638, %v13800_v31  }
 0x3b6   : > { %8322 = vperm.xlu1 %11639, %v13815_v50   ;;  %8317 = vperm.xlu0 %11638, %v13810_v24  }
 0x3ba   : > { %8332 = vperm.xlu1 %11639, %v13825_v13   ;;  %8327 = vperm.xlu0 %11638, %v13820_v14  }
 0x3f5   : > { %v8168_v45 = vpop.permute.xlu1 %8167  ;;  %v8158_v49 = vpop.permute.xlu0 %8157 }
 0x3f6   : > { %v8335_v51 = vmul.f32 %v8158_v49, %v13836_v12  ;;  %v8337_v44 = vmul.f32 %v8168_v45, %v13848_v52 }
 0x3f8   : > { %v8452_v9 = vmul.f32 %v8335_v51, %v13836_v12  ;;  %v8454_v7 = vmul.f32 %v8337_v44, %v13848_v52  ;;  %v8371_v42 = vsel %vm395_vm1, %v8335_v51, 0.0  ;;  %v8374_v19 = vsel %vm395_vm1, %v8337_v44, 0.0 }
 0x3f9   : > { %v8173_v34 = vpop.permute.xlu1 %8172  ;;  %v8163_v57 = vpop.permute.xlu0 %8162 }
 0x3fa   : > { %v8338_v21 = vmul.f32 %v8173_v34, %v13845_v40  ;;  %v8336_v63 = vmul.f32 %v8163_v57, %v13833_v6  ;;  %v8488_v11 = vsel %vm395_vm1, %v8452_v9, 0.0  ;;  %v8491_v1 = vsel %vm395_vm1, %v8454_v7, 0.0 }
 0x3fc   : > { %v8372_v17 = vsel %vm395_vm1, %v8336_v63, 0.0  ;;  %v8453_v39 = vmul.f32 %v8336_v63, %v13833_v6  ;;  %v8455_v38 = vmul.f32 %v8338_v21, %v13845_v40  ;;  %v8376_v5 = vsel %vm395_vm1, %v8338_v21, 0.0 }
 0x3fd   : > { %v8373_v10 = vadd.f32 %v8372_v17, %v8371_v42  ;;  %v8183_v25 = vpop.permute.xlu1 %8182  ;;  %v8178_v18 = vpop.permute.xlu0 %8177 }
 0x3fe   : > { %v8489_v33 = vsel %vm395_vm1, %v8453_v39, 0.0  ;;  %v8340_v41 = vmul.f32 %v8183_v25, %v13857_v46  ;;  %v8339_v53 = vmul.f32 %v8178_v18, %v13860_v29  ;;  %v8493_v22 = vsel %vm395_vm1, %v8455_v38, 0.0 }
 0x3ff   : > { %v8375_v59 = vadd.f32 %v8374_v19, %v8373_v10  ;;  %v8490_v61 = vadd.f32 %v8489_v33, %v8488_v11 }
 0x400   : > { %v8456_v60 = vmul.f32 %v8339_v53, %v13860_v29  ;;  %v8457_v24 = vmul.f32 %v8340_v41, %v13857_v46  ;;  %v8378_v50 = vsel %vm395_vm1, %v8339_v53, 0.0  ;;  %v8380_v40 = vsel %vm395_vm1, %v8340_v41, 0.0 }
 0x401   : > { %v8492_v48 = vadd.f32 %v8491_v1, %v8490_v61  ;;  %v8377_v26 = vadd.f32 %v8376_v5, %v8375_v59  ;;  %v8193_v31 = vpop.permute.xlu1 %8192  ;;  %v8188_v47 = vpop.permute.xlu0 %8187 }
 0x402   : > { %v8342_v14 = vmul.f32 %v8193_v31, %v13869_v58  ;;  %v8341_v13 = vmul.f32 %v8188_v47, %v13872_v62  ;;  %v8495_v52 = vsel %vm395_vm1, %v8456_v60, 0.0  ;;  %v8497_v54 = vsel %vm395_vm1, %v8457_v24, 0.0 }
 0x403   : > { %v8494_v6 = vadd.f32 %v8493_v22, %v8492_v48  ;;  %v8379_v12 = vadd.f32 %v8378_v50, %v8377_v26 }
 0x404   : > { %v8458_v29 = vmul.f32 %v8341_v13, %v13872_v62  ;;  %v8459_v55 = vmul.f32 %v8342_v14, %v13869_v58  ;;  %v8382_v16 = vsel %vm395_vm1, %v8341_v13, 0.0  ;;  %v8384_v49 = vsel %vm395_vm1, %v8342_v14, 0.0  ;;  %v14370_v14 = vld [vmem:[#allocation2_spill] sm:$0xff] }
 0x405   : > { %v8496_v23 = vadd.f32 %v8495_v52, %v8494_v6  ;;  %v8381_v30 = vadd.f32 %v8380_v40, %v8379_v12  ;;  %v8203_v0 = vpop.permute.xlu1 %8202  ;;  %v8198_v46 = vpop.permute.xlu0 %8197 }
 0x406   : > { %v8344_v8 = vmul.f32 %v8203_v0, %v13881_v36  ;;  %v8343_v15 = vmul.f32 %v8198_v46, %v13884_v56  ;;  %v8499_v62 = vsel %vm395_vm1, %v8458_v29, 0.0  ;;  %v8501_v58 = vsel %vm395_vm1, %v8459_v55, 0.0 }
 0x407   : > { %v8498_v4 = vadd.f32 %v8497_v54, %v8496_v23  ;;  %v8383_v45 = vadd.f32 %v8382_v16, %v8381_v30  ;;  %v14371_v54 = vld [vmem:[#allocation3_spill] sm:$0xff] }
 0x408   : > { %v8460_v51 = vmul.f32 %v8343_v15, %v13884_v56  ;;  %v8461_v21 = vmul.f32 %v8344_v8, %v13881_v36  ;;  %v8386_v63 = vsel %vm395_vm1, %v8343_v15, 0.0  ;;  %v8388_v19 = vsel %vm395_vm1, %v8344_v8, 0.0  ;;  %v14372_v8 = vld [vmem:[#allocation4_spill] sm:$0xff] }
 0x409   : > { %v8500_v44 = vadd.f32 %v8499_v62, %v8498_v4  ;;  %v8385_v34 = vadd.f32 %v8384_v49, %v8383_v45  ;;  %v8213_v57 = vpop.permute.xlu1 %8212  ;;  %v8208_v9 = vpop.permute.xlu0 %8207 }
 0x40a   : > { %v8346_v7 = vmul.f32 %v8213_v57, %v13893_v37  ;;  %v8345_v42 = vmul.f32 %v8208_v9, %v13896_v43  ;;  %v8503_v56 = vsel %vm395_vm1, %v8460_v51, 0.0  ;;  %v8505_v33 = vsel %vm395_vm1, %v8461_v21, 0.0 }
 0x40b   : > { %v8502_v17 = vadd.f32 %v8501_v58, %v8500_v44  ;;  %v8387_v39 = vadd.f32 %v8386_v63, %v8385_v34  ;;  %v14373_v63 = vld [vmem:[#allocation5_spill] sm:$0xff] }
 0x40c   : > { %v8462_v38 = vmul.f32 %v8345_v42, %v13896_v43  ;;  %v8463_v25 = vmul.f32 %v8346_v7, %v13893_v37  ;;  %v8390_v41 = vsel %vm395_vm1, %v8345_v42, 0.0  ;;  %v8392_v5 = vsel %vm395_vm1, %v8346_v7, 0.0  ;;  %v14374_v42 = vld [vmem:[#allocation6_spill] sm:$0xff] }
 0x40d   : > { %v8504_v10 = vadd.f32 %v8503_v56, %v8502_v17  ;;  %v8389_v18 = vadd.f32 %v8388_v19, %v8387_v39  ;;  %v8223_v11 = vpop.permute.xlu1 %8222  ;;  %v8218_v36 = vpop.permute.xlu0 %8217 }
 0x40e   : > { %v8348_v53 = vmul.f32 %v8223_v11, %v13905_v28  ;;  %v8347_v59 = vmul.f32 %v8218_v36, %v13908_v32  ;;  %v8507_v43 = vsel %vm395_vm1, %v8462_v38, 0.0  ;;  %v8509_v37 = vsel %vm395_vm1, %v8463_v25, 0.0 }
 0x40f   : > { %v8506_v61 = vadd.f32 %v8505_v33, %v8504_v10  ;;  %v8391_v1 = vadd.f32 %v8390_v41, %v8389_v18 }
 0x410   : > { %v8464_v60 = vmul.f32 %v8347_v59, %v13908_v32  ;;  %v8465_v47 = vmul.f32 %v8348_v53, %v13905_v28  ;;  %v8394_v24 = vsel %vm395_vm1, %v8347_v59, 0.0  ;;  %v8396_v40 = vsel %vm395_vm1, %v8348_v53, 0.0  ;;  %v14375_v59 = vld [vmem:[#allocation7_spill] sm:$0xff] }
 0x411   : > { %v8508_v22 = vadd.f32 %v8507_v43, %v8506_v61  ;;  %v8393_v48 = vadd.f32 %v8392_v5, %v8391_v1  ;;  %v8233_v26 = vpop.permute.xlu1 %8232  ;;  %v8228_v31 = vpop.permute.xlu0 %8227  ;;  %v14376_v1 = vld [vmem:[#allocation8_spill] sm:$0xff] }
 0x412   : > { %v8350_v50 = vmul.f32 %v8233_v26, %v13917_v35  ;;  %v8349_v13 = vmul.f32 %v8228_v31, %v14370_v14  ;;  %v8511_v32 = vsel %vm395_vm1, %v8464_v60, 0.0  ;;  %v8513_v0 = vsel %vm395_vm1, %v8465_v47, 0.0 }
 0x413   : > { %v8510_v6 = vadd.f32 %v8509_v37, %v8508_v22  ;;  %v8395_v12 = vadd.f32 %v8394_v24, %v8393_v48 }
 0x414   : > { %v8466_v52 = vmul.f32 %v8349_v13, %v14370_v14  ;;  %v8467_v23 = vmul.f32 %v8350_v50, %v13917_v35  ;;  %v8398_v46 = vsel %vm395_vm1, %v8349_v13, 0.0  ;;  %v8400_v49 = vsel %vm395_vm1, %v8350_v50, 0.0 }
 0x415   : > { %v8512_v29 = vadd.f32 %v8511_v32, %v8510_v6  ;;  %v8397_v55 = vadd.f32 %v8396_v40, %v8395_v12  ;;  %v8243_v30 = vpop.permute.xlu1 %8242  ;;  %v8238_v28 = vpop.permute.xlu0 %8237  ;;  %v14377_v6 = vld [vmem:[#allocation9_spill] sm:$0xff]  ;;  %v14378_v40 = vld [vmem:[#allocation10_spill] sm:$0xff] }
 0x416   : > { %v8352_v16 = vmul.f32 %v8243_v30, %v14371_v54  ;;  %v8351_v15 = vmul.f32 %v8238_v28, %v14372_v8  ;;  %v8515_v62 = vsel %vm395_vm1, %v8466_v52, 0.0  ;;  %v8517_v35 = vsel %vm395_vm1, %v8467_v23, 0.0 }
 0x417   : > { %v8514_v4 = vadd.f32 %v8513_v0, %v8512_v29  ;;  %v8399_v45 = vadd.f32 %v8398_v46, %v8397_v55 }
 0x418   : > { %v8468_v51 = vmul.f32 %v8351_v15, %v14372_v8  ;;  %v8469_v9 = vmul.f32 %v8352_v16, %v14371_v54  ;;  %v8402_v21 = vsel %vm395_vm1, %v8351_v15, 0.0  ;;  %v8404_v56 = vsel %vm395_vm1, %v8352_v16, 0.0 }
 0x419   : > { %v8516_v58 = vadd.f32 %v8515_v62, %v8514_v4  ;;  %v8401_v44 = vadd.f32 %v8400_v49, %v8399_v45  ;;  %v8253_v34 = vpop.permute.xlu1 %8252  ;;  %v8248_v57 = vpop.permute.xlu0 %8247  ;;  %v14379_v4 = vld [vmem:[#allocation11_spill] sm:$0xff]  ;;  %v14380_v49 = vld [vmem:[#allocation12_spill] sm:$0xff] }
 0x41a   : > { %v8354_v7 = vmul.f32 %v8253_v34, %v14373_v63  ;;  %v8353_v17 = vmul.f32 %v8248_v57, %v14374_v42  ;;  %v8519_v38 = vsel %vm395_vm1, %v8468_v51, 0.0  ;;  %v8521_v41 = vsel %vm395_vm1, %v8469_v9, 0.0 }
 0x41b   : > { %v8518_v39 = vadd.f32 %v8517_v35, %v8516_v58  ;;  %v8403_v19 = vadd.f32 %v8402_v21, %v8401_v44 }
 0x41c   : > { %v8470_v10 = vmul.f32 %v8353_v17, %v14374_v42  ;;  %v8471_v18 = vmul.f32 %v8354_v7, %v14373_v63  ;;  %v8406_v53 = vsel %vm395_vm1, %v8353_v17, 0.0  ;;  %v8408_v37 = vsel %vm395_vm1, %v8354_v7, 0.0 }
 0x41d   : > { %v8520_v25 = vadd.f32 %v8519_v38, %v8518_v39  ;;  %v8405_v11 = vadd.f32 %v8404_v56, %v8403_v19  ;;  %v8263_v36 = vpop.permute.xlu1 %8262  ;;  %v8258_v33 = vpop.permute.xlu0 %8257  ;;  %v14381_v39 = vld [vmem:[#allocation13_spill] sm:$0xff]  ;;  %v14382_v56 = vld [vmem:[#allocation14_spill] sm:$0xff] }
 0x41e   : > { %v8356_v61 = vmul.f32 %v8263_v36, %v14375_v59  ;;  %v8355_v5 = vmul.f32 %v8258_v33, %v14376_v1  ;;  %v8523_v22 = vsel %vm395_vm1, %v8470_v10, 0.0  ;;  %v8525_v26 = vsel %vm395_vm1, %v8471_v18, 0.0 }
 0x41f   : > { %v8522_v43 = vadd.f32 %v8521_v41, %v8520_v25  ;;  %v8407_v60 = vadd.f32 %v8406_v53, %v8405_v11 }
 0x420   : > { %v8472_v48 = vmul.f32 %v8355_v5, %v14376_v1  ;;  %v8473_v14 = vmul.f32 %v8356_v61, %v14375_v59  ;;  %v8410_v13 = vsel %vm395_vm1, %v8355_v5, 0.0  ;;  %v8412_v23 = vsel %vm395_vm1, %v8356_v61, 0.0 }
 0x421   : > { %v8524_v31 = vadd.f32 %v8523_v22, %v8522_v43  ;;  %v8409_v47 = vadd.f32 %v8408_v37, %v8407_v60  ;;  %v8273_v24 = vpop.permute.xlu1 %8272  ;;  %v8268_v50 = vpop.permute.xlu0 %8267  ;;  %v14383_v43 = vld [vmem:[#allocation15_spill] sm:$0xff]  ;;  %v14384_v37 = vld [vmem:[#allocation16_spill] sm:$0xff] }
 0x422   : > { %v8358_v12 = vmul.f32 %v8273_v24, %v14377_v6  ;;  %v8357_v32 = vmul.f32 %v8268_v50, %v14378_v40  ;;  %v8527_v55 = vsel %vm395_vm1, %v8472_v48, 0.0  ;;  %v8529_v8 = vsel %vm395_vm1, %v8473_v14, 0.0 }
 0x423   : > { %v8526_v52 = vadd.f32 %v8525_v26, %v8524_v31  ;;  %v8411_v29 = vadd.f32 %v8410_v13, %v8409_v47 }
 0x424   : > { %v8474_v30 = vmul.f32 %v8357_v32, %v14378_v40  ;;  %v8475_v0 = vmul.f32 %v8358_v12, %v14377_v6  ;;  %v8414_v15 = vsel %vm395_vm1, %v8357_v32, 0.0  ;;  %v8416_v58 = vsel %vm395_vm1, %v8358_v12, 0.0 }
 0x425   : > { %v8528_v28 = vadd.f32 %v8527_v55, %v8526_v52  ;;  %v8413_v46 = vadd.f32 %v8412_v23, %v8411_v29  ;;  %v8283_v54 = vpop.permute.xlu1 %8282  ;;  %v8278_v16 = vpop.permute.xlu0 %8277  ;;  %v14385_v52 = vld [vmem:[#allocation17_spill] sm:$0xff]  ;;  %v14386_v23 = vld [vmem:[#allocation18_spill] sm:$0xff] }
 0x426   : > { %v8360_v45 = vmul.f32 %v8283_v54, %v14379_v4  ;;  %v8359_v62 = vmul.f32 %v8278_v16, %v14380_v49  ;;  %v8531_v44 = vsel %vm395_vm1, %v8474_v30, 0.0  ;;  %v8533_v57 = vsel %vm395_vm1, %v8475_v0, 0.0 }
 0x427   : > { %v8530_v51 = vadd.f32 %v8529_v8, %v8528_v28  ;;  %v8415_v35 = vadd.f32 %v8414_v15, %v8413_v46 }
 0x428   : > { %v8476_v34 = vmul.f32 %v8359_v62, %v14380_v49  ;;  %v8477_v42 = vmul.f32 %v8360_v45, %v14379_v4  ;;  %v8418_v17 = vsel %vm395_vm1, %v8359_v62, 0.0  ;;  %v8420_v18 = vsel %vm395_vm1, %v8360_v45, 0.0 }
 0x429   : > { %v8532_v9 = vadd.f32 %v8531_v44, %v8530_v51  ;;  %v8417_v21 = vadd.f32 %v8416_v58, %v8415_v35  ;;  %v8293_v63 = vpop.permute.xlu1 %8292  ;;  %v8288_v7 = vpop.permute.xlu0 %8287 }
 0x42a   : > { %v8362_v19 = vmul.f32 %v8293_v63, %v14381_v39  ;;  %v8361_v38 = vmul.f32 %v8288_v7, %v14382_v56  ;;  %v8535_v11 = vsel %vm395_vm1, %v8476_v34, 0.0  ;;  %v8537_v1 = vsel %vm395_vm1, %v8477_v42, 0.0 }
 0x42b   : > { %v8534_v10 = vadd.f32 %v8533_v57, %v8532_v9  ;;  %v8419_v25 = vadd.f32 %v8418_v17, %v8417_v21 }
 0x42c   : > { %v8478_v36 = vmul.f32 %v8361_v38, %v14382_v56  ;;  %v8479_v41 = vmul.f32 %v8362_v19, %v14381_v39  ;;  %v8422_v5 = vsel %vm395_vm1, %v8361_v38, 0.0  ;;  %v8424_v31 = vsel %vm395_vm1, %v8362_v19, 0.0 }
 0x42d   : > { %v8536_v33 = vadd.f32 %v8535_v11, %v8534_v10  ;;  %v8421_v53 = vadd.f32 %v8420_v18, %v8419_v25  ;;  %v8303_v59 = vpop.permute.xlu1 %8302  ;;  %v8298_v61 = vpop.permute.xlu0 %8297 }
 0x42e   : > { %v8364_v60 = vmul.f32 %v8303_v59, %v14383_v43  ;;  %v8363_v22 = vmul.f32 %v8298_v61, %v14384_v37  ;;  %v8539_v47 = vsel %vm395_vm1, %v8478_v36, 0.0  ;;  %v8541_v50 = vsel %vm395_vm1, %v8479_v41, 0.0 }
 0x42f   : > { %v8538_v48 = vadd.f32 %v8537_v1, %v8536_v33  ;;  %v8423_v26 = vadd.f32 %v8422_v5, %v8421_v53 }
 0x430   : > { %v8480_v24 = vmul.f32 %v8363_v22, %v14384_v37  ;;  %v8481_v40 = vmul.f32 %v8364_v60, %v14383_v43  ;;  %v8426_v32 = vsel %vm395_vm1, %v8363_v22, 0.0  ;;  %v8428_v0 = vsel %vm395_vm1, %v8364_v60, 0.0 }
 0x431   : > { %v8540_v14 = vadd.f32 %v8539_v47, %v8538_v48  ;;  %v8425_v13 = vadd.f32 %v8424_v31, %v8423_v26  ;;  %v8313_v6 = vpop.permute.xlu1 %8312  ;;  %v8308_v12 = vpop.permute.xlu0 %8307 }
 0x432   : > { %v8366_v29 = vmul.f32 %v8313_v6, %v14385_v52  ;;  %v8365_v55 = vmul.f32 %v8308_v12, %v14386_v23  ;;  %v8543_v46 = vsel %vm395_vm1, %v8480_v24, 0.0  ;;  %v8545_v49 = vsel %vm395_vm1, %v8481_v40, 0.0  ;;  %v8451_v40 = vld [vmem:[%s14258_s8] sm:$0x1] }
 0x433   : > { %v8542_v30 = vadd.f32 %v8541_v50, %v8540_v14  ;;  %v8427_v28 = vadd.f32 %v8426_v32, %v8425_v13  ;;  %v8154_v13 = vld [vmem:[%s14257_s7] sm:$0x1] }
 0x434   : > { %v8482_v54 = vmul.f32 %v8365_v55, %v14386_v23  ;;  %v8483_v8 = vmul.f32 %v8366_v29, %v14385_v52  ;;  %v8430_v62 = vsel %vm395_vm1, %v8365_v55, 0.0  ;;  %v8432_v34 = vsel %vm395_vm1, %v8366_v29, 0.0 }
 0x435   : > { %v8544_v16 = vadd.f32 %v8543_v46, %v8542_v30  ;;  %v8429_v15 = vadd.f32 %v8428_v0, %v8427_v28  ;;  %v8323_v4 = vpop.permute.xlu1 %8322  ;;  %v8318_v45 = vpop.permute.xlu0 %8317 }
 0x436   : > { %v8368_v51 = vmul.f32 %v8323_v4, %v14025_v27  ;;  %v8367_v35 = vmul.f32 %v8318_v45, %v14028_v2  ;;  %v8547_v57 = vsel %vm395_vm1, %v8482_v54, 0.0  ;;  %v8549_v21 = vsel %vm395_vm1, %v8483_v8, 0.0 }
 0x437   : > { %v8546_v58 = vadd.f32 %v8545_v49, %v8544_v16  ;;  %v8431_v44 = vadd.f32 %v8430_v62, %v8429_v15 }
 0x438   : > { %v8484_v9 = vmul.f32 %v8367_v35, %v14028_v2  ;;  %v8485_v39 = vmul.f32 %v8368_v51, %v14025_v27  ;;  %v8434_v19 = vsel %vm395_vm1, %v8367_v35, 0.0  ;;  %v8436_v18 = vsel %vm395_vm1, %v8368_v51, 0.0 }
 0x439   : > { %v8548_v63 = vadd.f32 %v8547_v57, %v8546_v58  ;;  %v8433_v7 = vadd.f32 %v8432_v34, %v8431_v44  ;;  %v8333_v42 = vpop.permute.xlu1 %8332  ;;  %v8328_v17 = vpop.permute.xlu0 %8327 }
 0x43a   : > { %v8370_v56 = vmul.f32 %v8333_v42, %v14037_v20  ;;  %v8369_v38 = vmul.f32 %v8328_v17, %v14040_v3  ;;  %v8551_v2 = vsel %vm395_vm1, %v8484_v9, 0.0  ;;  %v8553_v41 = vsel %vm395_vm1, %v8485_v39, 0.0 }
 0x43b   : > { %v8550_v10 = vadd.f32 %v8549_v21, %v8548_v63  ;;  %v8435_v25 = vadd.f32 %v8434_v19, %v8433_v7 }
 0x43c   : > { %v8486_v11 = vmul.f32 %v8369_v38, %v14040_v3  ;;  %v8487_v27 = vmul.f32 %v8370_v56, %v14037_v20  ;;  %v8438_v53 = vsel %vm395_vm1, %v8369_v38, 0.0  ;;  %v8440_v1 = vsel %vm8109_vm3, %v8370_v56, 0.0 }
 0x43d   : > { %v8552_v36 = vadd.f32 %v8551_v2, %v8550_v10  ;;  %v8437_v33 = vadd.f32 %v8436_v18, %v8435_v25 }
 0x43e   : > { %v8555_v5 = vsel %vm395_vm1, %v8486_v11, 0.0  ;;  %v8557_v37 = vsel %vm8109_vm3, %v8487_v27, 0.0 }
 0x43f   : > { %v8554_v59 = vadd.f32 %v8553_v41, %v8552_v36  ;;  %v8439_v61 = vadd.f32 %v8438_v53, %v8437_v33 }
 0x441   : > { %v8441_v43 = vadd.f32 %v8440_v1, %v8439_v61  ;;  %v8556_v60 = vadd.f32 %v8555_v5, %v8554_v59 }
 0x443   : > { %v8442_v22 = vrot.slane %v8441_v43, 4  ;;  %v8558_v3 = vadd.f32 %v8557_v37, %v8556_v60 }
 0x445   : > { %v8443_v48 = vadd.f32 %v8442_v22, %v8441_v43  ;;  %v8559_v26 = vrot.slane %v8558_v3, 4 }
 0x447   : > { %v8444_v31 = vrot.slane %v8443_v48, 2  ;;  %v8560_v47 = vadd.f32 %v8559_v26, %v8558_v3 }
 0x449   : > { %v8445_v24 = vadd.f32 %v8444_v31, %v8443_v48  ;;  %v8561_v20 = vrot.slane %v8560_v47, 2 }
 0x44b   : > { %v8446_v50 = vrot.slane %v8445_v24, 1  ;;  %v8562_v14 = vadd.f32 %v8561_v20, %v8560_v47 }
 0x44d   : > { %v8447_v6 = vadd.f32 %v8446_v50, %v8445_v24  ;;  %v8563_v12 = vrot.slane %v8562_v14, 1 }
 0x44f   : > { %v8448_v32 = vadd.f32 %v8447_v6, %v8154_v13  ;;  %v8564_v52 = vadd.f32 %v8563_v12, %v8562_v14 }
 0x451   : > { %8450 = vst.msk [vmem:[%s14257_s7] sm:$0x1] %vm8449_vm5, %v8448_v32  ;;  %v8565_v29 = vadd.f32 %v8564_v52, %v8451_v40 }
 0x453   : > { %8566 = vst.msk [vmem:[%s14258_s8] sm:$0x1] %vm8449_vm5, %v8565_v29 }
 0x454 PF: > { %s19_s27 = sadd.s32 1, %s11646_s27  }
 0x455   : > { %p16_p5 = scmp.ge.s32.totalorder %s19_s27, 4  }
 0x457   :  { %18 = sbr.rel (!%p16_p5) target bundleno = 1 (0x1), region = 113 }

</bundles_post_ra>
